<compile_context>
chip_gen: v7x
topology: tpu7x:2x2x1
jax: 0.10.0
libtpu: 0.0.40
codegen_flags: <defaults>
</compile_context>

<pallas_src>
import functools
import math

import jax
import jax.numpy as jnp
import numpy as np
from jax import lax
from jax.experimental import pallas as pl
from jax.experimental.pallas import tpu as pltpu

_EPS = 1e-5          # torch InstanceNorm2d default eps
_NEG_SLOPE = 0.2     # LeakyReLU slope
_VMEM_LIMIT = 48 * 1024 * 1024   # below v7x's 64 MiB physical VMEM


def _ceil8(n):
    return ((n + 7) // 8) * 8


def _pick_wp(h, w):
    """Smallest row stride Wp >= w + 2 such that h * Wp is a multiple of 128."""
    step = 128 // math.gcd(h, 128)
    return ((w + 2 + step - 1) // step) * step


def _halo_base(wp):
    """Lane-aligned halo offset (>= Wp + 1)."""
    return ((wp + 1 + 127) // 128) * 128


def _sigmoid(v):
    return 1.0 / (1.0 + jnp.exp(-v))


# ----------------------------------------------------------------------------
# Trace-time numpy constants (masks, pooling / pixel-shuffle scatter matrices)
# ----------------------------------------------------------------------------
def _lane_mask_np(h, w, wp):
    m = np.zeros((1, h * wp), np.float32)
    for y in range(h):
        m[0, y * wp:y * wp + w] = 1.0
    return m


def _valid_mask_np(hp0, wpad0, h, w, big_h, wp):
    m = np.zeros((1, big_h * wp), np.float32)
    for y in range(hp0, hp0 + h):
        m[0, y * wp + wpad0:y * wp + wpad0 + w] = 1.0
    return m


def _pool_matrix_np(h2, w2, wp_in, wp_out):
    # TODO(synk): dense (L, L/4) pooling matrix is O(L^2); band it over output-row
    #             tiles before scaling to large images (v7x has only 64 MiB VMEM).
    P = np.zeros(((2 * h2) * wp_in, h2 * wp_out), np.float32)
    for y in range(h2):
        for x in range(w2):
            for r in range(2):
                for s in range(2):
                    P[(2 * y + r) * wp_in + 2 * x + s, y * wp_out + x] = 0.25
    return P


def _shuffle_matrices_np(h_lo, w_lo, wp_lo, wp_hi):
    # TODO(synk): dense (L_lo, L_hi) pixel-shuffle scatter matrices are O(L^2);
    #             switch to strided/banded scatter for large images.
    S = np.zeros((4, h_lo * wp_lo, 2 * h_lo * wp_hi), np.float32)
    for r in range(2):
        for s in range(2):
            rs = 2 * r + s
            for y in range(h_lo):
                for x in range(w_lo):
                    S[rs, y * wp_lo + x, (2 * y + r) * wp_hi + 2 * x + s] = 1.0
    return S


# ----------------------------------------------------------------------------
# Weight preprocessing (hoisted out of jit; run once)
# ----------------------------------------------------------------------------
def _fuse_conv3(w_oihw):
    """(Cout, Cin, 3, 3) -> (Cout, 9 * ceil8(Cin)), tap-major / channel-minor."""
    co, ci, _, _ = w_oihw.shape
    cpad = _ceil8(ci)
    wz = jnp.zeros((co, cpad, 3, 3), w_oihw.dtype).at[:, :ci].set(w_oihw)
    return jnp.transpose(wz, (0, 2, 3, 1)).reshape(co, 9 * cpad)


def preprocess_params(params):
    lw, lb = params["lstm_w"], params["lstm_b"]
    chans = lb.shape[0] // 4
    in_ch = lw.shape[1] - chans
    # zero initial hidden state: drop hidden-input weight columns and forget gate.
    w_iog = jnp.concatenate([lw[0:chans, :in_ch],
                             lw[2 * chans:3 * chans, :in_ch],
                             lw[3 * chans:4 * chans, :in_ch]], axis=0)
    b_iog = jnp.concatenate([lb[0:chans], lb[2 * chans:3 * chans],
                             lb[3 * chans:4 * chans]], axis=0)
    return {
        "lstm_w": _fuse_conv3(w_iog),
        "lstm_b": b_iog.reshape(3 * chans, 1),
        "down": [{"w1": _fuse_conv3(p["w1"]), "w2": _fuse_conv3(p["w2"])}
                 for p in params["down"]],
        "bottleneck": {"w1": _fuse_conv3(params["bottleneck"]["w1"]),
                       "w2": _fuse_conv3(params["bottleneck"]["w2"])},
        "up_t": [jnp.transpose(w, (2, 3, 1, 0)).reshape(4, w.shape[1], w.shape[0])
                 for w in params["up_t"]],
        "up_c": [{"w1": _fuse_conv3(p["w1"]), "w2": _fuse_conv3(p["w2"])}
                 for p in params["up_c"]],
        "final_w": params["final_w"].reshape(params["final_w"].shape[0],
                                             params["final_w"].shape[1]),
        "final_b": params["final_b"].reshape(-1, 1),
    }


# ----------------------------------------------------------------------------
# Forward pass: one fused pallas_call
# ----------------------------------------------------------------------------
def convlstm_norm_unet_forward(x, prep, *, chans=8, norm_groups=2,
                               padding_size=15, normalize=True):
    iscomplex = False
    if x.ndim == 5 and x.shape[-1] == 2:
        b_, c_, h_, w_, _ = x.shape
        x = jnp.transpose(x, (0, 4, 1, 2, 3)).reshape(b_, 2 * c_, h_, w_)
        iscomplex = True

    N, in_ch, h, w = x.shape
    num_pools = len(prep["down"])
    out_chans = prep["final_w"].shape[0]
    cpad_in = _ceil8(in_ch)
    cpg_in = in_ch // norm_groups

    # reference .pad(): grow to ((dim - 1) | padding_size) + 1, split floor/ceil
    w_mult = ((w - 1) | padding_size) + 1
    h_mult = ((h - 1) | padding_size) + 1
    w_pad = (math.floor((w_mult - w) / 2), math.ceil((w_mult - w) / 2))
    h_pad = (math.floor((h_mult - h) / 2), math.ceil((h_mult - h) / 2))
    H0, W0 = h_mult, w_mult

    # per-level "width-flat" (WF) geometry: (C, H*Wp) with H*Wp % 128 == 0
    n_levels = num_pools + 1
    Hs = [H0 >> l for l in range(n_levels)]
    Ws = [W0 >> l for l in range(n_levels)]
    Wps = [_pick_wp(Hs[l], Ws[l]) for l in range(n_levels)]
    Ls = [Hs[l] * Wps[l] for l in range(n_levels)]

    # input NCHW -> padded WF layout; channels zero-padded to a sublane multiple
    xp = jnp.pad(x, ((0, 0), (0, cpad_in - in_ch),
                     (h_pad[0], H0 - h - h_pad[0]),
                     (w_pad[0], Wps[0] - w - w_pad[0])))
    x_wf = xp.reshape(N, cpad_in, Ls[0]).astype(jnp.float32)

    # channel plan (fastMRI-style U-Net)
    enc_out = [chans]
    for _ in range(num_pools - 1):
        enc_out.append(enc_out[-1] * 2)
    bott_out = enc_out[-1] * 2

    cin_list = [cpad_in]
    prev = chans
    for l in range(num_pools):
        cin_list += [prev, enc_out[l]]
        prev = enc_out[l]
    cin_list += [enc_out[-1], bott_out]
    cur_ch = bott_out
    for _ in range(num_pools):
        up_out = cur_ch // 2
        cin_list += [cur_ch, up_out]
        cur_ch = up_out
    c_scr = max(_ceil8(c) for c in cin_list)
    xpad_w = max(Ls[l] + 2 * _halo_base(Wps[l]) for l in range(n_levels))

    # --- kernel constants (trace-time numpy -> XLA constants) ---
    consts = {}
    for l in range(n_levels):
        consts[f"mask{l}"] = jnp.asarray(_lane_mask_np(Hs[l], Ws[l], Wps[l]))
    if normalize:
        consts["vmask"] = jnp.asarray(
            _valid_mask_np(h_pad[0], w_pad[0], h, w, H0, Wps[0]))
        gi_gc = np.zeros((norm_groups, cpad_in), np.float32)
        gi_cg = np.zeros((cpad_in, norm_groups), np.float32)
        chm = np.zeros((cpad_in, 1), np.float32)
        for cc in range(in_ch):
            gi_gc[cc // cpg_in, cc] = 1.0
            gi_cg[cc, cc // cpg_in] = 1.0
            chm[cc, 0] = 1.0
        for cc in range(in_ch, cpad_in):
            gi_cg[cc, 0] = 1.0          # pad channels: finite stats, masked after
        consts["gsel_gc"] = jnp.asarray(gi_gc)
        consts["gsel_cg"] = jnp.asarray(gi_cg)
        consts["chmask"] = jnp.asarray(chm)
        cpg_out = out_chans // norm_groups
        go_cg = np.zeros((out_chans, norm_groups), np.float32)
        for cc in range(out_chans):
            go_cg[cc, cc // cpg_out] = 1.0
        consts["gselo_cg"] = jnp.asarray(go_cg)
    for l in range(num_pools):
        consts[f"pool{l}"] = jnp.asarray(
            _pool_matrix_np(Hs[l + 1], Ws[l + 1], Wps[l], Wps[l + 1]))
    for d in range(num_pools):
        lo = num_pools - d
        consts[f"shuf{d}"] = jnp.asarray(
            _shuffle_matrices_np(Hs[lo], Ws[lo], Wps[lo], Wps[lo - 1]))

    # --- weights (already pre-fused outside jit) ---
    weights = {"lstm_w": prep["lstm_w"], "lstm_b": prep["lstm_b"]}
    for l in range(num_pools):
        weights[f"enc{l}_w1"] = prep["down"][l]["w1"]
        weights[f"enc{l}_w2"] = prep["down"][l]["w2"]
    weights["bott_w1"] = prep["bottleneck"]["w1"]
    weights["bott_w2"] = prep["bottleneck"]["w2"]
    for d in range(num_pools):
        weights[f"up{d}_t"] = prep["up_t"][d]
        weights[f"up{d}_w1"] = prep["up_c"][d]["w1"]
        weights[f"up{d}_w2"] = prep["up_c"][d]["w2"]
    weights["final_w"] = prep["final_w"]
    weights["final_b"] = prep["final_b"]

    const_names = list(consts) + list(weights)
    const_arrays = [consts[k] for k in consts] + [weights[k] for k in weights]
    n_const = len(const_names)

    def kernel(*args):
        x_ref = args[0]
        cref = dict(zip(const_names, args[1:1 + n_const]))
        out_ref = args[1 + n_const]
        xpad = args[2 + n_const]    # (c_scr, xpad_w)   halo-padded input scratch
        stage = args[3 + n_const]   # (9*c_scr, L_max)  im2col staging scratch

        def conv3x3(parts, w_name, lvl, bias_name=None):
            """3x3 conv (padding=1) as ONE fused (Cout, 9*Cpad)@(9*Cpad, L) MXU dot."""
            H, W, Wp = Hs[lvl], Ws[lvl], Wps[lvl]
            L = H * Wp
            base = _halo_base(Wp)
            lwin = L + 2 * base
            cin = sum(c for _, c in parts)
            cpad = _ceil8(cin)
            xpad[0:cpad, 0:lwin] = jnp.zeros((cpad, lwin), jnp.float32)
            row = 0
            for val, c in parts:                 # skip "concat" = stacked rows
                xpad[row:row + c, base:base + L] = val
                row += c
            k = 0
            for dy in range(3):
                for dx in range(3):
                    off = base + (dy - 1) * Wp + (dx - 1)
                    stage[k * cpad:(k + 1) * cpad, 0:L] = xpad[0:cpad, off:off + L]
                    k += 1
            acc = jnp.dot(cref[w_name][...], stage[0:9 * cpad, 0:L],
                          preferred_element_type=jnp.float32)
            if bias_name is not None:
                acc = acc + cref[bias_name][...]
            return acc

        def inorm_lrelu(acc, lvl):
            """InstanceNorm2d(affine=False, eps=1e-5) + LeakyReLU(0.2), masked."""
            H, W = Hs[lvl], Ws[lvl]
            m = cref[f"mask{lvl}"][...]
            inv = 1.0 / float(H * W)
            mean = jnp.sum(acc * m, axis=1, keepdims=True) * inv
            d = (acc - mean) * m
            var = jnp.sum(d * d, axis=1, keepdims=True) * inv
            y = (acc - mean) * lax.rsqrt(var + _EPS)
            y = jnp.where(y >= 0, y, _NEG_SLOPE * y)
            return y * m

        def conv_block(parts, w1, w2, lvl):
            t = inorm_lrelu(conv3x3(parts, w1, lvl), lvl)
            return inorm_lrelu(conv3x3([(t, t.shape[0])], w2, lvl), lvl)

        # ---- prologue: group norm (reference .norm(), over the un-padded region) ----
        xv = x_ref[0]                                   # (cpad_in, L0)
        g_mean = g_std = None
        if normalize:
            vmask = cref["vmask"][...]
            cnt = float(cpg_in * h * w)
            ch_sum = jnp.sum(xv * vmask, axis=1, keepdims=True)
            g_mean = jnp.dot(cref["gsel_gc"][...], ch_sum,
                             preferred_element_type=jnp.float32) * (1.0 / cnt)
            mean_c = jnp.dot(cref["gsel_cg"][...], g_mean,
                             preferred_element_type=jnp.float32)
            dv = (xv - mean_c) * vmask
            ch_ss = jnp.sum(dv * dv, axis=1, keepdims=True)
            # unbiased std, no eps: matches torch .std() semantics
            g_std = jnp.sqrt(jnp.dot(cref["gsel_gc"][...], ch_ss,
                                     preferred_element_type=jnp.float32)
                             * (1.0 / (cnt - 1.0)))
            std_c = jnp.dot(cref["gsel_cg"][...], g_std,
                            preferred_element_type=jnp.float32)
            xv = ((xv - mean_c) / std_c) * vmask * cref["chmask"][...]

        # ---- ConvLSTM, one step, zero initial state: h = sig(o)*tanh(sig(i)*tanh(g)) ----
        acc = conv3x3([(xv, cpad_in)], "lstm_w", 0, bias_name="lstm_b")
        gi = acc[0:chans]
        go = acc[chans:2 * chans]
        gg = acc[2 * chans:3 * chans]
        cur = _sigmoid(go) * jnp.tanh(_sigmoid(gi) * jnp.tanh(gg))
        cur = cur * cref["mask0"][...]

        # ---- U-Net encoder (ConvBlock + fused 2x2 avg-pool per level) ----
        skips = []
        for l in range(num_pools):
            cur = conv_block([(cur, cur.shape[0])], f"enc{l}_w1", f"enc{l}_w2", l)
            skips.append(cur)
            cur = jnp.dot(cur, cref[f"pool{l}"][...],
                          preferred_element_type=jnp.float32)
        cur = conv_block([(cur, cur.shape[0])], "bott_w1", "bott_w2", num_pools)

        # ---- U-Net decoder (transposed conv + IN + LReLU + pixel-shuffle + ConvBlock) ----
        for d in range(num_pools):
            lvl_lo = num_pools - d
            lvl_hi = lvl_lo - 1
            m_lo = cref[f"mask{lvl_lo}"][...]
            wT = cref[f"up{d}_t"]
            S = cref[f"shuf{d}"]
            maps = [jnp.dot(wT[rs], cur, preferred_element_type=jnp.float32)
                    for rs in range(4)]
            inv = 1.0 / float(4 * Hs[lvl_lo] * Ws[lvl_lo])
            mean = sum(jnp.sum(t * m_lo, axis=1, keepdims=True) for t in maps) * inv
            var = sum(jnp.sum(((t - mean) * m_lo) ** 2, axis=1, keepdims=True)
                      for t in maps) * inv
            istd = lax.rsqrt(var + _EPS)
            up_hi = None
            for rs in range(4):
                y = (maps[rs] - mean) * istd
                y = jnp.where(y >= 0, y, _NEG_SLOPE * y) * m_lo
                t = jnp.dot(y, S[rs], preferred_element_type=jnp.float32)
                up_hi = t if up_hi is None else up_hi + t
            skip = skips[lvl_hi]
            cur = conv_block([(up_hi, up_hi.shape[0]), (skip, skip.shape[0])],
                             f"up{d}_w1", f"up{d}_w2", lvl_hi)

        # ---- final 1x1 conv + bias, with the reference .unnorm() fused in ----
        fin = jnp.dot(cref["final_w"][...], cur,
                      preferred_element_type=jnp.float32) + cref["final_b"][...]
        if normalize:
            std_oc = jnp.dot(cref["gselo_cg"][...], g_std,
                             preferred_element_type=jnp.float32)
            mean_oc = jnp.dot(cref["gselo_cg"][...], g_mean,
                              preferred_element_type=jnp.float32)
            fin = fin * std_oc + mean_oc
        out_ref[0] = fin.astype(out_ref.dtype)

    in_specs = [pl.BlockSpec((1, cpad_in, Ls[0]), lambda n: (n, 0, 0))]
    for arr in const_arrays:
        in_specs.append(pl.BlockSpec(arr.shape, lambda n, _nd=arr.ndim: (0,) * _nd))

    out = pl.pallas_call(
        kernel,
        out_shape=jax.ShapeDtypeStruct((N, out_chans, Ls[0]), jnp.float32),
        grid=(N,),
        in_specs=in_specs,
        out_specs=pl.BlockSpec((1, out_chans, Ls[0]), lambda n: (n, 0, 0)),
        scratch_shapes=[pltpu.VMEM((c_scr, xpad_w), jnp.float32),
                        pltpu.VMEM((9 * c_scr, Ls[0]), jnp.float32)],
        compiler_params=pltpu.CompilerParams(
            dimension_semantics=("parallel",),   # v7x: one batch item per TensorCore
            vmem_limit_bytes=_VMEM_LIMIT),
    )(x_wf, *const_arrays)

    # WF -> NCHW, unpad (reference .unpad()); unnorm already applied in-kernel
    y = out.reshape(N, out_chans, Hs[0], Wps[0])
    y = y[:, :, h_pad[0]:h_pad[0] + h, w_pad[0]:w_pad[0] + w]
    if iscomplex:
        y = jnp.transpose(y.reshape(N, 2, out_chans // 2, h, w), (0, 2, 3, 4, 1))
    return y


# ----------------------------------------------------------------------------
# Deterministic synthetic parameters (shapes from the module's __init__)
# ----------------------------------------------------------------------------
def init_params(key, *, chans=8, num_pools=2, in_chans=2, out_chans=2):
    keys = iter(jax.random.split(key, 64))

    def w(shape, scale=0.1):
        return jax.random.normal(next(keys), shape, jnp.float32) * scale

    params = {"lstm_w": w((4 * chans, in_chans + chans, 3, 3)),
              "lstm_b": w((4 * chans,), 0.01)}
    down = [{"w1": w((chans, chans, 3, 3)), "w2": w((chans, chans, 3, 3))}]
    ch = chans
    for _ in range(num_pools - 1):
        down.append({"w1": w((ch * 2, ch, 3, 3)), "w2": w((ch * 2, ch * 2, 3, 3))})
        ch *= 2
    params["down"] = down
    params["bottleneck"] = {"w1": w((ch * 2, ch, 3, 3)), "w2": w((ch * 2, ch * 2, 3, 3))}
    up_t, up_c = [], []
    for _ in range(num_pools - 1):
        up_t.append(w((ch * 2, ch, 2, 2)))
        up_c.append({"w1": w((ch, ch * 2, 3, 3)), "w2": w((ch, ch, 3, 3))})
        ch //= 2
    up_t.append(w((ch * 2, ch, 2, 2)))
    up_c.append({"w1": w((ch, ch * 2, 3, 3)), "w2": w((ch, ch, 3, 3))})
    params["up_t"] = up_t
    params["up_c"] = up_c
    params["final_w"] = w((out_chans, ch, 1, 1))
    params["final_b"] = w((out_chans,), 0.01)
    return params


if __name__ == "__main__":
    key = jax.random.PRNGKey(0)
    kp, kx = jax.random.split(key)
    chans, num_pools = 8, 2
    params = init_params(kp, chans=chans, num_pools=num_pools, in_chans=2, out_chans=2)
    prep = preprocess_params(params)   # weight re-layouts hoisted out of the jitted fwd

    # complex-valued input: (b=2, c=1, h=10, w=12, 2) -> 2 real channels internally
    x = jax.random.normal(kx, (2, 1, 10, 12, 2), jnp.float32)

    fwd = jax.jit(functools.partial(convlstm_norm_unet_forward, chans=chans,
                                    norm_groups=2, padding_size=15, normalize=True))
    out = jax.block_until_ready(fwd(x, prep))
    assert out.shape == (2, 1, 10, 12, 2), out.shape
    assert bool(jnp.all(jnp.isfinite(out)))
    print("KERNEL_OK")
</pallas_src>

<mosaic_0001>
module attributes {stable_mosaic.version = 11 : i64} {
  func.func @kernel(%arg0: i32, %arg1: memref<1x8x384xf32, #tpu.memory_space<vmem>>, %arg2: memref<1x384xf32, #tpu.memory_space<vmem>>, %arg3: memref<1x128xf32, #tpu.memory_space<vmem>>, %arg4: memref<1x128xf32, #tpu.memory_space<vmem>>, %arg5: memref<1x384xf32, #tpu.memory_space<vmem>>, %arg6: memref<2x8xf32, #tpu.memory_space<vmem>>, %arg7: memref<8x2xf32, #tpu.memory_space<vmem>>, %arg8: memref<8x1xf32, #tpu.memory_space<vmem>>, %arg9: memref<2x2xf32, #tpu.memory_space<vmem>>, %arg10: memref<384x128xf32, #tpu.memory_space<vmem>>, %arg11: memref<128x128xf32, #tpu.memory_space<vmem>>, %arg12: memref<4x128x128xf32, #tpu.memory_space<vmem>>, %arg13: memref<4x128x384xf32, #tpu.memory_space<vmem>>, %arg14: memref<24x72xf32, #tpu.memory_space<vmem>>, %arg15: memref<24x1xf32, #tpu.memory_space<vmem>>, %arg16: memref<8x72xf32, #tpu.memory_space<vmem>>, %arg17: memref<8x72xf32, #tpu.memory_space<vmem>>, %arg18: memref<16x72xf32, #tpu.memory_space<vmem>>, %arg19: memref<16x144xf32, #tpu.memory_space<vmem>>, %arg20: memref<32x144xf32, #tpu.memory_space<vmem>>, %arg21: memref<32x288xf32, #tpu.memory_space<vmem>>, %arg22: memref<4x16x32xf32, #tpu.memory_space<vmem>>, %arg23: memref<16x288xf32, #tpu.memory_space<vmem>>, %arg24: memref<16x144xf32, #tpu.memory_space<vmem>>, %arg25: memref<4x8x16xf32, #tpu.memory_space<vmem>>, %arg26: memref<8x144xf32, #tpu.memory_space<vmem>>, %arg27: memref<8x72xf32, #tpu.memory_space<vmem>>, %arg28: memref<2x8xf32, #tpu.memory_space<vmem>>, %arg29: memref<2x1xf32, #tpu.memory_space<vmem>>, %arg30: memref<1x2x384xf32, #tpu.memory_space<vmem>>, %arg31: memref<32x640xf32, #tpu.memory_space<vmem>>, %arg32: memref<288x384xf32, #tpu.memory_space<vmem>>) attributes {dimension_semantics = [#tpu.dimension_semantics<parallel>], iteration_bounds = array<i64: 2>, scalar_prefetch = 0 : i64, scratch_operands = 2 : i64, tpu.core_type = #tpu.core_type<tc>, window_params = [{transform_indices = @transform_0, window_bounds = array<i64: 1, 8, 384>}, {pipeline_mode = #tpu.pipeline_mode<synchronous>, transform_indices = @transform_1, window_bounds = array<i64: 1, 384>}, {pipeline_mode = #tpu.pipeline_mode<synchronous>, transform_indices = @transform_2, window_bounds = array<i64: 1, 128>}, {pipeline_mode = #tpu.pipeline_mode<synchronous>, transform_indices = @transform_3, window_bounds = array<i64: 1, 128>}, {pipeline_mode = #tpu.pipeline_mode<synchronous>, transform_indices = @transform_4, window_bounds = array<i64: 1, 384>}, {pipeline_mode = #tpu.pipeline_mode<synchronous>, transform_indices = @transform_5, window_bounds = array<i64: 2, 8>}, {pipeline_mode = #tpu.pipeline_mode<synchronous>, transform_indices = @transform_6, window_bounds = array<i64: 8, 2>}, {pipeline_mode = #tpu.pipeline_mode<synchronous>, transform_indices = @transform_7, window_bounds = array<i64: 8, 1>}, {pipeline_mode = #tpu.pipeline_mode<synchronous>, transform_indices = @transform_8, window_bounds = array<i64: 2, 2>}, {pipeline_mode = #tpu.pipeline_mode<synchronous>, transform_indices = @transform_9, window_bounds = array<i64: 384, 128>}, {pipeline_mode = #tpu.pipeline_mode<synchronous>, transform_indices = @transform_10, window_bounds = array<i64: 128, 128>}, {pipeline_mode = #tpu.pipeline_mode<synchronous>, transform_indices = @transform_11, window_bounds = array<i64: 4, 128, 128>}, {pipeline_mode = #tpu.pipeline_mode<synchronous>, transform_indices = @transform_12, window_bounds = array<i64: 4, 128, 384>}, {pipeline_mode = #tpu.pipeline_mode<synchronous>, transform_indices = @transform_13, window_bounds = array<i64: 24, 72>}, {pipeline_mode = #tpu.pipeline_mode<synchronous>, transform_indices = @transform_14, window_bounds = array<i64: 24, 1>}, {pipeline_mode = #tpu.pipeline_mode<synchronous>, transform_indices = @transform_15, window_bounds = array<i64: 8, 72>}, {pipeline_mode = #tpu.pipeline_mode<synchronous>, transform_indices = @transform_16, window_bounds = array<i64: 8, 72>}, {pipeline_mode = #tpu.pipeline_mode<synchronous>, transform_indices = @transform_17, window_bounds = array<i64: 16, 72>}, {pipeline_mode = #tpu.pipeline_mode<synchronous>, transform_indices = @transform_18, window_bounds = array<i64: 16, 144>}, {pipeline_mode = #tpu.pipeline_mode<synchronous>, transform_indices = @transform_19, window_bounds = array<i64: 32, 144>}, {pipeline_mode = #tpu.pipeline_mode<synchronous>, transform_indices = @transform_20, window_bounds = array<i64: 32, 288>}, {pipeline_mode = #tpu.pipeline_mode<synchronous>, transform_indices = @transform_21, window_bounds = array<i64: 4, 16, 32>}, {pipeline_mode = #tpu.pipeline_mode<synchronous>, transform_indices = @transform_22, window_bounds = array<i64: 16, 288>}, {pipeline_mode = #tpu.pipeline_mode<synchronous>, transform_indices = @transform_23, window_bounds = array<i64: 16, 144>}, {pipeline_mode = #tpu.pipeline_mode<synchronous>, transform_indices = @transform_24, window_bounds = array<i64: 4, 8, 16>}, {pipeline_mode = #tpu.pipeline_mode<synchronous>, transform_indices = @transform_25, window_bounds = array<i64: 8, 144>}, {pipeline_mode = #tpu.pipeline_mode<synchronous>, transform_indices = @transform_26, window_bounds = array<i64: 8, 72>}, {pipeline_mode = #tpu.pipeline_mode<synchronous>, transform_indices = @transform_27, window_bounds = array<i64: 2, 8>}, {pipeline_mode = #tpu.pipeline_mode<synchronous>, transform_indices = @transform_28, window_bounds = array<i64: 2, 1>}, {transform_indices = @transform_29, window_bounds = array<i64: 1, 2, 384>}]} {
    %c0 = arith.constant 0 : index
    %c0_0 = arith.constant 0 : index
    %c0_1 = arith.constant 0 : index
    %0 = vector.load %arg1[%c0, %c0_0, %c0_1] : memref<1x8x384xf32, #tpu.memory_space<vmem>>, vector<1x8x384xf32>
    %1 = vector.shape_cast %0 : vector<1x8x384xf32> to vector<8x384xf32>
    %c0_2 = arith.constant 0 : index
    %c0_3 = arith.constant 0 : index
    %2 = vector.load %arg5[%c0_2, %c0_3] : memref<1x384xf32, #tpu.memory_space<vmem>>, vector<1x384xf32>
    %3 = vector.broadcast %2 : vector<1x384xf32> to vector<8x384xf32>
    %4 = arith.mulf %1, %3 : vector<8x384xf32>
    %cst = arith.constant dense<0.000000e+00> : vector<8xf32>
    %5 = vector.multi_reduction <add>, %4, %cst [1] : vector<8x384xf32> to vector<8xf32>
    %6 = vector.shape_cast %5 : vector<8xf32> to vector<8x1xf32>
    %c0_4 = arith.constant 0 : index
    %c0_5 = arith.constant 0 : index
    %7 = vector.load %arg6[%c0_4, %c0_5] : memref<2x8xf32, #tpu.memory_space<vmem>>, vector<2x8xf32>
    %cst_6 = arith.constant dense<0.000000e+00> : vector<2x1xf32>
    %8 = tpu.matmul %7, %6, %cst_6 {dimension_numbers = #tpu.dot_dimension_numbers<[1], [0], [0], [1], [0, 0, 1, 1], [], []>} : vector<2x8xf32>, vector<8x1xf32>, vector<2x1xf32> -> vector<2x1xf32>
    %cst_7 = arith.constant 0.00833333377 : f32
    %9 = vector.broadcast %cst_7 : f32 to vector<2x1xf32>
    %10 = arith.mulf %8, %9 : vector<2x1xf32>
    %c0_8 = arith.constant 0 : index
    %c0_9 = arith.constant 0 : index
    %11 = vector.load %arg7[%c0_8, %c0_9] : memref<8x2xf32, #tpu.memory_space<vmem>>, vector<8x2xf32>
    %cst_10 = arith.constant dense<0.000000e+00> : vector<8x1xf32>
    %12 = tpu.matmul %11, %10, %cst_10 {dimension_numbers = #tpu.dot_dimension_numbers<[1], [0], [0], [1], [0, 0, 1, 1], [], []>} : vector<8x2xf32>, vector<2x1xf32>, vector<8x1xf32> -> vector<8x1xf32>
    %13 = vector.broadcast %12 : vector<8x1xf32> to vector<8x384xf32>
    %14 = arith.subf %1, %13 : vector<8x384xf32>
    %15 = vector.broadcast %2 : vector<1x384xf32> to vector<8x384xf32>
    %16 = arith.mulf %14, %15 : vector<8x384xf32>
    %17 = arith.mulf %16, %16 : vector<8x384xf32>
    %cst_11 = arith.constant dense<0.000000e+00> : vector<8xf32>
    %18 = vector.multi_reduction <add>, %17, %cst_11 [1] : vector<8x384xf32> to vector<8xf32>
    %19 = vector.shape_cast %18 : vector<8xf32> to vector<8x1xf32>
    %c0_12 = arith.constant 0 : index
    %c0_13 = arith.constant 0 : index
    %20 = vector.load %arg6[%c0_12, %c0_13] : memref<2x8xf32, #tpu.memory_space<vmem>>, vector<2x8xf32>
    %cst_14 = arith.constant dense<0.000000e+00> : vector<2x1xf32>
    %21 = tpu.matmul %20, %19, %cst_14 {dimension_numbers = #tpu.dot_dimension_numbers<[1], [0], [0], [1], [0, 0, 1, 1], [], []>} : vector<2x8xf32>, vector<8x1xf32>, vector<2x1xf32> -> vector<2x1xf32>
    %cst_15 = arith.constant 0.00840336177 : f32
    %22 = vector.broadcast %cst_15 : f32 to vector<2x1xf32>
    %23 = arith.mulf %21, %22 : vector<2x1xf32>
    %24 = math.sqrt %23 : vector<2x1xf32>
    %c0_16 = arith.constant 0 : index
    %c0_17 = arith.constant 0 : index
    %25 = vector.load %arg7[%c0_16, %c0_17] : memref<8x2xf32, #tpu.memory_space<vmem>>, vector<8x2xf32>
    %cst_18 = arith.constant dense<0.000000e+00> : vector<8x1xf32>
    %26 = tpu.matmul %25, %24, %cst_18 {dimension_numbers = #tpu.dot_dimension_numbers<[1], [0], [0], [1], [0, 0, 1, 1], [], []>} : vector<8x2xf32>, vector<2x1xf32>, vector<8x1xf32> -> vector<8x1xf32>
    %27 = vector.broadcast %12 : vector<8x1xf32> to vector<8x384xf32>
    %28 = arith.subf %1, %27 : vector<8x384xf32>
    %29 = vector.broadcast %26 : vector<8x1xf32> to vector<8x384xf32>
    %30 = arith.divf %28, %29 : vector<8x384xf32>
    %31 = vector.broadcast %2 : vector<1x384xf32> to vector<8x384xf32>
    %32 = arith.mulf %30, %31 : vector<8x384xf32>
    %c0_19 = arith.constant 0 : index
    %c0_20 = arith.constant 0 : index
    %33 = vector.load %arg8[%c0_19, %c0_20] : memref<8x1xf32, #tpu.memory_space<vmem>>, vector<8x1xf32>
    %34 = vector.broadcast %33 : vector<8x1xf32> to vector<8x384xf32>
    %35 = arith.mulf %32, %34 : vector<8x384xf32>
    %cst_21 = arith.constant 0.000000e+00 : f32
    %36 = vector.broadcast %cst_21 : f32 to vector<8x640xf32>
    %c0_22 = arith.constant 0 : index
    %c0_23 = arith.constant 0 : index
    %37 = vector.load %arg31[%c0_22, %c0_23] : memref<32x640xf32, #tpu.memory_space<vmem>>, vector<8x640xf32>
    tpu.vector_store %arg31[%c0_22, %c0_23], %36 {strides = array<i32>} : memref<32x640xf32, #tpu.memory_space<vmem>>, vector<8x640xf32>,
    %c0_24 = arith.constant 0 : index
    %c128 = arith.constant 128 : index
    %38 = vector.load %arg31[%c0_24, %c128] : memref<32x640xf32, #tpu.memory_space<vmem>>, vector<8x384xf32>
    tpu.vector_store %arg31[%c0_24, %c128], %35 {strides = array<i32>} : memref<32x640xf32, #tpu.memory_space<vmem>>, vector<8x384xf32>,
    %c0_25 = arith.constant 0 : index
    %c103 = arith.constant 103 : index
    %39 = vector.load %arg31[%c0_25, %c103] : memref<32x640xf32, #tpu.memory_space<vmem>>, vector<8x384xf32>
    %c0_26 = arith.constant 0 : index
    %c0_27 = arith.constant 0 : index
    %40 = vector.load %arg32[%c0_26, %c0_27] : memref<288x384xf32, #tpu.memory_space<vmem>>, vector<8x384xf32>
    tpu.vector_store %arg32[%c0_26, %c0_27], %39 {strides = array<i32>} : memref<288x384xf32, #tpu.memory_space<vmem>>, vector<8x384xf32>,
    %c0_28 = arith.constant 0 : index
    %c104 = arith.constant 104 : index
    %41 = vector.load %arg31[%c0_28, %c104] : memref<32x640xf32, #tpu.memory_space<vmem>>, vector<8x384xf32>
    %c8 = arith.constant 8 : index
    %c0_29 = arith.constant 0 : index
    %42 = vector.load %arg32[%c8, %c0_29] : memref<288x384xf32, #tpu.memory_space<vmem>>, vector<8x384xf32>
    tpu.vector_store %arg32[%c8, %c0_29], %41 {strides = array<i32>} : memref<288x384xf32, #tpu.memory_space<vmem>>, vector<8x384xf32>,
    %c0_30 = arith.constant 0 : index
    %c105 = arith.constant 105 : index
    %43 = vector.load %arg31[%c0_30, %c105] : memref<32x640xf32, #tpu.memory_space<vmem>>, vector<8x384xf32>
    %c16 = arith.constant 16 : index
    %c0_31 = arith.constant 0 : index
    %44 = vector.load %arg32[%c16, %c0_31] : memref<288x384xf32, #tpu.memory_space<vmem>>, vector<8x384xf32>
    tpu.vector_store %arg32[%c16, %c0_31], %43 {strides = array<i32>} : memref<288x384xf32, #tpu.memory_space<vmem>>, vector<8x384xf32>,
    %c0_32 = arith.constant 0 : index
    %c127 = arith.constant 127 : index
    %45 = vector.load %arg31[%c0_32, %c127] : memref<32x640xf32, #tpu.memory_space<vmem>>, vector<8x384xf32>
    %c24 = arith.constant 24 : index
    %c0_33 = arith.constant 0 : index
    %46 = vector.load %arg32[%c24, %c0_33] : memref<288x384xf32, #tpu.memory_space<vmem>>, vector<8x384xf32>
    tpu.vector_store %arg32[%c24, %c0_33], %45 {strides = array<i32>} : memref<288x384xf32, #tpu.memory_space<vmem>>, vector<8x384xf32>,
    %c0_34 = arith.constant 0 : index
    %c128_35 = arith.constant 128 : index
    %47 = vector.load %arg31[%c0_34, %c128_35] : memref<32x640xf32, #tpu.memory_space<vmem>>, vector<8x384xf32>
    %c32 = arith.constant 32 : index
    %c0_36 = arith.constant 0 : index
    %48 = vector.load %arg32[%c32, %c0_36] : memref<288x384xf32, #tpu.memory_space<vmem>>, vector<8x384xf32>
    tpu.vector_store %arg32[%c32, %c0_36], %47 {strides = array<i32>} : memref<288x384xf32, #tpu.memory_space<vmem>>, vector<8x384xf32>,
    %c0_37 = arith.constant 0 : index
    %c129 = arith.constant 129 : index
    %49 = vector.load %arg31[%c0_37, %c129] : memref<32x640xf32, #tpu.memory_space<vmem>>, vector<8x384xf32>
    %c40 = arith.constant 40 : index
    %c0_38 = arith.constant 0 : index
    %50 = vector.load %arg32[%c40, %c0_38] : memref<288x384xf32, #tpu.memory_space<vmem>>, vector<8x384xf32>
    tpu.vector_store %arg32[%c40, %c0_38], %49 {strides = array<i32>} : memref<288x384xf32, #tpu.memory_space<vmem>>, vector<8x384xf32>,
    %c0_39 = arith.constant 0 : index
    %c151 = arith.constant 151 : index
    %51 = vector.load %arg31[%c0_39, %c151] : memref<32x640xf32, #tpu.memory_space<vmem>>, vector<8x384xf32>
    %c48 = arith.constant 48 : index
    %c0_40 = arith.constant 0 : index
    %52 = vector.load %arg32[%c48, %c0_40] : memref<288x384xf32, #tpu.memory_space<vmem>>, vector<8x384xf32>
    tpu.vector_store %arg32[%c48, %c0_40], %51 {strides = array<i32>} : memref<288x384xf32, #tpu.memory_space<vmem>>, vector<8x384xf32>,
    %c0_41 = arith.constant 0 : index
    %c152 = arith.constant 152 : index
    %53 = vector.load %arg31[%c0_41, %c152] : memref<32x640xf32, #tpu.memory_space<vmem>>, vector<8x384xf32>
    %c56 = arith.constant 56 : index
    %c0_42 = arith.constant 0 : index
    %54 = vector.load %arg32[%c56, %c0_42] : memref<288x384xf32, #tpu.memory_space<vmem>>, vector<8x384xf32>
    tpu.vector_store %arg32[%c56, %c0_42], %53 {strides = array<i32>} : memref<288x384xf32, #tpu.memory_space<vmem>>, vector<8x384xf32>,
    %c0_43 = arith.constant 0 : index
    %c153 = arith.constant 153 : index
    %55 = vector.load %arg31[%c0_43, %c153] : memref<32x640xf32, #tpu.memory_space<vmem>>, vector<8x384xf32>
    %c64 = arith.constant 64 : index
    %c0_44 = arith.constant 0 : index
    %56 = vector.load %arg32[%c64, %c0_44] : memref<288x384xf32, #tpu.memory_space<vmem>>, vector<8x384xf32>
    tpu.vector_store %arg32[%c64, %c0_44], %55 {strides = array<i32>} : memref<288x384xf32, #tpu.memory_space<vmem>>, vector<8x384xf32>,
    %c0_45 = arith.constant 0 : index
    %c0_46 = arith.constant 0 : index
    %57 = vector.load %arg14[%c0_45, %c0_46] : memref<24x72xf32, #tpu.memory_space<vmem>>, vector<24x72xf32>
    %c0_47 = arith.constant 0 : index
    %c0_48 = arith.constant 0 : index
    %58 = vector.load %arg32[%c0_47, %c0_48] : memref<288x384xf32, #tpu.memory_space<vmem>>, vector<72x384xf32>
    %cst_49 = arith.constant dense<0.000000e+00> : vector<24x384xf32>
    %59 = tpu.matmul %57, %58, %cst_49 {dimension_numbers = #tpu.dot_dimension_numbers<[1], [0], [0], [1], [0, 0, 1, 1], [], []>} : vector<24x72xf32>, vector<72x384xf32>, vector<24x384xf32> -> vector<24x384xf32>
    %c0_50 = arith.constant 0 : index
    %c0_51 = arith.constant 0 : index
    %60 = vector.load %arg15[%c0_50, %c0_51] : memref<24x1xf32, #tpu.memory_space<vmem>>, vector<24x1xf32>
    %61 = vector.broadcast %60 : vector<24x1xf32> to vector<24x384xf32>
    %62 = arith.addf %59, %61 : vector<24x384xf32>
    %63 = vector.extract_strided_slice %62 {offsets = [0, 0], sizes = [8, 384], strides = [1, 1]} : vector<24x384xf32> to vector<8x384xf32>
    %64 = vector.extract_strided_slice %62 {offsets = [8, 0], sizes = [8, 384], strides = [1, 1]} : vector<24x384xf32> to vector<8x384xf32>
    %65 = vector.extract_strided_slice %62 {offsets = [16, 0], sizes = [8, 384], strides = [1, 1]} : vector<24x384xf32> to vector<8x384xf32>
    %cst_52 = arith.constant 0.000000e+00 : f32
    %66 = vector.broadcast %cst_52 : f32 to vector<8x384xf32>
    %67 = arith.subf %66, %64 : vector<8x384xf32>
    %68 = math.exp %67 : vector<8x384xf32>
    %cst_53 = arith.constant 1.000000e+00 : f32
    %69 = vector.broadcast %cst_53 : f32 to vector<8x384xf32>
    %70 = arith.addf %69, %68 : vector<8x384xf32>
    %cst_54 = arith.constant 1.000000e+00 : f32
    %71 = vector.broadcast %cst_54 : f32 to vector<8x384xf32>
    %72 = arith.divf %71, %70 : vector<8x384xf32>
    %cst_55 = arith.constant 0.000000e+00 : f32
    %73 = vector.broadcast %cst_55 : f32 to vector<8x384xf32>
    %74 = arith.subf %73, %63 : vector<8x384xf32>
    %75 = math.exp %74 : vector<8x384xf32>
    %cst_56 = arith.constant 1.000000e+00 : f32
    %76 = vector.broadcast %cst_56 : f32 to vector<8x384xf32>
    %77 = arith.addf %76, %75 : vector<8x384xf32>
    %cst_57 = arith.constant 1.000000e+00 : f32
    %78 = vector.broadcast %cst_57 : f32 to vector<8x384xf32>
    %79 = arith.divf %78, %77 : vector<8x384xf32>
    %80 = math.tanh %65 : vector<8x384xf32>
    %81 = arith.mulf %79, %80 : vector<8x384xf32>
    %82 = math.tanh %81 : vector<8x384xf32>
    %83 = arith.mulf %72, %82 : vector<8x384xf32>
    %c0_58 = arith.constant 0 : index
    %c0_59 = arith.constant 0 : index
    %84 = vector.load %arg2[%c0_58, %c0_59] : memref<1x384xf32, #tpu.memory_space<vmem>>, vector<1x384xf32>
    %85 = vector.broadcast %84 : vector<1x384xf32> to vector<8x384xf32>
    %86 = arith.mulf %83, %85 : vector<8x384xf32>
    %cst_60 = arith.constant 0.000000e+00 : f32
    %87 = vector.broadcast %cst_60 : f32 to vector<8x640xf32>
    %c0_61 = arith.constant 0 : index
    %c0_62 = arith.constant 0 : index
    %88 = vector.load %arg31[%c0_61, %c0_62] : memref<32x640xf32, #tpu.memory_space<vmem>>, vector<8x640xf32>
    tpu.vector_store %arg31[%c0_61, %c0_62], %87 {strides = array<i32>} : memref<32x640xf32, #tpu.memory_space<vmem>>, vector<8x640xf32>,
    %c0_63 = arith.constant 0 : index
    %c128_64 = arith.constant 128 : index
    %89 = vector.load %arg31[%c0_63, %c128_64] : memref<32x640xf32, #tpu.memory_space<vmem>>, vector<8x384xf32>
    tpu.vector_store %arg31[%c0_63, %c128_64], %86 {strides = array<i32>} : memref<32x640xf32, #tpu.memory_space<vmem>>, vector<8x384xf32>,
    %c0_65 = arith.constant 0 : index
    %c103_66 = arith.constant 103 : index
    %90 = vector.load %arg31[%c0_65, %c103_66] : memref<32x640xf32, #tpu.memory_space<vmem>>, vector<8x384xf32>
    %c0_67 = arith.constant 0 : index
    %c0_68 = arith.constant 0 : index
    %91 = vector.load %arg32[%c0_67, %c0_68] : memref<288x384xf32, #tpu.memory_space<vmem>>, vector<8x384xf32>
    tpu.vector_store %arg32[%c0_67, %c0_68], %90 {strides = array<i32>} : memref<288x384xf32, #tpu.memory_space<vmem>>, vector<8x384xf32>,
    %c0_69 = arith.constant 0 : index
    %c104_70 = arith.constant 104 : index
    %92 = vector.load %arg31[%c0_69, %c104_70] : memref<32x640xf32, #tpu.memory_space<vmem>>, vector<8x384xf32>
    %c8_71 = arith.constant 8 : index
    %c0_72 = arith.constant 0 : index
    %93 = vector.load %arg32[%c8_71, %c0_72] : memref<288x384xf32, #tpu.memory_space<vmem>>, vector<8x384xf32>
    tpu.vector_store %arg32[%c8_71, %c0_72], %92 {strides = array<i32>} : memref<288x384xf32, #tpu.memory_space<vmem>>, vector<8x384xf32>,
    %c0_73 = arith.constant 0 : index
    %c105_74 = arith.constant 105 : index
    %94 = vector.load %arg31[%c0_73, %c105_74] : memref<32x640xf32, #tpu.memory_space<vmem>>, vector<8x384xf32>
    %c16_75 = arith.constant 16 : index
    %c0_76 = arith.constant 0 : index
    %95 = vector.load %arg32[%c16_75, %c0_76] : memref<288x384xf32, #tpu.memory_space<vmem>>, vector<8x384xf32>
    tpu.vector_store %arg32[%c16_75, %c0_76], %94 {strides = array<i32>} : memref<288x384xf32, #tpu.memory_space<vmem>>, vector<8x384xf32>,
    %c0_77 = arith.constant 0 : index
    %c127_78 = arith.constant 127 : index
    %96 = vector.load %arg31[%c0_77, %c127_78] : memref<32x640xf32, #tpu.memory_space<vmem>>, vector<8x384xf32>
    %c24_79 = arith.constant 24 : index
    %c0_80 = arith.constant 0 : index
    %97 = vector.load %arg32[%c24_79, %c0_80] : memref<288x384xf32, #tpu.memory_space<vmem>>, vector<8x384xf32>
    tpu.vector_store %arg32[%c24_79, %c0_80], %96 {strides = array<i32>} : memref<288x384xf32, #tpu.memory_space<vmem>>, vector<8x384xf32>,
    %c0_81 = arith.constant 0 : index
    %c128_82 = arith.constant 128 : index
    %98 = vector.load %arg31[%c0_81, %c128_82] : memref<32x640xf32, #tpu.memory_space<vmem>>, vector<8x384xf32>
    %c32_83 = arith.constant 32 : index
    %c0_84 = arith.constant 0 : index
    %99 = vector.load %arg32[%c32_83, %c0_84] : memref<288x384xf32, #tpu.memory_space<vmem>>, vector<8x384xf32>
    tpu.vector_store %arg32[%c32_83, %c0_84], %98 {strides = array<i32>} : memref<288x384xf32, #tpu.memory_space<vmem>>, vector<8x384xf32>,
    %c0_85 = arith.constant 0 : index
    %c129_86 = arith.constant 129 : index
    %100 = vector.load %arg31[%c0_85, %c129_86] : memref<32x640xf32, #tpu.memory_space<vmem>>, vector<8x384xf32>
    %c40_87 = arith.constant 40 : index
    %c0_88 = arith.constant 0 : index
    %101 = vector.load %arg32[%c40_87, %c0_88] : memref<288x384xf32, #tpu.memory_space<vmem>>, vector<8x384xf32>
    tpu.vector_store %arg32[%c40_87, %c0_88], %100 {strides = array<i32>} : memref<288x384xf32, #tpu.memory_space<vmem>>, vector<8x384xf32>,
    %c0_89 = arith.constant 0 : index
    %c151_90 = arith.constant 151 : index
    %102 = vector.load %arg31[%c0_89, %c151_90] : memref<32x640xf32, #tpu.memory_space<vmem>>, vector<8x384xf32>
    %c48_91 = arith.constant 48 : index
    %c0_92 = arith.constant 0 : index
    %103 = vector.load %arg32[%c48_91, %c0_92] : memref<288x384xf32, #tpu.memory_space<vmem>>, vector<8x384xf32>
    tpu.vector_store %arg32[%c48_91, %c0_92], %102 {strides = array<i32>} : memref<288x384xf32, #tpu.memory_space<vmem>>, vector<8x384xf32>,
    %c0_93 = arith.constant 0 : index
    %c152_94 = arith.constant 152 : index
    %104 = vector.load %arg31[%c0_93, %c152_94] : memref<32x640xf32, #tpu.memory_space<vmem>>, vector<8x384xf32>
    %c56_95 = arith.constant 56 : index
    %c0_96 = arith.constant 0 : index
    %105 = vector.load %arg32[%c56_95, %c0_96] : memref<288x384xf32, #tpu.memory_space<vmem>>, vector<8x384xf32>
    tpu.vector_store %arg32[%c56_95, %c0_96], %104 {strides = array<i32>} : memref<288x384xf32, #tpu.memory_space<vmem>>, vector<8x384xf32>,
    %c0_97 = arith.constant 0 : index
    %c153_98 = arith.constant 153 : index
    %106 = vector.load %arg31[%c0_97, %c153_98] : memref<32x640xf32, #tpu.memory_space<vmem>>, vector<8x384xf32>
    %c64_99 = arith.constant 64 : index
    %c0_100 = arith.constant 0 : index
    %107 = vector.load %arg32[%c64_99, %c0_100] : memref<288x384xf32, #tpu.memory_space<vmem>>, vector<8x384xf32>
    tpu.vector_store %arg32[%c64_99, %c0_100], %106 {strides = array<i32>} : memref<288x384xf32, #tpu.memory_space<vmem>>, vector<8x384xf32>,
    %c0_101 = arith.constant 0 : index
    %c0_102 = arith.constant 0 : index
    %108 = vector.load %arg16[%c0_101, %c0_102] : memref<8x72xf32, #tpu.memory_space<vmem>>, vector<8x72xf32>
    %c0_103 = arith.constant 0 : index
    %c0_104 = arith.constant 0 : index
    %109 = vector.load %arg32[%c0_103, %c0_104] : memref<288x384xf32, #tpu.memory_space<vmem>>, vector<72x384xf32>
    %cst_105 = arith.constant dense<0.000000e+00> : vector<8x384xf32>
    %110 = tpu.matmul %108, %109, %cst_105 {dimension_numbers = #tpu.dot_dimension_numbers<[1], [0], [0], [1], [0, 0, 1, 1], [], []>} : vector<8x72xf32>, vector<72x384xf32>, vector<8x384xf32> -> vector<8x384xf32>
    %c0_106 = arith.constant 0 : index
    %c0_107 = arith.constant 0 : index
    %111 = vector.load %arg2[%c0_106, %c0_107] : memref<1x384xf32, #tpu.memory_space<vmem>>, vector<1x384xf32>
    %112 = vector.broadcast %111 : vector<1x384xf32> to vector<8x384xf32>
    %113 = arith.mulf %110, %112 : vector<8x384xf32>
    %cst_108 = arith.constant dense<0.000000e+00> : vector<8xf32>
    %114 = vector.multi_reduction <add>, %113, %cst_108 [1] : vector<8x384xf32> to vector<8xf32>
    %115 = vector.shape_cast %114 : vector<8xf32> to vector<8x1xf32>
    %cst_109 = arith.constant 3.906250e-03 : f32
    %116 = vector.broadcast %cst_109 : f32 to vector<8x1xf32>
    %117 = arith.mulf %115, %116 : vector<8x1xf32>
    %118 = vector.broadcast %117 : vector<8x1xf32> to vector<8x384xf32>
    %119 = arith.subf %110, %118 : vector<8x384xf32>
    %120 = vector.broadcast %111 : vector<1x384xf32> to vector<8x384xf32>
    %121 = arith.mulf %119, %120 : vector<8x384xf32>
    %122 = arith.mulf %121, %121 : vector<8x384xf32>
    %cst_110 = arith.constant dense<0.000000e+00> : vector<8xf32>
    %123 = vector.multi_reduction <add>, %122, %cst_110 [1] : vector<8x384xf32> to vector<8xf32>
    %124 = vector.shape_cast %123 : vector<8xf32> to vector<8x1xf32>
    %cst_111 = arith.constant 3.906250e-03 : f32
    %125 = vector.broadcast %cst_111 : f32 to vector<8x1xf32>
    %126 = arith.mulf %124, %125 : vector<8x1xf32>
    %127 = vector.broadcast %117 : vector<8x1xf32> to vector<8x384xf32>
    %128 = arith.subf %110, %127 : vector<8x384xf32>
    %cst_112 = arith.constant 9.99999974E-6 : f32
    %129 = vector.broadcast %cst_112 : f32 to vector<8x1xf32>
    %130 = arith.addf %126, %129 : vector<8x1xf32>
    %131 = math.rsqrt %130 : vector<8x1xf32>
    %132 = vector.broadcast %131 : vector<8x1xf32> to vector<8x384xf32>
    %133 = arith.mulf %128, %132 : vector<8x384xf32>
    %cst_113 = arith.constant 0.000000e+00 : f32
    %134 = vector.broadcast %cst_113 : f32 to vector<8x384xf32>
    %135 = arith.cmpf oge, %133, %134 : vector<8x384xf32>
    %cst_114 = arith.constant 2.000000e-01 : f32
    %136 = vector.broadcast %cst_114 : f32 to vector<8x384xf32>
    %137 = arith.mulf %136, %133 : vector<8x384xf32>
    %138 = arith.select %135, %133, %137 : vector<8x384xi1>, vector<8x384xf32>
    %139 = vector.broadcast %111 : vector<1x384xf32> to vector<8x384xf32>
    %140 = arith.mulf %138, %139 : vector<8x384xf32>
    %cst_115 = arith.constant 0.000000e+00 : f32
    %141 = vector.broadcast %cst_115 : f32 to vector<8x640xf32>
    %c0_116 = arith.constant 0 : index
    %c0_117 = arith.constant 0 : index
    %142 = vector.load %arg31[%c0_116, %c0_117] : memref<32x640xf32, #tpu.memory_space<vmem>>, vector<8x640xf32>
    tpu.vector_store %arg31[%c0_116, %c0_117], %141 {strides = array<i32>} : memref<32x640xf32, #tpu.memory_space<vmem>>, vector<8x640xf32>,
    %c0_118 = arith.constant 0 : index
    %c128_119 = arith.constant 128 : index
    %143 = vector.load %arg31[%c0_118, %c128_119] : memref<32x640xf32, #tpu.memory_space<vmem>>, vector<8x384xf32>
    tpu.vector_store %arg31[%c0_118, %c128_119], %140 {strides = array<i32>} : memref<32x640xf32, #tpu.memory_space<vmem>>, vector<8x384xf32>,
    %c0_120 = arith.constant 0 : index
    %c103_121 = arith.constant 103 : index
    %144 = vector.load %arg31[%c0_120, %c103_121] : memref<32x640xf32, #tpu.memory_space<vmem>>, vector<8x384xf32>
    %c0_122 = arith.constant 0 : index
    %c0_123 = arith.constant 0 : index
    %145 = vector.load %arg32[%c0_122, %c0_123] : memref<288x384xf32, #tpu.memory_space<vmem>>, vector<8x384xf32>
    tpu.vector_store %arg32[%c0_122, %c0_123], %144 {strides = array<i32>} : memref<288x384xf32, #tpu.memory_space<vmem>>, vector<8x384xf32>,
    %c0_124 = arith.constant 0 : index
    %c104_125 = arith.constant 104 : index
    %146 = vector.load %arg31[%c0_124, %c104_125] : memref<32x640xf32, #tpu.memory_space<vmem>>, vector<8x384xf32>
    %c8_126 = arith.constant 8 : index
    %c0_127 = arith.constant 0 : index
    %147 = vector.load %arg32[%c8_126, %c0_127] : memref<288x384xf32, #tpu.memory_space<vmem>>, vector<8x384xf32>
    tpu.vector_store %arg32[%c8_126, %c0_127], %146 {strides = array<i32>} : memref<288x384xf32, #tpu.memory_space<vmem>>, vector<8x384xf32>,
    %c0_128 = arith.constant 0 : index
    %c105_129 = arith.constant 105 : index
    %148 = vector.load %arg31[%c0_128, %c105_129] : memref<32x640xf32, #tpu.memory_space<vmem>>, vector<8x384xf32>
    %c16_130 = arith.constant 16 : index
    %c0_131 = arith.constant 0 : index
    %149 = vector.load %arg32[%c16_130, %c0_131] : memref<288x384xf32, #tpu.memory_space<vmem>>, vector<8x384xf32>
    tpu.vector_store %arg32[%c16_130, %c0_131], %148 {strides = array<i32>} : memref<288x384xf32, #tpu.memory_space<vmem>>, vector<8x384xf32>,
    %c0_132 = arith.constant 0 : index
    %c127_133 = arith.constant 127 : index
    %150 = vector.load %arg31[%c0_132, %c127_133] : memref<32x640xf32, #tpu.memory_space<vmem>>, vector<8x384xf32>
    %c24_134 = arith.constant 24 : index
    %c0_135 = arith.constant 0 : index
    %151 = vector.load %arg32[%c24_134, %c0_135] : memref<288x384xf32, #tpu.memory_space<vmem>>, vector<8x384xf32>
    tpu.vector_store %arg32[%c24_134, %c0_135], %150 {strides = array<i32>} : memref<288x384xf32, #tpu.memory_space<vmem>>, vector<8x384xf32>,
    %c0_136 = arith.constant 0 : index
    %c128_137 = arith.constant 128 : index
    %152 = vector.load %arg31[%c0_136, %c128_137] : memref<32x640xf32, #tpu.memory_space<vmem>>, vector<8x384xf32>
    %c32_138 = arith.constant 32 : index
    %c0_139 = arith.constant 0 : index
    %153 = vector.load %arg32[%c32_138, %c0_139] : memref<288x384xf32, #tpu.memory_space<vmem>>, vector<8x384xf32>
    tpu.vector_store %arg32[%c32_138, %c0_139], %152 {strides = array<i32>} : memref<288x384xf32, #tpu.memory_space<vmem>>, vector<8x384xf32>,
    %c0_140 = arith.constant 0 : index
    %c129_141 = arith.constant 129 : index
    %154 = vector.load %arg31[%c0_140, %c129_141] : memref<32x640xf32, #tpu.memory_space<vmem>>, vector<8x384xf32>
    %c40_142 = arith.constant 40 : index
    %c0_143 = arith.constant 0 : index
    %155 = vector.load %arg32[%c40_142, %c0_143] : memref<288x384xf32, #tpu.memory_space<vmem>>, vector<8x384xf32>
    tpu.vector_store %arg32[%c40_142, %c0_143], %154 {strides = array<i32>} : memref<288x384xf32, #tpu.memory_space<vmem>>, vector<8x384xf32>,
    %c0_144 = arith.constant 0 : index
    %c151_145 = arith.constant 151 : index
    %156 = vector.load %arg31[%c0_144, %c151_145] : memref<32x640xf32, #tpu.memory_space<vmem>>, vector<8x384xf32>
    %c48_146 = arith.constant 48 : index
    %c0_147 = arith.constant 0 : index
    %157 = vector.load %arg32[%c48_146, %c0_147] : memref<288x384xf32, #tpu.memory_space<vmem>>, vector<8x384xf32>
    tpu.vector_store %arg32[%c48_146, %c0_147], %156 {strides = array<i32>} : memref<288x384xf32, #tpu.memory_space<vmem>>, vector<8x384xf32>,
    %c0_148 = arith.constant 0 : index
    %c152_149 = arith.constant 152 : index
    %158 = vector.load %arg31[%c0_148, %c152_149] : memref<32x640xf32, #tpu.memory_space<vmem>>, vector<8x384xf32>
    %c56_150 = arith.constant 56 : index
    %c0_151 = arith.constant 0 : index
    %159 = vector.load %arg32[%c56_150, %c0_151] : memref<288x384xf32, #tpu.memory_space<vmem>>, vector<8x384xf32>
    tpu.vector_store %arg32[%c56_150, %c0_151], %158 {strides = array<i32>} : memref<288x384xf32, #tpu.memory_space<vmem>>, vector<8x384xf32>,
    %c0_152 = arith.constant 0 : index
    %c153_153 = arith.constant 153 : index
    %160 = vector.load %arg31[%c0_152, %c153_153] : memref<32x640xf32, #tpu.memory_space<vmem>>, vector<8x384xf32>
    %c64_154 = arith.constant 64 : index
    %c0_155 = arith.constant 0 : index
    %161 = vector.load %arg32[%c64_154, %c0_155] : memref<288x384xf32, #tpu.memory_space<vmem>>, vector<8x384xf32>
    tpu.vector_store %arg32[%c64_154, %c0_155], %160 {strides = array<i32>} : memref<288x384xf32, #tpu.memory_space<vmem>>, vector<8x384xf32>,
    %c0_156 = arith.constant 0 : index
    %c0_157 = arith.constant 0 : index
    %162 = vector.load %arg17[%c0_156, %c0_157] : memref<8x72xf32, #tpu.memory_space<vmem>>, vector<8x72xf32>
    %c0_158 = arith.constant 0 : index
    %c0_159 = arith.constant 0 : index
    %163 = vector.load %arg32[%c0_158, %c0_159] : memref<288x384xf32, #tpu.memory_space<vmem>>, vector<72x384xf32>
    %cst_160 = arith.constant dense<0.000000e+00> : vector<8x384xf32>
    %164 = tpu.matmul %162, %163, %cst_160 {dimension_numbers = #tpu.dot_dimension_numbers<[1], [0], [0], [1], [0, 0, 1, 1], [], []>} : vector<8x72xf32>, vector<72x384xf32>, vector<8x384xf32> -> vector<8x384xf32>
    %c0_161 = arith.constant 0 : index
    %c0_162 = arith.constant 0 : index
    %165 = vector.load %arg2[%c0_161, %c0_162] : memref<1x384xf32, #tpu.memory_space<vmem>>, vector<1x384xf32>
    %166 = vector.broadcast %165 : vector<1x384xf32> to vector<8x384xf32>
    %167 = arith.mulf %164, %166 : vector<8x384xf32>
    %cst_163 = arith.constant dense<0.000000e+00> : vector<8xf32>
    %168 = vector.multi_reduction <add>, %167, %cst_163 [1] : vector<8x384xf32> to vector<8xf32>
    %169 = vector.shape_cast %168 : vector<8xf32> to vector<8x1xf32>
    %cst_164 = arith.constant 3.906250e-03 : f32
    %170 = vector.broadcast %cst_164 : f32 to vector<8x1xf32>
    %171 = arith.mulf %169, %170 : vector<8x1xf32>
    %172 = vector.broadcast %171 : vector<8x1xf32> to vector<8x384xf32>
    %173 = arith.subf %164, %172 : vector<8x384xf32>
    %174 = vector.broadcast %165 : vector<1x384xf32> to vector<8x384xf32>
    %175 = arith.mulf %173, %174 : vector<8x384xf32>
    %176 = arith.mulf %175, %175 : vector<8x384xf32>
    %cst_165 = arith.constant dense<0.000000e+00> : vector<8xf32>
    %177 = vector.multi_reduction <add>, %176, %cst_165 [1] : vector<8x384xf32> to vector<8xf32>
    %178 = vector.shape_cast %177 : vector<8xf32> to vector<8x1xf32>
    %cst_166 = arith.constant 3.906250e-03 : f32
    %179 = vector.broadcast %cst_166 : f32 to vector<8x1xf32>
    %180 = arith.mulf %178, %179 : vector<8x1xf32>
    %181 = vector.broadcast %171 : vector<8x1xf32> to vector<8x384xf32>
    %182 = arith.subf %164, %181 : vector<8x384xf32>
    %cst_167 = arith.constant 9.99999974E-6 : f32
    %183 = vector.broadcast %cst_167 : f32 to vector<8x1xf32>
    %184 = arith.addf %180, %183 : vector<8x1xf32>
    %185 = math.rsqrt %184 : vector<8x1xf32>
    %186 = vector.broadcast %185 : vector<8x1xf32> to vector<8x384xf32>
    %187 = arith.mulf %182, %186 : vector<8x384xf32>
    %cst_168 = arith.constant 0.000000e+00 : f32
    %188 = vector.broadcast %cst_168 : f32 to vector<8x384xf32>
    %189 = arith.cmpf oge, %187, %188 : vector<8x384xf32>
    %cst_169 = arith.constant 2.000000e-01 : f32
    %190 = vector.broadcast %cst_169 : f32 to vector<8x384xf32>
    %191 = arith.mulf %190, %187 : vector<8x384xf32>
    %192 = arith.select %189, %187, %191 : vector<8x384xi1>, vector<8x384xf32>
    %193 = vector.broadcast %165 : vector<1x384xf32> to vector<8x384xf32>
    %194 = arith.mulf %192, %193 : vector<8x384xf32>
    %c0_170 = arith.constant 0 : index
    %c0_171 = arith.constant 0 : index
    %195 = vector.load %arg10[%c0_170, %c0_171] : memref<384x128xf32, #tpu.memory_space<vmem>>, vector<384x128xf32>
    %cst_172 = arith.constant dense<0.000000e+00> : vector<8x128xf32>
    %196 = tpu.matmul %194, %195, %cst_172 {dimension_numbers = #tpu.dot_dimension_numbers<[1], [0], [0], [1], [0, 0, 1, 1], [], []>} : vector<8x384xf32>, vector<384x128xf32>, vector<8x128xf32> -> vector<8x128xf32>
    %cst_173 = arith.constant 0.000000e+00 : f32
    %197 = vector.broadcast %cst_173 : f32 to vector<8x384xf32>
    %c0_174 = arith.constant 0 : index
    %c0_175 = arith.constant 0 : index
    %198 = vector.load %arg31[%c0_174, %c0_175] : memref<32x640xf32, #tpu.memory_space<vmem>>, vector<8x384xf32>
    tpu.vector_store %arg31[%c0_174, %c0_175], %197 {strides = array<i32>} : memref<32x640xf32, #tpu.memory_space<vmem>>, vector<8x384xf32>,
    %c0_176 = arith.constant 0 : index
    %c128_177 = arith.constant 128 : index
    %199 = vector.load %arg31[%c0_176, %c128_177] : memref<32x640xf32, #tpu.memory_space<vmem>>, vector<8x128xf32>
    tpu.vector_store %arg31[%c0_176, %c128_177], %196 {strides = array<i32>} : memref<32x640xf32, #tpu.memory_space<vmem>>, vector<8x128xf32>,
    %c0_178 = arith.constant 0 : index
    %c111 = arith.constant 111 : index
    %200 = vector.load %arg31[%c0_178, %c111] : memref<32x640xf32, #tpu.memory_space<vmem>>, vector<8x128xf32>
    %c0_179 = arith.constant 0 : index
    %c0_180 = arith.constant 0 : index
    %201 = vector.load %arg32[%c0_179, %c0_180] : memref<288x384xf32, #tpu.memory_space<vmem>>, vector<8x128xf32>
    tpu.vector_store %arg32[%c0_179, %c0_180], %200 {strides = array<i32>} : memref<288x384xf32, #tpu.memory_space<vmem>>, vector<8x128xf32>,
    %c0_181 = arith.constant 0 : index
    %c112 = arith.constant 112 : index
    %202 = vector.load %arg31[%c0_181, %c112] : memref<32x640xf32, #tpu.memory_space<vmem>>, vector<8x128xf32>
    %c8_182 = arith.constant 8 : index
    %c0_183 = arith.constant 0 : index
    %203 = vector.load %arg32[%c8_182, %c0_183] : memref<288x384xf32, #tpu.memory_space<vmem>>, vector<8x128xf32>
    tpu.vector_store %arg32[%c8_182, %c0_183], %202 {strides = array<i32>} : memref<288x384xf32, #tpu.memory_space<vmem>>, vector<8x128xf32>,
    %c0_184 = arith.constant 0 : index
    %c113 = arith.constant 113 : index
    %204 = vector.load %arg31[%c0_184, %c113] : memref<32x640xf32, #tpu.memory_space<vmem>>, vector<8x128xf32>
    %c16_185 = arith.constant 16 : index
    %c0_186 = arith.constant 0 : index
    %205 = vector.load %arg32[%c16_185, %c0_186] : memref<288x384xf32, #tpu.memory_space<vmem>>, vector<8x128xf32>
    tpu.vector_store %arg32[%c16_185, %c0_186], %204 {strides = array<i32>} : memref<288x384xf32, #tpu.memory_space<vmem>>, vector<8x128xf32>,
    %c0_187 = arith.constant 0 : index
    %c127_188 = arith.constant 127 : index
    %206 = vector.load %arg31[%c0_187, %c127_188] : memref<32x640xf32, #tpu.memory_space<vmem>>, vector<8x128xf32>
    %c24_189 = arith.constant 24 : index
    %c0_190 = arith.constant 0 : index
    %207 = vector.load %arg32[%c24_189, %c0_190] : memref<288x384xf32, #tpu.memory_space<vmem>>, vector<8x128xf32>
    tpu.vector_store %arg32[%c24_189, %c0_190], %206 {strides = array<i32>} : memref<288x384xf32, #tpu.memory_space<vmem>>, vector<8x128xf32>,
    %c0_191 = arith.constant 0 : index
    %c128_192 = arith.constant 128 : index
    %208 = vector.load %arg31[%c0_191, %c128_192] : memref<32x640xf32, #tpu.memory_space<vmem>>, vector<8x128xf32>
    %c32_193 = arith.constant 32 : index
    %c0_194 = arith.constant 0 : index
    %209 = vector.load %arg32[%c32_193, %c0_194] : memref<288x384xf32, #tpu.memory_space<vmem>>, vector<8x128xf32>
    tpu.vector_store %arg32[%c32_193, %c0_194], %208 {strides = array<i32>} : memref<288x384xf32, #tpu.memory_space<vmem>>, vector<8x128xf32>,
    %c0_195 = arith.constant 0 : index
    %c129_196 = arith.constant 129 : index
    %210 = vector.load %arg31[%c0_195, %c129_196] : memref<32x640xf32, #tpu.memory_space<vmem>>, vector<8x128xf32>
    %c40_197 = arith.constant 40 : index
    %c0_198 = arith.constant 0 : index
    %211 = vector.load %arg32[%c40_197, %c0_198] : memref<288x384xf32, #tpu.memory_space<vmem>>, vector<8x128xf32>
    tpu.vector_store %arg32[%c40_197, %c0_198], %210 {strides = array<i32>} : memref<288x384xf32, #tpu.memory_space<vmem>>, vector<8x128xf32>,
    %c0_199 = arith.constant 0 : index
    %c143 = arith.constant 143 : index
    %212 = vector.load %arg31[%c0_199, %c143] : memref<32x640xf32, #tpu.memory_space<vmem>>, vector<8x128xf32>
    %c48_200 = arith.constant 48 : index
    %c0_201 = arith.constant 0 : index
    %213 = vector.load %arg32[%c48_200, %c0_201] : memref<288x384xf32, #tpu.memory_space<vmem>>, vector<8x128xf32>
    tpu.vector_store %arg32[%c48_200, %c0_201], %212 {strides = array<i32>} : memref<288x384xf32, #tpu.memory_space<vmem>>, vector<8x128xf32>,
    %c0_202 = arith.constant 0 : index
    %c144 = arith.constant 144 : index
    %214 = vector.load %arg31[%c0_202, %c144] : memref<32x640xf32, #tpu.memory_space<vmem>>, vector<8x128xf32>
    %c56_203 = arith.constant 56 : index
    %c0_204 = arith.constant 0 : index
    %215 = vector.load %arg32[%c56_203, %c0_204] : memref<288x384xf32, #tpu.memory_space<vmem>>, vector<8x128xf32>
    tpu.vector_store %arg32[%c56_203, %c0_204], %214 {strides = array<i32>} : memref<288x384xf32, #tpu.memory_space<vmem>>, vector<8x128xf32>,
    %c0_205 = arith.constant 0 : index
    %c145 = arith.constant 145 : index
    %216 = vector.load %arg31[%c0_205, %c145] : memref<32x640xf32, #tpu.memory_space<vmem>>, vector<8x128xf32>
    %c64_206 = arith.constant 64 : index
    %c0_207 = arith.constant 0 : index
    %217 = vector.load %arg32[%c64_206, %c0_207] : memref<288x384xf32, #tpu.memory_space<vmem>>, vector<8x128xf32>
    tpu.vector_store %arg32[%c64_206, %c0_207], %216 {strides = array<i32>} : memref<288x384xf32, #tpu.memory_space<vmem>>, vector<8x128xf32>,
    %c0_208 = arith.constant 0 : index
    %c0_209 = arith.constant 0 : index
    %218 = vector.load %arg18[%c0_208, %c0_209] : memref<16x72xf32, #tpu.memory_space<vmem>>, vector<16x72xf32>
    %c0_210 = arith.constant 0 : index
    %c0_211 = arith.constant 0 : index
    %219 = vector.load %arg32[%c0_210, %c0_211] : memref<288x384xf32, #tpu.memory_space<vmem>>, vector<72x128xf32>
    %cst_212 = arith.constant dense<0.000000e+00> : vector<16x128xf32>
    %220 = tpu.matmul %218, %219, %cst_212 {dimension_numbers = #tpu.dot_dimension_numbers<[1], [0], [0], [1], [0, 0, 1, 1], [], []>} : vector<16x72xf32>, vector<72x128xf32>, vector<16x128xf32> -> vector<16x128xf32>
    %c0_213 = arith.constant 0 : index
    %c0_214 = arith.constant 0 : index
    %221 = vector.load %arg3[%c0_213, %c0_214] : memref<1x128xf32, #tpu.memory_space<vmem>>, vector<1x128xf32>
    %222 = vector.broadcast %221 : vector<1x128xf32> to vector<16x128xf32>
    %223 = arith.mulf %220, %222 : vector<16x128xf32>
    %cst_215 = arith.constant dense<0.000000e+00> : vector<16xf32>
    %224 = vector.multi_reduction <add>, %223, %cst_215 [1] : vector<16x128xf32> to vector<16xf32>
    %225 = vector.shape_cast %224 : vector<16xf32> to vector<16x1xf32>
    %cst_216 = arith.constant 1.562500e-02 : f32
    %226 = vector.broadcast %cst_216 : f32 to vector<16x1xf32>
    %227 = arith.mulf %225, %226 : vector<16x1xf32>
    %228 = vector.broadcast %227 : vector<16x1xf32> to vector<16x128xf32>
    %229 = arith.subf %220, %228 : vector<16x128xf32>
    %230 = vector.broadcast %221 : vector<1x128xf32> to vector<16x128xf32>
    %231 = arith.mulf %229, %230 : vector<16x128xf32>
    %232 = arith.mulf %231, %231 : vector<16x128xf32>
    %cst_217 = arith.constant dense<0.000000e+00> : vector<16xf32>
    %233 = vector.multi_reduction <add>, %232, %cst_217 [1] : vector<16x128xf32> to vector<16xf32>
    %234 = vector.shape_cast %233 : vector<16xf32> to vector<16x1xf32>
    %cst_218 = arith.constant 1.562500e-02 : f32
    %235 = vector.broadcast %cst_218 : f32 to vector<16x1xf32>
    %236 = arith.mulf %234, %235 : vector<16x1xf32>
    %237 = vector.broadcast %227 : vector<16x1xf32> to vector<16x128xf32>
    %238 = arith.subf %220, %237 : vector<16x128xf32>
    %cst_219 = arith.constant 9.99999974E-6 : f32
    %239 = vector.broadcast %cst_219 : f32 to vector<16x1xf32>
    %240 = arith.addf %236, %239 : vector<16x1xf32>
    %241 = math.rsqrt %240 : vector<16x1xf32>
    %242 = vector.broadcast %241 : vector<16x1xf32> to vector<16x128xf32>
    %243 = arith.mulf %238, %242 : vector<16x128xf32>
    %cst_220 = arith.constant 0.000000e+00 : f32
    %244 = vector.broadcast %cst_220 : f32 to vector<16x128xf32>
    %245 = arith.cmpf oge, %243, %244 : vector<16x128xf32>
    %cst_221 = arith.constant 2.000000e-01 : f32
    %246 = vector.broadcast %cst_221 : f32 to vector<16x128xf32>
    %247 = arith.mulf %246, %243 : vector<16x128xf32>
    %248 = arith.select %245, %243, %247 : vector<16x128xi1>, vector<16x128xf32>
    %249 = vector.broadcast %221 : vector<1x128xf32> to vector<16x128xf32>
    %250 = arith.mulf %248, %249 : vector<16x128xf32>
    %cst_222 = arith.constant 0.000000e+00 : f32
    %251 = vector.broadcast %cst_222 : f32 to vector<16x384xf32>
    %c0_223 = arith.constant 0 : index
    %c0_224 = arith.constant 0 : index
    %252 = vector.load %arg31[%c0_223, %c0_224] : memref<32x640xf32, #tpu.memory_space<vmem>>, vector<16x384xf32>
    tpu.vector_store %arg31[%c0_223, %c0_224], %251 {strides = array<i32>} : memref<32x640xf32, #tpu.memory_space<vmem>>, vector<16x384xf32>,
    %c0_225 = arith.constant 0 : index
    %c128_226 = arith.constant 128 : index
    %253 = vector.load %arg31[%c0_225, %c128_226] : memref<32x640xf32, #tpu.memory_space<vmem>>, vector<16x128xf32>
    tpu.vector_store %arg31[%c0_225, %c128_226], %250 {strides = array<i32>} : memref<32x640xf32, #tpu.memory_space<vmem>>, vector<16x128xf32>,
    %c0_227 = arith.constant 0 : index
    %c111_228 = arith.constant 111 : index
    %254 = vector.load %arg31[%c0_227, %c111_228] : memref<32x640xf32, #tpu.memory_space<vmem>>, vector<16x128xf32>
    %c0_229 = arith.constant 0 : index
    %c0_230 = arith.constant 0 : index
    %255 = vector.load %arg32[%c0_229, %c0_230] : memref<288x384xf32, #tpu.memory_space<vmem>>, vector<16x128xf32>
    tpu.vector_store %arg32[%c0_229, %c0_230], %254 {strides = array<i32>} : memref<288x384xf32, #tpu.memory_space<vmem>>, vector<16x128xf32>,
    %c0_231 = arith.constant 0 : index
    %c112_232 = arith.constant 112 : index
    %256 = vector.load %arg31[%c0_231, %c112_232] : memref<32x640xf32, #tpu.memory_space<vmem>>, vector<16x128xf32>
    %c16_233 = arith.constant 16 : index
    %c0_234 = arith.constant 0 : index
    %257 = vector.load %arg32[%c16_233, %c0_234] : memref<288x384xf32, #tpu.memory_space<vmem>>, vector<16x128xf32>
    tpu.vector_store %arg32[%c16_233, %c0_234], %256 {strides = array<i32>} : memref<288x384xf32, #tpu.memory_space<vmem>>, vector<16x128xf32>,
    %c0_235 = arith.constant 0 : index
    %c113_236 = arith.constant 113 : index
    %258 = vector.load %arg31[%c0_235, %c113_236] : memref<32x640xf32, #tpu.memory_space<vmem>>, vector<16x128xf32>
    %c32_237 = arith.constant 32 : index
    %c0_238 = arith.constant 0 : index
    %259 = vector.load %arg32[%c32_237, %c0_238] : memref<288x384xf32, #tpu.memory_space<vmem>>, vector<16x128xf32>
    tpu.vector_store %arg32[%c32_237, %c0_238], %258 {strides = array<i32>} : memref<288x384xf32, #tpu.memory_space<vmem>>, vector<16x128xf32>,
    %c0_239 = arith.constant 0 : index
    %c127_240 = arith.constant 127 : index
    %260 = vector.load %arg31[%c0_239, %c127_240] : memref<32x640xf32, #tpu.memory_space<vmem>>, vector<16x128xf32>
    %c48_241 = arith.constant 48 : index
    %c0_242 = arith.constant 0 : index
    %261 = vector.load %arg32[%c48_241, %c0_242] : memref<288x384xf32, #tpu.memory_space<vmem>>, vector<16x128xf32>
    tpu.vector_store %arg32[%c48_241, %c0_242], %260 {strides = array<i32>} : memref<288x384xf32, #tpu.memory_space<vmem>>, vector<16x128xf32>,
    %c0_243 = arith.constant 0 : index
    %c128_244 = arith.constant 128 : index
    %262 = vector.load %arg31[%c0_243, %c128_244] : memref<32x640xf32, #tpu.memory_space<vmem>>, vector<16x128xf32>
    %c64_245 = arith.constant 64 : index
    %c0_246 = arith.constant 0 : index
    %263 = vector.load %arg32[%c64_245, %c0_246] : memref<288x384xf32, #tpu.memory_space<vmem>>, vector<16x128xf32>
    tpu.vector_store %arg32[%c64_245, %c0_246], %262 {strides = array<i32>} : memref<288x384xf32, #tpu.memory_space<vmem>>, vector<16x128xf32>,
    %c0_247 = arith.constant 0 : index
    %c129_248 = arith.constant 129 : index
    %264 = vector.load %arg31[%c0_247, %c129_248] : memref<32x640xf32, #tpu.memory_space<vmem>>, vector<16x128xf32>
    %c80 = arith.constant 80 : index
    %c0_249 = arith.constant 0 : index
    %265 = vector.load %arg32[%c80, %c0_249] : memref<288x384xf32, #tpu.memory_space<vmem>>, vector<16x128xf32>
    tpu.vector_store %arg32[%c80, %c0_249], %264 {strides = array<i32>} : memref<288x384xf32, #tpu.memory_space<vmem>>, vector<16x128xf32>,
    %c0_250 = arith.constant 0 : index
    %c143_251 = arith.constant 143 : index
    %266 = vector.load %arg31[%c0_250, %c143_251] : memref<32x640xf32, #tpu.memory_space<vmem>>, vector<16x128xf32>
    %c96 = arith.constant 96 : index
    %c0_252 = arith.constant 0 : index
    %267 = vector.load %arg32[%c96, %c0_252] : memref<288x384xf32, #tpu.memory_space<vmem>>, vector<16x128xf32>
    tpu.vector_store %arg32[%c96, %c0_252], %266 {strides = array<i32>} : memref<288x384xf32, #tpu.memory_space<vmem>>, vector<16x128xf32>,
    %c0_253 = arith.constant 0 : index
    %c144_254 = arith.constant 144 : index
    %268 = vector.load %arg31[%c0_253, %c144_254] : memref<32x640xf32, #tpu.memory_space<vmem>>, vector<16x128xf32>
    %c112_255 = arith.constant 112 : index
    %c0_256 = arith.constant 0 : index
    %269 = vector.load %arg32[%c112_255, %c0_256] : memref<288x384xf32, #tpu.memory_space<vmem>>, vector<16x128xf32>
    tpu.vector_store %arg32[%c112_255, %c0_256], %268 {strides = array<i32>} : memref<288x384xf32, #tpu.memory_space<vmem>>, vector<16x128xf32>,
    %c0_257 = arith.constant 0 : index
    %c145_258 = arith.constant 145 : index
    %270 = vector.load %arg31[%c0_257, %c145_258] : memref<32x640xf32, #tpu.memory_space<vmem>>, vector<16x128xf32>
    %c128_259 = arith.constant 128 : index
    %c0_260 = arith.constant 0 : index
    %271 = vector.load %arg32[%c128_259, %c0_260] : memref<288x384xf32, #tpu.memory_space<vmem>>, vector<16x128xf32>
    tpu.vector_store %arg32[%c128_259, %c0_260], %270 {strides = array<i32>} : memref<288x384xf32, #tpu.memory_space<vmem>>, vector<16x128xf32>,
    %c0_261 = arith.constant 0 : index
    %c0_262 = arith.constant 0 : index
    %272 = vector.load %arg19[%c0_261, %c0_262] : memref<16x144xf32, #tpu.memory_space<vmem>>, vector<16x144xf32>
    %c0_263 = arith.constant 0 : index
    %c0_264 = arith.constant 0 : index
    %273 = vector.load %arg32[%c0_263, %c0_264] : memref<288x384xf32, #tpu.memory_space<vmem>>, vector<144x128xf32>
    %cst_265 = arith.constant dense<0.000000e+00> : vector<16x128xf32>
    %274 = tpu.matmul %272, %273, %cst_265 {dimension_numbers = #tpu.dot_dimension_numbers<[1], [0], [0], [1], [0, 0, 1, 1], [], []>} : vector<16x144xf32>, vector<144x128xf32>, vector<16x128xf32> -> vector<16x128xf32>
    %c0_266 = arith.constant 0 : index
    %c0_267 = arith.constant 0 : index
    %275 = vector.load %arg3[%c0_266, %c0_267] : memref<1x128xf32, #tpu.memory_space<vmem>>, vector<1x128xf32>
    %276 = vector.broadcast %275 : vector<1x128xf32> to vector<16x128xf32>
    %277 = arith.mulf %274, %276 : vector<16x128xf32>
    %cst_268 = arith.constant dense<0.000000e+00> : vector<16xf32>
    %278 = vector.multi_reduction <add>, %277, %cst_268 [1] : vector<16x128xf32> to vector<16xf32>
    %279 = vector.shape_cast %278 : vector<16xf32> to vector<16x1xf32>
    %cst_269 = arith.constant 1.562500e-02 : f32
    %280 = vector.broadcast %cst_269 : f32 to vector<16x1xf32>
    %281 = arith.mulf %279, %280 : vector<16x1xf32>
    %282 = vector.broadcast %281 : vector<16x1xf32> to vector<16x128xf32>
    %283 = arith.subf %274, %282 : vector<16x128xf32>
    %284 = vector.broadcast %275 : vector<1x128xf32> to vector<16x128xf32>
    %285 = arith.mulf %283, %284 : vector<16x128xf32>
    %286 = arith.mulf %285, %285 : vector<16x128xf32>
    %cst_270 = arith.constant dense<0.000000e+00> : vector<16xf32>
    %287 = vector.multi_reduction <add>, %286, %cst_270 [1] : vector<16x128xf32> to vector<16xf32>
    %288 = vector.shape_cast %287 : vector<16xf32> to vector<16x1xf32>
    %cst_271 = arith.constant 1.562500e-02 : f32
    %289 = vector.broadcast %cst_271 : f32 to vector<16x1xf32>
    %290 = arith.mulf %288, %289 : vector<16x1xf32>
    %291 = vector.broadcast %281 : vector<16x1xf32> to vector<16x128xf32>
    %292 = arith.subf %274, %291 : vector<16x128xf32>
    %cst_272 = arith.constant 9.99999974E-6 : f32
    %293 = vector.broadcast %cst_272 : f32 to vector<16x1xf32>
    %294 = arith.addf %290, %293 : vector<16x1xf32>
    %295 = math.rsqrt %294 : vector<16x1xf32>
    %296 = vector.broadcast %295 : vector<16x1xf32> to vector<16x128xf32>
    %297 = arith.mulf %292, %296 : vector<16x128xf32>
    %cst_273 = arith.constant 0.000000e+00 : f32
    %298 = vector.broadcast %cst_273 : f32 to vector<16x128xf32>
    %299 = arith.cmpf oge, %297, %298 : vector<16x128xf32>
    %cst_274 = arith.constant 2.000000e-01 : f32
    %300 = vector.broadcast %cst_274 : f32 to vector<16x128xf32>
    %301 = arith.mulf %300, %297 : vector<16x128xf32>
    %302 = arith.select %299, %297, %301 : vector<16x128xi1>, vector<16x128xf32>
    %303 = vector.broadcast %275 : vector<1x128xf32> to vector<16x128xf32>
    %304 = arith.mulf %302, %303 : vector<16x128xf32>
    %c0_275 = arith.constant 0 : index
    %c0_276 = arith.constant 0 : index
    %305 = vector.load %arg11[%c0_275, %c0_276] : memref<128x128xf32, #tpu.memory_space<vmem>>, vector<128x128xf32>
    %cst_277 = arith.constant dense<0.000000e+00> : vector<16x128xf32>
    %306 = tpu.matmul %304, %305, %cst_277 {dimension_numbers = #tpu.dot_dimension_numbers<[1], [0], [0], [1], [0, 0, 1, 1], [], []>} : vector<16x128xf32>, vector<128x128xf32>, vector<16x128xf32> -> vector<16x128xf32>
    %cst_278 = arith.constant 0.000000e+00 : f32
    %307 = vector.broadcast %cst_278 : f32 to vector<16x384xf32>
    %c0_279 = arith.constant 0 : index
    %c0_280 = arith.constant 0 : index
    %308 = vector.load %arg31[%c0_279, %c0_280] : memref<32x640xf32, #tpu.memory_space<vmem>>, vector<16x384xf32>
    tpu.vector_store %arg31[%c0_279, %c0_280], %307 {strides = array<i32>} : memref<32x640xf32, #tpu.memory_space<vmem>>, vector<16x384xf32>,
    %c0_281 = arith.constant 0 : index
    %c128_282 = arith.constant 128 : index
    %309 = vector.load %arg31[%c0_281, %c128_282] : memref<32x640xf32, #tpu.memory_space<vmem>>, vector<16x128xf32>
    tpu.vector_store %arg31[%c0_281, %c128_282], %306 {strides = array<i32>} : memref<32x640xf32, #tpu.memory_space<vmem>>, vector<16x128xf32>,
    %c0_283 = arith.constant 0 : index
    %c95 = arith.constant 95 : index
    %310 = vector.load %arg31[%c0_283, %c95] : memref<32x640xf32, #tpu.memory_space<vmem>>, vector<16x128xf32>
    %c0_284 = arith.constant 0 : index
    %c0_285 = arith.constant 0 : index
    %311 = vector.load %arg32[%c0_284, %c0_285] : memref<288x384xf32, #tpu.memory_space<vmem>>, vector<16x128xf32>
    tpu.vector_store %arg32[%c0_284, %c0_285], %310 {strides = array<i32>} : memref<288x384xf32, #tpu.memory_space<vmem>>, vector<16x128xf32>,
    %c0_286 = arith.constant 0 : index
    %c96_287 = arith.constant 96 : index
    %312 = vector.load %arg31[%c0_286, %c96_287] : memref<32x640xf32, #tpu.memory_space<vmem>>, vector<16x128xf32>
    %c16_288 = arith.constant 16 : index
    %c0_289 = arith.constant 0 : index
    %313 = vector.load %arg32[%c16_288, %c0_289] : memref<288x384xf32, #tpu.memory_space<vmem>>, vector<16x128xf32>
    tpu.vector_store %arg32[%c16_288, %c0_289], %312 {strides = array<i32>} : memref<288x384xf32, #tpu.memory_space<vmem>>, vector<16x128xf32>,
    %c0_290 = arith.constant 0 : index
    %c97 = arith.constant 97 : index
    %314 = vector.load %arg31[%c0_290, %c97] : memref<32x640xf32, #tpu.memory_space<vmem>>, vector<16x128xf32>
    %c32_291 = arith.constant 32 : index
    %c0_292 = arith.constant 0 : index
    %315 = vector.load %arg32[%c32_291, %c0_292] : memref<288x384xf32, #tpu.memory_space<vmem>>, vector<16x128xf32>
    tpu.vector_store %arg32[%c32_291, %c0_292], %314 {strides = array<i32>} : memref<288x384xf32, #tpu.memory_space<vmem>>, vector<16x128xf32>,
    %c0_293 = arith.constant 0 : index
    %c127_294 = arith.constant 127 : index
    %316 = vector.load %arg31[%c0_293, %c127_294] : memref<32x640xf32, #tpu.memory_space<vmem>>, vector<16x128xf32>
    %c48_295 = arith.constant 48 : index
    %c0_296 = arith.constant 0 : index
    %317 = vector.load %arg32[%c48_295, %c0_296] : memref<288x384xf32, #tpu.memory_space<vmem>>, vector<16x128xf32>
    tpu.vector_store %arg32[%c48_295, %c0_296], %316 {strides = array<i32>} : memref<288x384xf32, #tpu.memory_space<vmem>>, vector<16x128xf32>,
    %c0_297 = arith.constant 0 : index
    %c128_298 = arith.constant 128 : index
    %318 = vector.load %arg31[%c0_297, %c128_298] : memref<32x640xf32, #tpu.memory_space<vmem>>, vector<16x128xf32>
    %c64_299 = arith.constant 64 : index
    %c0_300 = arith.constant 0 : index
    %319 = vector.load %arg32[%c64_299, %c0_300] : memref<288x384xf32, #tpu.memory_space<vmem>>, vector<16x128xf32>
    tpu.vector_store %arg32[%c64_299, %c0_300], %318 {strides = array<i32>} : memref<288x384xf32, #tpu.memory_space<vmem>>, vector<16x128xf32>,
    %c0_301 = arith.constant 0 : index
    %c129_302 = arith.constant 129 : index
    %320 = vector.load %arg31[%c0_301, %c129_302] : memref<32x640xf32, #tpu.memory_space<vmem>>, vector<16x128xf32>
    %c80_303 = arith.constant 80 : index
    %c0_304 = arith.constant 0 : index
    %321 = vector.load %arg32[%c80_303, %c0_304] : memref<288x384xf32, #tpu.memory_space<vmem>>, vector<16x128xf32>
    tpu.vector_store %arg32[%c80_303, %c0_304], %320 {strides = array<i32>} : memref<288x384xf32, #tpu.memory_space<vmem>>, vector<16x128xf32>,
    %c0_305 = arith.constant 0 : index
    %c159 = arith.constant 159 : index
    %322 = vector.load %arg31[%c0_305, %c159] : memref<32x640xf32, #tpu.memory_space<vmem>>, vector<16x128xf32>
    %c96_306 = arith.constant 96 : index
    %c0_307 = arith.constant 0 : index
    %323 = vector.load %arg32[%c96_306, %c0_307] : memref<288x384xf32, #tpu.memory_space<vmem>>, vector<16x128xf32>
    tpu.vector_store %arg32[%c96_306, %c0_307], %322 {strides = array<i32>} : memref<288x384xf32, #tpu.memory_space<vmem>>, vector<16x128xf32>,
    %c0_308 = arith.constant 0 : index
    %c160 = arith.constant 160 : index
    %324 = vector.load %arg31[%c0_308, %c160] : memref<32x640xf32, #tpu.memory_space<vmem>>, vector<16x128xf32>
    %c112_309 = arith.constant 112 : index
    %c0_310 = arith.constant 0 : index
    %325 = vector.load %arg32[%c112_309, %c0_310] : memref<288x384xf32, #tpu.memory_space<vmem>>, vector<16x128xf32>
    tpu.vector_store %arg32[%c112_309, %c0_310], %324 {strides = array<i32>} : memref<288x384xf32, #tpu.memory_space<vmem>>, vector<16x128xf32>,
    %c0_311 = arith.constant 0 : index
    %c161 = arith.constant 161 : index
    %326 = vector.load %arg31[%c0_311, %c161] : memref<32x640xf32, #tpu.memory_space<vmem>>, vector<16x128xf32>
    %c128_312 = arith.constant 128 : index
    %c0_313 = arith.constant 0 : index
    %327 = vector.load %arg32[%c128_312, %c0_313] : memref<288x384xf32, #tpu.memory_space<vmem>>, vector<16x128xf32>
    tpu.vector_store %arg32[%c128_312, %c0_313], %326 {strides = array<i32>} : memref<288x384xf32, #tpu.memory_space<vmem>>, vector<16x128xf32>,
    %c0_314 = arith.constant 0 : index
    %c0_315 = arith.constant 0 : index
    %328 = vector.load %arg20[%c0_314, %c0_315] : memref<32x144xf32, #tpu.memory_space<vmem>>, vector<32x144xf32>
    %c0_316 = arith.constant 0 : index
    %c0_317 = arith.constant 0 : index
    %329 = vector.load %arg32[%c0_316, %c0_317] : memref<288x384xf32, #tpu.memory_space<vmem>>, vector<144x128xf32>
    %cst_318 = arith.constant dense<0.000000e+00> : vector<32x128xf32>
    %330 = tpu.matmul %328, %329, %cst_318 {dimension_numbers = #tpu.dot_dimension_numbers<[1], [0], [0], [1], [0, 0, 1, 1], [], []>} : vector<32x144xf32>, vector<144x128xf32>, vector<32x128xf32> -> vector<32x128xf32>
    %c0_319 = arith.constant 0 : index
    %c0_320 = arith.constant 0 : index
    %331 = vector.load %arg4[%c0_319, %c0_320] : memref<1x128xf32, #tpu.memory_space<vmem>>, vector<1x128xf32>
    %332 = vector.broadcast %331 : vector<1x128xf32> to vector<32x128xf32>
    %333 = arith.mulf %330, %332 : vector<32x128xf32>
    %cst_321 = arith.constant dense<0.000000e+00> : vector<32xf32>
    %334 = vector.multi_reduction <add>, %333, %cst_321 [1] : vector<32x128xf32> to vector<32xf32>
    %335 = vector.shape_cast %334 : vector<32xf32> to vector<32x1xf32>
    %cst_322 = arith.constant 6.250000e-02 : f32
    %336 = vector.broadcast %cst_322 : f32 to vector<32x1xf32>
    %337 = arith.mulf %335, %336 : vector<32x1xf32>
    %338 = vector.broadcast %337 : vector<32x1xf32> to vector<32x128xf32>
    %339 = arith.subf %330, %338 : vector<32x128xf32>
    %340 = vector.broadcast %331 : vector<1x128xf32> to vector<32x128xf32>
    %341 = arith.mulf %339, %340 : vector<32x128xf32>
    %342 = arith.mulf %341, %341 : vector<32x128xf32>
    %cst_323 = arith.constant dense<0.000000e+00> : vector<32xf32>
    %343 = vector.multi_reduction <add>, %342, %cst_323 [1] : vector<32x128xf32> to vector<32xf32>
    %344 = vector.shape_cast %343 : vector<32xf32> to vector<32x1xf32>
    %cst_324 = arith.constant 6.250000e-02 : f32
    %345 = vector.broadcast %cst_324 : f32 to vector<32x1xf32>
    %346 = arith.mulf %344, %345 : vector<32x1xf32>
    %347 = vector.broadcast %337 : vector<32x1xf32> to vector<32x128xf32>
    %348 = arith.subf %330, %347 : vector<32x128xf32>
    %cst_325 = arith.constant 9.99999974E-6 : f32
    %349 = vector.broadcast %cst_325 : f32 to vector<32x1xf32>
    %350 = arith.addf %346, %349 : vector<32x1xf32>
    %351 = math.rsqrt %350 : vector<32x1xf32>
    %352 = vector.broadcast %351 : vector<32x1xf32> to vector<32x128xf32>
    %353 = arith.mulf %348, %352 : vector<32x128xf32>
    %cst_326 = arith.constant 0.000000e+00 : f32
    %354 = vector.broadcast %cst_326 : f32 to vector<32x128xf32>
    %355 = arith.cmpf oge, %353, %354 : vector<32x128xf32>
    %cst_327 = arith.constant 2.000000e-01 : f32
    %356 = vector.broadcast %cst_327 : f32 to vector<32x128xf32>
    %357 = arith.mulf %356, %353 : vector<32x128xf32>
    %358 = arith.select %355, %353, %357 : vector<32x128xi1>, vector<32x128xf32>
    %359 = vector.broadcast %331 : vector<1x128xf32> to vector<32x128xf32>
    %360 = arith.mulf %358, %359 : vector<32x128xf32>
    %cst_328 = arith.constant 0.000000e+00 : f32
    %361 = vector.broadcast %cst_328 : f32 to vector<32x384xf32>
    %c0_329 = arith.constant 0 : index
    %c0_330 = arith.constant 0 : index
    %362 = vector.load %arg31[%c0_329, %c0_330] : memref<32x640xf32, #tpu.memory_space<vmem>>, vector<32x384xf32>
    tpu.vector_store %arg31[%c0_329, %c0_330], %361 {strides = array<i32>} : memref<32x640xf32, #tpu.memory_space<vmem>>, vector<32x384xf32>,
    %c0_331 = arith.constant 0 : index
    %c128_332 = arith.constant 128 : index
    %363 = vector.load %arg31[%c0_331, %c128_332] : memref<32x640xf32, #tpu.memory_space<vmem>>, vector<32x128xf32>
    tpu.vector_store %arg31[%c0_331, %c128_332], %360 {strides = array<i32>} : memref<32x640xf32, #tpu.memory_space<vmem>>, vector<32x128xf32>,
    %c0_333 = arith.constant 0 : index
    %c95_334 = arith.constant 95 : index
    %364 = vector.load %arg31[%c0_333, %c95_334] : memref<32x640xf32, #tpu.memory_space<vmem>>, vector<32x128xf32>
    %c0_335 = arith.constant 0 : index
    %c0_336 = arith.constant 0 : index
    %365 = vector.load %arg32[%c0_335, %c0_336] : memref<288x384xf32, #tpu.memory_space<vmem>>, vector<32x128xf32>
    tpu.vector_store %arg32[%c0_335, %c0_336], %364 {strides = array<i32>} : memref<288x384xf32, #tpu.memory_space<vmem>>, vector<32x128xf32>,
    %c0_337 = arith.constant 0 : index
    %c96_338 = arith.constant 96 : index
    %366 = vector.load %arg31[%c0_337, %c96_338] : memref<32x640xf32, #tpu.memory_space<vmem>>, vector<32x128xf32>
    %c32_339 = arith.constant 32 : index
    %c0_340 = arith.constant 0 : index
    %367 = vector.load %arg32[%c32_339, %c0_340] : memref<288x384xf32, #tpu.memory_space<vmem>>, vector<32x128xf32>
    tpu.vector_store %arg32[%c32_339, %c0_340], %366 {strides = array<i32>} : memref<288x384xf32, #tpu.memory_space<vmem>>, vector<32x128xf32>,
    %c0_341 = arith.constant 0 : index
    %c97_342 = arith.constant 97 : index
    %368 = vector.load %arg31[%c0_341, %c97_342] : memref<32x640xf32, #tpu.memory_space<vmem>>, vector<32x128xf32>
    %c64_343 = arith.constant 64 : index
    %c0_344 = arith.constant 0 : index
    %369 = vector.load %arg32[%c64_343, %c0_344] : memref<288x384xf32, #tpu.memory_space<vmem>>, vector<32x128xf32>
    tpu.vector_store %arg32[%c64_343, %c0_344], %368 {strides = array<i32>} : memref<288x384xf32, #tpu.memory_space<vmem>>, vector<32x128xf32>,
    %c0_345 = arith.constant 0 : index
    %c127_346 = arith.constant 127 : index
    %370 = vector.load %arg31[%c0_345, %c127_346] : memref<32x640xf32, #tpu.memory_space<vmem>>, vector<32x128xf32>
    %c96_347 = arith.constant 96 : index
    %c0_348 = arith.constant 0 : index
    %371 = vector.load %arg32[%c96_347, %c0_348] : memref<288x384xf32, #tpu.memory_space<vmem>>, vector<32x128xf32>
    tpu.vector_store %arg32[%c96_347, %c0_348], %370 {strides = array<i32>} : memref<288x384xf32, #tpu.memory_space<vmem>>, vector<32x128xf32>,
    %c0_349 = arith.constant 0 : index
    %c128_350 = arith.constant 128 : index
    %372 = vector.load %arg31[%c0_349, %c128_350] : memref<32x640xf32, #tpu.memory_space<vmem>>, vector<32x128xf32>
    %c128_351 = arith.constant 128 : index
    %c0_352 = arith.constant 0 : index
    %373 = vector.load %arg32[%c128_351, %c0_352] : memref<288x384xf32, #tpu.memory_space<vmem>>, vector<32x128xf32>
    tpu.vector_store %arg32[%c128_351, %c0_352], %372 {strides = array<i32>} : memref<288x384xf32, #tpu.memory_space<vmem>>, vector<32x128xf32>,
    %c0_353 = arith.constant 0 : index
    %c129_354 = arith.constant 129 : index
    %374 = vector.load %arg31[%c0_353, %c129_354] : memref<32x640xf32, #tpu.memory_space<vmem>>, vector<32x128xf32>
    %c160_355 = arith.constant 160 : index
    %c0_356 = arith.constant 0 : index
    %375 = vector.load %arg32[%c160_355, %c0_356] : memref<288x384xf32, #tpu.memory_space<vmem>>, vector<32x128xf32>
    tpu.vector_store %arg32[%c160_355, %c0_356], %374 {strides = array<i32>} : memref<288x384xf32, #tpu.memory_space<vmem>>, vector<32x128xf32>,
    %c0_357 = arith.constant 0 : index
    %c159_358 = arith.constant 159 : index
    %376 = vector.load %arg31[%c0_357, %c159_358] : memref<32x640xf32, #tpu.memory_space<vmem>>, vector<32x128xf32>
    %c192 = arith.constant 192 : index
    %c0_359 = arith.constant 0 : index
    %377 = vector.load %arg32[%c192, %c0_359] : memref<288x384xf32, #tpu.memory_space<vmem>>, vector<32x128xf32>
    tpu.vector_store %arg32[%c192, %c0_359], %376 {strides = array<i32>} : memref<288x384xf32, #tpu.memory_space<vmem>>, vector<32x128xf32>,
    %c0_360 = arith.constant 0 : index
    %c160_361 = arith.constant 160 : index
    %378 = vector.load %arg31[%c0_360, %c160_361] : memref<32x640xf32, #tpu.memory_space<vmem>>, vector<32x128xf32>
    %c224 = arith.constant 224 : index
    %c0_362 = arith.constant 0 : index
    %379 = vector.load %arg32[%c224, %c0_362] : memref<288x384xf32, #tpu.memory_space<vmem>>, vector<32x128xf32>
    tpu.vector_store %arg32[%c224, %c0_362], %378 {strides = array<i32>} : memref<288x384xf32, #tpu.memory_space<vmem>>, vector<32x128xf32>,
    %c0_363 = arith.constant 0 : index
    %c161_364 = arith.constant 161 : index
    %380 = vector.load %arg31[%c0_363, %c161_364] : memref<32x640xf32, #tpu.memory_space<vmem>>, vector<32x128xf32>
    %c256 = arith.constant 256 : index
    %c0_365 = arith.constant 0 : index
    %381 = vector.load %arg32[%c256, %c0_365] : memref<288x384xf32, #tpu.memory_space<vmem>>, vector<32x128xf32>
    tpu.vector_store %arg32[%c256, %c0_365], %380 {strides = array<i32>} : memref<288x384xf32, #tpu.memory_space<vmem>>, vector<32x128xf32>,
    %c0_366 = arith.constant 0 : index
    %c0_367 = arith.constant 0 : index
    %382 = vector.load %arg21[%c0_366, %c0_367] : memref<32x288xf32, #tpu.memory_space<vmem>>, vector<32x288xf32>
    %c0_368 = arith.constant 0 : index
    %c0_369 = arith.constant 0 : index
    %383 = vector.load %arg32[%c0_368, %c0_369] : memref<288x384xf32, #tpu.memory_space<vmem>>, vector<288x128xf32>
    %cst_370 = arith.constant dense<0.000000e+00> : vector<32x128xf32>
    %384 = tpu.matmul %382, %383, %cst_370 {dimension_numbers = #tpu.dot_dimension_numbers<[1], [0], [0], [1], [0, 0, 1, 1], [], []>} : vector<32x288xf32>, vector<288x128xf32>, vector<32x128xf32> -> vector<32x128xf32>
    %c0_371 = arith.constant 0 : index
    %c0_372 = arith.constant 0 : index
    %385 = vector.load %arg4[%c0_371, %c0_372] : memref<1x128xf32, #tpu.memory_space<vmem>>, vector<1x128xf32>
    %386 = vector.broadcast %385 : vector<1x128xf32> to vector<32x128xf32>
    %387 = arith.mulf %384, %386 : vector<32x128xf32>
    %cst_373 = arith.constant dense<0.000000e+00> : vector<32xf32>
    %388 = vector.multi_reduction <add>, %387, %cst_373 [1] : vector<32x128xf32> to vector<32xf32>
    %389 = vector.shape_cast %388 : vector<32xf32> to vector<32x1xf32>
    %cst_374 = arith.constant 6.250000e-02 : f32
    %390 = vector.broadcast %cst_374 : f32 to vector<32x1xf32>
    %391 = arith.mulf %389, %390 : vector<32x1xf32>
    %392 = vector.broadcast %391 : vector<32x1xf32> to vector<32x128xf32>
    %393 = arith.subf %384, %392 : vector<32x128xf32>
    %394 = vector.broadcast %385 : vector<1x128xf32> to vector<32x128xf32>
    %395 = arith.mulf %393, %394 : vector<32x128xf32>
    %396 = arith.mulf %395, %395 : vector<32x128xf32>
    %cst_375 = arith.constant dense<0.000000e+00> : vector<32xf32>
    %397 = vector.multi_reduction <add>, %396, %cst_375 [1] : vector<32x128xf32> to vector<32xf32>
    %398 = vector.shape_cast %397 : vector<32xf32> to vector<32x1xf32>
    %cst_376 = arith.constant 6.250000e-02 : f32
    %399 = vector.broadcast %cst_376 : f32 to vector<32x1xf32>
    %400 = arith.mulf %398, %399 : vector<32x1xf32>
    %401 = vector.broadcast %391 : vector<32x1xf32> to vector<32x128xf32>
    %402 = arith.subf %384, %401 : vector<32x128xf32>
    %cst_377 = arith.constant 9.99999974E-6 : f32
    %403 = vector.broadcast %cst_377 : f32 to vector<32x1xf32>
    %404 = arith.addf %400, %403 : vector<32x1xf32>
    %405 = math.rsqrt %404 : vector<32x1xf32>
    %406 = vector.broadcast %405 : vector<32x1xf32> to vector<32x128xf32>
    %407 = arith.mulf %402, %406 : vector<32x128xf32>
    %cst_378 = arith.constant 0.000000e+00 : f32
    %408 = vector.broadcast %cst_378 : f32 to vector<32x128xf32>
    %409 = arith.cmpf oge, %407, %408 : vector<32x128xf32>
    %cst_379 = arith.constant 2.000000e-01 : f32
    %410 = vector.broadcast %cst_379 : f32 to vector<32x128xf32>
    %411 = arith.mulf %410, %407 : vector<32x128xf32>
    %412 = arith.select %409, %407, %411 : vector<32x128xi1>, vector<32x128xf32>
    %413 = vector.broadcast %385 : vector<1x128xf32> to vector<32x128xf32>
    %414 = arith.mulf %412, %413 : vector<32x128xf32>
    %c0_380 = arith.constant 0 : index
    %c0_381 = arith.constant 0 : index
    %415 = vector.load %arg4[%c0_380, %c0_381] : memref<1x128xf32, #tpu.memory_space<vmem>>, vector<1x128xf32>
    %c0_382 = arith.constant 0 : index
    %c0_383 = arith.constant 0 : index
    %c0_384 = arith.constant 0 : index
    %416 = vector.load %arg22[%c0_382, %c0_383, %c0_384] : memref<4x16x32xf32, #tpu.memory_space<vmem>>, vector<1x16x32xf32>
    %417 = vector.shape_cast %416 : vector<1x16x32xf32> to vector<16x32xf32>
    %cst_385 = arith.constant dense<0.000000e+00> : vector<16x128xf32>
    %418 = tpu.matmul %417, %414, %cst_385 {dimension_numbers = #tpu.dot_dimension_numbers<[1], [0], [0], [1], [0, 0, 1, 1], [], []>} : vector<16x32xf32>, vector<32x128xf32>, vector<16x128xf32> -> vector<16x128xf32>
    %c1 = arith.constant 1 : index
    %c0_386 = arith.constant 0 : index
    %c0_387 = arith.constant 0 : index
    %419 = vector.load %arg22[%c1, %c0_386, %c0_387] : memref<4x16x32xf32, #tpu.memory_space<vmem>>, vector<1x16x32xf32>
    %420 = vector.shape_cast %419 : vector<1x16x32xf32> to vector<16x32xf32>
    %cst_388 = arith.constant dense<0.000000e+00> : vector<16x128xf32>
    %421 = tpu.matmul %420, %414, %cst_388 {dimension_numbers = #tpu.dot_dimension_numbers<[1], [0], [0], [1], [0, 0, 1, 1], [], []>} : vector<16x32xf32>, vector<32x128xf32>, vector<16x128xf32> -> vector<16x128xf32>
    %c2 = arith.constant 2 : index
    %c0_389 = arith.constant 0 : index
    %c0_390 = arith.constant 0 : index
    %422 = vector.load %arg22[%c2, %c0_389, %c0_390] : memref<4x16x32xf32, #tpu.memory_space<vmem>>, vector<1x16x32xf32>
    %423 = vector.shape_cast %422 : vector<1x16x32xf32> to vector<16x32xf32>
    %cst_391 = arith.constant dense<0.000000e+00> : vector<16x128xf32>
    %424 = tpu.matmul %423, %414, %cst_391 {dimension_numbers = #tpu.dot_dimension_numbers<[1], [0], [0], [1], [0, 0, 1, 1], [], []>} : vector<16x32xf32>, vector<32x128xf32>, vector<16x128xf32> -> vector<16x128xf32>
    %c3 = arith.constant 3 : index
    %c0_392 = arith.constant 0 : index
    %c0_393 = arith.constant 0 : index
    %425 = vector.load %arg22[%c3, %c0_392, %c0_393] : memref<4x16x32xf32, #tpu.memory_space<vmem>>, vector<1x16x32xf32>
    %426 = vector.shape_cast %425 : vector<1x16x32xf32> to vector<16x32xf32>
    %cst_394 = arith.constant dense<0.000000e+00> : vector<16x128xf32>
    %427 = tpu.matmul %426, %414, %cst_394 {dimension_numbers = #tpu.dot_dimension_numbers<[1], [0], [0], [1], [0, 0, 1, 1], [], []>} : vector<16x32xf32>, vector<32x128xf32>, vector<16x128xf32> -> vector<16x128xf32>
    %428 = vector.broadcast %415 : vector<1x128xf32> to vector<16x128xf32>
    %429 = arith.mulf %418, %428 : vector<16x128xf32>
    %cst_395 = arith.constant dense<0.000000e+00> : vector<16xf32>
    %430 = vector.multi_reduction <add>, %429, %cst_395 [1] : vector<16x128xf32> to vector<16xf32>
    %431 = vector.shape_cast %430 : vector<16xf32> to vector<16x1xf32>
    %cst_396 = arith.constant 0.000000e+00 : f32
    %432 = vector.broadcast %cst_396 : f32 to vector<16x1xf32>
    %433 = arith.addf %432, %431 : vector<16x1xf32>
    %434 = vector.broadcast %415 : vector<1x128xf32> to vector<16x128xf32>
    %435 = arith.mulf %421, %434 : vector<16x128xf32>
    %cst_397 = arith.constant dense<0.000000e+00> : vector<16xf32>
    %436 = vector.multi_reduction <add>, %435, %cst_397 [1] : vector<16x128xf32> to vector<16xf32>
    %437 = vector.shape_cast %436 : vector<16xf32> to vector<16x1xf32>
    %438 = arith.addf %433, %437 : vector<16x1xf32>
    %439 = vector.broadcast %415 : vector<1x128xf32> to vector<16x128xf32>
    %440 = arith.mulf %424, %439 : vector<16x128xf32>
    %cst_398 = arith.constant dense<0.000000e+00> : vector<16xf32>
    %441 = vector.multi_reduction <add>, %440, %cst_398 [1] : vector<16x128xf32> to vector<16xf32>
    %442 = vector.shape_cast %441 : vector<16xf32> to vector<16x1xf32>
    %443 = arith.addf %438, %442 : vector<16x1xf32>
    %444 = vector.broadcast %415 : vector<1x128xf32> to vector<16x128xf32>
    %445 = arith.mulf %427, %444 : vector<16x128xf32>
    %cst_399 = arith.constant dense<0.000000e+00> : vector<16xf32>
    %446 = vector.multi_reduction <add>, %445, %cst_399 [1] : vector<16x128xf32> to vector<16xf32>
    %447 = vector.shape_cast %446 : vector<16xf32> to vector<16x1xf32>
    %448 = arith.addf %443, %447 : vector<16x1xf32>
    %cst_400 = arith.constant 1.562500e-02 : f32
    %449 = vector.broadcast %cst_400 : f32 to vector<16x1xf32>
    %450 = arith.mulf %448, %449 : vector<16x1xf32>
    %451 = vector.broadcast %450 : vector<16x1xf32> to vector<16x128xf32>
    %452 = arith.subf %418, %451 : vector<16x128xf32>
    %453 = vector.broadcast %415 : vector<1x128xf32> to vector<16x128xf32>
    %454 = arith.mulf %452, %453 : vector<16x128xf32>
    %455 = arith.mulf %454, %454 : vector<16x128xf32>
    %cst_401 = arith.constant dense<0.000000e+00> : vector<16xf32>
    %456 = vector.multi_reduction <add>, %455, %cst_401 [1] : vector<16x128xf32> to vector<16xf32>
    %457 = vector.shape_cast %456 : vector<16xf32> to vector<16x1xf32>
    %cst_402 = arith.constant 0.000000e+00 : f32
    %458 = vector.broadcast %cst_402 : f32 to vector<16x1xf32>
    %459 = arith.addf %458, %457 : vector<16x1xf32>
    %460 = vector.broadcast %450 : vector<16x1xf32> to vector<16x128xf32>
    %461 = arith.subf %421, %460 : vector<16x128xf32>
    %462 = vector.broadcast %415 : vector<1x128xf32> to vector<16x128xf32>
    %463 = arith.mulf %461, %462 : vector<16x128xf32>
    %464 = arith.mulf %463, %463 : vector<16x128xf32>
    %cst_403 = arith.constant dense<0.000000e+00> : vector<16xf32>
    %465 = vector.multi_reduction <add>, %464, %cst_403 [1] : vector<16x128xf32> to vector<16xf32>
    %466 = vector.shape_cast %465 : vector<16xf32> to vector<16x1xf32>
    %467 = arith.addf %459, %466 : vector<16x1xf32>
    %468 = vector.broadcast %450 : vector<16x1xf32> to vector<16x128xf32>
    %469 = arith.subf %424, %468 : vector<16x128xf32>
    %470 = vector.broadcast %415 : vector<1x128xf32> to vector<16x128xf32>
    %471 = arith.mulf %469, %470 : vector<16x128xf32>
    %472 = arith.mulf %471, %471 : vector<16x128xf32>
    %cst_404 = arith.constant dense<0.000000e+00> : vector<16xf32>
    %473 = vector.multi_reduction <add>, %472, %cst_404 [1] : vector<16x128xf32> to vector<16xf32>
    %474 = vector.shape_cast %473 : vector<16xf32> to vector<16x1xf32>
    %475 = arith.addf %467, %474 : vector<16x1xf32>
    %476 = vector.broadcast %450 : vector<16x1xf32> to vector<16x128xf32>
    %477 = arith.subf %427, %476 : vector<16x128xf32>
    %478 = vector.broadcast %415 : vector<1x128xf32> to vector<16x128xf32>
    %479 = arith.mulf %477, %478 : vector<16x128xf32>
    %480 = arith.mulf %479, %479 : vector<16x128xf32>
    %cst_405 = arith.constant dense<0.000000e+00> : vector<16xf32>
    %481 = vector.multi_reduction <add>, %480, %cst_405 [1] : vector<16x128xf32> to vector<16xf32>
    %482 = vector.shape_cast %481 : vector<16xf32> to vector<16x1xf32>
    %483 = arith.addf %475, %482 : vector<16x1xf32>
    %cst_406 = arith.constant 1.562500e-02 : f32
    %484 = vector.broadcast %cst_406 : f32 to vector<16x1xf32>
    %485 = arith.mulf %483, %484 : vector<16x1xf32>
    %cst_407 = arith.constant 9.99999974E-6 : f32
    %486 = vector.broadcast %cst_407 : f32 to vector<16x1xf32>
    %487 = arith.addf %485, %486 : vector<16x1xf32>
    %488 = math.rsqrt %487 : vector<16x1xf32>
    %489 = vector.broadcast %450 : vector<16x1xf32> to vector<16x128xf32>
    %490 = arith.subf %418, %489 : vector<16x128xf32>
    %491 = vector.broadcast %488 : vector<16x1xf32> to vector<16x128xf32>
    %492 = arith.mulf %490, %491 : vector<16x128xf32>
    %cst_408 = arith.constant 0.000000e+00 : f32
    %493 = vector.broadcast %cst_408 : f32 to vector<16x128xf32>
    %494 = arith.cmpf oge, %492, %493 : vector<16x128xf32>
    %cst_409 = arith.constant 2.000000e-01 : f32
    %495 = vector.broadcast %cst_409 : f32 to vector<16x128xf32>
    %496 = arith.mulf %495, %492 : vector<16x128xf32>
    %497 = arith.select %494, %492, %496 : vector<16x128xi1>, vector<16x128xf32>
    %498 = vector.broadcast %415 : vector<1x128xf32> to vector<16x128xf32>
    %499 = arith.mulf %497, %498 : vector<16x128xf32>
    %c0_410 = arith.constant 0 : index
    %c0_411 = arith.constant 0 : index
    %c0_412 = arith.constant 0 : index
    %500 = vector.load %arg12[%c0_410, %c0_411, %c0_412] : memref<4x128x128xf32, #tpu.memory_space<vmem>>, vector<1x128x128xf32>
    %501 = vector.shape_cast %500 : vector<1x128x128xf32> to vector<128x128xf32>
    %cst_413 = arith.constant dense<0.000000e+00> : vector<16x128xf32>
    %502 = tpu.matmul %499, %501, %cst_413 {dimension_numbers = #tpu.dot_dimension_numbers<[1], [0], [0], [1], [0, 0, 1, 1], [], []>} : vector<16x128xf32>, vector<128x128xf32>, vector<16x128xf32> -> vector<16x128xf32>
    %503 = vector.broadcast %450 : vector<16x1xf32> to vector<16x128xf32>
    %504 = arith.subf %421, %503 : vector<16x128xf32>
    %505 = vector.broadcast %488 : vector<16x1xf32> to vector<16x128xf32>
    %506 = arith.mulf %504, %505 : vector<16x128xf32>
    %cst_414 = arith.constant 0.000000e+00 : f32
    %507 = vector.broadcast %cst_414 : f32 to vector<16x128xf32>
    %508 = arith.cmpf oge, %506, %507 : vector<16x128xf32>
    %cst_415 = arith.constant 2.000000e-01 : f32
    %509 = vector.broadcast %cst_415 : f32 to vector<16x128xf32>
    %510 = arith.mulf %509, %506 : vector<16x128xf32>
    %511 = arith.select %508, %506, %510 : vector<16x128xi1>, vector<16x128xf32>
    %512 = vector.broadcast %415 : vector<1x128xf32> to vector<16x128xf32>
    %513 = arith.mulf %511, %512 : vector<16x128xf32>
    %c1_416 = arith.constant 1 : index
    %c0_417 = arith.constant 0 : index
    %c0_418 = arith.constant 0 : index
    %514 = vector.load %arg12[%c1_416, %c0_417, %c0_418] : memref<4x128x128xf32, #tpu.memory_space<vmem>>, vector<1x128x128xf32>
    %515 = vector.shape_cast %514 : vector<1x128x128xf32> to vector<128x128xf32>
    %cst_419 = arith.constant dense<0.000000e+00> : vector<16x128xf32>
    %516 = tpu.matmul %513, %515, %cst_419 {dimension_numbers = #tpu.dot_dimension_numbers<[1], [0], [0], [1], [0, 0, 1, 1], [], []>} : vector<16x128xf32>, vector<128x128xf32>, vector<16x128xf32> -> vector<16x128xf32>
    %517 = arith.addf %502, %516 : vector<16x128xf32>
    %518 = vector.broadcast %450 : vector<16x1xf32> to vector<16x128xf32>
    %519 = arith.subf %424, %518 : vector<16x128xf32>
    %520 = vector.broadcast %488 : vector<16x1xf32> to vector<16x128xf32>
    %521 = arith.mulf %519, %520 : vector<16x128xf32>
    %cst_420 = arith.constant 0.000000e+00 : f32
    %522 = vector.broadcast %cst_420 : f32 to vector<16x128xf32>
    %523 = arith.cmpf oge, %521, %522 : vector<16x128xf32>
    %cst_421 = arith.constant 2.000000e-01 : f32
    %524 = vector.broadcast %cst_421 : f32 to vector<16x128xf32>
    %525 = arith.mulf %524, %521 : vector<16x128xf32>
    %526 = arith.select %523, %521, %525 : vector<16x128xi1>, vector<16x128xf32>
    %527 = vector.broadcast %415 : vector<1x128xf32> to vector<16x128xf32>
    %528 = arith.mulf %526, %527 : vector<16x128xf32>
    %c2_422 = arith.constant 2 : index
    %c0_423 = arith.constant 0 : index
    %c0_424 = arith.constant 0 : index
    %529 = vector.load %arg12[%c2_422, %c0_423, %c0_424] : memref<4x128x128xf32, #tpu.memory_space<vmem>>, vector<1x128x128xf32>
    %530 = vector.shape_cast %529 : vector<1x128x128xf32> to vector<128x128xf32>
    %cst_425 = arith.constant dense<0.000000e+00> : vector<16x128xf32>
    %531 = tpu.matmul %528, %530, %cst_425 {dimension_numbers = #tpu.dot_dimension_numbers<[1], [0], [0], [1], [0, 0, 1, 1], [], []>} : vector<16x128xf32>, vector<128x128xf32>, vector<16x128xf32> -> vector<16x128xf32>
    %532 = arith.addf %517, %531 : vector<16x128xf32>
    %533 = vector.broadcast %450 : vector<16x1xf32> to vector<16x128xf32>
    %534 = arith.subf %427, %533 : vector<16x128xf32>
    %535 = vector.broadcast %488 : vector<16x1xf32> to vector<16x128xf32>
    %536 = arith.mulf %534, %535 : vector<16x128xf32>
    %cst_426 = arith.constant 0.000000e+00 : f32
    %537 = vector.broadcast %cst_426 : f32 to vector<16x128xf32>
    %538 = arith.cmpf oge, %536, %537 : vector<16x128xf32>
    %cst_427 = arith.constant 2.000000e-01 : f32
    %539 = vector.broadcast %cst_427 : f32 to vector<16x128xf32>
    %540 = arith.mulf %539, %536 : vector<16x128xf32>
    %541 = arith.select %538, %536, %540 : vector<16x128xi1>, vector<16x128xf32>
    %542 = vector.broadcast %415 : vector<1x128xf32> to vector<16x128xf32>
    %543 = arith.mulf %541, %542 : vector<16x128xf32>
    %c3_428 = arith.constant 3 : index
    %c0_429 = arith.constant 0 : index
    %c0_430 = arith.constant 0 : index
    %544 = vector.load %arg12[%c3_428, %c0_429, %c0_430] : memref<4x128x128xf32, #tpu.memory_space<vmem>>, vector<1x128x128xf32>
    %545 = vector.shape_cast %544 : vector<1x128x128xf32> to vector<128x128xf32>
    %cst_431 = arith.constant dense<0.000000e+00> : vector<16x128xf32>
    %546 = tpu.matmul %543, %545, %cst_431 {dimension_numbers = #tpu.dot_dimension_numbers<[1], [0], [0], [1], [0, 0, 1, 1], [], []>} : vector<16x128xf32>, vector<128x128xf32>, vector<16x128xf32> -> vector<16x128xf32>
    %547 = arith.addf %532, %546 : vector<16x128xf32>
    %cst_432 = arith.constant 0.000000e+00 : f32
    %548 = vector.broadcast %cst_432 : f32 to vector<32x384xf32>
    %c0_433 = arith.constant 0 : index
    %c0_434 = arith.constant 0 : index
    %549 = vector.load %arg31[%c0_433, %c0_434] : memref<32x640xf32, #tpu.memory_space<vmem>>, vector<32x384xf32>
    tpu.vector_store %arg31[%c0_433, %c0_434], %548 {strides = array<i32>} : memref<32x640xf32, #tpu.memory_space<vmem>>, vector<32x384xf32>,
    %c0_435 = arith.constant 0 : index
    %c128_436 = arith.constant 128 : index
    %550 = vector.load %arg31[%c0_435, %c128_436] : memref<32x640xf32, #tpu.memory_space<vmem>>, vector<16x128xf32>
    tpu.vector_store %arg31[%c0_435, %c128_436], %547 {strides = array<i32>} : memref<32x640xf32, #tpu.memory_space<vmem>>, vector<16x128xf32>,
    %c16_437 = arith.constant 16 : index
    %c128_438 = arith.constant 128 : index
    %551 = vector.load %arg31[%c16_437, %c128_438] : memref<32x640xf32, #tpu.memory_space<vmem>>, vector<16x128xf32>
    tpu.vector_store %arg31[%c16_437, %c128_438], %304 {strides = array<i32>} : memref<32x640xf32, #tpu.memory_space<vmem>>, vector<16x128xf32>,
    %c0_439 = arith.constant 0 : index
    %c111_440 = arith.constant 111 : index
    %552 = vector.load %arg31[%c0_439, %c111_440] : memref<32x640xf32, #tpu.memory_space<vmem>>, vector<32x128xf32>
    %c0_441 = arith.constant 0 : index
    %c0_442 = arith.constant 0 : index
    %553 = vector.load %arg32[%c0_441, %c0_442] : memref<288x384xf32, #tpu.memory_space<vmem>>, vector<32x128xf32>
    tpu.vector_store %arg32[%c0_441, %c0_442], %552 {strides = array<i32>} : memref<288x384xf32, #tpu.memory_space<vmem>>, vector<32x128xf32>,
    %c0_443 = arith.constant 0 : index
    %c112_444 = arith.constant 112 : index
    %554 = vector.load %arg31[%c0_443, %c112_444] : memref<32x640xf32, #tpu.memory_space<vmem>>, vector<32x128xf32>
    %c32_445 = arith.constant 32 : index
    %c0_446 = arith.constant 0 : index
    %555 = vector.load %arg32[%c32_445, %c0_446] : memref<288x384xf32, #tpu.memory_space<vmem>>, vector<32x128xf32>
    tpu.vector_store %arg32[%c32_445, %c0_446], %554 {strides = array<i32>} : memref<288x384xf32, #tpu.memory_space<vmem>>, vector<32x128xf32>,
    %c0_447 = arith.constant 0 : index
    %c113_448 = arith.constant 113 : index
    %556 = vector.load %arg31[%c0_447, %c113_448] : memref<32x640xf32, #tpu.memory_space<vmem>>, vector<32x128xf32>
    %c64_449 = arith.constant 64 : index
    %c0_450 = arith.constant 0 : index
    %557 = vector.load %arg32[%c64_449, %c0_450] : memref<288x384xf32, #tpu.memory_space<vmem>>, vector<32x128xf32>
    tpu.vector_store %arg32[%c64_449, %c0_450], %556 {strides = array<i32>} : memref<288x384xf32, #tpu.memory_space<vmem>>, vector<32x128xf32>,
    %c0_451 = arith.constant 0 : index
    %c127_452 = arith.constant 127 : index
    %558 = vector.load %arg31[%c0_451, %c127_452] : memref<32x640xf32, #tpu.memory_space<vmem>>, vector<32x128xf32>
    %c96_453 = arith.constant 96 : index
    %c0_454 = arith.constant 0 : index
    %559 = vector.load %arg32[%c96_453, %c0_454] : memref<288x384xf32, #tpu.memory_space<vmem>>, vector<32x128xf32>
    tpu.vector_store %arg32[%c96_453, %c0_454], %558 {strides = array<i32>} : memref<288x384xf32, #tpu.memory_space<vmem>>, vector<32x128xf32>,
    %c0_455 = arith.constant 0 : index
    %c128_456 = arith.constant 128 : index
    %560 = vector.load %arg31[%c0_455, %c128_456] : memref<32x640xf32, #tpu.memory_space<vmem>>, vector<32x128xf32>
    %c128_457 = arith.constant 128 : index
    %c0_458 = arith.constant 0 : index
    %561 = vector.load %arg32[%c128_457, %c0_458] : memref<288x384xf32, #tpu.memory_space<vmem>>, vector<32x128xf32>
    tpu.vector_store %arg32[%c128_457, %c0_458], %560 {strides = array<i32>} : memref<288x384xf32, #tpu.memory_space<vmem>>, vector<32x128xf32>,
    %c0_459 = arith.constant 0 : index
    %c129_460 = arith.constant 129 : index
    %562 = vector.load %arg31[%c0_459, %c129_460] : memref<32x640xf32, #tpu.memory_space<vmem>>, vector<32x128xf32>
    %c160_461 = arith.constant 160 : index
    %c0_462 = arith.constant 0 : index
    %563 = vector.load %arg32[%c160_461, %c0_462] : memref<288x384xf32, #tpu.memory_space<vmem>>, vector<32x128xf32>
    tpu.vector_store %arg32[%c160_461, %c0_462], %562 {strides = array<i32>} : memref<288x384xf32, #tpu.memory_space<vmem>>, vector<32x128xf32>,
    %c0_463 = arith.constant 0 : index
    %c143_464 = arith.constant 143 : index
    %564 = vector.load %arg31[%c0_463, %c143_464] : memref<32x640xf32, #tpu.memory_space<vmem>>, vector<32x128xf32>
    %c192_465 = arith.constant 192 : index
    %c0_466 = arith.constant 0 : index
    %565 = vector.load %arg32[%c192_465, %c0_466] : memref<288x384xf32, #tpu.memory_space<vmem>>, vector<32x128xf32>
    tpu.vector_store %arg32[%c192_465, %c0_466], %564 {strides = array<i32>} : memref<288x384xf32, #tpu.memory_space<vmem>>, vector<32x128xf32>,
    %c0_467 = arith.constant 0 : index
    %c144_468 = arith.constant 144 : index
    %566 = vector.load %arg31[%c0_467, %c144_468] : memref<32x640xf32, #tpu.memory_space<vmem>>, vector<32x128xf32>
    %c224_469 = arith.constant 224 : index
    %c0_470 = arith.constant 0 : index
    %567 = vector.load %arg32[%c224_469, %c0_470] : memref<288x384xf32, #tpu.memory_space<vmem>>, vector<32x128xf32>
    tpu.vector_store %arg32[%c224_469, %c0_470], %566 {strides = array<i32>} : memref<288x384xf32, #tpu.memory_space<vmem>>, vector<32x128xf32>,
    %c0_471 = arith.constant 0 : index
    %c145_472 = arith.constant 145 : index
    %568 = vector.load %arg31[%c0_471, %c145_472] : memref<32x640xf32, #tpu.memory_space<vmem>>, vector<32x128xf32>
    %c256_473 = arith.constant 256 : index
    %c0_474 = arith.constant 0 : index
    %569 = vector.load %arg32[%c256_473, %c0_474] : memref<288x384xf32, #tpu.memory_space<vmem>>, vector<32x128xf32>
    tpu.vector_store %arg32[%c256_473, %c0_474], %568 {strides = array<i32>} : memref<288x384xf32, #tpu.memory_space<vmem>>, vector<32x128xf32>,
    %c0_475 = arith.constant 0 : index
    %c0_476 = arith.constant 0 : index
    %570 = vector.load %arg23[%c0_475, %c0_476] : memref<16x288xf32, #tpu.memory_space<vmem>>, vector<16x288xf32>
    %c0_477 = arith.constant 0 : index
    %c0_478 = arith.constant 0 : index
    %571 = vector.load %arg32[%c0_477, %c0_478] : memref<288x384xf32, #tpu.memory_space<vmem>>, vector<288x128xf32>
    %cst_479 = arith.constant dense<0.000000e+00> : vector<16x128xf32>
    %572 = tpu.matmul %570, %571, %cst_479 {dimension_numbers = #tpu.dot_dimension_numbers<[1], [0], [0], [1], [0, 0, 1, 1], [], []>} : vector<16x288xf32>, vector<288x128xf32>, vector<16x128xf32> -> vector<16x128xf32>
    %c0_480 = arith.constant 0 : index
    %c0_481 = arith.constant 0 : index
    %573 = vector.load %arg3[%c0_480, %c0_481] : memref<1x128xf32, #tpu.memory_space<vmem>>, vector<1x128xf32>
    %574 = vector.broadcast %573 : vector<1x128xf32> to vector<16x128xf32>
    %575 = arith.mulf %572, %574 : vector<16x128xf32>
    %cst_482 = arith.constant dense<0.000000e+00> : vector<16xf32>
    %576 = vector.multi_reduction <add>, %575, %cst_482 [1] : vector<16x128xf32> to vector<16xf32>
    %577 = vector.shape_cast %576 : vector<16xf32> to vector<16x1xf32>
    %cst_483 = arith.constant 1.562500e-02 : f32
    %578 = vector.broadcast %cst_483 : f32 to vector<16x1xf32>
    %579 = arith.mulf %577, %578 : vector<16x1xf32>
    %580 = vector.broadcast %579 : vector<16x1xf32> to vector<16x128xf32>
    %581 = arith.subf %572, %580 : vector<16x128xf32>
    %582 = vector.broadcast %573 : vector<1x128xf32> to vector<16x128xf32>
    %583 = arith.mulf %581, %582 : vector<16x128xf32>
    %584 = arith.mulf %583, %583 : vector<16x128xf32>
    %cst_484 = arith.constant dense<0.000000e+00> : vector<16xf32>
    %585 = vector.multi_reduction <add>, %584, %cst_484 [1] : vector<16x128xf32> to vector<16xf32>
    %586 = vector.shape_cast %585 : vector<16xf32> to vector<16x1xf32>
    %cst_485 = arith.constant 1.562500e-02 : f32
    %587 = vector.broadcast %cst_485 : f32 to vector<16x1xf32>
    %588 = arith.mulf %586, %587 : vector<16x1xf32>
    %589 = vector.broadcast %579 : vector<16x1xf32> to vector<16x128xf32>
    %590 = arith.subf %572, %589 : vector<16x128xf32>
    %cst_486 = arith.constant 9.99999974E-6 : f32
    %591 = vector.broadcast %cst_486 : f32 to vector<16x1xf32>
    %592 = arith.addf %588, %591 : vector<16x1xf32>
    %593 = math.rsqrt %592 : vector<16x1xf32>
    %594 = vector.broadcast %593 : vector<16x1xf32> to vector<16x128xf32>
    %595 = arith.mulf %590, %594 : vector<16x128xf32>
    %cst_487 = arith.constant 0.000000e+00 : f32
    %596 = vector.broadcast %cst_487 : f32 to vector<16x128xf32>
    %597 = arith.cmpf oge, %595, %596 : vector<16x128xf32>
    %cst_488 = arith.constant 2.000000e-01 : f32
    %598 = vector.broadcast %cst_488 : f32 to vector<16x128xf32>
    %599 = arith.mulf %598, %595 : vector<16x128xf32>
    %600 = arith.select %597, %595, %599 : vector<16x128xi1>, vector<16x128xf32>
    %601 = vector.broadcast %573 : vector<1x128xf32> to vector<16x128xf32>
    %602 = arith.mulf %600, %601 : vector<16x128xf32>
    %cst_489 = arith.constant 0.000000e+00 : f32
    %603 = vector.broadcast %cst_489 : f32 to vector<16x384xf32>
    %c0_490 = arith.constant 0 : index
    %c0_491 = arith.constant 0 : index
    %604 = vector.load %arg31[%c0_490, %c0_491] : memref<32x640xf32, #tpu.memory_space<vmem>>, vector<16x384xf32>
    tpu.vector_store %arg31[%c0_490, %c0_491], %603 {strides = array<i32>} : memref<32x640xf32, #tpu.memory_space<vmem>>, vector<16x384xf32>,
    %c0_492 = arith.constant 0 : index
    %c128_493 = arith.constant 128 : index
    %605 = vector.load %arg31[%c0_492, %c128_493] : memref<32x640xf32, #tpu.memory_space<vmem>>, vector<16x128xf32>
    tpu.vector_store %arg31[%c0_492, %c128_493], %602 {strides = array<i32>} : memref<32x640xf32, #tpu.memory_space<vmem>>, vector<16x128xf32>,
    %c0_494 = arith.constant 0 : index
    %c111_495 = arith.constant 111 : index
    %606 = vector.load %arg31[%c0_494, %c111_495] : memref<32x640xf32, #tpu.memory_space<vmem>>, vector<16x128xf32>
    %c0_496 = arith.constant 0 : index
    %c0_497 = arith.constant 0 : index
    %607 = vector.load %arg32[%c0_496, %c0_497] : memref<288x384xf32, #tpu.memory_space<vmem>>, vector<16x128xf32>
    tpu.vector_store %arg32[%c0_496, %c0_497], %606 {strides = array<i32>} : memref<288x384xf32, #tpu.memory_space<vmem>>, vector<16x128xf32>,
    %c0_498 = arith.constant 0 : index
    %c112_499 = arith.constant 112 : index
    %608 = vector.load %arg31[%c0_498, %c112_499] : memref<32x640xf32, #tpu.memory_space<vmem>>, vector<16x128xf32>
    %c16_500 = arith.constant 16 : index
    %c0_501 = arith.constant 0 : index
    %609 = vector.load %arg32[%c16_500, %c0_501] : memref<288x384xf32, #tpu.memory_space<vmem>>, vector<16x128xf32>
    tpu.vector_store %arg32[%c16_500, %c0_501], %608 {strides = array<i32>} : memref<288x384xf32, #tpu.memory_space<vmem>>, vector<16x128xf32>,
    %c0_502 = arith.constant 0 : index
    %c113_503 = arith.constant 113 : index
    %610 = vector.load %arg31[%c0_502, %c113_503] : memref<32x640xf32, #tpu.memory_space<vmem>>, vector<16x128xf32>
    %c32_504 = arith.constant 32 : index
    %c0_505 = arith.constant 0 : index
    %611 = vector.load %arg32[%c32_504, %c0_505] : memref<288x384xf32, #tpu.memory_space<vmem>>, vector<16x128xf32>
    tpu.vector_store %arg32[%c32_504, %c0_505], %610 {strides = array<i32>} : memref<288x384xf32, #tpu.memory_space<vmem>>, vector<16x128xf32>,
    %c0_506 = arith.constant 0 : index
    %c127_507 = arith.constant 127 : index
    %612 = vector.load %arg31[%c0_506, %c127_507] : memref<32x640xf32, #tpu.memory_space<vmem>>, vector<16x128xf32>
    %c48_508 = arith.constant 48 : index
    %c0_509 = arith.constant 0 : index
    %613 = vector.load %arg32[%c48_508, %c0_509] : memref<288x384xf32, #tpu.memory_space<vmem>>, vector<16x128xf32>
    tpu.vector_store %arg32[%c48_508, %c0_509], %612 {strides = array<i32>} : memref<288x384xf32, #tpu.memory_space<vmem>>, vector<16x128xf32>,
    %c0_510 = arith.constant 0 : index
    %c128_511 = arith.constant 128 : index
    %614 = vector.load %arg31[%c0_510, %c128_511] : memref<32x640xf32, #tpu.memory_space<vmem>>, vector<16x128xf32>
    %c64_512 = arith.constant 64 : index
    %c0_513 = arith.constant 0 : index
    %615 = vector.load %arg32[%c64_512, %c0_513] : memref<288x384xf32, #tpu.memory_space<vmem>>, vector<16x128xf32>
    tpu.vector_store %arg32[%c64_512, %c0_513], %614 {strides = array<i32>} : memref<288x384xf32, #tpu.memory_space<vmem>>, vector<16x128xf32>,
    %c0_514 = arith.constant 0 : index
    %c129_515 = arith.constant 129 : index
    %616 = vector.load %arg31[%c0_514, %c129_515] : memref<32x640xf32, #tpu.memory_space<vmem>>, vector<16x128xf32>
    %c80_516 = arith.constant 80 : index
    %c0_517 = arith.constant 0 : index
    %617 = vector.load %arg32[%c80_516, %c0_517] : memref<288x384xf32, #tpu.memory_space<vmem>>, vector<16x128xf32>
    tpu.vector_store %arg32[%c80_516, %c0_517], %616 {strides = array<i32>} : memref<288x384xf32, #tpu.memory_space<vmem>>, vector<16x128xf32>,
    %c0_518 = arith.constant 0 : index
    %c143_519 = arith.constant 143 : index
    %618 = vector.load %arg31[%c0_518, %c143_519] : memref<32x640xf32, #tpu.memory_space<vmem>>, vector<16x128xf32>
    %c96_520 = arith.constant 96 : index
    %c0_521 = arith.constant 0 : index
    %619 = vector.load %arg32[%c96_520, %c0_521] : memref<288x384xf32, #tpu.memory_space<vmem>>, vector<16x128xf32>
    tpu.vector_store %arg32[%c96_520, %c0_521], %618 {strides = array<i32>} : memref<288x384xf32, #tpu.memory_space<vmem>>, vector<16x128xf32>,
    %c0_522 = arith.constant 0 : index
    %c144_523 = arith.constant 144 : index
    %620 = vector.load %arg31[%c0_522, %c144_523] : memref<32x640xf32, #tpu.memory_space<vmem>>, vector<16x128xf32>
    %c112_524 = arith.constant 112 : index
    %c0_525 = arith.constant 0 : index
    %621 = vector.load %arg32[%c112_524, %c0_525] : memref<288x384xf32, #tpu.memory_space<vmem>>, vector<16x128xf32>
    tpu.vector_store %arg32[%c112_524, %c0_525], %620 {strides = array<i32>} : memref<288x384xf32, #tpu.memory_space<vmem>>, vector<16x128xf32>,
    %c0_526 = arith.constant 0 : index
    %c145_527 = arith.constant 145 : index
    %622 = vector.load %arg31[%c0_526, %c145_527] : memref<32x640xf32, #tpu.memory_space<vmem>>, vector<16x128xf32>
    %c128_528 = arith.constant 128 : index
    %c0_529 = arith.constant 0 : index
    %623 = vector.load %arg32[%c128_528, %c0_529] : memref<288x384xf32, #tpu.memory_space<vmem>>, vector<16x128xf32>
    tpu.vector_store %arg32[%c128_528, %c0_529], %622 {strides = array<i32>} : memref<288x384xf32, #tpu.memory_space<vmem>>, vector<16x128xf32>,
    %c0_530 = arith.constant 0 : index
    %c0_531 = arith.constant 0 : index
    %624 = vector.load %arg24[%c0_530, %c0_531] : memref<16x144xf32, #tpu.memory_space<vmem>>, vector<16x144xf32>
    %c0_532 = arith.constant 0 : index
    %c0_533 = arith.constant 0 : index
    %625 = vector.load %arg32[%c0_532, %c0_533] : memref<288x384xf32, #tpu.memory_space<vmem>>, vector<144x128xf32>
    %cst_534 = arith.constant dense<0.000000e+00> : vector<16x128xf32>
    %626 = tpu.matmul %624, %625, %cst_534 {dimension_numbers = #tpu.dot_dimension_numbers<[1], [0], [0], [1], [0, 0, 1, 1], [], []>} : vector<16x144xf32>, vector<144x128xf32>, vector<16x128xf32> -> vector<16x128xf32>
    %c0_535 = arith.constant 0 : index
    %c0_536 = arith.constant 0 : index
    %627 = vector.load %arg3[%c0_535, %c0_536] : memref<1x128xf32, #tpu.memory_space<vmem>>, vector<1x128xf32>
    %628 = vector.broadcast %627 : vector<1x128xf32> to vector<16x128xf32>
    %629 = arith.mulf %626, %628 : vector<16x128xf32>
    %cst_537 = arith.constant dense<0.000000e+00> : vector<16xf32>
    %630 = vector.multi_reduction <add>, %629, %cst_537 [1] : vector<16x128xf32> to vector<16xf32>
    %631 = vector.shape_cast %630 : vector<16xf32> to vector<16x1xf32>
    %cst_538 = arith.constant 1.562500e-02 : f32
    %632 = vector.broadcast %cst_538 : f32 to vector<16x1xf32>
    %633 = arith.mulf %631, %632 : vector<16x1xf32>
    %634 = vector.broadcast %633 : vector<16x1xf32> to vector<16x128xf32>
    %635 = arith.subf %626, %634 : vector<16x128xf32>
    %636 = vector.broadcast %627 : vector<1x128xf32> to vector<16x128xf32>
    %637 = arith.mulf %635, %636 : vector<16x128xf32>
    %638 = arith.mulf %637, %637 : vector<16x128xf32>
    %cst_539 = arith.constant dense<0.000000e+00> : vector<16xf32>
    %639 = vector.multi_reduction <add>, %638, %cst_539 [1] : vector<16x128xf32> to vector<16xf32>
    %640 = vector.shape_cast %639 : vector<16xf32> to vector<16x1xf32>
    %cst_540 = arith.constant 1.562500e-02 : f32
    %641 = vector.broadcast %cst_540 : f32 to vector<16x1xf32>
    %642 = arith.mulf %640, %641 : vector<16x1xf32>
    %643 = vector.broadcast %633 : vector<16x1xf32> to vector<16x128xf32>
    %644 = arith.subf %626, %643 : vector<16x128xf32>
    %cst_541 = arith.constant 9.99999974E-6 : f32
    %645 = vector.broadcast %cst_541 : f32 to vector<16x1xf32>
    %646 = arith.addf %642, %645 : vector<16x1xf32>
    %647 = math.rsqrt %646 : vector<16x1xf32>
    %648 = vector.broadcast %647 : vector<16x1xf32> to vector<16x128xf32>
    %649 = arith.mulf %644, %648 : vector<16x128xf32>
    %cst_542 = arith.constant 0.000000e+00 : f32
    %650 = vector.broadcast %cst_542 : f32 to vector<16x128xf32>
    %651 = arith.cmpf oge, %649, %650 : vector<16x128xf32>
    %cst_543 = arith.constant 2.000000e-01 : f32
    %652 = vector.broadcast %cst_543 : f32 to vector<16x128xf32>
    %653 = arith.mulf %652, %649 : vector<16x128xf32>
    %654 = arith.select %651, %649, %653 : vector<16x128xi1>, vector<16x128xf32>
    %655 = vector.broadcast %627 : vector<1x128xf32> to vector<16x128xf32>
    %656 = arith.mulf %654, %655 : vector<16x128xf32>
    %c0_544 = arith.constant 0 : index
    %c0_545 = arith.constant 0 : index
    %657 = vector.load %arg3[%c0_544, %c0_545] : memref<1x128xf32, #tpu.memory_space<vmem>>, vector<1x128xf32>
    %c0_546 = arith.constant 0 : index
    %c0_547 = arith.constant 0 : index
    %c0_548 = arith.constant 0 : index
    %658 = vector.load %arg25[%c0_546, %c0_547, %c0_548] : memref<4x8x16xf32, #tpu.memory_space<vmem>>, vector<1x8x16xf32>
    %659 = vector.shape_cast %658 : vector<1x8x16xf32> to vector<8x16xf32>
    %cst_549 = arith.constant dense<0.000000e+00> : vector<8x128xf32>
    %660 = tpu.matmul %659, %656, %cst_549 {dimension_numbers = #tpu.dot_dimension_numbers<[1], [0], [0], [1], [0, 0, 1, 1], [], []>} : vector<8x16xf32>, vector<16x128xf32>, vector<8x128xf32> -> vector<8x128xf32>
    %c1_550 = arith.constant 1 : index
    %c0_551 = arith.constant 0 : index
    %c0_552 = arith.constant 0 : index
    %661 = vector.load %arg25[%c1_550, %c0_551, %c0_552] : memref<4x8x16xf32, #tpu.memory_space<vmem>>, vector<1x8x16xf32>
    %662 = vector.shape_cast %661 : vector<1x8x16xf32> to vector<8x16xf32>
    %cst_553 = arith.constant dense<0.000000e+00> : vector<8x128xf32>
    %663 = tpu.matmul %662, %656, %cst_553 {dimension_numbers = #tpu.dot_dimension_numbers<[1], [0], [0], [1], [0, 0, 1, 1], [], []>} : vector<8x16xf32>, vector<16x128xf32>, vector<8x128xf32> -> vector<8x128xf32>
    %c2_554 = arith.constant 2 : index
    %c0_555 = arith.constant 0 : index
    %c0_556 = arith.constant 0 : index
    %664 = vector.load %arg25[%c2_554, %c0_555, %c0_556] : memref<4x8x16xf32, #tpu.memory_space<vmem>>, vector<1x8x16xf32>
    %665 = vector.shape_cast %664 : vector<1x8x16xf32> to vector<8x16xf32>
    %cst_557 = arith.constant dense<0.000000e+00> : vector<8x128xf32>
    %666 = tpu.matmul %665, %656, %cst_557 {dimension_numbers = #tpu.dot_dimension_numbers<[1], [0], [0], [1], [0, 0, 1, 1], [], []>} : vector<8x16xf32>, vector<16x128xf32>, vector<8x128xf32> -> vector<8x128xf32>
    %c3_558 = arith.constant 3 : index
    %c0_559 = arith.constant 0 : index
    %c0_560 = arith.constant 0 : index
    %667 = vector.load %arg25[%c3_558, %c0_559, %c0_560] : memref<4x8x16xf32, #tpu.memory_space<vmem>>, vector<1x8x16xf32>
    %668 = vector.shape_cast %667 : vector<1x8x16xf32> to vector<8x16xf32>
    %cst_561 = arith.constant dense<0.000000e+00> : vector<8x128xf32>
    %669 = tpu.matmul %668, %656, %cst_561 {dimension_numbers = #tpu.dot_dimension_numbers<[1], [0], [0], [1], [0, 0, 1, 1], [], []>} : vector<8x16xf32>, vector<16x128xf32>, vector<8x128xf32> -> vector<8x128xf32>
    %670 = vector.broadcast %657 : vector<1x128xf32> to vector<8x128xf32>
    %671 = arith.mulf %660, %670 : vector<8x128xf32>
    %cst_562 = arith.constant dense<0.000000e+00> : vector<8xf32>
    %672 = vector.multi_reduction <add>, %671, %cst_562 [1] : vector<8x128xf32> to vector<8xf32>
    %673 = vector.shape_cast %672 : vector<8xf32> to vector<8x1xf32>
    %cst_563 = arith.constant 0.000000e+00 : f32
    %674 = vector.broadcast %cst_563 : f32 to vector<8x1xf32>
    %675 = arith.addf %674, %673 : vector<8x1xf32>
    %676 = vector.broadcast %657 : vector<1x128xf32> to vector<8x128xf32>
    %677 = arith.mulf %663, %676 : vector<8x128xf32>
    %cst_564 = arith.constant dense<0.000000e+00> : vector<8xf32>
    %678 = vector.multi_reduction <add>, %677, %cst_564 [1] : vector<8x128xf32> to vector<8xf32>
    %679 = vector.shape_cast %678 : vector<8xf32> to vector<8x1xf32>
    %680 = arith.addf %675, %679 : vector<8x1xf32>
    %681 = vector.broadcast %657 : vector<1x128xf32> to vector<8x128xf32>
    %682 = arith.mulf %666, %681 : vector<8x128xf32>
    %cst_565 = arith.constant dense<0.000000e+00> : vector<8xf32>
    %683 = vector.multi_reduction <add>, %682, %cst_565 [1] : vector<8x128xf32> to vector<8xf32>
    %684 = vector.shape_cast %683 : vector<8xf32> to vector<8x1xf32>
    %685 = arith.addf %680, %684 : vector<8x1xf32>
    %686 = vector.broadcast %657 : vector<1x128xf32> to vector<8x128xf32>
    %687 = arith.mulf %669, %686 : vector<8x128xf32>
    %cst_566 = arith.constant dense<0.000000e+00> : vector<8xf32>
    %688 = vector.multi_reduction <add>, %687, %cst_566 [1] : vector<8x128xf32> to vector<8xf32>
    %689 = vector.shape_cast %688 : vector<8xf32> to vector<8x1xf32>
    %690 = arith.addf %685, %689 : vector<8x1xf32>
    %cst_567 = arith.constant 3.906250e-03 : f32
    %691 = vector.broadcast %cst_567 : f32 to vector<8x1xf32>
    %692 = arith.mulf %690, %691 : vector<8x1xf32>
    %693 = vector.broadcast %692 : vector<8x1xf32> to vector<8x128xf32>
    %694 = arith.subf %660, %693 : vector<8x128xf32>
    %695 = vector.broadcast %657 : vector<1x128xf32> to vector<8x128xf32>
    %696 = arith.mulf %694, %695 : vector<8x128xf32>
    %697 = arith.mulf %696, %696 : vector<8x128xf32>
    %cst_568 = arith.constant dense<0.000000e+00> : vector<8xf32>
    %698 = vector.multi_reduction <add>, %697, %cst_568 [1] : vector<8x128xf32> to vector<8xf32>
    %699 = vector.shape_cast %698 : vector<8xf32> to vector<8x1xf32>
    %cst_569 = arith.constant 0.000000e+00 : f32
    %700 = vector.broadcast %cst_569 : f32 to vector<8x1xf32>
    %701 = arith.addf %700, %699 : vector<8x1xf32>
    %702 = vector.broadcast %692 : vector<8x1xf32> to vector<8x128xf32>
    %703 = arith.subf %663, %702 : vector<8x128xf32>
    %704 = vector.broadcast %657 : vector<1x128xf32> to vector<8x128xf32>
    %705 = arith.mulf %703, %704 : vector<8x128xf32>
    %706 = arith.mulf %705, %705 : vector<8x128xf32>
    %cst_570 = arith.constant dense<0.000000e+00> : vector<8xf32>
    %707 = vector.multi_reduction <add>, %706, %cst_570 [1] : vector<8x128xf32> to vector<8xf32>
    %708 = vector.shape_cast %707 : vector<8xf32> to vector<8x1xf32>
    %709 = arith.addf %701, %708 : vector<8x1xf32>
    %710 = vector.broadcast %692 : vector<8x1xf32> to vector<8x128xf32>
    %711 = arith.subf %666, %710 : vector<8x128xf32>
    %712 = vector.broadcast %657 : vector<1x128xf32> to vector<8x128xf32>
    %713 = arith.mulf %711, %712 : vector<8x128xf32>
    %714 = arith.mulf %713, %713 : vector<8x128xf32>
    %cst_571 = arith.constant dense<0.000000e+00> : vector<8xf32>
    %715 = vector.multi_reduction <add>, %714, %cst_571 [1] : vector<8x128xf32> to vector<8xf32>
    %716 = vector.shape_cast %715 : vector<8xf32> to vector<8x1xf32>
    %717 = arith.addf %709, %716 : vector<8x1xf32>
    %718 = vector.broadcast %692 : vector<8x1xf32> to vector<8x128xf32>
    %719 = arith.subf %669, %718 : vector<8x128xf32>
    %720 = vector.broadcast %657 : vector<1x128xf32> to vector<8x128xf32>
    %721 = arith.mulf %719, %720 : vector<8x128xf32>
    %722 = arith.mulf %721, %721 : vector<8x128xf32>
    %cst_572 = arith.constant dense<0.000000e+00> : vector<8xf32>
    %723 = vector.multi_reduction <add>, %722, %cst_572 [1] : vector<8x128xf32> to vector<8xf32>
    %724 = vector.shape_cast %723 : vector<8xf32> to vector<8x1xf32>
    %725 = arith.addf %717, %724 : vector<8x1xf32>
    %cst_573 = arith.constant 3.906250e-03 : f32
    %726 = vector.broadcast %cst_573 : f32 to vector<8x1xf32>
    %727 = arith.mulf %725, %726 : vector<8x1xf32>
    %cst_574 = arith.constant 9.99999974E-6 : f32
    %728 = vector.broadcast %cst_574 : f32 to vector<8x1xf32>
    %729 = arith.addf %727, %728 : vector<8x1xf32>
    %730 = math.rsqrt %729 : vector<8x1xf32>
    %731 = vector.broadcast %692 : vector<8x1xf32> to vector<8x128xf32>
    %732 = arith.subf %660, %731 : vector<8x128xf32>
    %733 = vector.broadcast %730 : vector<8x1xf32> to vector<8x128xf32>
    %734 = arith.mulf %732, %733 : vector<8x128xf32>
    %cst_575 = arith.constant 0.000000e+00 : f32
    %735 = vector.broadcast %cst_575 : f32 to vector<8x128xf32>
    %736 = arith.cmpf oge, %734, %735 : vector<8x128xf32>
    %cst_576 = arith.constant 2.000000e-01 : f32
    %737 = vector.broadcast %cst_576 : f32 to vector<8x128xf32>
    %738 = arith.mulf %737, %734 : vector<8x128xf32>
    %739 = arith.select %736, %734, %738 : vector<8x128xi1>, vector<8x128xf32>
    %740 = vector.broadcast %657 : vector<1x128xf32> to vector<8x128xf32>
    %741 = arith.mulf %739, %740 : vector<8x128xf32>
    %c0_577 = arith.constant 0 : index
    %c0_578 = arith.constant 0 : index
    %c0_579 = arith.constant 0 : index
    %742 = vector.load %arg13[%c0_577, %c0_578, %c0_579] : memref<4x128x384xf32, #tpu.memory_space<vmem>>, vector<1x128x384xf32>
    %743 = vector.shape_cast %742 : vector<1x128x384xf32> to vector<128x384xf32>
    %cst_580 = arith.constant dense<0.000000e+00> : vector<8x384xf32>
    %744 = tpu.matmul %741, %743, %cst_580 {dimension_numbers = #tpu.dot_dimension_numbers<[1], [0], [0], [1], [0, 0, 1, 1], [], []>} : vector<8x128xf32>, vector<128x384xf32>, vector<8x384xf32> -> vector<8x384xf32>
    %745 = vector.broadcast %692 : vector<8x1xf32> to vector<8x128xf32>
    %746 = arith.subf %663, %745 : vector<8x128xf32>
    %747 = vector.broadcast %730 : vector<8x1xf32> to vector<8x128xf32>
    %748 = arith.mulf %746, %747 : vector<8x128xf32>
    %cst_581 = arith.constant 0.000000e+00 : f32
    %749 = vector.broadcast %cst_581 : f32 to vector<8x128xf32>
    %750 = arith.cmpf oge, %748, %749 : vector<8x128xf32>
    %cst_582 = arith.constant 2.000000e-01 : f32
    %751 = vector.broadcast %cst_582 : f32 to vector<8x128xf32>
    %752 = arith.mulf %751, %748 : vector<8x128xf32>
    %753 = arith.select %750, %748, %752 : vector<8x128xi1>, vector<8x128xf32>
    %754 = vector.broadcast %657 : vector<1x128xf32> to vector<8x128xf32>
    %755 = arith.mulf %753, %754 : vector<8x128xf32>
    %c1_583 = arith.constant 1 : index
    %c0_584 = arith.constant 0 : index
    %c0_585 = arith.constant 0 : index
    %756 = vector.load %arg13[%c1_583, %c0_584, %c0_585] : memref<4x128x384xf32, #tpu.memory_space<vmem>>, vector<1x128x384xf32>
    %757 = vector.shape_cast %756 : vector<1x128x384xf32> to vector<128x384xf32>
    %cst_586 = arith.constant dense<0.000000e+00> : vector<8x384xf32>
    %758 = tpu.matmul %755, %757, %cst_586 {dimension_numbers = #tpu.dot_dimension_numbers<[1], [0], [0], [1], [0, 0, 1, 1], [], []>} : vector<8x128xf32>, vector<128x384xf32>, vector<8x384xf32> -> vector<8x384xf32>
    %759 = arith.addf %744, %758 : vector<8x384xf32>
    %760 = vector.broadcast %692 : vector<8x1xf32> to vector<8x128xf32>
    %761 = arith.subf %666, %760 : vector<8x128xf32>
    %762 = vector.broadcast %730 : vector<8x1xf32> to vector<8x128xf32>
    %763 = arith.mulf %761, %762 : vector<8x128xf32>
    %cst_587 = arith.constant 0.000000e+00 : f32
    %764 = vector.broadcast %cst_587 : f32 to vector<8x128xf32>
    %765 = arith.cmpf oge, %763, %764 : vector<8x128xf32>
    %cst_588 = arith.constant 2.000000e-01 : f32
    %766 = vector.broadcast %cst_588 : f32 to vector<8x128xf32>
    %767 = arith.mulf %766, %763 : vector<8x128xf32>
    %768 = arith.select %765, %763, %767 : vector<8x128xi1>, vector<8x128xf32>
    %769 = vector.broadcast %657 : vector<1x128xf32> to vector<8x128xf32>
    %770 = arith.mulf %768, %769 : vector<8x128xf32>
    %c2_589 = arith.constant 2 : index
    %c0_590 = arith.constant 0 : index
    %c0_591 = arith.constant 0 : index
    %771 = vector.load %arg13[%c2_589, %c0_590, %c0_591] : memref<4x128x384xf32, #tpu.memory_space<vmem>>, vector<1x128x384xf32>
    %772 = vector.shape_cast %771 : vector<1x128x384xf32> to vector<128x384xf32>
    %cst_592 = arith.constant dense<0.000000e+00> : vector<8x384xf32>
    %773 = tpu.matmul %770, %772, %cst_592 {dimension_numbers = #tpu.dot_dimension_numbers<[1], [0], [0], [1], [0, 0, 1, 1], [], []>} : vector<8x128xf32>, vector<128x384xf32>, vector<8x384xf32> -> vector<8x384xf32>
    %774 = arith.addf %759, %773 : vector<8x384xf32>
    %775 = vector.broadcast %692 : vector<8x1xf32> to vector<8x128xf32>
    %776 = arith.subf %669, %775 : vector<8x128xf32>
    %777 = vector.broadcast %730 : vector<8x1xf32> to vector<8x128xf32>
    %778 = arith.mulf %776, %777 : vector<8x128xf32>
    %cst_593 = arith.constant 0.000000e+00 : f32
    %779 = vector.broadcast %cst_593 : f32 to vector<8x128xf32>
    %780 = arith.cmpf oge, %778, %779 : vector<8x128xf32>
    %cst_594 = arith.constant 2.000000e-01 : f32
    %781 = vector.broadcast %cst_594 : f32 to vector<8x128xf32>
    %782 = arith.mulf %781, %778 : vector<8x128xf32>
    %783 = arith.select %780, %778, %782 : vector<8x128xi1>, vector<8x128xf32>
    %784 = vector.broadcast %657 : vector<1x128xf32> to vector<8x128xf32>
    %785 = arith.mulf %783, %784 : vector<8x128xf32>
    %c3_595 = arith.constant 3 : index
    %c0_596 = arith.constant 0 : index
    %c0_597 = arith.constant 0 : index
    %786 = vector.load %arg13[%c3_595, %c0_596, %c0_597] : memref<4x128x384xf32, #tpu.memory_space<vmem>>, vector<1x128x384xf32>
    %787 = vector.shape_cast %786 : vector<1x128x384xf32> to vector<128x384xf32>
    %cst_598 = arith.constant dense<0.000000e+00> : vector<8x384xf32>
    %788 = tpu.matmul %785, %787, %cst_598 {dimension_numbers = #tpu.dot_dimension_numbers<[1], [0], [0], [1], [0, 0, 1, 1], [], []>} : vector<8x128xf32>, vector<128x384xf32>, vector<8x384xf32> -> vector<8x384xf32>
    %789 = arith.addf %774, %788 : vector<8x384xf32>
    %cst_599 = arith.constant 0.000000e+00 : f32
    %790 = vector.broadcast %cst_599 : f32 to vector<16x640xf32>
    %c0_600 = arith.constant 0 : index
    %c0_601 = arith.constant 0 : index
    %791 = vector.load %arg31[%c0_600, %c0_601] : memref<32x640xf32, #tpu.memory_space<vmem>>, vector<16x640xf32>
    tpu.vector_store %arg31[%c0_600, %c0_601], %790 {strides = array<i32>} : memref<32x640xf32, #tpu.memory_space<vmem>>, vector<16x640xf32>,
    %c0_602 = arith.constant 0 : index
    %c128_603 = arith.constant 128 : index
    %792 = vector.load %arg31[%c0_602, %c128_603] : memref<32x640xf32, #tpu.memory_space<vmem>>, vector<8x384xf32>
    tpu.vector_store %arg31[%c0_602, %c128_603], %789 {strides = array<i32>} : memref<32x640xf32, #tpu.memory_space<vmem>>, vector<8x384xf32>,
    %c8_604 = arith.constant 8 : index
    %c128_605 = arith.constant 128 : index
    %793 = vector.load %arg31[%c8_604, %c128_605] : memref<32x640xf32, #tpu.memory_space<vmem>>, vector<8x384xf32>
    tpu.vector_store %arg31[%c8_604, %c128_605], %194 {strides = array<i32>} : memref<32x640xf32, #tpu.memory_space<vmem>>, vector<8x384xf32>,
    %c0_606 = arith.constant 0 : index
    %c103_607 = arith.constant 103 : index
    %794 = vector.load %arg31[%c0_606, %c103_607] : memref<32x640xf32, #tpu.memory_space<vmem>>, vector<16x384xf32>
    %c0_608 = arith.constant 0 : index
    %c0_609 = arith.constant 0 : index
    %795 = vector.load %arg32[%c0_608, %c0_609] : memref<288x384xf32, #tpu.memory_space<vmem>>, vector<16x384xf32>
    tpu.vector_store %arg32[%c0_608, %c0_609], %794 {strides = array<i32>} : memref<288x384xf32, #tpu.memory_space<vmem>>, vector<16x384xf32>,
    %c0_610 = arith.constant 0 : index
    %c104_611 = arith.constant 104 : index
    %796 = vector.load %arg31[%c0_610, %c104_611] : memref<32x640xf32, #tpu.memory_space<vmem>>, vector<16x384xf32>
    %c16_612 = arith.constant 16 : index
    %c0_613 = arith.constant 0 : index
    %797 = vector.load %arg32[%c16_612, %c0_613] : memref<288x384xf32, #tpu.memory_space<vmem>>, vector<16x384xf32>
    tpu.vector_store %arg32[%c16_612, %c0_613], %796 {strides = array<i32>} : memref<288x384xf32, #tpu.memory_space<vmem>>, vector<16x384xf32>,
    %c0_614 = arith.constant 0 : index
    %c105_615 = arith.constant 105 : index
    %798 = vector.load %arg31[%c0_614, %c105_615] : memref<32x640xf32, #tpu.memory_space<vmem>>, vector<16x384xf32>
    %c32_616 = arith.constant 32 : index
    %c0_617 = arith.constant 0 : index
    %799 = vector.load %arg32[%c32_616, %c0_617] : memref<288x384xf32, #tpu.memory_space<vmem>>, vector<16x384xf32>
    tpu.vector_store %arg32[%c32_616, %c0_617], %798 {strides = array<i32>} : memref<288x384xf32, #tpu.memory_space<vmem>>, vector<16x384xf32>,
    %c0_618 = arith.constant 0 : index
    %c127_619 = arith.constant 127 : index
    %800 = vector.load %arg31[%c0_618, %c127_619] : memref<32x640xf32, #tpu.memory_space<vmem>>, vector<16x384xf32>
    %c48_620 = arith.constant 48 : index
    %c0_621 = arith.constant 0 : index
    %801 = vector.load %arg32[%c48_620, %c0_621] : memref<288x384xf32, #tpu.memory_space<vmem>>, vector<16x384xf32>
    tpu.vector_store %arg32[%c48_620, %c0_621], %800 {strides = array<i32>} : memref<288x384xf32, #tpu.memory_space<vmem>>, vector<16x384xf32>,
    %c0_622 = arith.constant 0 : index
    %c128_623 = arith.constant 128 : index
    %802 = vector.load %arg31[%c0_622, %c128_623] : memref<32x640xf32, #tpu.memory_space<vmem>>, vector<16x384xf32>
    %c64_624 = arith.constant 64 : index
    %c0_625 = arith.constant 0 : index
    %803 = vector.load %arg32[%c64_624, %c0_625] : memref<288x384xf32, #tpu.memory_space<vmem>>, vector<16x384xf32>
    tpu.vector_store %arg32[%c64_624, %c0_625], %802 {strides = array<i32>} : memref<288x384xf32, #tpu.memory_space<vmem>>, vector<16x384xf32>,
    %c0_626 = arith.constant 0 : index
    %c129_627 = arith.constant 129 : index
    %804 = vector.load %arg31[%c0_626, %c129_627] : memref<32x640xf32, #tpu.memory_space<vmem>>, vector<16x384xf32>
    %c80_628 = arith.constant 80 : index
    %c0_629 = arith.constant 0 : index
    %805 = vector.load %arg32[%c80_628, %c0_629] : memref<288x384xf32, #tpu.memory_space<vmem>>, vector<16x384xf32>
    tpu.vector_store %arg32[%c80_628, %c0_629], %804 {strides = array<i32>} : memref<288x384xf32, #tpu.memory_space<vmem>>, vector<16x384xf32>,
    %c0_630 = arith.constant 0 : index
    %c151_631 = arith.constant 151 : index
    %806 = vector.load %arg31[%c0_630, %c151_631] : memref<32x640xf32, #tpu.memory_space<vmem>>, vector<16x384xf32>
    %c96_632 = arith.constant 96 : index
    %c0_633 = arith.constant 0 : index
    %807 = vector.load %arg32[%c96_632, %c0_633] : memref<288x384xf32, #tpu.memory_space<vmem>>, vector<16x384xf32>
    tpu.vector_store %arg32[%c96_632, %c0_633], %806 {strides = array<i32>} : memref<288x384xf32, #tpu.memory_space<vmem>>, vector<16x384xf32>,
    %c0_634 = arith.constant 0 : index
    %c152_635 = arith.constant 152 : index
    %808 = vector.load %arg31[%c0_634, %c152_635] : memref<32x640xf32, #tpu.memory_space<vmem>>, vector<16x384xf32>
    %c112_636 = arith.constant 112 : index
    %c0_637 = arith.constant 0 : index
    %809 = vector.load %arg32[%c112_636, %c0_637] : memref<288x384xf32, #tpu.memory_space<vmem>>, vector<16x384xf32>
    tpu.vector_store %arg32[%c112_636, %c0_637], %808 {strides = array<i32>} : memref<288x384xf32, #tpu.memory_space<vmem>>, vector<16x384xf32>,
    %c0_638 = arith.constant 0 : index
    %c153_639 = arith.constant 153 : index
    %810 = vector.load %arg31[%c0_638, %c153_639] : memref<32x640xf32, #tpu.memory_space<vmem>>, vector<16x384xf32>
    %c128_640 = arith.constant 128 : index
    %c0_641 = arith.constant 0 : index
    %811 = vector.load %arg32[%c128_640, %c0_641] : memref<288x384xf32, #tpu.memory_space<vmem>>, vector<16x384xf32>
    tpu.vector_store %arg32[%c128_640, %c0_641], %810 {strides = array<i32>} : memref<288x384xf32, #tpu.memory_space<vmem>>, vector<16x384xf32>,
    %c0_642 = arith.constant 0 : index
    %c0_643 = arith.constant 0 : index
    %812 = vector.load %arg26[%c0_642, %c0_643] : memref<8x144xf32, #tpu.memory_space<vmem>>, vector<8x144xf32>
    %c0_644 = arith.constant 0 : index
    %c0_645 = arith.constant 0 : index
    %813 = vector.load %arg32[%c0_644, %c0_645] : memref<288x384xf32, #tpu.memory_space<vmem>>, vector<144x384xf32>
    %cst_646 = arith.constant dense<0.000000e+00> : vector<8x384xf32>
    %814 = tpu.matmul %812, %813, %cst_646 {dimension_numbers = #tpu.dot_dimension_numbers<[1], [0], [0], [1], [0, 0, 1, 1], [], []>} : vector<8x144xf32>, vector<144x384xf32>, vector<8x384xf32> -> vector<8x384xf32>
    %c0_647 = arith.constant 0 : index
    %c0_648 = arith.constant 0 : index
    %815 = vector.load %arg2[%c0_647, %c0_648] : memref<1x384xf32, #tpu.memory_space<vmem>>, vector<1x384xf32>
    %816 = vector.broadcast %815 : vector<1x384xf32> to vector<8x384xf32>
    %817 = arith.mulf %814, %816 : vector<8x384xf32>
    %cst_649 = arith.constant dense<0.000000e+00> : vector<8xf32>
    %818 = vector.multi_reduction <add>, %817, %cst_649 [1] : vector<8x384xf32> to vector<8xf32>
    %819 = vector.shape_cast %818 : vector<8xf32> to vector<8x1xf32>
    %cst_650 = arith.constant 3.906250e-03 : f32
    %820 = vector.broadcast %cst_650 : f32 to vector<8x1xf32>
    %821 = arith.mulf %819, %820 : vector<8x1xf32>
    %822 = vector.broadcast %821 : vector<8x1xf32> to vector<8x384xf32>
    %823 = arith.subf %814, %822 : vector<8x384xf32>
    %824 = vector.broadcast %815 : vector<1x384xf32> to vector<8x384xf32>
    %825 = arith.mulf %823, %824 : vector<8x384xf32>
    %826 = arith.mulf %825, %825 : vector<8x384xf32>
    %cst_651 = arith.constant dense<0.000000e+00> : vector<8xf32>
    %827 = vector.multi_reduction <add>, %826, %cst_651 [1] : vector<8x384xf32> to vector<8xf32>
    %828 = vector.shape_cast %827 : vector<8xf32> to vector<8x1xf32>
    %cst_652 = arith.constant 3.906250e-03 : f32
    %829 = vector.broadcast %cst_652 : f32 to vector<8x1xf32>
    %830 = arith.mulf %828, %829 : vector<8x1xf32>
    %831 = vector.broadcast %821 : vector<8x1xf32> to vector<8x384xf32>
    %832 = arith.subf %814, %831 : vector<8x384xf32>
    %cst_653 = arith.constant 9.99999974E-6 : f32
    %833 = vector.broadcast %cst_653 : f32 to vector<8x1xf32>
    %834 = arith.addf %830, %833 : vector<8x1xf32>
    %835 = math.rsqrt %834 : vector<8x1xf32>
    %836 = vector.broadcast %835 : vector<8x1xf32> to vector<8x384xf32>
    %837 = arith.mulf %832, %836 : vector<8x384xf32>
    %cst_654 = arith.constant 0.000000e+00 : f32
    %838 = vector.broadcast %cst_654 : f32 to vector<8x384xf32>
    %839 = arith.cmpf oge, %837, %838 : vector<8x384xf32>
    %cst_655 = arith.constant 2.000000e-01 : f32
    %840 = vector.broadcast %cst_655 : f32 to vector<8x384xf32>
    %841 = arith.mulf %840, %837 : vector<8x384xf32>
    %842 = arith.select %839, %837, %841 : vector<8x384xi1>, vector<8x384xf32>
    %843 = vector.broadcast %815 : vector<1x384xf32> to vector<8x384xf32>
    %844 = arith.mulf %842, %843 : vector<8x384xf32>
    %cst_656 = arith.constant 0.000000e+00 : f32
    %845 = vector.broadcast %cst_656 : f32 to vector<8x640xf32>
    %c0_657 = arith.constant 0 : index
    %c0_658 = arith.constant 0 : index
    %846 = vector.load %arg31[%c0_657, %c0_658] : memref<32x640xf32, #tpu.memory_space<vmem>>, vector<8x640xf32>
    tpu.vector_store %arg31[%c0_657, %c0_658], %845 {strides = array<i32>} : memref<32x640xf32, #tpu.memory_space<vmem>>, vector<8x640xf32>,
    %c0_659 = arith.constant 0 : index
    %c128_660 = arith.constant 128 : index
    %847 = vector.load %arg31[%c0_659, %c128_660] : memref<32x640xf32, #tpu.memory_space<vmem>>, vector<8x384xf32>
    tpu.vector_store %arg31[%c0_659, %c128_660], %844 {strides = array<i32>} : memref<32x640xf32, #tpu.memory_space<vmem>>, vector<8x384xf32>,
    %c0_661 = arith.constant 0 : index
    %c103_662 = arith.constant 103 : index
    %848 = vector.load %arg31[%c0_661, %c103_662] : memref<32x640xf32, #tpu.memory_space<vmem>>, vector<8x384xf32>
    %c0_663 = arith.constant 0 : index
    %c0_664 = arith.constant 0 : index
    %849 = vector.load %arg32[%c0_663, %c0_664] : memref<288x384xf32, #tpu.memory_space<vmem>>, vector<8x384xf32>
    tpu.vector_store %arg32[%c0_663, %c0_664], %848 {strides = array<i32>} : memref<288x384xf32, #tpu.memory_space<vmem>>, vector<8x384xf32>,
    %c0_665 = arith.constant 0 : index
    %c104_666 = arith.constant 104 : index
    %850 = vector.load %arg31[%c0_665, %c104_666] : memref<32x640xf32, #tpu.memory_space<vmem>>, vector<8x384xf32>
    %c8_667 = arith.constant 8 : index
    %c0_668 = arith.constant 0 : index
    %851 = vector.load %arg32[%c8_667, %c0_668] : memref<288x384xf32, #tpu.memory_space<vmem>>, vector<8x384xf32>
    tpu.vector_store %arg32[%c8_667, %c0_668], %850 {strides = array<i32>} : memref<288x384xf32, #tpu.memory_space<vmem>>, vector<8x384xf32>,
    %c0_669 = arith.constant 0 : index
    %c105_670 = arith.constant 105 : index
    %852 = vector.load %arg31[%c0_669, %c105_670] : memref<32x640xf32, #tpu.memory_space<vmem>>, vector<8x384xf32>
    %c16_671 = arith.constant 16 : index
    %c0_672 = arith.constant 0 : index
    %853 = vector.load %arg32[%c16_671, %c0_672] : memref<288x384xf32, #tpu.memory_space<vmem>>, vector<8x384xf32>
    tpu.vector_store %arg32[%c16_671, %c0_672], %852 {strides = array<i32>} : memref<288x384xf32, #tpu.memory_space<vmem>>, vector<8x384xf32>,
    %c0_673 = arith.constant 0 : index
    %c127_674 = arith.constant 127 : index
    %854 = vector.load %arg31[%c0_673, %c127_674] : memref<32x640xf32, #tpu.memory_space<vmem>>, vector<8x384xf32>
    %c24_675 = arith.constant 24 : index
    %c0_676 = arith.constant 0 : index
    %855 = vector.load %arg32[%c24_675, %c0_676] : memref<288x384xf32, #tpu.memory_space<vmem>>, vector<8x384xf32>
    tpu.vector_store %arg32[%c24_675, %c0_676], %854 {strides = array<i32>} : memref<288x384xf32, #tpu.memory_space<vmem>>, vector<8x384xf32>,
    %c0_677 = arith.constant 0 : index
    %c128_678 = arith.constant 128 : index
    %856 = vector.load %arg31[%c0_677, %c128_678] : memref<32x640xf32, #tpu.memory_space<vmem>>, vector<8x384xf32>
    %c32_679 = arith.constant 32 : index
    %c0_680 = arith.constant 0 : index
    %857 = vector.load %arg32[%c32_679, %c0_680] : memref<288x384xf32, #tpu.memory_space<vmem>>, vector<8x384xf32>
    tpu.vector_store %arg32[%c32_679, %c0_680], %856 {strides = array<i32>} : memref<288x384xf32, #tpu.memory_space<vmem>>, vector<8x384xf32>,
    %c0_681 = arith.constant 0 : index
    %c129_682 = arith.constant 129 : index
    %858 = vector.load %arg31[%c0_681, %c129_682] : memref<32x640xf32, #tpu.memory_space<vmem>>, vector<8x384xf32>
    %c40_683 = arith.constant 40 : index
    %c0_684 = arith.constant 0 : index
    %859 = vector.load %arg32[%c40_683, %c0_684] : memref<288x384xf32, #tpu.memory_space<vmem>>, vector<8x384xf32>
    tpu.vector_store %arg32[%c40_683, %c0_684], %858 {strides = array<i32>} : memref<288x384xf32, #tpu.memory_space<vmem>>, vector<8x384xf32>,
    %c0_685 = arith.constant 0 : index
    %c151_686 = arith.constant 151 : index
    %860 = vector.load %arg31[%c0_685, %c151_686] : memref<32x640xf32, #tpu.memory_space<vmem>>, vector<8x384xf32>
    %c48_687 = arith.constant 48 : index
    %c0_688 = arith.constant 0 : index
    %861 = vector.load %arg32[%c48_687, %c0_688] : memref<288x384xf32, #tpu.memory_space<vmem>>, vector<8x384xf32>
    tpu.vector_store %arg32[%c48_687, %c0_688], %860 {strides = array<i32>} : memref<288x384xf32, #tpu.memory_space<vmem>>, vector<8x384xf32>,
    %c0_689 = arith.constant 0 : index
    %c152_690 = arith.constant 152 : index
    %862 = vector.load %arg31[%c0_689, %c152_690] : memref<32x640xf32, #tpu.memory_space<vmem>>, vector<8x384xf32>
    %c56_691 = arith.constant 56 : index
    %c0_692 = arith.constant 0 : index
    %863 = vector.load %arg32[%c56_691, %c0_692] : memref<288x384xf32, #tpu.memory_space<vmem>>, vector<8x384xf32>
    tpu.vector_store %arg32[%c56_691, %c0_692], %862 {strides = array<i32>} : memref<288x384xf32, #tpu.memory_space<vmem>>, vector<8x384xf32>,
    %c0_693 = arith.constant 0 : index
    %c153_694 = arith.constant 153 : index
    %864 = vector.load %arg31[%c0_693, %c153_694] : memref<32x640xf32, #tpu.memory_space<vmem>>, vector<8x384xf32>
    %c64_695 = arith.constant 64 : index
    %c0_696 = arith.constant 0 : index
    %865 = vector.load %arg32[%c64_695, %c0_696] : memref<288x384xf32, #tpu.memory_space<vmem>>, vector<8x384xf32>
    tpu.vector_store %arg32[%c64_695, %c0_696], %864 {strides = array<i32>} : memref<288x384xf32, #tpu.memory_space<vmem>>, vector<8x384xf32>,
    %c0_697 = arith.constant 0 : index
    %c0_698 = arith.constant 0 : index
    %866 = vector.load %arg27[%c0_697, %c0_698] : memref<8x72xf32, #tpu.memory_space<vmem>>, vector<8x72xf32>
    %c0_699 = arith.constant 0 : index
    %c0_700 = arith.constant 0 : index
    %867 = vector.load %arg32[%c0_699, %c0_700] : memref<288x384xf32, #tpu.memory_space<vmem>>, vector<72x384xf32>
    %cst_701 = arith.constant dense<0.000000e+00> : vector<8x384xf32>
    %868 = tpu.matmul %866, %867, %cst_701 {dimension_numbers = #tpu.dot_dimension_numbers<[1], [0], [0], [1], [0, 0, 1, 1], [], []>} : vector<8x72xf32>, vector<72x384xf32>, vector<8x384xf32> -> vector<8x384xf32>
    %c0_702 = arith.constant 0 : index
    %c0_703 = arith.constant 0 : index
    %869 = vector.load %arg2[%c0_702, %c0_703] : memref<1x384xf32, #tpu.memory_space<vmem>>, vector<1x384xf32>
    %870 = vector.broadcast %869 : vector<1x384xf32> to vector<8x384xf32>
    %871 = arith.mulf %868, %870 : vector<8x384xf32>
    %cst_704 = arith.constant dense<0.000000e+00> : vector<8xf32>
    %872 = vector.multi_reduction <add>, %871, %cst_704 [1] : vector<8x384xf32> to vector<8xf32>
    %873 = vector.shape_cast %872 : vector<8xf32> to vector<8x1xf32>
    %cst_705 = arith.constant 3.906250e-03 : f32
    %874 = vector.broadcast %cst_705 : f32 to vector<8x1xf32>
    %875 = arith.mulf %873, %874 : vector<8x1xf32>
    %876 = vector.broadcast %875 : vector<8x1xf32> to vector<8x384xf32>
    %877 = arith.subf %868, %876 : vector<8x384xf32>
    %878 = vector.broadcast %869 : vector<1x384xf32> to vector<8x384xf32>
    %879 = arith.mulf %877, %878 : vector<8x384xf32>
    %880 = arith.mulf %879, %879 : vector<8x384xf32>
    %cst_706 = arith.constant dense<0.000000e+00> : vector<8xf32>
    %881 = vector.multi_reduction <add>, %880, %cst_706 [1] : vector<8x384xf32> to vector<8xf32>
    %882 = vector.shape_cast %881 : vector<8xf32> to vector<8x1xf32>
    %cst_707 = arith.constant 3.906250e-03 : f32
    %883 = vector.broadcast %cst_707 : f32 to vector<8x1xf32>
    %884 = arith.mulf %882, %883 : vector<8x1xf32>
    %885 = vector.broadcast %875 : vector<8x1xf32> to vector<8x384xf32>
    %886 = arith.subf %868, %885 : vector<8x384xf32>
    %cst_708 = arith.constant 9.99999974E-6 : f32
    %887 = vector.broadcast %cst_708 : f32 to vector<8x1xf32>
    %888 = arith.addf %884, %887 : vector<8x1xf32>
    %889 = math.rsqrt %888 : vector<8x1xf32>
    %890 = vector.broadcast %889 : vector<8x1xf32> to vector<8x384xf32>
    %891 = arith.mulf %886, %890 : vector<8x384xf32>
    %cst_709 = arith.constant 0.000000e+00 : f32
    %892 = vector.broadcast %cst_709 : f32 to vector<8x384xf32>
    %893 = arith.cmpf oge, %891, %892 : vector<8x384xf32>
    %cst_710 = arith.constant 2.000000e-01 : f32
    %894 = vector.broadcast %cst_710 : f32 to vector<8x384xf32>
    %895 = arith.mulf %894, %891 : vector<8x384xf32>
    %896 = arith.select %893, %891, %895 : vector<8x384xi1>, vector<8x384xf32>
    %897 = vector.broadcast %869 : vector<1x384xf32> to vector<8x384xf32>
    %898 = arith.mulf %896, %897 : vector<8x384xf32>
    %c0_711 = arith.constant 0 : index
    %c0_712 = arith.constant 0 : index
    %899 = vector.load %arg28[%c0_711, %c0_712] : memref<2x8xf32, #tpu.memory_space<vmem>>, vector<2x8xf32>
    %cst_713 = arith.constant dense<0.000000e+00> : vector<2x384xf32>
    %900 = tpu.matmul %899, %898, %cst_713 {dimension_numbers = #tpu.dot_dimension_numbers<[1], [0], [0], [1], [0, 0, 1, 1], [], []>} : vector<2x8xf32>, vector<8x384xf32>, vector<2x384xf32> -> vector<2x384xf32>
    %c0_714 = arith.constant 0 : index
    %c0_715 = arith.constant 0 : index
    %901 = vector.load %arg29[%c0_714, %c0_715] : memref<2x1xf32, #tpu.memory_space<vmem>>, vector<2x1xf32>
    %902 = vector.broadcast %901 : vector<2x1xf32> to vector<2x384xf32>
    %903 = arith.addf %900, %902 : vector<2x384xf32>
    %c0_716 = arith.constant 0 : index
    %c0_717 = arith.constant 0 : index
    %904 = vector.load %arg9[%c0_716, %c0_717] : memref<2x2xf32, #tpu.memory_space<vmem>>, vector<2x2xf32>
    %cst_718 = arith.constant dense<0.000000e+00> : vector<2x1xf32>
    %905 = tpu.matmul %904, %24, %cst_718 {dimension_numbers = #tpu.dot_dimension_numbers<[1], [0], [0], [1], [0, 0, 1, 1], [], []>} : vector<2x2xf32>, vector<2x1xf32>, vector<2x1xf32> -> vector<2x1xf32>
    %c0_719 = arith.constant 0 : index
    %c0_720 = arith.constant 0 : index
    %906 = vector.load %arg9[%c0_719, %c0_720] : memref<2x2xf32, #tpu.memory_space<vmem>>, vector<2x2xf32>
    %cst_721 = arith.constant dense<0.000000e+00> : vector<2x1xf32>
    %907 = tpu.matmul %906, %10, %cst_721 {dimension_numbers = #tpu.dot_dimension_numbers<[1], [0], [0], [1], [0, 0, 1, 1], [], []>} : vector<2x2xf32>, vector<2x1xf32>, vector<2x1xf32> -> vector<2x1xf32>
    %908 = vector.broadcast %905 : vector<2x1xf32> to vector<2x384xf32>
    %909 = arith.mulf %903, %908 : vector<2x384xf32>
    %910 = vector.broadcast %907 : vector<2x1xf32> to vector<2x384xf32>
    %911 = arith.addf %909, %910 : vector<2x384xf32>
    %c0_722 = arith.constant 0 : index
    %c0_723 = arith.constant 0 : index
    %c0_724 = arith.constant 0 : index
    %912 = vector.load %arg30[%c0_722, %c0_723, %c0_724] : memref<1x2x384xf32, #tpu.memory_space<vmem>>, vector<1x2x384xf32>
    %913 = vector.shape_cast %912 : vector<1x2x384xf32> to vector<2x384xf32>
    %914 = vector.shape_cast %911 : vector<2x384xf32> to vector<1x2x384xf32>
    tpu.vector_store %arg30[%c0_722, %c0_723, %c0_724], %914 {strides = array<i32>} : memref<1x2x384xf32, #tpu.memory_space<vmem>>, vector<1x2x384xf32>,
    return
  }
  func.func @transform_0(%arg0: i32) -> (i32, i32, i32) {
    %c0_i32 = arith.constant 0 : i32
    %c0_i32_0 = arith.constant 0 : i32
    %c0_i32_1 = arith.constant 0 : i32
    return %arg0, %c0_i32, %c0_i32_0 : i32, i32, i32
  }
  func.func @transform_1(%arg0: i32) -> (i32, i32) {
    %c0_i32 = arith.constant 0 : i32
    %c0_i32_0 = arith.constant 0 : i32
    %c0_i32_1 = arith.constant 0 : i32
    return %c0_i32, %c0_i32_0 : i32, i32
  }
  func.func @transform_2(%arg0: i32) -> (i32, i32) {
    %c0_i32 = arith.constant 0 : i32
    %c0_i32_0 = arith.constant 0 : i32
    %c0_i32_1 = arith.constant 0 : i32
    return %c0_i32, %c0_i32_0 : i32, i32
  }
  func.func @transform_3(%arg0: i32) -> (i32, i32) {
    %c0_i32 = arith.constant 0 : i32
    %c0_i32_0 = arith.constant 0 : i32
    %c0_i32_1 = arith.constant 0 : i32
    return %c0_i32, %c0_i32_0 : i32, i32
  }
  func.func @transform_4(%arg0: i32) -> (i32, i32) {
    %c0_i32 = arith.constant 0 : i32
    %c0_i32_0 = arith.constant 0 : i32
    %c0_i32_1 = arith.constant 0 : i32
    return %c0_i32, %c0_i32_0 : i32, i32
  }
  func.func @transform_5(%arg0: i32) -> (i32, i32) {
    %c0_i32 = arith.constant 0 : i32
    %c0_i32_0 = arith.constant 0 : i32
    %c0_i32_1 = arith.constant 0 : i32
    return %c0_i32, %c0_i32_0 : i32, i32
  }
  func.func @transform_6(%arg0: i32) -> (i32, i32) {
    %c0_i32 = arith.constant 0 : i32
    %c0_i32_0 = arith.constant 0 : i32
    %c0_i32_1 = arith.constant 0 : i32
    return %c0_i32, %c0_i32_0 : i32, i32
  }
  func.func @transform_7(%arg0: i32) -> (i32, i32) {
    %c0_i32 = arith.constant 0 : i32
    %c0_i32_0 = arith.constant 0 : i32
    %c0_i32_1 = arith.constant 0 : i32
    return %c0_i32, %c0_i32_0 : i32, i32
  }
  func.func @transform_8(%arg0: i32) -> (i32, i32) {
    %c0_i32 = arith.constant 0 : i32
    %c0_i32_0 = arith.constant 0 : i32
    %c0_i32_1 = arith.constant 0 : i32
    return %c0_i32, %c0_i32_0 : i32, i32
  }
  func.func @transform_9(%arg0: i32) -> (i32, i32) {
    %c0_i32 = arith.constant 0 : i32
    %c0_i32_0 = arith.constant 0 : i32
    %c0_i32_1 = arith.constant 0 : i32
    return %c0_i32, %c0_i32_0 : i32, i32
  }
  func.func @transform_10(%arg0: i32) -> (i32, i32) {
    %c0_i32 = arith.constant 0 : i32
    %c0_i32_0 = arith.constant 0 : i32
    %c0_i32_1 = arith.constant 0 : i32
    return %c0_i32, %c0_i32_0 : i32, i32
  }
  func.func @transform_11(%arg0: i32) -> (i32, i32, i32) {
    %c0_i32 = arith.constant 0 : i32
    %c0_i32_0 = arith.constant 0 : i32
    %c0_i32_1 = arith.constant 0 : i32
    %c0_i32_2 = arith.constant 0 : i32
    return %c0_i32, %c0_i32_0, %c0_i32_1 : i32, i32, i32
  }
  func.func @transform_12(%arg0: i32) -> (i32, i32, i32) {
    %c0_i32 = arith.constant 0 : i32
    %c0_i32_0 = arith.constant 0 : i32
    %c0_i32_1 = arith.constant 0 : i32
    %c0_i32_2 = arith.constant 0 : i32
    return %c0_i32, %c0_i32_0, %c0_i32_1 : i32, i32, i32
  }
  func.func @transform_13(%arg0: i32) -> (i32, i32) {
    %c0_i32 = arith.constant 0 : i32
    %c0_i32_0 = arith.constant 0 : i32
    %c0_i32_1 = arith.constant 0 : i32
    return %c0_i32, %c0_i32_0 : i32, i32
  }
  func.func @transform_14(%arg0: i32) -> (i32, i32) {
    %c0_i32 = arith.constant 0 : i32
    %c0_i32_0 = arith.constant 0 : i32
    %c0_i32_1 = arith.constant 0 : i32
    return %c0_i32, %c0_i32_0 : i32, i32
  }
  func.func @transform_15(%arg0: i32) -> (i32, i32) {
    %c0_i32 = arith.constant 0 : i32
    %c0_i32_0 = arith.constant 0 : i32
    %c0_i32_1 = arith.constant 0 : i32
    return %c0_i32, %c0_i32_0 : i32, i32
  }
  func.func @transform_16(%arg0: i32) -> (i32, i32) {
    %c0_i32 = arith.constant 0 : i32
    %c0_i32_0 = arith.constant 0 : i32
    %c0_i32_1 = arith.constant 0 : i32
    return %c0_i32, %c0_i32_0 : i32, i32
  }
  func.func @transform_17(%arg0: i32) -> (i32, i32) {
    %c0_i32 = arith.constant 0 : i32
    %c0_i32_0 = arith.constant 0 : i32
    %c0_i32_1 = arith.constant 0 : i32
    return %c0_i32, %c0_i32_0 : i32, i32
  }
  func.func @transform_18(%arg0: i32) -> (i32, i32) {
    %c0_i32 = arith.constant 0 : i32
    %c0_i32_0 = arith.constant 0 : i32
    %c0_i32_1 = arith.constant 0 : i32
    return %c0_i32, %c0_i32_0 : i32, i32
  }
  func.func @transform_19(%arg0: i32) -> (i32, i32) {
    %c0_i32 = arith.constant 0 : i32
    %c0_i32_0 = arith.constant 0 : i32
    %c0_i32_1 = arith.constant 0 : i32
    return %c0_i32, %c0_i32_0 : i32, i32
  }
  func.func @transform_20(%arg0: i32) -> (i32, i32) {
    %c0_i32 = arith.constant 0 : i32
    %c0_i32_0 = arith.constant 0 : i32
    %c0_i32_1 = arith.constant 0 : i32
    return %c0_i32, %c0_i32_0 : i32, i32
  }
  func.func @transform_21(%arg0: i32) -> (i32, i32, i32) {
    %c0_i32 = arith.constant 0 : i32
    %c0_i32_0 = arith.constant 0 : i32
    %c0_i32_1 = arith.constant 0 : i32
    %c0_i32_2 = arith.constant 0 : i32
    return %c0_i32, %c0_i32_0, %c0_i32_1 : i32, i32, i32
  }
  func.func @transform_22(%arg0: i32) -> (i32, i32) {
    %c0_i32 = arith.constant 0 : i32
    %c0_i32_0 = arith.constant 0 : i32
    %c0_i32_1 = arith.constant 0 : i32
    return %c0_i32, %c0_i32_0 : i32, i32
  }
  func.func @transform_23(%arg0: i32) -> (i32, i32) {
    %c0_i32 = arith.constant 0 : i32
    %c0_i32_0 = arith.constant 0 : i32
    %c0_i32_1 = arith.constant 0 : i32
    return %c0_i32, %c0_i32_0 : i32, i32
  }
  func.func @transform_24(%arg0: i32) -> (i32, i32, i32) {
    %c0_i32 = arith.constant 0 : i32
    %c0_i32_0 = arith.constant 0 : i32
    %c0_i32_1 = arith.constant 0 : i32
    %c0_i32_2 = arith.constant 0 : i32
    return %c0_i32, %c0_i32_0, %c0_i32_1 : i32, i32, i32
  }
  func.func @transform_25(%arg0: i32) -> (i32, i32) {
    %c0_i32 = arith.constant 0 : i32
    %c0_i32_0 = arith.constant 0 : i32
    %c0_i32_1 = arith.constant 0 : i32
    return %c0_i32, %c0_i32_0 : i32, i32
  }
  func.func @transform_26(%arg0: i32) -> (i32, i32) {
    %c0_i32 = arith.constant 0 : i32
    %c0_i32_0 = arith.constant 0 : i32
    %c0_i32_1 = arith.constant 0 : i32
    return %c0_i32, %c0_i32_0 : i32, i32
  }
  func.func @transform_27(%arg0: i32) -> (i32, i32) {
    %c0_i32 = arith.constant 0 : i32
    %c0_i32_0 = arith.constant 0 : i32
    %c0_i32_1 = arith.constant 0 : i32
    return %c0_i32, %c0_i32_0 : i32, i32
  }
  func.func @transform_28(%arg0: i32) -> (i32, i32) {
    %c0_i32 = arith.constant 0 : i32
    %c0_i32_0 = arith.constant 0 : i32
    %c0_i32_1 = arith.constant 0 : i32
    return %c0_i32, %c0_i32_0 : i32, i32
  }
  func.func @transform_29(%arg0: i32) -> (i32, i32, i32) {
    %c0_i32 = arith.constant 0 : i32
    %c0_i32_0 = arith.constant 0 : i32
    %c0_i32_1 = arith.constant 0 : i32
    return %arg0, %c0_i32, %c0_i32_0 : i32, i32, i32
  }
}

</mosaic_0001>

<bundles_post_ra>
// kernel: convlstm_norm_unet_forward.1
= control target key start
LH: loop header
LB: loop body
LE: loop exit
PB: predicated region body
PF: predicated region fallthrough
CT: control target
= control target key end

     0   :  { %s13100_s6 = smov 1   ;;  %s13101_s10 = smov 2   ;;  %s15064_s0 = inlined_call_operand.smem [shape: u32[30], index: -1, kind: input, shape index: {}] }
   0x1   :  { %s13182_s5 = sld [smem:[%s15064_s0]]   ;;  %s13102_s14 = smov 3  }
   0x2   :  { %s13187_s9 = sld [smem:[%s15064_s0 + %s13100_s6]]   ;;  %s13103_s18 = smov 4  }
   0x3   :  { %s13192_s13 = sld [smem:[%s15064_s0 + %s13101_s10]]   ;;  %s13104_s22 = smov 5  }
   0x4   :  { %s13197_s17 = sld [smem:[%s15064_s0 + %s13102_s14]]   ;;  %s13105_s26 = smov 6  }
   0x5   :  { %s13202_s21 = sld [smem:[%s15064_s0 + %s13103_s18]]   ;;  %s13106_s30 = smov 7  }
   0x6   :  { %s13207_s25 = sld [smem:[%s15064_s0 + %s13104_s22]]   ;;  %s13107_s4 = smov 8  }
   0x7   :  { %s13212_s29 = sld [smem:[%s15064_s0 + %s13105_s26]]   ;;  %s13108_s10 = smov 9  }
   0x8   :  { %15136 = sst [smem:[#allocation34_spill]] %s13187_s9  ;;  %s13109_s15 = smov 10  }
   0x9   :  { %15137 = sst [smem:[#allocation35_spill]] %s13192_s13  ;;  %s13110_s20 = smov 11  }
   0xa   :  { %15138 = sst [smem:[#allocation36_spill]] %s13197_s17  ;;  %s13111_s26 = smov 12  }
   0xb   :  { %15139 = sst [smem:[#allocation37_spill]] %s13202_s21  ;;  %s13112_s1 = smov 13  }
   0xc   :  { %15140 = sst [smem:[#allocation38_spill]] %s13207_s25  ;;  %s13113_s7 = smov 14  }
   0xd   :  { %15141 = sst [smem:[#allocation39_spill]] %s13212_s29  ;;  %s13115_s22 = smov 16  }
   0xe   :  { %s13217_s3 = sld [smem:[%s15064_s0 + %s13106_s30]]   ;;  %s13116_s28 = smov 17  }
   0xf   :  { %s13222_s8 = sld [smem:[%s15064_s0 + %s13107_s4]]  }
  0x10   :  { %s13227_s14 = sld [smem:[%s15064_s0 + %s13108_s10]]  }
  0x11   :  { %s13232_s19 = sld [smem:[%s15064_s0 + %s13109_s15]]   ;;  %s13114_s15 = smov 15  }
  0x12   :  { %s13237_s24 = sld [smem:[%s15064_s0 + %s13110_s20]]  }
  0x13   :  { %s13242_s30 = sld [smem:[%s15064_s0 + %s13111_s26]]  }
  0x14   :  { %15142 = sst [smem:[#allocation40_spill]] %s13217_s3 }
  0x15   :  { %15143 = sst [smem:[#allocation41_spill]] %s13222_s8 }
  0x16   :  { %s13247_s6 = sld [smem:[%s15064_s0 + %s13112_s1]]  }
  0x17   :  { %15144 = sst [smem:[#allocation42_spill]] %s13232_s19 }
  0x18   :  { %15145 = sst [smem:[#allocation43_spill]] %s13237_s24 }
  0x19   :  { %s13252_s12 = sld [smem:[%s15064_s0 + %s13113_s7]]   ;;  %s13117_s7 = smov 18  }
  0x1a   :  { %s13257_s20 = sld [smem:[%s15064_s0 + %s13114_s15]]   ;;  %s13118_s15 = smov 19  }
  0x1b   :  { %s13262_s27 = sld [smem:[%s15064_s0 + %s13115_s22]]   ;;  %s13119_s22 = smov 20  }
  0x1c   :  { %15146 = sst [smem:[#allocation44_spill]] %s13247_s6 }
  0x1d   :  { %s13267_s4 = sld [smem:[%s15064_s0 + %s13116_s28]]   ;;  %s13120_s28 = smov 21  }
  0x1e   :  { %s13272_s24 = sld [smem:[%s15064_s0 + %s13117_s7]]   ;;  %s13121_s7 = smov 22  }
  0x1f   :  { %15147 = sst [smem:[#allocation45_spill]] %s13252_s12 }
  0x20   :  { %s13277_s17 = sld [smem:[%s15064_s0 + %s13118_s15]]   ;;  %s13122_s15 = smov 23  }
  0x21   :  { %s13282_s19 = sld [smem:[%s15064_s0 + %s13119_s22]]   ;;  %s13123_s22 = smov 24  }
  0x22   :  { %s13287_s13 = sld [smem:[%s15064_s0 + %s13120_s28]]   ;;  %s13124_s28 = smov 25  }
  0x23   :  { %s13292_s9 = sld [smem:[%s15064_s0 + %s13121_s7]]   ;;  %s13125_s7 = smov 26  }
  0x24   :  { %s13307_s6 = sld [smem:[%s15064_s0 + %s13124_s28]]   ;;  %s13128_s28 = smov 29  }
  0x25   :  { %s13312_s12 = sld [smem:[%s15064_s0 + %s13125_s7]]  }
  0x26   :  { %15148 = sst [smem:[#allocation46_spill]] %s13277_s17 }
  0x27   :  { %15149 = sst [smem:[#allocation47_spill]] %s13282_s19 }
  0x28   :  { %s13297_s17 = sld [smem:[%s15064_s0 + %s13122_s15]]   ;;  %s13126_s15 = smov 27  }
  0x29   :  { %s13302_s19 = sld [smem:[%s15064_s0 + %s13123_s22]]   ;;  %s13127_s22 = smov 28  }
  0x2a   :  { %s13317_s29 = sld [smem:[%s15064_s0 + %s13126_s15]]  }
  0x2b   :  { %s13322_s25 = sld [smem:[%s15064_s0 + %s13127_s22]]  }
  0x2c   :  { %s13327_s21 = sld [smem:[%s15064_s0 + %s13128_s28]]  }
  0x2d   :  { %64 = vsyncpa [#allocation5], 0 }
  0x2e   :  { %65 = vsyncpa [#allocation7], 0 }
  0x2f   :  { %66 = vsyncpa [#allocation10], 0 }
  0x30   :  { %67 = vsyncpa [#allocation13], 0 }
  0x31   :  { %68 = vsyncpa [#allocation16], 0 }
  0x32   :  { %69 = vsyncpa [#allocation19], 0 }
  0x33   :  { %70 = vsyncpa [#allocation22], 0 }
  0x34   :  { %71 = vsyncpa [#allocation25], 0  ;;  %s13329_s7 = smov 0  }
  0x35 LB: > { %s15150_s3 = sld [smem:[#allocation40_spill]]  ;;  %s15151_s8 = sld [smem:[#allocation41_spill]]  ;;  %s13098_s7 = sphi %s13329_s7, %s77_s7  }
  0x36   : > { %s13129_s0 = smov [#allocation6]   ;;  %s13335_s11 = sadd.s32 4294967295, %s13098_s7  }
  0x37   : > { %s764_s10 = sshll.u32 %s13129_s0, 4  ;;  %p9368_p0 = scmp.ge.s32.totalorder %s13098_s7, 1  ;;  %s13340_s10 = int_to_ptr.vmem [resolvable:$true] %s764_s10 }
  0x38   : > { %p722_p1 = scmp.lt.s32.totalorder %s13098_s7, 3  ;;  %p15074_p2 = scmp.eq.s32.totalorder %s13335_s11, 0 }
  0x39   : > { %s13130_s16 = smov [#allocation9]   ;;  %s13131_s23 = smov [#allocation12]  }
  0x3a   : > { %p13342_p3 = pnand %p9368_p0, %p722_p1  ;;  %s793_s18 = sshll.u32 %s13130_s16, 4  ;;  %s13348_s18 = int_to_ptr.vmem [resolvable:$true] %s793_s18 }
  0x3b   : > { %s824_s26 = sshll.u32 %s13131_s23, 4  ;;  %s13132_s28 = smov [#allocation15]   ;;  %s13356_s26 = int_to_ptr.vmem [resolvable:$true] %s824_s26 }
  0x3c   : > { %s15152_s15 = scalar_select %p13342_p3, 1, 0 }
  0x3d   : > { %p11425_p4 = pneg %p13342_p3  ;;  %s13358_s1 = sshll.u32 %s13132_s28, 4  ;;  %s848_s1 = int_to_ptr.vmem [resolvable:$true] %s13358_s1 }
  0x3e   : > { %s12668_s2 = scalar_lea.hbm %s15151_s8, 32 }
  0x3f   : > { %p13352_p5 = pnand %p15074_p2, %p11425_p4  ;;  %p12669_p6 = scmp.ne.s32.totalorder %s15151_s8, %s12668_s2 }
  0x40   : > { %p12675_p10 = scmp.lt.u32.totalorder %s12668_s2, %s15151_s8 }
  0x41   : > { %p13364_p7 = pneg %p13352_p5 }
  0x43   : > { %p12671_p8 = pnand %p13364_p7, %p12669_p6 }
  0x45   : > { %p12672_p9 = pneg %p12671_p8 }
  0x47   : > { %p12677_p11 = pnand %p12675_p10, %p12672_p9 }
  0x49   : > { %12680 = shalt.err (!%p12677_p11)
}
  0x4a   : > { %s12681_s16 = scalar_lea.vmem %s13340_s10, 32  ;;  %p12689_p1 = scmp.lt.s32.totalorder %s13340_s10, %s13340_s10 }
  0x4b   : > { %p12682_p12 = scmp.ne.s32.totalorder %s13340_s10, %s12681_s16  ;;  %p12690_p4 = scmp.lt.s32.totalorder %s12681_s16, %s12681_s16 }
  0x4d   : > { %p12684_p13 = pnand %p12682_p12, %p13364_p7  ;;  %p12691_p2 = por %p12690_p4, %p12689_p1 }
  0x4f   : > { %p12685_p0 = pneg %p12684_p13 }
  0x51   : > { %p12692_p3 = pnand %p12691_p2, %p12685_p0 }
  0x53   : > { %12695 = shalt.err (!%p12692_p3)
}
  0x54   : > { %11431 = dma.hbm_to_vmem [thread:$0]  (!%p13352_p5), %s15151_s8, 32, %s13340_s10, [#allocation7]  }
  0x55   : > { %s12696_s23 = scalar_lea.hbm %s13242_s30, 24576 }
  0x56   : > { %p12697_p6 = scmp.ne.s32.totalorder %s13242_s30, %s12696_s23  ;;  %p12703_p10 = scmp.lt.u32.totalorder %s12696_s23, %s13242_s30 }
  0x58   : > { %p12699_p8 = pnand %p12697_p6, %p13364_p7 }
  0x5a   : > { %p12700_p9 = pneg %p12699_p8 }
  0x5c   : > { %p12705_p11 = pnand %p12703_p10, %p12700_p9 }
  0x5e   : > { %12708 = shalt.err (!%p12705_p11)
}
  0x5f   : > { %s12709_s28 = scalar_lea.vmem %s13348_s18, 24576  ;;  %p12717_p13 = scmp.lt.s32.totalorder %s13348_s18, %s13348_s18 }
  0x60   : > { %p12710_p2 = scmp.ne.s32.totalorder %s13348_s18, %s12709_s28  ;;  %p12718_p0 = scmp.lt.s32.totalorder %s12709_s28, %s12709_s28 }
  0x62   : > { %p12712_p3 = pnand %p12710_p2, %p13364_p7  ;;  %p12719_p1 = por %p12718_p0, %p12717_p13 }
  0x64   : > { %p12713_p12 = pneg %p12712_p3 }
  0x66   : > { %p12720_p4 = pnand %p12719_p1, %p12713_p12 }
  0x68   : > { %12723 = shalt.err (!%p12720_p4)
}
  0x69   : > { %s15076_s10 = smov 384   ;;  %s13134_s2 = smov 24  }
  0x6a   : > { %11437 = dma.hbm_to_vmem [thread:$0]  (!%p13352_p5), %s13242_s30, 24576, %s13348_s18, [#allocation10], %s15076_s10, %s15076_s10, %s13134_s2  }
  0x6b   : > { %s12724_s16 = scalar_lea.hbm %s13262_s27, 128 }
  0x6c   : > { %p12725_p6 = scmp.ne.s32.totalorder %s13262_s27, %s12724_s16  ;;  %p12731_p10 = scmp.lt.u32.totalorder %s12724_s16, %s13262_s27 }
  0x6e   : > { %p12727_p8 = pnand %p12725_p6, %p13364_p7 }
  0x70   : > { %p12728_p9 = pneg %p12727_p8 }
  0x72   : > { %p12733_p11 = pnand %p12731_p10, %p12728_p9 }
  0x74   : > { %12736 = shalt.err (!%p12733_p11)
}
  0x75   : > { %s12737_s23 = scalar_lea.vmem %s13356_s26, 128  ;;  %p12745_p13 = scmp.lt.s32.totalorder %s13356_s26, %s13356_s26 }
  0x76   : > { %p12738_p2 = scmp.ne.s32.totalorder %s13356_s26, %s12737_s23  ;;  %p12746_p0 = scmp.lt.s32.totalorder %s12737_s23, %s12737_s23 }
  0x78   : > { %p12740_p3 = pnand %p12738_p2, %p13364_p7  ;;  %p12747_p1 = por %p12746_p0, %p12745_p13 }
  0x7a   : > { %p12741_p12 = pneg %p12740_p3 }
  0x7c   : > { %p12748_p4 = pnand %p12747_p1, %p12741_p12 }
  0x7e   : > { %12751 = shalt.err (!%p12748_p4)
}
  0x7f   : > { %11443 = dma.hbm_to_vmem [thread:$0]  (!%p13352_p5), %s13262_s27, 128, %s13356_s26, [#allocation13]  }
  0x80   : > { %s12752_s18 = scalar_lea.hbm %s13272_s24, 512 }
  0x81   : > { %p12753_p6 = scmp.ne.s32.totalorder %s13272_s24, %s12752_s18  ;;  %p12759_p10 = scmp.lt.u32.totalorder %s12752_s18, %s13272_s24 }
  0x83   : > { %p12755_p8 = pnand %p12753_p6, %p13364_p7 }
  0x85   : > { %p12756_p9 = pneg %p12755_p8 }
  0x87   : > { %p12761_p11 = pnand %p12759_p10, %p12756_p9 }
  0x89   : > { %12764 = shalt.err (!%p12761_p11)
}
  0x8a   : > { %s12765_s28 = scalar_lea.vmem %s848_s1, 512  ;;  %p12773_p13 = scmp.lt.s32.totalorder %s848_s1, %s848_s1 }
  0x8b   : > { %p12766_p2 = scmp.ne.s32.totalorder %s848_s1, %s12765_s28  ;;  %p12774_p0 = scmp.lt.s32.totalorder %s12765_s28, %s12765_s28 }
  0x8d   : > { %p12768_p3 = pnand %p12766_p2, %p13364_p7  ;;  %p12775_p1 = por %p12774_p0, %p12773_p13 }
  0x8f   : > { %p12769_p12 = pneg %p12768_p3 }
  0x91   : > { %p12776_p4 = pnand %p12775_p1, %p12769_p12 }
  0x93   : > { %12779 = shalt.err (!%p12776_p4)
}
  0x94   : > { %s15077_s26 = smov 256   ;;  %s15078_s16 = smov 16  }
  0x95   : > { %11449 = dma.hbm_to_vmem [thread:$0]  (!%p13352_p5), %s13272_s24, 512, %s848_s1, [#allocation16], %s15077_s26, %s15077_s26, %s15078_s16  }
  0x96   : > { %s13137_s23 = smov [#allocation18]   ;;  %s12780_s28 = scalar_lea.hbm %s13292_s9, 768 }
  0x97   : > { %s879_s18 = sshll.u32 %s13137_s23, 4  ;;  %p12781_p6 = scmp.ne.s32.totalorder %s13292_s9, %s12780_s28  ;;  %s880_s18 = int_to_ptr.vmem [resolvable:$true] %s879_s18 }
  0x98   : > { %p12787_p10 = scmp.lt.u32.totalorder %s12780_s28, %s13292_s9 }
  0x99   : > { %p12783_p8 = pnand %p12781_p6, %p13364_p7 }
  0x9b   : > { %p12784_p9 = pneg %p12783_p8 }
  0x9d   : > { %p12789_p11 = pnand %p12787_p10, %p12784_p9 }
  0x9f   : > { %12792 = shalt.err (!%p12789_p11)
}
  0xa0   : > { %s12793_s10 = scalar_lea.vmem %s880_s18, 768  ;;  %p12801_p13 = scmp.lt.s32.totalorder %s880_s18, %s880_s18 }
  0xa1   : > { %p12794_p2 = scmp.ne.s32.totalorder %s880_s18, %s12793_s10  ;;  %p12802_p0 = scmp.lt.s32.totalorder %s12793_s10, %s12793_s10 }
  0xa3   : > { %p12796_p3 = pnand %p12794_p2, %p13364_p7  ;;  %p12803_p1 = por %p12802_p0, %p12801_p13 }
  0xa5   : > { %p12797_p12 = pneg %p12796_p3 }
  0xa7   : > { %p12804_p4 = pnand %p12803_p1, %p12797_p12 }
  0xa9   : > { %12807 = shalt.err (!%p12804_p4)
}
  0xaa   : > { %s15155_s1 = smov 384   ;;  %s13138_s23 = smov [#allocation21]  }
  0xab   : > { %11455 = dma.hbm_to_vmem [thread:$0]  (!%p13352_p5), %s13292_s9, 768, %s880_s18, [#allocation19], %s15155_s1, %s15155_s1, %s13134_s2  }
  0xac   : > { %s905_s28 = sshll.u32 %s13138_s23, 4  ;;  %s13139_s26 = smov [#allocation4]   ;;  %s906_s28 = int_to_ptr.vmem [resolvable:$true] %s905_s28 }
  0xad   : > { %s753_s16 = sshll.u32 %s13139_s26, 4  ;;  %s12808_s10 = scalar_lea.hbm %s13302_s19, 512  ;;  %s13441_s16 = int_to_ptr.vmem [resolvable:$true] %s753_s16 }
  0xae   : > { %p12809_p6 = scmp.ne.s32.totalorder %s13302_s19, %s12808_s10  ;;  %p12815_p10 = scmp.lt.u32.totalorder %s12808_s10, %s13302_s19 }
  0xb0   : > { %p12811_p8 = pnand %p12809_p6, %p13364_p7 }
  0xb2   : > { %p12812_p9 = pneg %p12811_p8 }
  0xb4   : > { %p12817_p11 = pnand %p12815_p10, %p12812_p9 }
  0xb6   : > { %12820 = shalt.err (!%p12817_p11)
}
  0xb7   : > { %s12821_s8 = scalar_lea.vmem %s906_s28, 512  ;;  %p12829_p13 = scmp.lt.s32.totalorder %s906_s28, %s906_s28 }
  0xb8   : > { %p12822_p2 = scmp.ne.s32.totalorder %s906_s28, %s12821_s8  ;;  %p12830_p0 = scmp.lt.s32.totalorder %s12821_s8, %s12821_s8 }
  0xba   : > { %p12824_p3 = pnand %p12822_p2, %p13364_p7  ;;  %p12831_p1 = por %p12830_p0, %p12829_p13 }
  0xbc   : > { %p12825_p12 = pneg %p12824_p3 }
  0xbe   : > { %p12832_p4 = pnand %p12831_p1, %p12825_p12 }
  0xc0   : > { %12835 = shalt.err (!%p12832_p4)
}
  0xc1   : > { %s13140_s2 = smov 128   ;;  %s13141_s26 = smov 8  }
  0xc2   : > { %11461 = dma.hbm_to_vmem [thread:$0]  (!%p13352_p5), %s13302_s19, 512, %s906_s28, [#allocation22], %s13140_s2, %s13140_s2, %s13141_s26  }
  0xc3   : > { %s12836_s18 = scalar_lea.hbm %s15150_s3, 128 }
  0xc4   : > { %p12837_p6 = scmp.ne.s32.totalorder %s15150_s3, %s12836_s18  ;;  %p12843_p10 = scmp.lt.u32.totalorder %s12836_s18, %s15150_s3 }
  0xc6   : > { %p12839_p8 = pnand %p12837_p6, %p13364_p7 }
  0xc8   : > { %p12840_p9 = pneg %p12839_p8 }
  0xca   : > { %p12845_p11 = pnand %p12843_p10, %p12840_p9 }
  0xcc   : > { %12848 = shalt.err (!%p12845_p11)
}
  0xcd   : > { %s12849_s8 = scalar_lea.vmem %s13441_s16, 128  ;;  %p12857_p13 = scmp.lt.s32.totalorder %s13441_s16, %s13441_s16 }
  0xce   : > { %p12850_p2 = scmp.ne.s32.totalorder %s13441_s16, %s12849_s8  ;;  %p12858_p0 = scmp.lt.s32.totalorder %s12849_s8, %s12849_s8 }
  0xd0   : > { %p12852_p3 = pnand %p12850_p2, %p13364_p7  ;;  %p12859_p1 = por %p12858_p0, %p12857_p13 }
  0xd2   : > { %p12853_p12 = pneg %p12852_p3 }
  0xd4   : > { %p12860_p4 = pnand %p12859_p1, %p12853_p12 }
  0xd6   : > { %12863 = shalt.err (!%p12860_p4)
}
  0xd7   : > { %11428 = dma.hbm_to_vmem [thread:$0]  (!%p13352_p5), %s15150_s3, 128, %s13441_s16, [#allocation5]  }
  0xd8   : > { %s13142_s1 = smov [#allocation8]   ;;  %s13143_s28 = smov [#allocation11]  }
  0xd9   : > { %s774_s23 = sshll.u32 %s13142_s1, 4  ;;  %s813_s10 = sshll.u32 %s13143_s28, 4  ;;  %s775_s23 = int_to_ptr.vmem [resolvable:$true] %s774_s23  ;;  %s13471_s10 = int_to_ptr.vmem [resolvable:$true] %s813_s10 }
  0xda   : > { %s12864_s18 = scalar_lea.hbm %s13227_s14, 6144 }
  0xdb   : > { %p12865_p6 = scmp.ne.s32.totalorder %s13227_s14, %s12864_s18  ;;  %p12871_p10 = scmp.lt.u32.totalorder %s12864_s18, %s13227_s14 }
  0xdd   : > { %p12867_p8 = pnand %p12865_p6, %p13364_p7 }
  0xdf   : > { %p12868_p9 = pneg %p12867_p8 }
  0xe1   : > { %p12873_p11 = pnand %p12871_p10, %p12868_p9 }
  0xe3   : > { %12876 = shalt.err (!%p12873_p11)
}
  0xe4   : > { %s12877_s8 = scalar_lea.vmem %s775_s23, 6144  ;;  %p12885_p13 = scmp.lt.s32.totalorder %s775_s23, %s775_s23 }
  0xe5   : > { %p12878_p2 = scmp.ne.s32.totalorder %s775_s23, %s12877_s8  ;;  %p12886_p0 = scmp.lt.s32.totalorder %s12877_s8, %s12877_s8 }
  0xe7   : > { %p12880_p3 = pnand %p12878_p2, %p13364_p7  ;;  %p12887_p1 = por %p12886_p0, %p12885_p13 }
  0xe9   : > { %p12881_p12 = pneg %p12880_p3 }
  0xeb   : > { %p12888_p4 = pnand %p12887_p1, %p12881_p12 }
  0xed   : > { %12891 = shalt.err (!%p12888_p4)
}
  0xee   : > { %11434 = dma.hbm_to_vmem [thread:$0]  (!%p13352_p5), %s13227_s14, 6144, %s775_s23, [#allocation7], %s13140_s2, %s13140_s2, %s13141_s26  }
  0xef   : > { %s12892_s16 = scalar_lea.hbm %s13257_s20, 128 }
  0xf0   : > { %p12893_p6 = scmp.ne.s32.totalorder %s13257_s20, %s12892_s16  ;;  %p12899_p10 = scmp.lt.u32.totalorder %s12892_s16, %s13257_s20 }
  0xf2   : > { %p12895_p8 = pnand %p12893_p6, %p13364_p7 }
  0xf4   : > { %p12896_p9 = pneg %p12895_p8 }
  0xf6   : > { %p12901_p11 = pnand %p12899_p10, %p12896_p9 }
  0xf8   : > { %12904 = shalt.err (!%p12901_p11)
}
  0xf9   : > { %s12905_s1 = scalar_lea.vmem %s13471_s10, 128  ;;  %p12913_p13 = scmp.lt.s32.totalorder %s13471_s10, %s13471_s10 }
  0xfa   : > { %p12906_p2 = scmp.ne.s32.totalorder %s13471_s10, %s12905_s1  ;;  %p12914_p0 = scmp.lt.s32.totalorder %s12905_s1, %s12905_s1 }
  0xfc   : > { %p12908_p3 = pnand %p12906_p2, %p13364_p7  ;;  %p12915_p1 = por %p12914_p0, %p12913_p13 }
  0xfe   : > { %p12909_p12 = pneg %p12908_p3 }
 0x100   : > { %p12916_p4 = pnand %p12915_p1, %p12909_p12 }
 0x102   : > { %12919 = shalt.err (!%p12916_p4)
}
 0x103   : > { %11440 = dma.hbm_to_vmem [thread:$0]  (!%p13352_p5), %s13257_s20, 128, %s13471_s10, [#allocation10]  }
 0x104   : > { %s13144_s23 = smov [#allocation14]   ;;  %s13145_s18 = smov [#allocation17]  }
 0x105   : > { %s834_s28 = sshll.u32 %s13144_s23, 4  ;;  %s866_s8 = sshll.u32 %s13145_s18, 4  ;;  %s835_s28 = int_to_ptr.vmem [resolvable:$true] %s834_s28  ;;  %s13501_s8 = int_to_ptr.vmem [resolvable:$true] %s866_s8 }
 0x106   : > { %s12920_s16 = scalar_lea.hbm %s13267_s4, 256 }
 0x107   : > { %p12921_p6 = scmp.ne.s32.totalorder %s13267_s4, %s12920_s16  ;;  %p12927_p10 = scmp.lt.u32.totalorder %s12920_s16, %s13267_s4 }
 0x109   : > { %p12923_p8 = pnand %p12921_p6, %p13364_p7 }
 0x10b   : > { %p12924_p9 = pneg %p12923_p8 }
 0x10d   : > { %p12929_p11 = pnand %p12927_p10, %p12924_p9 }
 0x10f   : > { %12932 = shalt.err (!%p12929_p11)
}
 0x110   : > { %s12933_s1 = scalar_lea.vmem %s835_s28, 256  ;;  %p12941_p13 = scmp.lt.s32.totalorder %s835_s28, %s835_s28 }
 0x111   : > { %p12934_p2 = scmp.ne.s32.totalorder %s835_s28, %s12933_s1  ;;  %p12942_p0 = scmp.lt.s32.totalorder %s12933_s1, %s12933_s1 }
 0x113   : > { %p12936_p3 = pnand %p12934_p2, %p13364_p7  ;;  %p12943_p1 = por %p12942_p0, %p12941_p13 }
 0x115   : > { %p12937_p12 = pneg %p12936_p3 }
 0x117   : > { %p12944_p4 = pnand %p12943_p1, %p12937_p12 }
 0x119   : > { %12947 = shalt.err (!%p12944_p4)
}
 0x11a   : > { %11446 = dma.hbm_to_vmem [thread:$0]  (!%p13352_p5), %s13267_s4, 256, %s835_s28, [#allocation13], %s13140_s2, %s13140_s2, %s13141_s26  }
 0x11b   : > { %s12948_s10 = scalar_lea.hbm %s13287_s13, 1024 }
 0x11c   : > { %p12949_p6 = scmp.ne.s32.totalorder %s13287_s13, %s12948_s10  ;;  %p12955_p10 = scmp.lt.u32.totalorder %s12948_s10, %s13287_s13 }
 0x11e   : > { %p12951_p8 = pnand %p12949_p6, %p13364_p7 }
 0x120   : > { %p12952_p9 = pneg %p12951_p8 }
 0x122   : > { %p12957_p11 = pnand %p12955_p10, %p12952_p9 }
 0x124   : > { %12960 = shalt.err (!%p12957_p11)
}
 0x125   : > { %s12961_s23 = scalar_lea.vmem %s13501_s8, 1024  ;;  %p12969_p13 = scmp.lt.s32.totalorder %s13501_s8, %s13501_s8 }
 0x126   : > { %p12962_p2 = scmp.ne.s32.totalorder %s13501_s8, %s12961_s23  ;;  %p12970_p0 = scmp.lt.s32.totalorder %s12961_s23, %s12961_s23 }
 0x128   : > { %p12964_p3 = pnand %p12962_p2, %p13364_p7  ;;  %p12971_p1 = por %p12970_p0, %p12969_p13 }
 0x12a   : > { %p12965_p12 = pneg %p12964_p3 }
 0x12c   : > { %p12972_p4 = pnand %p12971_p1, %p12965_p12 }
 0x12e   : > { %12975 = shalt.err (!%p12972_p4)
}
 0x12f   : > { %11452 = dma.hbm_to_vmem [thread:$0]  (!%p13352_p5), %s13287_s13, 1024, %s13501_s8, [#allocation16], %s13140_s2, %s13140_s2, %s13141_s26  }
 0x130   : > { %s13146_s28 = smov [#allocation20]   ;;  %s13147_s16 = smov [#allocation23]  }
 0x131   : > { %s892_s18 = sshll.u32 %s13146_s28, 4  ;;  %s919_s1 = sshll.u32 %s13147_s16, 4  ;;  %s893_s18 = int_to_ptr.vmem [resolvable:$true] %s892_s18  ;;  %s13534_s1 = int_to_ptr.vmem [resolvable:$true] %s919_s1 }
 0x132   : > { %s12976_s10 = scalar_lea.hbm %s13297_s17, 512 }
 0x133   : > { %p12977_p6 = scmp.ne.s32.totalorder %s13297_s17, %s12976_s10  ;;  %p12983_p10 = scmp.lt.u32.totalorder %s12976_s10, %s13297_s17 }
 0x135   : > { %p12979_p8 = pnand %p12977_p6, %p13364_p7 }
 0x137   : > { %p12980_p9 = pneg %p12979_p8 }
 0x139   : > { %p12985_p11 = pnand %p12983_p10, %p12980_p9 }
 0x13b   : > { %12988 = shalt.err (!%p12985_p11)
}
 0x13c   : > { %s12989_s23 = scalar_lea.vmem %s893_s18, 512  ;;  %p12997_p13 = scmp.lt.s32.totalorder %s893_s18, %s893_s18 }
 0x13d   : > { %p12990_p2 = scmp.ne.s32.totalorder %s893_s18, %s12989_s23  ;;  %p12998_p0 = scmp.lt.s32.totalorder %s12989_s23, %s12989_s23 }
 0x13f   : > { %p12992_p3 = pnand %p12990_p2, %p13364_p7  ;;  %p12999_p1 = por %p12998_p0, %p12997_p13 }
 0x141   : > { %p12993_p12 = pneg %p12992_p3 }
 0x143   : > { %p13000_p4 = pnand %p12999_p1, %p12993_p12 }
 0x145   : > { %13003 = shalt.err (!%p13000_p4)
}
 0x146   : > { %s15156_s2 = smov 16   ;;  %s15157_s26 = smov 256  }
 0x147   : > { %11458 = dma.hbm_to_vmem [thread:$0]  (!%p13352_p5), %s13297_s17, 512, %s893_s18, [#allocation19], %s15157_s26, %s15157_s26, %s15156_s2  }
 0x148   : > { %s13004_s8 = scalar_lea.hbm %s13307_s6, 256 }
 0x149   : > { %p13005_p6 = scmp.ne.s32.totalorder %s13307_s6, %s13004_s8  ;;  %p13011_p10 = scmp.lt.u32.totalorder %s13004_s8, %s13307_s6 }
 0x14b   : > { %p13007_p8 = pnand %p13005_p6, %p13364_p7 }
 0x14d   : > { %p13008_p9 = pneg %p13007_p8 }
 0x14f   : > { %p13013_p11 = pnand %p13011_p10, %p13008_p9 }
 0x151   : > { %13016 = shalt.err (!%p13013_p11)
}
 0x152   : > { %s13017_s28 = scalar_lea.vmem %s13534_s1, 256  ;;  %p13025_p13 = scmp.lt.s32.totalorder %s13534_s1, %s13534_s1 }
 0x153   : > { %p13018_p2 = scmp.ne.s32.totalorder %s13534_s1, %s13017_s28  ;;  %p13026_p0 = scmp.lt.s32.totalorder %s13017_s28, %s13017_s28 }
 0x155   : > { %p13020_p3 = pnand %p13018_p2, %p13364_p7  ;;  %p13027_p1 = por %p13026_p0, %p13025_p13 }
 0x157   : > { %p13021_p12 = pneg %p13020_p3 }
 0x159   : > { %p13028_p4 = pnand %p13027_p1, %p13021_p12 }
 0x15b   : > { %13031 = shalt.err (!%p13028_p4)
}
 0x15c   : > { %11464 = dma.hbm_to_vmem [thread:$0]  (!%p13352_p5), %s13307_s6, 256, %s13534_s1, [#allocation22]  }
 0x15d   : > { %s13148_s18 = smov [#allocation24]   ;;  %s13032_s10 = scalar_lea.hbm %s13312_s12, 128 }
 0x15e   : > { %s930_s16 = sshll.u32 %s13148_s18, 4  ;;  %p13033_p6 = scmp.ne.s32.totalorder %s13312_s12, %s13032_s10  ;;  %s931_s16 = int_to_ptr.vmem [resolvable:$true] %s930_s16 }
 0x15f   : > { %p13039_p10 = scmp.lt.u32.totalorder %s13032_s10, %s13312_s12 }
 0x160   : > { %p13035_p8 = pnand %p13033_p6, %p13364_p7 }
 0x162   : > { %p13036_p9 = pneg %p13035_p8 }
 0x164   : > { %p13041_p11 = pnand %p13039_p10, %p13036_p9 }
 0x166   : > { %13044 = shalt.err (!%p13041_p11)
}
 0x167   : > { %s13045_s23 = scalar_lea.vmem %s931_s16, 128  ;;  %p13053_p13 = scmp.lt.s32.totalorder %s931_s16, %s931_s16 }
 0x168   : > { %p13046_p2 = scmp.ne.s32.totalorder %s931_s16, %s13045_s23  ;;  %p13054_p0 = scmp.lt.s32.totalorder %s13045_s23, %s13045_s23 }
 0x16a   : > { %p13048_p3 = pnand %p13046_p2, %p13364_p7  ;;  %p13055_p1 = por %p13054_p0, %p13053_p13 }
 0x16c   : > { %p13049_p12 = pneg %p13048_p3 }
 0x16e   : > { %p13056_p4 = pnand %p13055_p1, %p13049_p12 }
 0x170   : > { %13059 = shalt.err (!%p13056_p4)
}
 0x171   : > { %11467 = dma.hbm_to_vmem [thread:$0]  (!%p13352_p5), %s13312_s12, 128, %s931_s16, [#allocation25]  }
 0x172   : > { %p15158_p6 = scmp.ne.s32.totalorder %s15152_s15, 0 }
 0x173   : > { %p15159_p8 = scmp.eq.s32.totalorder (!%p15158_p6), %s13335_s11, 0 }
 0x174   : > { %957 = sbr.rel (%p15158_p6) target bundleno = 11775 (0x2dff), region = 136 }
 0x17b   : > { %13065 = dma.done.wait (%p15159_p8), [#allocation5], 128   ;;  %p15160_p9 = pmov %p15159_p8 }
 0x17c   : > { %p15161_p7 = pmov %p15159_p8 }
 0x17d   : > { %13067 = vsyncadd (%p15160_p9), [#allocation5], 4294967168 }
 0x17e   : > { %13069 = dma.done.wait (%p15161_p7), [#allocation7], 6176   ;;  %p15162_p10 = pmov %p15161_p7 }
 0x17f   : > { %p15163_p11 = pmov %p15161_p7 }
 0x180   : > { %13071 = vsyncadd (%p15162_p10), [#allocation7], 4294961120 }
 0x181   : > { %13073 = dma.done.wait (%p15163_p11), [#allocation10], 24704   ;;  %p15164_p5 = pmov %p15161_p7 }
 0x183   : > { %13075 = vsyncadd (%p15164_p5), [#allocation10], 4294942592  ;;  %p15165_p2 = pmov %p15164_p5 }
 0x185   : > { %13077 = dma.done.wait (%p15165_p2), [#allocation13], 384   ;;  %p15166_p3 = pmov %p15165_p2 }
 0x186   : > { %p15167_p12 = pmov %p15165_p2 }
 0x187   : > { %13079 = vsyncadd (%p15166_p3), [#allocation13], 4294966912 }
 0x188   : > { %13081 = dma.done.wait (%p15167_p12), [#allocation16], 1536   ;;  %p15168_p13 = pmov %p15165_p2 }
 0x189   : > { %p15169_p0 = pmov %p15165_p2 }
 0x18a   : > { %13083 = vsyncadd (%p15168_p13), [#allocation16], 4294965760 }
 0x18b   : > { %13085 = dma.done.wait (%p15169_p0), [#allocation19], 1280   ;;  %p15170_p1 = pmov %p15169_p0 }
 0x18c   : > { %p15171_p4 = pmov %p15169_p0 }
 0x18d   : > { %13087 = vsyncadd (%p15170_p1), [#allocation19], 4294966016 }
 0x18e   : > { %13089 = dma.done.wait (%p15171_p4), [#allocation22], 768   ;;  %p15172_p6 = pmov %p15169_p0 }
 0x18f   : > { %p15173_p8 = pmov %p15169_p0 }
 0x190   : > { %13091 = vsyncadd (%p15172_p6), [#allocation22], 4294966528 }
 0x191   : > { %13093 = dma.done.wait (%p15173_p8), [#allocation25], 128   ;;  %p15174_p9 = pmov %p15169_p0 }
 0x192   : > { %s15175_s15 = sld [smem:[#allocation37_spill]]  ;;  %p1085_p7 = scmp.lt.s32.totalorder %s13335_s11, 1  ;;  %v1100_v0 = vlaneseq  ;;  %v13149_v1 = vmov 0.0   ;;  %vm13150_vm0 = vmmov 0   ;;  %vm15090_vm1 = vcmask 64512   ;;  %v1458_v50 = vld [vmem:[#allocation4] sm:$0xff] }
 0x193   : > { %13095 = vsyncadd (%p15174_p9), [#allocation25], 4294967168  ;;  %9920 = vmatprep.subr.mxu0 %v13149_v1  ;;  %9925 = vmatprep.subr.mxu1 %v13149_v1  ;;  %s15176_s1 = sld [smem:[#allocation38_spill]]  ;;  %s15177_s2 = sld [smem:[#allocation39_spill]]  ;;  %v13151_v20 = vmov 0   ;;  %vm15094_vm2 = vcmask 1041408  }
 0x194   : > { %s15276_s11 = smov (!%p1085_p7, %s13335_s11), 1  ;;  %v13614_v2 = vshrl.u32 %v1100_v0, 7  ;;  %9922 = vmatprep.mubr.msk.f32.mxu0 %vm13150_vm0, %v13149_v1  ;;  %9927 = vmatprep.mubr.msk.f32.mxu1 %vm13150_vm0, %v13149_v1  ;;  %vm15091_vm3 = vcmask 15360   ;;  %s15086_s26 = smov 23   ;;  %vm15119_vm6 = vcmask 203776   ;;  %vm15116_vm7 = vcmask 195584  }
 0x195   : > { %s11367_s22 = smul.u32 24, %s15276_s11  ;;  %11578 = vset.pattern.permute.xlu0 %v13151_v20  ;;  %11579 = vset.pattern.permute.xlu1 %v13151_v20  ;;  %s15092_s8 = smov 25   ;;  %vm15115_vm8 = vcmask 187392   ;;  %vm1569_vm9 = vcmask 7168   ;;  %vm1601_vm10 = vcmask 1039360   ;;  %vm15114_vm11 = vcmask 859136  }
 0x196   : > { %v13618_v3 = vsub.s32 0, %v13614_v2  ;;  %v13621_v4 = vsub.s32 1, %v13614_v2  ;;  %v13624_v5 = vsub.s32 2, %v13614_v2  ;;  %s15125_s28 = smov 127   ;;  %s15088_s18 = smov 24   ;;  %vm15113_vm12 = vcmask 850944  }
 0x197   : > { %s1089_s0 = scalar_lea.vmem %s13182_s5, %s11367_s22  ;;  %s15178_s16 = sld [smem:[#allocation45_spill]]  ;;  %vm15096_vm13 = vcmask 842752   ;;  %vm15095_vm14 = vcmask 588800  }
 0x198   : > { %v1095_v6 = vld [vmem:[%s1089_s0] sm:$0xff]  ;;  %v1096_v7 = vld [vmem:[%s1089_s0 + $0x8] sm:$0xff]  ;;  %v1097_v8 = vld [vmem:[%s1089_s0 + $0x10] sm:$0xff]  ;;  %s15084_s10 = smov 105   ;;  %s15080_s23 = smov 103  }
 0x199   : > { %v1098_v9 = vld [vmem:[%s15175_s15] sm:$0x7]  ;;  %s15121_s15 = smov 1   ;;  %s15082_s22 = smov 104  }
 0x19a   : > { %v13629_v10 = vrot.slane %v1098_v9, %v13618_v3  ;;  %v13632_v11 = vrot.slane %v1098_v9, %v13621_v4  ;;  %v13635_v12 = vrot.slane %v1098_v9, %v13624_v5  ;;  %v1122_v18 = vld [vmem:[%s15176_s1] sm:$0x3]  ;;  %s15179_s0 = sld [smem:[#allocation44_spill]]  ;;  %s15180_s1 = sld [smem:[#allocation34_spill]] }
 0x19b   : > { %v1198_v24 = vld [vmem:[%s15177_s2] sm:$0xff]  ;;  %s15105_s2 = smov 16   ;;  %s15192_s3 = smov 31  }
 0x19c   : > { %v1115_v13 = vmul.f32 %v13629_v10, %v1095_v6  ;;  %v1116_v14 = vmul.f32 %v13632_v11, %v1096_v7  ;;  %v1117_v15 = vmul.f32 %v13635_v12, %v1097_v8 }
 0x19d   : > { %v1719_v9 = vld [vmem:[%s15178_s16] sm:$0xff] }
 0x19e   : > { %v1118_v16 = vadd.f32 %v1116_v14, %v1115_v13 }
 0x1a0   : > { %v1119_v17 = vadd.f32 %v1118_v16, %v1117_v15 }
 0x1a2   : > { %1120 = vadd.xlane.f32.xlu0 %v1119_v17 }
 0x22f   : > { %v1121_v19 = vpop.xlane.xlu0 %1120 }
 0x230   : > { %9921 = vmatpush3.msra.mxu0 %v1121_v19 }
 0x231   : > { %9923 = vmatmul.mubr.msk.f32.vlgmr.msra.gmra.mrb[0].mxu0 %vm15090_vm1, %v1122_v18  ;;  %9930 = vmatprep.subr.mxu0 %v13149_v1 }
 0x232   : > { %9932 = vmatprep.mubr.msk.f32.mxu0 %vm13150_vm0, %v13149_v1 }
 0x304   : > { %v1193_v21 = vpop.f32.mrb[0].mxu0 }
 0x305   : > { %v13649_v22 = vmul.f32 0.008333334, %v1193_v21  ;;  %v9924_v23 = vpop.f32.mrb[1].mxu0 }
 0x307   : > { %9926 = vmatpush3.msk.msra.mxu1 %vm15094_vm2, %v13649_v22 }
 0x308   : > { %9928 = vmatmul.mubr.msk.f32.vlgmr.msra.gmra.mrb[0].mxu1 %vm15091_vm3, %v1198_v24  ;;  %9935 = vmatprep.subr.mxu1 %v13149_v1 }
 0x309   : > { %9937 = vmatprep.mubr.msk.f32.mxu1 %vm13150_vm0, %v13149_v1 }
 0x3db   : > { %v1273_v25 = vpop.f32.mrb[0].mxu1 }
 0x3dc   : > { %1279 = vperm.xlu0 %11578, %v1273_v25   ;;  %v9929_v26 = vpop.f32.mrb[1].mxu1 }
 0x45b   : > { %v1280_v27 = vpop.permute.xlu0 %1279 }
 0x45c   : > { %v1282_v28 = vsub.f32 %v1095_v6, %v1280_v27  ;;  %v1283_v29 = vsub.f32 %v1096_v7, %v1280_v27  ;;  %v1284_v30 = vsub.f32 %v1097_v8, %v1280_v27  ;;  %v13156_v7 = vmov 0.0|0.0  }
 0x45e   : > { %v1285_v31 = vmul.f32 %v1282_v28, %v13629_v10  ;;  %v1286_v32 = vmul.f32 %v1283_v29, %v13632_v11  ;;  %v1287_v33 = vmul.f32 %v1284_v30, %v13635_v12 }
 0x460   : > { %v1288_v34 = vmul.f32 %v1285_v31, %v1285_v31  ;;  %v1289_v35 = vmul.f32 %v1286_v32, %v1286_v32  ;;  %v1290_v36 = vmul.f32 %v1287_v33, %v1287_v33 }
 0x462   : > { %v1291_v37 = vadd.f32 %v1289_v35, %v1288_v34 }
 0x464   : > { %v1292_v38 = vadd.f32 %v1291_v37, %v1290_v36 }
 0x466   : > { %1293 = vadd.xlane.f32.xlu1 %v1292_v38 }
 0x4f3   : > { %v1294_v39 = vpop.xlane.xlu1 %1293 }
 0x4f4   : > { %9931 = vmatpush3.msra.mxu0 %v1294_v39 }
 0x4f5   : > { %9933 = vmatmul.mubr.msk.f32.vlgmr.msra.gmra.mrb[2].mxu0 %vm15090_vm1, %v1122_v18  ;;  %vm3122_vm1 = vcmask 924672  }
 0x4f6   : > { %1811 = vmatprep.mubr.f32.mxu0 %v13149_v1 }
 0x5c8   : > { %v1361_v40 = vpop.f32.mrb[2].mxu0 }
 0x5c9   : > { %v1365_v41 = vmul.f32 0.008403362, %v1361_v40  ;;  %v9934_v42 = vpop.f32.mrb[3].mxu0 }
 0x5cb   : > { %12580 = vrsqrt.f32 %v1365_v41  ;;  %vm1368_vm4 = vcmp.eq.f32.partialorder %v1365_v41, inf  ;;  %v1371_v45 = vand.u32 2147483648, %v1365_v41  ;;  %vm1370_vm5 = vcmp.eq.f32.partialorder %v1365_v41, 0.0 }
 0x5d5   : > { %v12581_v43 = vpop.eup %12580 }
 0x5d6   : > { %v1367_v44 = vmul.f32 %v12581_v43, %v1365_v41 }
 0x5d8   : > { %v1369_v46 = vsel %vm1368_vm4, %v1365_v41, %v1367_v44 }
 0x5d9   : > { %v13663_v47 = vsel %vm1370_vm5, %v1371_v45, %v1369_v46 }
 0x5da   : > { %9936 = vmatpush3.msk.msra.mxu1 %vm15094_vm2, %v13663_v47  ;;  %vm15120_vm2 = vcmask 908288  }
 0x5db   : > { %9938 = vmatmul.mubr.msk.f32.vlgmr.msra.gmra.mrb[2].mxu1 %vm15091_vm3, %v1198_v24  ;;  %10529 = vmatprep.subr.bf16.mxu1 %v13156_v7  ;;  %vm3134_vm3 = vcmask 916480  }
 0x5dc   : > { %9958 = vmatprep.mubr.msk.f32.mxu1 %vm13150_vm0, %v13149_v1 }
 0x6ae   : > { %v1442_v48 = vpop.f32.mrb[2].mxu1 }
 0x6af   : > { %1448 = vperm.xlu1 %11579, %v1442_v48   ;;  %v9939_v49 = vpop.f32.mrb[3].mxu1 }
 0x6b3   : > { %1461 = vperm.xlu1 %11579, %v1458_v50  }
 0x72e   : > { %v1449_v51 = vpop.permute.xlu1 %1448 }
 0x72f   : > { %12582 = vrcp.f32 %v1449_v51 }
 0x732   : > { %v1462_v59 = vpop.permute.xlu1 %1461 }
 0x739   : > { %v12583_v52 = vpop.eup %12582 }
 0x73a   : > { %v1452_v53 = vmul.f32 %v12583_v52, %v1282_v28  ;;  %v1453_v54 = vmul.f32 %v12583_v52, %v1283_v29  ;;  %v1454_v55 = vmul.f32 %v12583_v52, %v1284_v30 }
 0x73c   : > { %v1455_v56 = vmul.f32 %v1452_v53, %v13629_v10  ;;  %v1456_v57 = vmul.f32 %v1453_v54, %v13632_v11  ;;  %v1457_v58 = vmul.f32 %v1454_v55, %v13635_v12  ;;  %v1721_v10 = vld [vmem:[%s15178_s16 + $0x10] sm:$0xff]  ;;  %v1720_v11 = vld [vmem:[%s15178_s16 + $0x8] sm:$0xff] }
 0x73e   : > { %v13673_v60 = vmul.f32 %v1462_v59, %v1455_v56  ;;  %v13675_v61 = vmul.f32 %v1462_v59, %v1456_v57  ;;  %v13677_v62 = vmul.f32 %v1462_v59, %v1457_v58 }
 0x740   : > { %v11610_v63 = vpack.i.bf16 %v13677_v62, %v13149_v1  ;;  %v11580_v0 = vpack.i.bf16 %v13675_v61, %v13673_v60  ;;  %v11620_v6 = vpack.i.bf16 %v13677_v62, %v13675_v61  ;;  %v11640_v8 = vpack.i.bf16 %v13149_v1, %v13673_v60 }
 0x742   : > { %11611 = vrot.lane.b32.xlu0 %v11610_v63, %s15086_s26  ;;  %11581 = vrot.lane.b32.xlu1 %v11580_v0, %s15092_s8 }
 0x746   : > { %11621 = vrot.lane.b32.xlu0 %v11620_v6, %s15125_s28  ;;  %11586 = vrot.lane.b32.xlu1 %v11580_v0, %s15088_s18 }
 0x74a   : > { %11631 = vrot.lane.b32.xlu0 %v11620_v6, %s15084_s10  ;;  %11591 = vrot.lane.b32.xlu1 %v11610_v63, %s15092_s8 }
 0x74e   : > { %11641 = vrot.lane.b32.xlu0 %v11640_v8, %s15084_s10  ;;  %11596 = vrot.lane.b32.xlu1 %v11610_v63, %s15088_s18 }
 0x752   : > { %1673 = vrot.lane.b32.xlu0 %v13675_v61, %s15080_s23  ;;  %11601 = vrot.lane.b32.xlu1 %v11580_v0, %s15086_s26 }
 0x756   : > { %1671 = vrot.lane.b32.xlu0 %v13673_v60, %s15080_s23  ;;  %11606 = vrot.lane.b32.xlu1 %v11580_v0, %s15121_s15 }
 0x75a   : > { %1724 = vperm.xlu0 %11578, %v1719_v9   ;;  %11616 = vrot.lane.b32.xlu1 %v11610_v63, %s15121_s15 }
 0x75e   : > { %1734 = vperm.xlu0 %11578, %v1721_v10   ;;  %11626 = vrot.lane.b32.xlu1 %v11640_v8, %s15125_s28 }
 0x762   : > { %11636 = vrot.lane.b32.xlu1 %v11620_v6, %s15082_s22 }
 0x766   : > { %11646 = vrot.lane.b32.xlu1 %v11640_v8, %s15082_s22 }
 0x76a   : > { %1675 = vrot.lane.b32.xlu1 %v13677_v62, %s15080_s23 }
 0x76e   : > { %1677 = vrot.lane.b32.xlu1 %v13149_v1, %s15080_s23 }
 0x772   : > { %1729 = vperm.xlu1 %11579, %v1720_v11  }
 0x7b4   : > { %v11582_v12 = vpop.permute.xlu1 %11581  ;;  %v11612_v25 = vpop.permute.xlu0 %11611 }
 0x7b5   : > { %v11584_v13 = vunpack.i.h.bf16 %v11582_v12  ;;  %v11583_v14 = vunpack.i.l.bf16 %v11582_v12  ;;  %v11614_v50 = vunpack.i.h.bf16 %v11612_v25  ;;  %v11613_v51 = vunpack.i.l.bf16 %v11612_v25 }
 0x7b7   : > { %v1493_v18 = vsel %vm15119_vm6, %v11583_v14, %v11584_v13 }
 0x7b8   : > { %v11587_v15 = vpop.permute.xlu1 %11586  ;;  %v11622_v36 = vpop.permute.xlu0 %11621 }
 0x7b9   : > { %v11589_v16 = vunpack.i.h.bf16 %v11587_v15  ;;  %v11588_v17 = vunpack.i.l.bf16 %v11587_v15  ;;  %v11624_v42 = vunpack.i.h.bf16 %v11622_v36  ;;  %v11623_v43 = vunpack.i.l.bf16 %v11622_v36 }
 0x7bb   : > { %v1519_v19 = vsel %vm15116_vm7, %v11588_v17, %v11589_v16  ;;  %v1603_v54 = vsel %vm1601_vm10, %v11623_v43, %v11624_v42 }
 0x7bc   : > { %v11592_v20 = vpop.permute.xlu1 %11591  ;;  %v10513_v21 = vpack.c.bf16 %v1519_v19, %v1493_v18  ;;  %v11632_v46 = vpop.permute.xlu0 %11631  ;;  %v10521_v9 = vpack.c.bf16 %v1603_v54, %v13675_v61 }
 0x7bd   : > { %v11594_v23 = vunpack.i.h.bf16 %v11592_v20  ;;  %v11593_v24 = vunpack.i.l.bf16 %v11592_v20  ;;  %v11634_v11 = vunpack.i.h.bf16 %v11632_v46  ;;  %v11633_v12 = vunpack.i.l.bf16 %v11632_v46 }
 0x7be   : > { %10514 = vmatprep.subr.bf16.mxu0 %v10513_v21 }
 0x7bf   : > { %v1492_v29 = vsel %vm15119_vm6, %v11593_v24, %v11583_v14  ;;  %v1494_v30 = vsel %vm15119_vm6, %v11584_v13, %v11594_v23  ;;  %v1629_v21 = vsel %vm15114_vm11, %v11633_v12, %v11634_v11 }
 0x7c0   : > { %v11597_v26 = vpop.permute.xlu1 %11596  ;;  %v11642_v10 = vpop.permute.xlu0 %11641 }
 0x7c1   : > { %v11599_v27 = vunpack.i.h.bf16 %v11597_v26  ;;  %v11598_v28 = vunpack.i.l.bf16 %v11597_v26  ;;  %v11644_v19 = vunpack.i.h.bf16 %v11642_v10  ;;  %v11643_v20 = vunpack.i.l.bf16 %v11642_v10 }
 0x7c3   : > { %v1518_v31 = vsel %vm15116_vm7, %v11598_v28, %v11588_v17  ;;  %v1520_v32 = vsel %vm15116_vm7, %v11589_v16, %v11599_v27  ;;  %v1628_v28 = vsel %vm15114_vm11, %v11643_v20, %v11633_v12 }
 0x7c4   : > { %v11602_v33 = vpop.permute.xlu1 %11601  ;;  %v10515_v34 = vpack.c.bf16 %v1518_v31, %v1492_v29  ;;  %v10530_v35 = vpack.c.bf16 %v1520_v32, %v1494_v30  ;;  %v1674_v24 = vpop.permute.xlu0 %1673 }
 0x7c5   : > { %v11604_v37 = vunpack.i.h.bf16 %v11602_v33  ;;  %v11603_v38 = vunpack.i.l.bf16 %v11602_v33 }
 0x7c6   : > { %10516 = vmatpush1.bf16.msra.mxu0 %v10515_v34  ;;  %10531 = vmatpush3.bf16.msra.mxu1 %v10530_v35 }
 0x7c7   : > { %10532 = vmatprep.subr.bf16.mxu1 %v13156_v7  ;;  %v1545_v44 = vsel %vm15115_vm8, %v11603_v38, %v11604_v37  ;;  %v1546_v55 = vsel %vm15115_vm8, %v11604_v37, %v11614_v50  ;;  %v1544_v56 = vsel %vm15115_vm8, %v11613_v51, %v11603_v38  ;;  %v1689_v37 = vld [vmem:[%s15179_s0] sm:$0xff] }
 0x7c8   : > { %v11607_v39 = vpop.permute.xlu1 %11606  ;;  %v1672_v35 = vpop.permute.xlu0 %1671 }
 0x7c9   : > { %v11609_v40 = vunpack.i.h.bf16 %v11607_v39  ;;  %v11608_v41 = vunpack.i.l.bf16 %v11607_v39  ;;  %v1680_v38 = vsel %vm15096_vm13, %v1672_v35, %v1674_v24 }
 0x7cb   : > { %v1571_v45 = vsel %vm1569_vm9, %v11608_v41, %v11609_v40 }
 0x7cc   : > { %v11617_v48 = vpop.permute.xlu1 %11616  ;;  %v10517_v49 = vpack.c.bf16 %v1571_v45, %v1545_v44 }
 0x7cd   : > { %v11619_v52 = vunpack.i.h.bf16 %v11617_v48  ;;  %v11618_v53 = vunpack.i.l.bf16 %v11617_v48 }
 0x7ce   : > { %10518 = vmatprep.subr.bf16.mxu0 %v10517_v49 }
 0x7cf   : > { %v1570_v57 = vsel %vm1569_vm9, %v11618_v53, %v11608_v41  ;;  %v1572_v58 = vsel %vm1569_vm9, %v11609_v40, %v11619_v52  ;;  %v1690_v40 = vld [vmem:[%s15179_s0 + $0x8] sm:$0xff]  ;;  %v1691_v41 = vld [vmem:[%s15179_s0 + $0x10] sm:$0xff]  ;;  %s15188_s0 = smov 1  }
 0x7d0   : > { %v11627_v59 = vpop.permute.xlu1 %11626  ;;  %v10519_v63 = vpack.c.bf16 %v1570_v57, %v1544_v56  ;;  %v10533_v0 = vpack.c.bf16 %v1572_v58, %v1546_v55 }
 0x7d1   : > { %v11629_v6 = vunpack.i.h.bf16 %v11627_v59  ;;  %v11628_v8 = vunpack.i.l.bf16 %v11627_v59 }
 0x7d2   : > { %10520 = vmatpush1.bf16.msra.mxu0 %v10519_v63  ;;  %10534 = vmatpush3.bf16.msra.mxu1 %v10533_v0 }
 0x7d3   : > { %v1604_v13 = vsel %vm1601_vm10, %v11624_v42, %v11629_v6  ;;  %v1602_v14 = vsel %vm1601_vm10, %v11628_v8, %v11623_v43  ;;  %10522 = vmatprep.subr.bf16.mxu0 %v10521_v9  ;;  %10535 = vmatprep.subr.bf16.mxu1 %v13156_v7 }
 0x7d4   : > { %v11637_v15 = vpop.permute.xlu1 %11636  ;;  %v10523_v16 = vpack.c.bf16 %v1602_v14, %v13673_v60  ;;  %v10536_v17 = vpack.c.bf16 %v1604_v13, %v13677_v62  ;;  %v1630_v62 = vsel %vm15114_vm11, %v11634_v11, %v11644_v19 }
 0x7d5   : > { %v11639_v61 = vunpack.i.h.bf16 %v11637_v15  ;;  %v11638_v18 = vunpack.i.l.bf16 %v11637_v15 }
 0x7d6   : > { %10524 = vmatpush1.bf16.msra.mxu0 %v10523_v16  ;;  %10537 = vmatpush3.bf16.msra.mxu1 %v10536_v17 }
 0x7d7   : > { %v1655_v23 = vsel %vm15113_vm12, %v11638_v18, %v11639_v61  ;;  %10538 = vmatprep.subr.bf16.mxu1 %v13156_v7 }
 0x7d8   : > { %v11647_v25 = vpop.permute.xlu1 %11646  ;;  %v10525_v26 = vpack.c.bf16 %v1655_v23, %v1629_v21 }
 0x7d9   : > { %v11649_v27 = vunpack.i.h.bf16 %v11647_v25  ;;  %v11648_v60 = vunpack.i.l.bf16 %v11647_v25  ;;  %v1725_v42 = vpop.permute.xlu0 %1724 }
 0x7da   : > { %10526 = vmatprep.subr.bf16.mxu0 %v10525_v26 }
 0x7db   : > { %v1654_v29 = vsel %vm15113_vm12, %v11648_v60, %v11638_v18  ;;  %v1656_v30 = vsel %vm15113_vm12, %v11639_v61, %v11649_v27 }
 0x7dc   : > { %v1676_v31 = vpop.permute.xlu1 %1675  ;;  %v10527_v32 = vpack.c.bf16 %v1654_v29, %v1628_v28  ;;  %v10539_v33 = vpack.c.bf16 %v1656_v30, %v1630_v62 }
 0x7dd   : > { %v1681_v34 = vsel %vm15096_vm13, %v1674_v24, %v1676_v31  ;;  %v1735_v19 = vpop.permute.xlu0 %1734 }
 0x7de   : > { %10528 = vmatpush1.bf16.msra.mxu0 %v10527_v32  ;;  %10540 = vmatpush3.bf16.msra.mxu1 %v10539_v33 }
 0x7df   : > { %1763 = vmatprep.subr.mxu0 %v1681_v34  ;;  %9956 = vmatprep.subr.mxu1 %v13149_v1 }
 0x7e0   : > { %v1678_v36 = vpop.permute.xlu1 %1677 }
 0x7e1   : > { %v1682_v39 = vsel %vm15096_vm13, %v1676_v31, %v1678_v36 }
 0x7e2   : > { %1764 = vmatpush1.msra.mxu0 %v1680_v38  ;;  %9957 = vmatpush3.msra.mxu1 %v1682_v39 }
 0x7e3   : > { %9407 = vmatmul.mubr.msk.f32.vlgmr.msra.gmra.mrb[4].mxu0 %vm15095_vm14, %v1689_v37  ;;  %9959 = vmatmul.mubr.msk.f32.vlgmr.msra.gmra.mrb[4].mxu1 %vm15095_vm14, %v1689_v37 }
 0x7e4   : > { %1817 = vmatprep.mubr.f32.mxu0 %v13149_v1  ;;  %9961 = vmatprep.mubr.msk.f32.mxu1 %vm13150_vm0, %v13149_v1 }
 0x7e5   : > { %10557 = vmatprep.subr.bf16.mxu1 %v13156_v7 }
 0x7e7   : > { %9408 = vmatmul.mubr.msk.f32.gmra.mrb[6].mxu0 %vm15095_vm14, %v1690_v40  ;;  %9962 = vmatmul.mubr.msk.f32.gmra.mrb[6].mxu1 %vm15095_vm14, %v1690_v40 }
 0x7e8   : > { %1823 = vmatprep.mubr.f32.mxu0 %v13149_v1  ;;  %9964 = vmatprep.mubr.msk.f32.mxu1 %vm13150_vm0, %v13149_v1 }
 0x7eb   : > { %9409 = vmatmul.mubr.msk.f32.gmra.mrb[8].mxu0 %vm15095_vm14, %v1691_v41  ;;  %9965 = vmatmul.mubr.msk.f32.gmra.mrb[8].mxu1 %vm15095_vm14, %v1691_v41 }
 0x7ec   : > { %2287 = vmatprep.mubr.f32.mxu0 %v13149_v1  ;;  %9985 = vmatprep.mubr.msk.f32.mxu1 %vm13150_vm0, %v13149_v1 }
 0x7f1   : > { %v1730_v51 = vpop.permute.xlu1 %1729 }
 0x8b6   : > { %v1813_v43 = vpop.f32.mrb[4].mxu0  ;;  %v1896_v44 = vpop.f32.mrb[4].mxu1 }
 0x8b7   : > { %v1814_v45 = vadd.f32 %v1813_v43, %v1725_v42  ;;  %v1897_v46 = vadd.f32 %v1896_v44, %v1725_v42  ;;  %v1815_v48 = vpop.f32.mrb[5].mxu0  ;;  %v9960_v49 = vpop.f32.mrb[5].mxu1  ;;  %v1958_v44 = vld [vmem:[%s15180_s1] sm:$0x7] }
 0x8b8   : > { %v1816_v50 = vadd.f32 %v1815_v48, %v1725_v42  ;;  %v1971_v49 = vrot.slane %v1958_v44, %v13624_v5 }
 0x8b9   : > { %v1928_v52 = vsub.f32 0.0, %v1814_v45  ;;  %v1930_v53 = vsub.f32 0.0, %v1897_v46 }
 0x8ba   : > { %v1929_v54 = vsub.f32 0.0, %v1816_v50  ;;  %v1819_v55 = vpop.f32.mrb[6].mxu0  ;;  %v1901_v56 = vpop.f32.mrb[6].mxu1 }
 0x8bb   : > { %v1931_v57 = vmul.f32 1.442695, %v1928_v52  ;;  %v1935_v58 = vmul.f32 1.442695, %v1930_v53  ;;  %v1820_v59 = vadd.f32 %v1819_v55, %v1730_v51  ;;  %v1902_v63 = vadd.f32 %v1901_v56, %v1730_v51  ;;  %v1821_v0 = vpop.f32.mrb[7].mxu0  ;;  %v9963_v6 = vpop.f32.mrb[7].mxu1 }
 0x8bc   : > { %v1933_v8 = vmul.f32 1.442695, %v1929_v54  ;;  %v1822_v9 = vadd.f32 %v1821_v0, %v1730_v51  ;;  %v1963_v56 = vrot.slane %v1958_v44, %v13618_v3 }
 0x8bd   : > { %12584 = vpow2.f32 %v1931_v57  ;;  %v1910_v10 = vsub.f32 0.0, %v1820_v59  ;;  %v1912_v11 = vsub.f32 0.0, %v1902_v63  ;;  %v1967_v57 = vrot.slane %v1958_v44, %v13621_v4 }
 0x8be   : > { %12586 = vpow2.f32 %v1935_v58  ;;  %v1911_v12 = vsub.f32 0.0, %v1822_v9  ;;  %v1825_v13 = vpop.f32.mrb[8].mxu0  ;;  %v1906_v14 = vpop.f32.mrb[8].mxu1 }
 0x8bf   : > { %12588 = vpow2.f32 %v1933_v8  ;;  %v1913_v15 = vmul.f32 1.442695, %v1910_v10  ;;  %v1827_v16 = vpop.f32.mrb[9].mxu0  ;;  %v9966_v17 = vpop.f32.mrb[9].mxu1  ;;  %v1917_v61 = vmul.f32 1.442695, %v1912_v11  ;;  %v1826_v20 = vadd.f32 %v1825_v13, %v1735_v19 }
 0x8c0   : > { %v1915_v18 = vmul.f32 1.442695, %v1911_v12  ;;  %v1907_v21 = vadd.f32 %v1906_v14, %v1735_v19  ;;  %v1828_v23 = vadd.f32 %v1827_v16, %v1735_v19 }
 0x8c1   : > { %12590 = vpow2.f32 %v1913_v15 }
 0x8c2   : > { %12592 = vpow2.f32 %v1917_v61 }
 0x8c3   : > { %12594 = vpow2.f32 %v1915_v18 }
 0x8c4   : > { %12596 = vtanh.f32 %v1826_v20 }
 0x8c5   : > { %12598 = vtanh.f32 %v1907_v21 }
 0x8c6   : > { %12600 = vtanh.f32 %v1828_v23 }
 0x8c7   : > { %v12585_v24 = vpop.eup %12584 }
 0x8c8   : > { %v12587_v25 = vpop.eup %12586  ;;  %v1937_v26 = vadd.f32 1.0, %v12585_v24 }
 0x8c9   : > { %v12589_v27 = vpop.eup %12588  ;;  %v1939_v60 = vadd.f32 1.0, %v12587_v25 }
 0x8ca   : > { %12602 = vrcp.f32 %v1937_v26  ;;  %v1938_v62 = vadd.f32 1.0, %v12589_v27 }
 0x8cb   : > { %12604 = vrcp.f32 %v1939_v60  ;;  %v12591_v28 = vpop.eup %12590 }
 0x8cc   : > { %12606 = vrcp.f32 %v1938_v62  ;;  %v12593_v29 = vpop.eup %12592  ;;  %v1919_v31 = vadd.f32 1.0, %v12591_v28 }
 0x8cd   : > { %v12595_v30 = vpop.eup %12594  ;;  %v1921_v33 = vadd.f32 1.0, %v12593_v29 }
 0x8ce   : > { %v12597_v32 = vpop.eup %12596  ;;  %v1920_v35 = vadd.f32 1.0, %v12595_v30  ;;  %12608 = vrcp.f32 %v1919_v31 }
 0x8cf   : > { %v12599_v34 = vpop.eup %12598  ;;  %12610 = vrcp.f32 %v1921_v33 }
 0x8d0   : > { %v12601_v36 = vpop.eup %12600  ;;  %12612 = vrcp.f32 %v1920_v35 }
 0x8d4   : > { %v12603_v37 = vpop.eup %12602 }
 0x8d5   : > { %v12605_v38 = vpop.eup %12604  ;;  %v1949_v39 = vmul.f32 %v12603_v37, %v12597_v32 }
 0x8d6   : > { %v12607_v40 = vpop.eup %12606  ;;  %v1951_v41 = vmul.f32 %v12605_v38, %v12599_v34 }
 0x8d7   : > { %12614 = vtanh.f32 %v1949_v39  ;;  %v1950_v42 = vmul.f32 %v12607_v40, %v12601_v36 }
 0x8d8   : > { %12616 = vtanh.f32 %v1951_v41  ;;  %v12609_v43 = vpop.eup %12608 }
 0x8d9   : > { %12618 = vtanh.f32 %v1950_v42  ;;  %v12611_v45 = vpop.eup %12610 }
 0x8da   : > { %v12613_v46 = vpop.eup %12612 }
 0x8e1   : > { %v12615_v48 = vpop.eup %12614 }
 0x8e2   : > { %v12617_v50 = vpop.eup %12616  ;;  %v1955_v51 = vmul.f32 %v12615_v48, %v12609_v43 }
 0x8e3   : > { %v12619_v52 = vpop.eup %12618  ;;  %v1957_v53 = vmul.f32 %v12617_v50, %v12611_v45 }
 0x8e4   : > { %v1956_v54 = vmul.f32 %v12619_v52, %v12613_v46  ;;  %v13773_v59 = vmul.f32 %v1963_v56, %v1955_v51 }
 0x8e5   : > { %v13765_v55 = vmul.f32 %v1971_v49, %v1957_v53 }
 0x8e6   : > { %v13775_v63 = vmul.f32 %v1967_v57, %v1956_v54  ;;  %v11690_v6 = vpack.i.bf16 %v13149_v1, %v13773_v59 }
 0x8e7   : > { %v11655_v58 = vpack.i.bf16 %v13765_v55, %v13149_v1 }
 0x8e8   : > { %v11675_v0 = vpack.i.bf16 %v13775_v63, %v13773_v59  ;;  %v11710_v8 = vpack.i.bf16 %v13765_v55, %v13775_v63 }
 0x8e9   : > { %11656 = vrot.lane.b32.xlu0 %v11655_v58, %s15088_s18  ;;  %11651 = vrot.lane.b32.xlu1 %v11655_v58, %s15092_s8 }
 0x8ed   : > { %11666 = vrot.lane.b32.xlu0 %v11655_v58, %s15121_s15  ;;  %11661 = vrot.lane.b32.xlu1 %v11655_v58, %s15086_s26 }
 0x8f1   : > { %11676 = vrot.lane.b32.xlu0 %v11675_v0, %s15088_s18  ;;  %11671 = vrot.lane.b32.xlu1 %v11675_v0, %s15092_s8 }
 0x8f5   : > { %11686 = vrot.lane.b32.xlu0 %v11675_v0, %s15121_s15  ;;  %11681 = vrot.lane.b32.xlu1 %v11675_v0, %s15086_s26 }
 0x8f9   : > { %11691 = vrot.lane.b32.xlu0 %v11690_v6, %s15125_s28  ;;  %11696 = vrot.lane.b32.xlu1 %v11690_v6, %s15084_s10 }
 0x8fd   : > { %11711 = vrot.lane.b32.xlu0 %v11710_v8, %s15082_s22  ;;  %11701 = vrot.lane.b32.xlu1 %v11710_v8, %s15125_s28 }
 0x901   : > { %11716 = vrot.lane.b32.xlu0 %v11690_v6, %s15082_s22  ;;  %11706 = vrot.lane.b32.xlu1 %v11710_v8, %s15084_s10 }
 0x905   : > { %2179 = vrot.lane.b32.xlu0 %v13765_v55, %s15080_s23  ;;  %2177 = vrot.lane.b32.xlu1 %v13775_v63, %s15080_s23 }
 0x909   : > { %2181 = vrot.lane.b32.xlu0 %v13149_v1, %s15080_s23  ;;  %2175 = vrot.lane.b32.xlu1 %v13773_v59, %s15080_s23 }
 0x95b   : > { %v11657_v9 = vpop.permute.xlu0 %11656  ;;  %v11652_v10 = vpop.permute.xlu1 %11651 }
 0x95c   : > { %v11659_v13 = vunpack.i.h.bf16 %v11657_v9  ;;  %v11658_v14 = vunpack.i.l.bf16 %v11657_v9  ;;  %v11654_v15 = vunpack.i.h.bf16 %v11652_v10  ;;  %v11653_v16 = vunpack.i.l.bf16 %v11652_v10 }
 0x95f   : > { %v11667_v11 = vpop.permute.xlu0 %11666  ;;  %v11662_v12 = vpop.permute.xlu1 %11661 }
 0x960   : > { %v11669_v23 = vunpack.i.h.bf16 %v11667_v11  ;;  %v11668_v24 = vunpack.i.l.bf16 %v11667_v11  ;;  %v11664_v25 = vunpack.i.h.bf16 %v11662_v12  ;;  %v11663_v26 = vunpack.i.l.bf16 %v11662_v12 }
 0x963   : > { %v11677_v17 = vpop.permute.xlu0 %11676  ;;  %v11672_v61 = vpop.permute.xlu1 %11671 }
 0x964   : > { %v11679_v18 = vunpack.i.h.bf16 %v11677_v17  ;;  %v11678_v19 = vunpack.i.l.bf16 %v11677_v17  ;;  %v11674_v20 = vunpack.i.h.bf16 %v11672_v61  ;;  %v11673_v21 = vunpack.i.l.bf16 %v11672_v61 }
 0x966   : > { %v2029_v27 = vsel %vm15116_vm7, %v11679_v18, %v11659_v13  ;;  %v2027_v60 = vsel %vm15116_vm7, %v11658_v14, %v11678_v19  ;;  %v2004_v62 = vsel %vm15119_vm6, %v11674_v20, %v11654_v15  ;;  %v2002_v28 = vsel %vm15119_vm6, %v11653_v16, %v11673_v21 }
 0x967   : > { %v11687_v29 = vpop.permute.xlu0 %11686  ;;  %v11682_v30 = vpop.permute.xlu1 %11681  ;;  %v2003_v31 = vsel %vm15119_vm6, %v11673_v21, %v11674_v20  ;;  %v2028_v32 = vsel %vm15116_vm7, %v11678_v19, %v11679_v18  ;;  %v10558_v33 = vpack.c.bf16 %v2029_v27, %v2004_v62  ;;  %v10543_v34 = vpack.c.bf16 %v2027_v60, %v2002_v28 }
 0x968   : > { %v11689_v35 = vunpack.i.h.bf16 %v11687_v29  ;;  %v11688_v36 = vunpack.i.l.bf16 %v11687_v29  ;;  %v11684_v37 = vunpack.i.h.bf16 %v11682_v30  ;;  %v11683_v38 = vunpack.i.l.bf16 %v11682_v30 }
 0x969   : > { %v10541_v39 = vpack.c.bf16 %v2028_v32, %v2003_v31  ;;  %10559 = vmatpush3.bf16.msra.mxu1 %v10558_v33  ;;  %v2192_v33 = vld [vmem:[#allocation11] sm:$0xff] }
 0x96a   : > { %v2079_v40 = vsel %vm1569_vm9, %v11689_v35, %v11669_v23  ;;  %v2077_v41 = vsel %vm1569_vm9, %v11668_v24, %v11688_v36  ;;  %v2054_v42 = vsel %vm15115_vm8, %v11684_v37, %v11664_v25  ;;  %v2052_v43 = vsel %vm15115_vm8, %v11663_v26, %v11683_v38  ;;  %10560 = vmatprep.subr.bf16.mxu1 %v13156_v7 }
 0x96b   : > { %10542 = vmatprep.subr.bf16.mxu0 %v10541_v39  ;;  %v11692_v44 = vpop.permute.xlu0 %11691  ;;  %v11697_v45 = vpop.permute.xlu1 %11696  ;;  %v2053_v46 = vsel %vm15115_vm8, %v11683_v38, %v11684_v37  ;;  %v2078_v48 = vsel %vm1569_vm9, %v11688_v36, %v11689_v35  ;;  %v10561_v49 = vpack.c.bf16 %v2079_v40, %v2054_v42  ;;  %v10547_v50 = vpack.c.bf16 %v2077_v41, %v2052_v43 }
 0x96c   : > { %10544 = vmatpush1.bf16.msra.mxu0 %v10543_v34  ;;  %v10545_v51 = vpack.c.bf16 %v2078_v48, %v2053_v46  ;;  %v11694_v54 = vunpack.i.h.bf16 %v11692_v44  ;;  %v11693_v56 = vunpack.i.l.bf16 %v11692_v44  ;;  %v11699_v0 = vunpack.i.h.bf16 %v11697_v45  ;;  %v2364_v34 = vld [vmem:[%s15180_s1] sm:$0x7] }
 0x96d   : > { %10562 = vmatpush3.bf16.msra.mxu1 %v10561_v49  ;;  %v11698_v6 = vunpack.i.l.bf16 %v11697_v45  ;;  %v2369_v35 = vrot.slane %v2364_v34, %v13618_v3  ;;  %v2373_v36 = vrot.slane %v2364_v34, %v13621_v4  ;;  %v2377_v38 = vrot.slane %v2364_v34, %v13624_v5 }
 0x96e   : > { %10563 = vmatprep.subr.bf16.mxu1 %v13156_v7  ;;  %10546 = vmatprep.subr.bf16.mxu0 %v10545_v51 }
 0x96f   : > { %v11712_v52 = vpop.permute.xlu0 %11711  ;;  %v11702_v53 = vpop.permute.xlu1 %11701 }
 0x970   : > { %10548 = vmatpush1.bf16.msra.mxu0 %v10547_v50  ;;  %v11704_v57 = vunpack.i.h.bf16 %v11702_v53  ;;  %v11703_v58 = vunpack.i.l.bf16 %v11702_v53  ;;  %v11714_v8 = vunpack.i.h.bf16 %v11712_v52  ;;  %v11713_v12 = vunpack.i.l.bf16 %v11712_v52 }
 0x972   : > { %v2110_v9 = vsel %vm1601_vm10, %v11704_v57, %v11694_v54  ;;  %v2108_v10 = vsel %vm1601_vm10, %v11693_v56, %v11703_v58  ;;  %v2109_v11 = vsel %vm1601_vm10, %v11703_v58, %v11704_v57 }
 0x973   : > { %v11717_v13 = vpop.permute.xlu0 %11716  ;;  %v11707_v14 = vpop.permute.xlu1 %11706  ;;  %v10549_v15 = vpack.c.bf16 %v2109_v11, %v13775_v63  ;;  %v10564_v16 = vpack.c.bf16 %v2110_v9, %v13765_v55  ;;  %v10551_v17 = vpack.c.bf16 %v2108_v10, %v13773_v59  ;;  %v2159_v59 = vsel %vm15113_vm12, %v11713_v12, %v11714_v8 }
 0x974   : > { %v11719_v61 = vunpack.i.h.bf16 %v11717_v13  ;;  %v11718_v18 = vunpack.i.l.bf16 %v11717_v13  ;;  %v11709_v19 = vunpack.i.h.bf16 %v11707_v14  ;;  %v11708_v20 = vunpack.i.l.bf16 %v11707_v14 }
 0x975   : > { %10550 = vmatprep.subr.bf16.mxu0 %v10549_v15  ;;  %10565 = vmatpush3.bf16.msra.mxu1 %v10564_v16 }
 0x976   : > { %v2158_v21 = vsel %vm15113_vm12, %v11718_v18, %v11713_v12  ;;  %v2160_v23 = vsel %vm15113_vm12, %v11714_v8, %v11719_v61  ;;  %v2133_v24 = vsel %vm15114_vm11, %v11698_v6, %v11708_v20  ;;  %v2135_v25 = vsel %vm15114_vm11, %v11709_v19, %v11699_v0  ;;  %10552 = vmatpush1.bf16.msra.mxu0 %v10551_v17 }
 0x977   : > { %v2180_v63 = vpop.permute.xlu0 %2179  ;;  %v2178_v26 = vpop.permute.xlu1 %2177  ;;  %10566 = vmatprep.subr.bf16.mxu1 %v13156_v7  ;;  %v2134_v55 = vsel %vm15114_vm11, %v11708_v20, %v11709_v19  ;;  %v10567_v27 = vpack.c.bf16 %v2160_v23, %v2135_v25  ;;  %v10555_v60 = vpack.c.bf16 %v2158_v21, %v2133_v24 }
 0x978   : > { %v10553_v62 = vpack.c.bf16 %v2159_v59, %v2134_v55  ;;  %v2184_v30 = vsel %vm15096_vm13, %v2178_v26, %v2180_v63 }
 0x979   : > { %10568 = vmatpush3.bf16.msra.mxu1 %v10567_v27 }
 0x97a   : > { %10554 = vmatprep.subr.bf16.mxu0 %v10553_v62  ;;  %9983 = vmatprep.subr.mxu1 %v13149_v1 }
 0x97b   : > { %10556 = vmatpush1.bf16.msra.mxu0 %v10555_v60  ;;  %v2182_v28 = vpop.permute.xlu0 %2181  ;;  %v2176_v29 = vpop.permute.xlu1 %2175 }
 0x97c   : > { %v2185_v31 = vsel %vm15096_vm13, %v2180_v63, %v2182_v28  ;;  %v2183_v32 = vsel %vm15096_vm13, %v2176_v29, %v2178_v26  ;;  %2239 = vmatprep.subr.mxu0 %v2184_v30 }
 0x97d   : > { %9984 = vmatpush3.msra.mxu1 %v2185_v31 }
 0x97e   : > { %9986 = vmatmul.mubr.msk.f32.vlgmr.msra.gmra.mrb[10].mxu1 %vm15095_vm14, %v2192_v33  ;;  %10585 = vmatprep.subr.bf16.mxu1 %v13156_v7 }
 0x97f   : > { %2240 = vmatpush1.msra.mxu0 %v2183_v32  ;;  %10006 = vmatprep.mubr.msk.f32.mxu1 %vm13150_vm0, %v13149_v1 }
 0x980   : > { %9413 = vmatmul.mubr.msk.f32.vlgmr.msra.gmra.mrb[10].mxu0 %vm15095_vm14, %v2192_v33 }
 0x981   : > { %2729 = vmatprep.mubr.f32.mxu0 %v13149_v1 }
 0xa51   : > { %v2360_v37 = vpop.f32.mrb[10].mxu1 }
 0xa52   : > { %v9987_v39 = vpop.f32.mrb[11].mxu1  ;;  %v2383_v44 = vmul.f32 %v2377_v38, %v2360_v37 }
 0xa53   : > { %v2289_v40 = vpop.f32.mrb[10].mxu0 }
 0xa54   : > { %v2381_v41 = vmul.f32 %v2369_v35, %v2289_v40  ;;  %v2291_v42 = vpop.f32.mrb[11].mxu0 }
 0xa55   : > { %v2382_v43 = vmul.f32 %v2373_v36, %v2291_v42 }
 0xa57   : > { %v2384_v45 = vadd.f32 %v2382_v43, %v2381_v41 }
 0xa59   : > { %v2385_v46 = vadd.f32 %v2384_v45, %v2383_v44 }
 0xa5b   : > { %2386 = vadd.xlane.f32.xlu1 %v2385_v46 }
 0xae8   : > { %v2387_v48 = vpop.xlane.xlu1 %2386 }
 0xae9   : > { %v2388_v49 = vmul.f32 0.00390625, %v2387_v48 }
 0xaeb   : > { %v2389_v50 = vsub.f32 %v2289_v40, %v2388_v49  ;;  %v2390_v51 = vsub.f32 %v2291_v42, %v2388_v49  ;;  %v2391_v52 = vsub.f32 %v2360_v37, %v2388_v49 }
 0xaed   : > { %v2392_v53 = vmul.f32 %v2389_v50, %v2369_v35  ;;  %v2393_v54 = vmul.f32 %v2390_v51, %v2373_v36  ;;  %v2394_v56 = vmul.f32 %v2391_v52, %v2377_v38 }
 0xaef   : > { %v2395_v57 = vmul.f32 %v2392_v53, %v2392_v53  ;;  %v2396_v58 = vmul.f32 %v2393_v54, %v2393_v54  ;;  %v2397_v0 = vmul.f32 %v2394_v56, %v2394_v56 }
 0xaf1   : > { %v2398_v6 = vadd.f32 %v2396_v58, %v2395_v57 }
 0xaf3   : > { %v2399_v8 = vadd.f32 %v2398_v6, %v2397_v0 }
 0xaf5   : > { %2400 = vadd.xlane.f32.xlu0 %v2399_v8 }
 0xb82   : > { %v2401_v9 = vpop.xlane.xlu0 %2400 }
 0xb83   : > { %v2402_v10 = vmul.f32 0.00390625, %v2401_v9 }
 0xb85   : > { %v2403_v11 = vadd.f32 1e-05, %v2402_v10 }
 0xb87   : > { %12620 = vrsqrt.f32 %v2403_v11 }
 0xb91   : > { %v12621_v12 = vpop.eup %12620 }
 0xb92   : > { %v2405_v13 = vmul.f32 %v12621_v12, %v2389_v50  ;;  %v2406_v14 = vmul.f32 %v12621_v12, %v2390_v51  ;;  %v2407_v15 = vmul.f32 %v12621_v12, %v2391_v52 }
 0xb94   : > { %vm2408_vm15 = vcmp.ge.f32.partialorder %v2405_v13, 0.0  ;;  %vm2409_vm4 = vcmp.ge.f32.partialorder %v2406_v14, 0.0  ;;  %vm2410_vm5 = vcmp.ge.f32.partialorder %v2407_v15, 0.0  ;;  %v2411_v16 = vmul.f32 0.2, %v2405_v13 }
 0xb95   : > { %v2412_v17 = vmul.f32 0.2, %v2406_v14  ;;  %v2413_v61 = vmul.f32 0.2, %v2407_v15 }
 0xb96   : > { %v2414_v18 = vsel %vm2408_vm15, %v2405_v13, %v2411_v16 }
 0xb97   : > { %v2415_v19 = vsel %vm2409_vm4, %v2406_v14, %v2412_v17  ;;  %v2416_v20 = vsel %vm2410_vm5, %v2407_v15, %v2413_v61  ;;  %v13844_v21 = vmul.f32 %v2414_v18, %v2369_v35 }
 0xb98   : > { %v13846_v23 = vmul.f32 %v2415_v19, %v2373_v36  ;;  %v13848_v24 = vmul.f32 %v2416_v20, %v2377_v38 }
 0xb99   : > { %v11765_v55 = vpack.i.bf16 %v13149_v1, %v13844_v21 }
 0xb9a   : > { %v11725_v25 = vpack.i.bf16 %v13846_v23, %v13844_v21  ;;  %v11730_v63 = vpack.i.bf16 %v13848_v24, %v13149_v1  ;;  %v11760_v26 = vpack.i.bf16 %v13848_v24, %v13846_v23 }
 0xb9c   : > { %11726 = vrot.lane.b32.xlu1 %v11725_v25, %s15088_s18  ;;  %11721 = vrot.lane.b32.xlu0 %v11725_v25, %s15092_s8 }
 0xba0   : > { %11731 = vrot.lane.b32.xlu1 %v11730_v63, %s15092_s8  ;;  %11736 = vrot.lane.b32.xlu0 %v11730_v63, %s15088_s18  ;;  %s15097_s18 = smov 111   ;;  %s15181_s8 = sld [smem:[#allocation35_spill]] }
 0xba4   : > { %11741 = vrot.lane.b32.xlu1 %v11725_v25, %s15086_s26  ;;  %11746 = vrot.lane.b32.xlu0 %v11725_v25, %s15121_s15 }
 0xba8   : > { %11751 = vrot.lane.b32.xlu1 %v11730_v63, %s15086_s26  ;;  %11756 = vrot.lane.b32.xlu0 %v11730_v63, %s15121_s15  ;;  %s15099_s26 = smov 112  }
 0xbac   : > { %11761 = vrot.lane.b32.xlu1 %v11760_v26, %s15125_s28  ;;  %11766 = vrot.lane.b32.xlu0 %v11765_v55, %s15125_s28 }
 0xbb0   : > { %11771 = vrot.lane.b32.xlu1 %v11760_v26, %s15084_s10  ;;  %11776 = vrot.lane.b32.xlu0 %v11760_v26, %s15082_s22 }
 0xbb4   : > { %11781 = vrot.lane.b32.xlu1 %v11765_v55, %s15084_s10  ;;  %11786 = vrot.lane.b32.xlu0 %v11765_v55, %s15082_s22  ;;  %s15101_s22 = smov 15   ;;  %s15103_s10 = smov 113  }
 0xbb8   : > { %2619 = vrot.lane.b32.xlu1 %v13846_v23, %s15080_s23  ;;  %2621 = vrot.lane.b32.xlu0 %v13848_v24, %s15080_s23 }
 0xbbc   : > { %2617 = vrot.lane.b32.xlu1 %v13844_v21, %s15080_s23  ;;  %2623 = vrot.lane.b32.xlu0 %v13149_v1, %s15080_s23  ;;  %s15107_s23 = smov 17  }
 0xc0e   : > { %v11727_v59 = vpop.permute.xlu1 %11726  ;;  %v11722_v27 = vpop.permute.xlu0 %11721 }
 0xc0f   : > { %v11729_v60 = vunpack.i.h.bf16 %v11727_v59  ;;  %v11728_v62 = vunpack.i.l.bf16 %v11727_v59  ;;  %v11724_v28 = vunpack.i.h.bf16 %v11722_v27  ;;  %v11723_v29 = vunpack.i.l.bf16 %v11722_v27 }
 0xc11   : > { %v2445_v30 = vsel %vm15119_vm6, %v11723_v29, %v11724_v28  ;;  %v2470_v31 = vsel %vm15116_vm7, %v11728_v62, %v11729_v60 }
 0xc12   : > { %v11732_v32 = vpop.permute.xlu1 %11731  ;;  %v11737_v33 = vpop.permute.xlu0 %11736  ;;  %v10569_v34 = vpack.c.bf16 %v2470_v31, %v2445_v30 }
 0xc13   : > { %v11734_v35 = vunpack.i.h.bf16 %v11732_v32  ;;  %v11733_v36 = vunpack.i.l.bf16 %v11732_v32  ;;  %v11739_v37 = vunpack.i.h.bf16 %v11737_v33  ;;  %v11738_v38 = vunpack.i.l.bf16 %v11737_v33 }
 0xc14   : > { %10570 = vmatprep.subr.bf16.mxu0 %v10569_v34 }
 0xc15   : > { %v2444_v39 = vsel %vm15119_vm6, %v11733_v36, %v11723_v29  ;;  %v2446_v40 = vsel %vm15119_vm6, %v11724_v28, %v11734_v35  ;;  %v2471_v41 = vsel %vm15116_vm7, %v11729_v60, %v11739_v37  ;;  %v2469_v42 = vsel %vm15116_vm7, %v11738_v38, %v11728_v62 }
 0xc16   : > { %v11742_v43 = vpop.permute.xlu1 %11741  ;;  %v11747_v44 = vpop.permute.xlu0 %11746  ;;  %v10571_v45 = vpack.c.bf16 %v2469_v42, %v2444_v39  ;;  %v10586_v46 = vpack.c.bf16 %v2471_v41, %v2446_v40  ;;  %vm3893_vm7 = vcmask 777216  }
 0xc17   : > { %v11744_v48 = vunpack.i.h.bf16 %v11742_v43  ;;  %v11743_v49 = vunpack.i.l.bf16 %v11742_v43  ;;  %v11749_v50 = vunpack.i.h.bf16 %v11747_v44  ;;  %v11748_v51 = vunpack.i.l.bf16 %v11747_v44 }
 0xc18   : > { %10572 = vmatpush1.bf16.msra.mxu0 %v10571_v45  ;;  %10587 = vmatpush3.bf16.msra.mxu1 %v10586_v46 }
 0xc19   : > { %v2495_v52 = vsel %vm15115_vm8, %v11743_v49, %v11744_v48  ;;  %v2520_v53 = vsel %vm1569_vm9, %v11748_v51, %v11749_v50  ;;  %10588 = vmatprep.subr.bf16.mxu1 %v13156_v7 }
 0xc1a   : > { %v11752_v54 = vpop.permute.xlu1 %11751  ;;  %v11757_v56 = vpop.permute.xlu0 %11756  ;;  %v10573_v57 = vpack.c.bf16 %v2520_v53, %v2495_v52  ;;  %v2806_v52 = vld [vmem:[%s15180_s1] sm:$0x7] }
 0xc1b   : > { %v11754_v58 = vunpack.i.h.bf16 %v11752_v54  ;;  %v11753_v0 = vunpack.i.l.bf16 %v11752_v54  ;;  %v11759_v6 = vunpack.i.h.bf16 %v11757_v56  ;;  %v11758_v8 = vunpack.i.l.bf16 %v11757_v56 }
 0xc1c   : > { %10574 = vmatprep.subr.bf16.mxu0 %v10573_v57  ;;  %v13918_v53 = vrot.slane %v2806_v52, %v13618_v3  ;;  %v13921_v54 = vrot.slane %v2806_v52, %v13621_v4  ;;  %v13924_v56 = vrot.slane %v2806_v52, %v13624_v5 }
 0xc1d   : > { %v2494_v9 = vsel %vm15115_vm8, %v11753_v0, %v11743_v49  ;;  %v2496_v10 = vsel %vm15115_vm8, %v11744_v48, %v11754_v58  ;;  %v2519_v11 = vsel %vm1569_vm9, %v11758_v8, %v11748_v51  ;;  %v2521_v12 = vsel %vm1569_vm9, %v11749_v50, %v11759_v6  ;;  %v2634_v49 = vld [vmem:[#allocation12] sm:$0xff] }
 0xc1e   : > { %v11762_v13 = vpop.permute.xlu1 %11761  ;;  %v11767_v14 = vpop.permute.xlu0 %11766  ;;  %v10575_v15 = vpack.c.bf16 %v2519_v11, %v2494_v9  ;;  %v10589_v16 = vpack.c.bf16 %v2521_v12, %v2496_v10  ;;  %vm3870_vm8 = vcmask 785408  }
 0xc1f   : > { %v11764_v17 = vunpack.i.h.bf16 %v11762_v13  ;;  %v11763_v61 = vunpack.i.l.bf16 %v11762_v13  ;;  %v11769_v18 = vunpack.i.h.bf16 %v11767_v14  ;;  %v11768_v19 = vunpack.i.l.bf16 %v11767_v14  ;;  %v2878_v13 = vld [vmem:[#allocation8 + $0x80] sm:$0xff]  ;;  %v2879_v14 = vld [vmem:[#allocation8 + $0x88] sm:$0xff] }
 0xc20   : > { %10576 = vmatpush1.bf16.msra.mxu0 %v10575_v15  ;;  %10590 = vmatpush3.bf16.msra.mxu1 %v10589_v16  ;;  %v2894_v15 = vld [vmem:[#allocation8 + $0x100] sm:$0xff]  ;;  %v10597_v16 = vpack.c.bf16 %v2879_v14, %v2878_v13  ;;  %v2903_v13 = vld [vmem:[#allocation8 + $0x148] sm:$0xff] }
 0xc21   : > { %v2552_v20 = vsel %vm1601_vm10, %v11764_v17, %v11769_v18  ;;  %v2550_v25 = vsel %vm1601_vm10, %v11768_v19, %v11763_v61  ;;  %10591 = vmatprep.subr.bf16.mxu1 %v13156_v7  ;;  %v2551_v63 = vsel %vm1601_vm10, %v11763_v61, %v11764_v17  ;;  %v2895_v17 = vld [vmem:[#allocation8 + $0x108] sm:$0xff]  ;;  %v2862_v61 = vld [vmem:[#allocation8] sm:$0xff] }
 0xc22   : > { %v11772_v26 = vpop.permute.xlu1 %11771  ;;  %v11777_v55 = vpop.permute.xlu0 %11776  ;;  %v10577_v59 = vpack.c.bf16 %v2551_v63, %v13846_v23  ;;  %v10592_v27 = vpack.c.bf16 %v2552_v20, %v13848_v24  ;;  %v10579_v60 = vpack.c.bf16 %v2550_v25, %v13844_v21  ;;  %v2863_v18 = vld [vmem:[#allocation8 + $0x8] sm:$0xff]  ;;  %v10630_v19 = vpack.c.bf16 %v2895_v17, %v2894_v15  ;;  %v2880_v25 = vld [vmem:[#allocation8 + $0x90] sm:$0xff]  ;;  %v2881_v63 = vld [vmem:[#allocation8 + $0x98] sm:$0xff] }
 0xc23   : > { %v11774_v62 = vunpack.i.h.bf16 %v11772_v26  ;;  %v11773_v28 = vunpack.i.l.bf16 %v11772_v26  ;;  %v11779_v29 = vunpack.i.h.bf16 %v11777_v55  ;;  %v11778_v30 = vunpack.i.l.bf16 %v11777_v55  ;;  %v2896_v26 = vld [vmem:[#allocation8 + $0x110] sm:$0xff]  ;;  %v2870_v14 = vld [vmem:[#allocation8 + $0x40] sm:$0xff]  ;;  %v2871_v15 = vld [vmem:[#allocation8 + $0x48] sm:$0xff] }
 0xc24   : > { %10578 = vmatprep.subr.bf16.mxu0 %v10577_v59  ;;  %10593 = vmatpush3.bf16.msra.mxu1 %v10592_v27  ;;  %v10599_v20 = vpack.c.bf16 %v2863_v18, %v2862_v61  ;;  %v10601_v55 = vpack.c.bf16 %v2881_v63, %v2880_v25  ;;  %v2897_v59 = vld [vmem:[#allocation8 + $0x118] sm:$0xff]  ;;  %v2864_v27 = vld [vmem:[#allocation8 + $0x10] sm:$0xff]  ;;  %v10615_v17 = vpack.c.bf16 %v2871_v15, %v2870_v14 }
 0xc25   : > { %10580 = vmatpush1.bf16.msra.mxu0 %v10579_v60  ;;  %v2576_v31 = vsel %vm15114_vm11, %v11773_v28, %v11774_v62  ;;  %v2601_v32 = vsel %vm15113_vm12, %v11778_v30, %v11779_v29  ;;  %10594 = vmatprep.subr.bf16.mxu1 %v13156_v7  ;;  %v2865_v60 = vld [vmem:[#allocation8 + $0x18] sm:$0xff]  ;;  %v2888_v61 = vld [vmem:[#allocation8 + $0xd0] sm:$0xff] }
 0xc26   : > { %v11782_v33 = vpop.permute.xlu1 %11781  ;;  %v11787_v34 = vpop.permute.xlu0 %11786  ;;  %v10581_v23 = vpack.c.bf16 %v2601_v32, %v2576_v31  ;;  %v2898_v32 = vld [vmem:[#allocation8 + $0x120] sm:$0xff]  ;;  %v2889_v18 = vld [vmem:[#allocation8 + $0xd8] sm:$0xff]  ;;  %v2872_v63 = vld [vmem:[#allocation8 + $0x50] sm:$0xff] }
 0xc27   : > { %v11784_v35 = vunpack.i.h.bf16 %v11782_v33  ;;  %v11783_v24 = vunpack.i.l.bf16 %v11782_v33  ;;  %v11789_v36 = vunpack.i.h.bf16 %v11787_v34  ;;  %v11788_v21 = vunpack.i.l.bf16 %v11787_v34  ;;  %v2899_v33 = vld [vmem:[#allocation8 + $0x128] sm:$0xff]  ;;  %v2905_v25 = vld [vmem:[#allocation8 + $0x158] sm:$0xff] }
 0xc28   : > { %10582 = vmatprep.subr.bf16.mxu0 %v10581_v23  ;;  %v10636_v34 = vpack.c.bf16 %v2899_v33, %v2898_v32 }
 0xc29   : > { %v2575_v37 = vsel %vm15114_vm11, %v11783_v24, %v11773_v28  ;;  %v2577_v38 = vsel %vm15114_vm11, %v11774_v62, %v11784_v35  ;;  %v2600_v39 = vsel %vm15113_vm12, %v11788_v21, %v11778_v30  ;;  %v2602_v40 = vsel %vm15113_vm12, %v11779_v29, %v11789_v36  ;;  %v2882_v29 = vld [vmem:[#allocation8 + $0xa0] sm:$0xff]  ;;  %v2883_v30 = vld [vmem:[#allocation8 + $0xa8] sm:$0xff] }
 0xc2a   : > { %v2620_v41 = vpop.permute.xlu1 %2619  ;;  %v2622_v42 = vpop.permute.xlu0 %2621  ;;  %v10583_v43 = vpack.c.bf16 %v2600_v39, %v2575_v37  ;;  %v10595_v44 = vpack.c.bf16 %v2602_v40, %v2577_v38  ;;  %v10633_v62 = vpack.c.bf16 %v2897_v59, %v2896_v26  ;;  %v10603_v28 = vpack.c.bf16 %v2865_v60, %v2864_v27  ;;  %v2873_v26 = vld [vmem:[#allocation8 + $0x58] sm:$0xff]  ;;  %v2890_v27 = vld [vmem:[#allocation8 + $0xe0] sm:$0xff]  ;;  %v2891_v60 = vld [vmem:[#allocation8 + $0xe8] sm:$0xff] }
 0xc2b   : > { %v2626_v45 = vsel %vm15096_vm13, %v2620_v41, %v2622_v42  ;;  %v10605_v31 = vpack.c.bf16 %v2883_v30, %v2882_v29  ;;  %v10619_v59 = vpack.c.bf16 %v2873_v26, %v2872_v63  ;;  %v2907_v29 = vld [vmem:[#allocation8 + $0x168] sm:$0xff]  ;;  %v2874_v30 = vld [vmem:[#allocation8 + $0x60] sm:$0xff]  ;;  %vm3776_vm12 = vcmask 252928  }
 0xc2c   : > { %10584 = vmatpush1.bf16.msra.mxu0 %v10583_v43  ;;  %10596 = vmatpush3.bf16.msra.mxu1 %v10595_v44  ;;  %vm3847_vm11 = vcmask 793600  }
 0xc2d   : > { %2681 = vmatprep.subr.mxu0 %v2626_v45  ;;  %10004 = vmatprep.subr.mxu1 %v13149_v1  ;;  %v2866_v45 = vld [vmem:[#allocation8 + $0x20] sm:$0xff] }
 0xc2e   : > { %v2618_v46 = vpop.permute.xlu1 %2617  ;;  %v2624_v48 = vpop.permute.xlu0 %2623 }
 0xc2f   : > { %v2625_v50 = vsel %vm15096_vm13, %v2618_v46, %v2620_v41  ;;  %v2627_v51 = vsel %vm15096_vm13, %v2622_v42, %v2624_v48  ;;  %v2867_v46 = vld [vmem:[#allocation8 + $0x28] sm:$0xff] }
 0xc30   : > { %2682 = vmatpush1.msra.mxu0 %v2625_v50  ;;  %10005 = vmatpush3.msra.mxu1 %v2627_v51  ;;  %v10607_v48 = vpack.c.bf16 %v2867_v46, %v2866_v45  ;;  %v2885_v50 = vld [vmem:[#allocation8 + $0xb8] sm:$0xff]  ;;  %v2900_v51 = vld [vmem:[#allocation8 + $0x130] sm:$0xff] }
 0xc31   : > { %9415 = vmatmul.mubr.msk.f32.vlgmr.msra.gmra.mrb[12].mxu0 %vm15095_vm14, %v2634_v49  ;;  %10007 = vmatmul.mubr.msk.f32.vlgmr.msra.gmra.mrb[12].mxu1 %vm15095_vm14, %v2634_v49  ;;  %v2884_v49 = vld [vmem:[#allocation8 + $0xb0] sm:$0xff] }
 0xc32   : > { %10629 = vmatprep.subr.bf16.mxu1 %v13156_v7  ;;  %10041 = vmatprep.mubr.msk.f32.mxu1 %vm13150_vm0, %v13149_v1  ;;  %v10609_v52 = vpack.c.bf16 %v2885_v50, %v2884_v49 }
 0xc33   : > { %10598 = vmatprep.subr.bf16.mxu0 %v10597_v16  ;;  %10631 = vmatpush3.bf16.msra.mxu1 %v10630_v19  ;;  %v2904_v19 = vld [vmem:[#allocation8 + $0x150] sm:$0xff] }
 0xc34   : > { %10600 = vmatpush3.bf16.msra.mxu0 %v10599_v20  ;;  %10632 = vmatprep.subr.bf16.mxu1 %v13156_v7  ;;  %v10617_v20 = vpack.c.bf16 %v2889_v18, %v2888_v61 }
 0xc35   : > { %10602 = vmatprep.subr.bf16.mxu0 %v10601_v55  ;;  %v10645_v55 = vpack.c.bf16 %v2905_v25, %v2904_v19 }
 0xc37   : > { %10634 = vmatpush3.bf16.msra.mxu1 %v10633_v62  ;;  %v2906_v62 = vld [vmem:[#allocation8 + $0x160] sm:$0xff] }
 0xc38   : > { %10604 = vmatpush3.bf16.msra.mxu0 %v10603_v28  ;;  %10635 = vmatprep.subr.bf16.mxu1 %v13156_v7  ;;  %v10621_v28 = vpack.c.bf16 %v2891_v60, %v2890_v27  ;;  %v10648_v32 = vpack.c.bf16 %v2907_v29, %v2906_v62 }
 0xc39   : > { %10606 = vmatprep.subr.bf16.mxu0 %v10605_v31  ;;  %v2875_v31 = vld [vmem:[#allocation8 + $0x68] sm:$0xff] }
 0xc3a   : > { %v10623_v33 = vpack.c.bf16 %v2875_v31, %v2874_v30 }
 0xc3b   : > { %10637 = vmatpush3.bf16.msra.mxu1 %v10636_v34  ;;  %v2892_v34 = vld [vmem:[#allocation8 + $0xf0] sm:$0xff] }
 0xc3c   : > { %10638 = vmatprep.subr.bf16.mxu1 %v13156_v7  ;;  %10608 = vmatpush3.bf16.msra.mxu0 %v10607_v48 }
 0xc3d   : > { %10610 = vmatprep.subr.bf16.mxu0 %v10609_v52 }
 0xd04   : > { %v2731_v57 = vpop.f32.mrb[12].mxu0  ;;  %v2802_v58 = vpop.f32.mrb[12].mxu1 }
 0xd05   : > { %v2823_v0 = vmul.f32 %v13918_v53, %v2731_v57  ;;  %v2733_v6 = vpop.f32.mrb[13].mxu0  ;;  %v10008_v8 = vpop.f32.mrb[13].mxu1  ;;  %v2825_v10 = vmul.f32 %v13924_v56, %v2802_v58 }
 0xd06   : > { %v2824_v9 = vmul.f32 %v13921_v54, %v2733_v6 }
 0xd08   : > { %v2826_v11 = vadd.f32 %v2824_v9, %v2823_v0  ;;  %v2869_v0 = vld [vmem:[#allocation8 + $0x38] sm:$0xff]  ;;  %v2886_v9 = vld [vmem:[#allocation8 + $0xc0] sm:$0xff] }
 0xd0a   : > { %v2827_v12 = vadd.f32 %v2826_v11, %v2825_v10  ;;  %v2887_v10 = vld [vmem:[#allocation8 + $0xc8] sm:$0xff]  ;;  %v2902_v11 = vld [vmem:[#allocation8 + $0x140] sm:$0xff] }
 0xd0b   : > { %v10642_v16 = vpack.c.bf16 %v2903_v13, %v2902_v11 }
 0xd0c   : > { %2828 = vadd.xlane.f32.xlu1 %v2827_v12  ;;  %v10613_v12 = vpack.c.bf16 %v2887_v10, %v2886_v9 }
 0xd99   : > { %v2829_v23 = vpop.xlane.xlu1 %2828 }
 0xd9a   : > { %v2830_v35 = vmul.f32 0.00390625, %v2829_v23  ;;  %v2893_v23 = vld [vmem:[#allocation8 + $0xf8] sm:$0xff] }
 0xd9c   : > { %v13932_v24 = vsub.f32 %v2731_v57, %v2830_v35  ;;  %v13934_v36 = vsub.f32 %v2733_v6, %v2830_v35  ;;  %v13936_v21 = vsub.f32 %v2802_v58, %v2830_v35  ;;  %v2901_v57 = vld [vmem:[#allocation8 + $0x138] sm:$0xff]  ;;  %v2868_v58 = vld [vmem:[#allocation8 + $0x30] sm:$0xff] }
 0xd9d   : > { %v10639_v6 = vpack.c.bf16 %v2901_v57, %v2900_v51  ;;  %v10611_v8 = vpack.c.bf16 %v2869_v0, %v2868_v58  ;;  %v2908_v35 = vld [vmem:[#allocation8 + $0x170] sm:$0xff] }
 0xd9e   : > { %v2834_v37 = vmul.f32 %v13932_v24, %v13918_v53  ;;  %v2835_v38 = vmul.f32 %v13934_v36, %v13921_v54  ;;  %v2836_v39 = vmul.f32 %v13936_v21, %v13924_v56 }
 0xd9f   : > { %10640 = vmatpush3.bf16.msra.mxu1 %v10639_v6  ;;  %10612 = vmatpush3.bf16.msra.mxu0 %v10611_v8 }
 0xda0   : > { %v2837_v40 = vmul.f32 %v2834_v37, %v2834_v37  ;;  %v2838_v41 = vmul.f32 %v2835_v38, %v2835_v38  ;;  %v2839_v42 = vmul.f32 %v2836_v39, %v2836_v39  ;;  %10641 = vmatprep.subr.bf16.mxu1 %v13156_v7  ;;  %10614 = vmatprep.subr.bf16.mxu0 %v10613_v12  ;;  %v2909_v38 = vld [vmem:[#allocation8 + $0x178] sm:$0xff]  ;;  %v2876_v39 = vld [vmem:[#allocation8 + $0x70] sm:$0xff] }
 0xda1   : > { %v10625_v37 = vpack.c.bf16 %v2893_v23, %v2892_v34 }
 0xda2   : > { %v2840_v43 = vadd.f32 %v2838_v41, %v2837_v40  ;;  %v2877_v40 = vld [vmem:[#allocation8 + $0x78] sm:$0xff]  ;;  %v10651_v41 = vpack.c.bf16 %v2909_v38, %v2908_v35 }
 0xda3   : > { %10643 = vmatpush3.bf16.msra.mxu1 %v10642_v16  ;;  %10616 = vmatpush3.bf16.msra.mxu0 %v10615_v17 }
 0xda4   : > { %v2841_v44 = vadd.f32 %v2840_v43, %v2839_v42  ;;  %10644 = vmatprep.subr.bf16.mxu1 %v13156_v7  ;;  %10618 = vmatprep.subr.bf16.mxu0 %v10617_v20  ;;  %v10627_v42 = vpack.c.bf16 %v2877_v40, %v2876_v39 }
 0xda6   : > { %2842 = vadd.xlane.f32.xlu0 %v2841_v44 }
 0xda7   : > { %10646 = vmatpush3.bf16.msra.mxu1 %v10645_v55  ;;  %10620 = vmatpush3.bf16.msra.mxu0 %v10619_v59 }
 0xda8   : > { %10647 = vmatprep.subr.bf16.mxu1 %v13156_v7  ;;  %10622 = vmatprep.subr.bf16.mxu0 %v10621_v28 }
 0xdab   : > { %10649 = vmatpush3.bf16.msra.mxu1 %v10648_v32  ;;  %10624 = vmatpush3.bf16.msra.mxu0 %v10623_v33 }
 0xdac   : > { %10650 = vmatprep.subr.bf16.mxu1 %v13156_v7  ;;  %10626 = vmatprep.subr.bf16.mxu0 %v10625_v37 }
 0xdaf   : > { %10652 = vmatpush3.bf16.msra.mxu1 %v10651_v41  ;;  %10628 = vmatpush3.bf16.msra.mxu0 %v10627_v42 }
 0xdb0   : > { %10669 = vmatprep.subr.bf16.mxu1 %v13156_v7 }
 0xe33   : > { %v2843_v43 = vpop.xlane.xlu0 %2842 }
 0xe34   : > { %v2844_v44 = vmul.f32 0.00390625, %v2843_v43 }
 0xe36   : > { %v2845_v45 = vadd.f32 1e-05, %v2844_v44 }
 0xe38   : > { %12622 = vrsqrt.f32 %v2845_v45 }
 0xe42   : > { %v12623_v46 = vpop.eup %12622 }
 0xe43   : > { %v2847_v48 = vmul.f32 %v12623_v46, %v13932_v24  ;;  %v2848_v49 = vmul.f32 %v12623_v46, %v13934_v36  ;;  %v2849_v50 = vmul.f32 %v12623_v46, %v13936_v21 }
 0xe45   : > { %vm2850_vm15 = vcmp.ge.f32.partialorder %v2847_v48, 0.0  ;;  %vm2851_vm4 = vcmp.ge.f32.partialorder %v2848_v49, 0.0  ;;  %vm2852_vm5 = vcmp.ge.f32.partialorder %v2849_v50, 0.0  ;;  %v2853_v51 = vmul.f32 0.2, %v2847_v48 }
 0xe46   : > { %v2854_v52 = vmul.f32 0.2, %v2848_v49  ;;  %v2855_v57 = vmul.f32 0.2, %v2849_v50 }
 0xe47   : > { %v2856_v58 = vsel %vm2850_vm15, %v2847_v48, %v2853_v51  ;;  %vm3062_vm15 = vcmask 138240   ;;  %v3151_v48 = vld [vmem:[#allocation14 + $0x8] sm:$0xff] }
 0xe48   : > { %v2857_v0 = vsel %vm2851_vm4, %v2848_v49, %v2854_v52  ;;  %v2858_v6 = vsel %vm2852_vm5, %v2849_v50, %v2855_v57  ;;  %v13953_v8 = vmul.f32 %v2856_v58, %v13918_v53  ;;  %vm3074_vm4 = vcmask 130048   ;;  %v13987_v49 = vld [vmem:[%s15181_s8] ss:$0 sm:$0xff] }
 0xe49   : > { %v13956_v9 = vmul.f32 %v2857_v0, %v13921_v54  ;;  %v13959_v24 = vmul.f32 %v2858_v6, %v13924_v56  ;;  %v3150_v56 = vld [vmem:[#allocation14] sm:$0xff]  ;;  %vm3086_vm5 = vcmask 121856  }
 0xe4b   : > { %2974 = vmatprep.mubr.f32.mxu0 %v13956_v9  ;;  %10042 = vmatmul.mubr.f32.vlgmr.msra.gmra.mrb[14].mxu1 %v13959_v24 }
 0xe4c   : > { %2975 = vmatmul.mubr.f32.vlgmr.msra.gmra.mrb[14].mxu0 %v13953_v8 }
 0xe4d   : > { %10062 = vmatprep.mubr.msk.f32.mxu0 %vm15095_vm14, %v3150_v56 }
 0xf1e   : > { %v3046_v36 = vpop.f32.mrb[14].mxu1 }
 0xf1f   : > { %v9583_v21 = vpop.f32.mrb[14].mxu0  ;;  %v10043_v10 = vpop.f32.mrb[15].mxu1 }
 0xf20   : > { %v9584_v11 = vpop.f32.mrb[15].mxu0 }
 0xf21   : > { %v9585_v12 = vadd.f32 %v9584_v11, %v9583_v21 }
 0xf23   : > { %v3047_v13 = vadd.f32 %v9585_v12, %v3046_v36 }
 0xf25   : > { %v11795_v53 = vpack.i.bf16 %v3047_v13, %v13149_v1  ;;  %v11810_v54 = vpack.i.bf16 %v13149_v1, %v3047_v13 }
 0xf27   : > { %11796 = vrot.lane.b32.xlu1 %v11795_v53, %s15105_s2  ;;  %11791 = vrot.lane.b32.xlu0 %v11795_v53, %s15107_s23 }
 0xf2b   : > { %11801 = vrot.lane.b32.xlu1 %v11795_v53, %s15101_s22  ;;  %11806 = vrot.lane.b32.xlu0 %v11795_v53, %s15121_s15 }
 0xf2f   : > { %11811 = vrot.lane.b32.xlu1 %v11810_v54, %s15125_s28  ;;  %11816 = vrot.lane.b32.xlu0 %v11810_v54, %s15103_s10 }
 0xf33   : > { %11821 = vrot.lane.b32.xlu1 %v11810_v54, %s15099_s26  ;;  %3142 = vrot.lane.b32.xlu0 %v3047_v13, %s15097_s18 }
 0xf37   : > { %3144 = vrot.lane.b32.xlu1 %v13149_v1, %s15097_s18 }
 0xf99   : > { %v11797_v14 = vpop.permute.xlu1 %11796  ;;  %v11792_v15 = vpop.permute.xlu0 %11791 }
 0xf9a   : > { %v11799_v16 = vunpack.i.h.bf16 %v11797_v14  ;;  %v11798_v17 = vunpack.i.l.bf16 %v11797_v14  ;;  %v11794_v61 = vunpack.i.h.bf16 %v11792_v15  ;;  %v11793_v18 = vunpack.i.l.bf16 %v11792_v15 }
 0xf9c   : > { %v3063_v19 = vsel %vm3062_vm15, %v11793_v18, %v11794_v61  ;;  %v3075_v20 = vsel %vm3074_vm4, %v11798_v17, %v11799_v16 }
 0xf9d   : > { %v11802_v25 = vpop.permute.xlu1 %11801  ;;  %v11807_v63 = vpop.permute.xlu0 %11806  ;;  %v10653_v26 = vpack.c.bf16 %v3075_v20, %v3063_v19 }
 0xf9e   : > { %v11804_v55 = vunpack.i.h.bf16 %v11802_v25  ;;  %v11803_v59 = vunpack.i.l.bf16 %v11802_v25  ;;  %v11809_v27 = vunpack.i.h.bf16 %v11807_v63  ;;  %v11808_v60 = vunpack.i.l.bf16 %v11807_v63 }
 0xf9f   : > { %10654 = vmatprep.subr.bf16.mxu0 %v10653_v26 }
 0xfa0   : > { %10656 = vmatpush3.bf16.msra.mxu0 %v10653_v26  ;;  %v3087_v62 = vsel %vm3086_vm5, %v11803_v59, %v11804_v55  ;;  %v3098_v28 = vsel %vm1569_vm9, %v11808_v60, %v11809_v27 }
 0xfa1   : > { %v11812_v29 = vpop.permute.xlu1 %11811  ;;  %v11817_v30 = vpop.permute.xlu0 %11816  ;;  %v10657_v31 = vpack.c.bf16 %v3098_v28, %v3087_v62 }
 0xfa2   : > { %v11814_v32 = vunpack.i.h.bf16 %v11812_v29  ;;  %v11813_v33 = vunpack.i.l.bf16 %v11812_v29  ;;  %v11819_v34 = vunpack.i.h.bf16 %v11817_v30  ;;  %v11818_v23 = vunpack.i.l.bf16 %v11817_v30 }
 0xfa3   : > { %10658 = vmatprep.subr.bf16.mxu0 %v10657_v31 }
 0xfa4   : > { %10660 = vmatpush3.bf16.msra.mxu0 %v10657_v31  ;;  %v3111_v35 = vsel %vm1601_vm10, %v11813_v33, %v11814_v32  ;;  %v3123_v41 = vsel %vm3122_vm1, %v11818_v23, %v11819_v34  ;;  %v3472_v31 = vld [vmem:[#allocation15 + $0x8] sm:$0xff] }
 0xfa5   : > { %v11822_v37 = vpop.permute.xlu1 %11821  ;;  %v10661_v38 = vpack.c.bf16 %v3111_v35, %v3047_v13  ;;  %v3143_v45 = vpop.permute.xlu0 %3142  ;;  %9420 = vmatprep.mubr.msk.f32.mxu1 %vm3074_vm4, %v3472_v31 }
 0xfa6   : > { %v11824_v39 = vunpack.i.h.bf16 %v11822_v37  ;;  %v11823_v40 = vunpack.i.l.bf16 %v11822_v37 }
 0xfa7   : > { %10662 = vmatprep.subr.bf16.mxu0 %v10661_v38 }
 0xfa8   : > { %10664 = vmatpush3.bf16.msra.mxu0 %v10661_v38  ;;  %v3135_v42 = vsel %vm3134_vm3, %v11823_v40, %v11824_v39 }
 0xfa9   : > { %v3145_v43 = vpop.permute.xlu1 %3144  ;;  %v10665_v44 = vpack.c.bf16 %v3135_v42, %v3123_v41 }
 0xfaa   : > { %v3147_v46 = vsel %vm15120_vm2, %v3143_v45, %v3145_v43 }
 0xfab   : > { %10666 = vmatprep.subr.bf16.mxu0 %v10665_v44 }
 0xfac   : > { %10668 = vmatpush3.bf16.msra.mxu0 %v10665_v44 }
 0xfad   : > { %10060 = vmatprep.subr.mxu0 %v3147_v46 }
 0xfb0   : > { %10061 = vmatpush3.msra.mxu0 %v3147_v46 }
 0xfb1   : > { %10063 = vmatmul.mubr.msk.f32.vlgmr.msra.gmra.mrb[16].mxu0 %vm15095_vm14, %v3151_v48 }
0x1084   : > { %v10064_v50 = vpop.f32.mrb[16].mxu0 }
0x1085   : > { %v3233_v51 = vpop.f32.mrb[17].mxu0  ;;  %v3250_v52 = vmul.f32 %v10064_v50, %v13987_v49 }
0x1086   : > { %v3249_v57 = vmul.f32 %v13987_v49, %v3233_v51 }
0x1087   : > { %3253 = vadd.xlane.f32.xlu1 %v3250_v52 }
0x1088   : > { %3251 = vadd.xlane.f32.xlu0 %v3249_v57 }
0x1114   : > { %v3254_v58 = vpop.xlane.xlu1 %3253 }
0x1115   : > { %v3256_v0 = vmul.f32 0.015625, %v3254_v58  ;;  %v3252_v6 = vpop.xlane.xlu0 %3251 }
0x1116   : > { %v3255_v36 = vmul.f32 0.015625, %v3252_v6 }
0x1117   : > { %v3258_v21 = vsub.f32 %v10064_v50, %v3256_v0 }
0x1118   : > { %v3257_v10 = vsub.f32 %v3233_v51, %v3255_v36 }
0x1119   : > { %v3260_v13 = vmul.f32 %v13987_v49, %v3258_v21 }
0x111a   : > { %v3259_v11 = vmul.f32 %v13987_v49, %v3257_v10 }
0x111b   : > { %v3262_v53 = vmul.f32 %v3260_v13, %v3260_v13 }
0x111c   : > { %v3261_v12 = vmul.f32 %v3259_v11, %v3259_v11 }
0x111e   : > { %3263 = vadd.xlane.f32.xlu0 %v3261_v12 }
0x1122   : > { %3265 = vadd.xlane.f32.xlu0 %v3262_v53 }
0x11ab   : > { %v3264_v54 = vpop.xlane.xlu0 %3263 }
0x11ac   : > { %v3267_v56 = vmul.f32 0.015625, %v3264_v54 }
0x11ae   : > { %v3269_v14 = vadd.f32 1e-05, %v3267_v56 }
0x11af   : > { %v3266_v15 = vpop.xlane.xlu0 %3265 }
0x11b0   : > { %12624 = vrsqrt.f32 %v3269_v14  ;;  %v3268_v16 = vmul.f32 0.015625, %v3266_v15 }
0x11b2   : > { %v3270_v17 = vadd.f32 1e-05, %v3268_v16 }
0x11b4   : > { %12626 = vrsqrt.f32 %v3270_v17 }
0x11ba   : > { %v12625_v61 = vpop.eup %12624 }
0x11bb   : > { %v3273_v18 = vmul.f32 %v12625_v61, %v3257_v10 }
0x11bd   : > { %v3277_v19 = vmul.f32 0.2, %v3273_v18  ;;  %vm3275_vm14 = vcmp.ge.f32.partialorder %v3273_v18, 0.0 }
0x11be   : > { %v12627_v20 = vpop.eup %12626 }
0x11bf   : > { %v3274_v25 = vmul.f32 %v12627_v20, %v3258_v21  ;;  %v3279_v63 = vsel %vm3275_vm14, %v3273_v18, %v3277_v19 }
0x11c0   : > { %v13994_v59 = vmul.f32 %v13987_v49, %v3279_v63 }
0x11c1   : > { %vm3276_vm13 = vcmp.ge.f32.partialorder %v3274_v25, 0.0  ;;  %v3278_v26 = vmul.f32 0.2, %v3274_v25 }
0x11c2   : > { %v11835_v28 = vpack.i.bf16 %v13994_v59, %v13149_v1  ;;  %v11880_v29 = vpack.i.bf16 %v13149_v1, %v13994_v59 }
0x11c3   : > { %v3280_v55 = vsel %vm3276_vm13, %v3274_v25, %v3278_v26 }
0x11c4   : > { %v13997_v27 = vmul.f32 %v13987_v49, %v3280_v55 }
0x11c6   : > { %v11830_v60 = vpack.i.bf16 %v13997_v27, %v13149_v1  ;;  %v10682_v62 = vpack.c.bf16 %v13997_v27, %v13994_v59  ;;  %v11865_v30 = vpack.i.bf16 %v13149_v1, %v13997_v27 }
0x11c8   : > { %11831 = vrot.lane.b32.xlu1 %v11830_v60, %s15105_s2  ;;  %11826 = vrot.lane.b32.xlu0 %v11830_v60, %s15107_s23 }
0x11cc   : > { %11836 = vrot.lane.b32.xlu1 %v11835_v28, %s15107_s23  ;;  %11851 = vrot.lane.b32.xlu0 %v11835_v28, %s15101_s22  ;;  %s15129_s23 = smov 97  }
0x11d0   : > { %11841 = vrot.lane.b32.xlu1 %v11835_v28, %s15105_s2  ;;  %11856 = vrot.lane.b32.xlu0 %v11835_v28, %s15121_s15  ;;  %s15183_s2 = sld [smem:[#allocation46_spill]] }
0x11d4   : > { %11846 = vrot.lane.b32.xlu1 %v11830_v60, %s15101_s22  ;;  %11881 = vrot.lane.b32.xlu0 %v11880_v29, %s15125_s28  ;;  %s15109_s22 = smov 33  }
0x11d8   : > { %11861 = vrot.lane.b32.xlu1 %v11830_v60, %s15121_s15  ;;  %11886 = vrot.lane.b32.xlu0 %v11880_v29, %s15103_s10 }
0x11dc   : > { %11866 = vrot.lane.b32.xlu1 %v11865_v30, %s15125_s28  ;;  %11891 = vrot.lane.b32.xlu0 %v11880_v29, %s15099_s26 }
0x11e0   : > { %11871 = vrot.lane.b32.xlu1 %v11865_v30, %s15103_s10  ;;  %11896 = vrot.lane.b32.xlu0 %v11880_v29, %s15097_s18  ;;  %s15131_s10 = smov 31  }
0x11e4   : > { %11876 = vrot.lane.b32.xlu1 %v11865_v30, %s15099_s26  ;;  %s15111_s26 = smov 32  }
0x11e8   : > { %11901 = vrot.lane.b32.xlu1 %v11865_v30, %s15097_s18  ;;  %s15182_s18 = sld [smem:[#allocation42_spill]] }
0x123a   : > { %v11832_v32 = vpop.permute.xlu1 %11831  ;;  %v11827_v33 = vpop.permute.xlu0 %11826 }
0x123b   : > { %v11829_v34 = vunpack.i.h.bf16 %v11827_v33  ;;  %v11828_v23 = vunpack.i.l.bf16 %v11827_v33  ;;  %v11834_v40 = vunpack.i.h.bf16 %v11832_v32  ;;  %v11833_v41 = vunpack.i.l.bf16 %v11832_v32 }
0x123d   : > { %v3308_v42 = vsel %vm3062_vm15, %v11828_v23, %v11829_v34  ;;  %v3330_v51 = vsel %vm3074_vm4, %v11833_v41, %v11834_v40 }
0x123e   : > { %v11837_v35 = vpop.permute.xlu1 %11836  ;;  %v11852_v37 = vpop.permute.xlu0 %11851 }
0x123f   : > { %v11839_v38 = vunpack.i.h.bf16 %v11837_v35  ;;  %v11838_v39 = vunpack.i.l.bf16 %v11837_v35  ;;  %v11854_v52 = vunpack.i.h.bf16 %v11852_v37  ;;  %v11853_v57 = vunpack.i.l.bf16 %v11852_v37 }
0x1241   : > { %v3307_v43 = vsel %vm3062_vm15, %v11838_v39, %v11839_v38  ;;  %v3351_v11 = vsel %vm3086_vm5, %v11853_v57, %v11854_v52 }
0x1242   : > { %v11842_v44 = vpop.permute.xlu1 %11841  ;;  %v11857_v45 = vpop.permute.xlu0 %11856  ;;  %v10670_v46 = vpack.c.bf16 %v3308_v42, %v3307_v43 }
0x1243   : > { %v11844_v48 = vunpack.i.h.bf16 %v11842_v44  ;;  %v11843_v50 = vunpack.i.l.bf16 %v11842_v44  ;;  %v11859_v12 = vunpack.i.h.bf16 %v11857_v45  ;;  %v11858_v13 = vunpack.i.l.bf16 %v11857_v45 }
0x1244   : > { %10671 = vmatpush1.bf16.msra.mxu1 %v10670_v46 }
0x1245   : > { %v3329_v58 = vsel %vm3074_vm4, %v11843_v50, %v11844_v48  ;;  %10672 = vmatprep.subr.bf16.mxu1 %v13156_v7  ;;  %v3373_v16 = vsel %vm1569_vm9, %v11858_v13, %v11859_v12 }
0x1246   : > { %v11847_v0 = vpop.permute.xlu1 %11846  ;;  %v10673_v6 = vpack.c.bf16 %v3330_v51, %v3329_v58  ;;  %v11882_v10 = vpop.permute.xlu0 %11881  ;;  %v3471_v58 = vld [vmem:[#allocation15] sm:$0xff] }
0x1247   : > { %v11849_v36 = vunpack.i.h.bf16 %v11847_v0  ;;  %v11848_v21 = vunpack.i.l.bf16 %v11847_v0  ;;  %v11884_v63 = vunpack.i.h.bf16 %v11882_v10  ;;  %v11883_v26 = vunpack.i.l.bf16 %v11882_v10  ;;  %v3474_v0 = vld [vmem:[#allocation15 + $0x18] sm:$0xff] }
0x1248   : > { %10674 = vmatpush1.bf16.msra.mxu1 %v10673_v6  ;;  %v3473_v6 = vld [vmem:[#allocation15 + $0x10] sm:$0xff] }
0x1249   : > { %v3352_v53 = vsel %vm3086_vm5, %v11848_v21, %v11849_v36  ;;  %10675 = vmatprep.subr.bf16.mxu1 %v13156_v7  ;;  %v3399_v31 = vsel %vm1601_vm10, %v11883_v26, %v11884_v63 }
0x124a   : > { %v11862_v54 = vpop.permute.xlu1 %11861  ;;  %v10676_v56 = vpack.c.bf16 %v3352_v53, %v3351_v11  ;;  %v11887_v61 = vpop.permute.xlu0 %11886  ;;  %v3615_v53 = vld [vmem:[%s15182_s18] sm:$0xff] }
0x124b   : > { %v11864_v14 = vunpack.i.h.bf16 %v11862_v54  ;;  %v11863_v15 = vunpack.i.l.bf16 %v11862_v54  ;;  %v11889_v32 = vunpack.i.h.bf16 %v11887_v61  ;;  %v11888_v33 = vunpack.i.l.bf16 %v11887_v61  ;;  %v3616_v54 = vld [vmem:[%s15182_s18 + $0x8] sm:$0xff] }
0x124c   : > { %10677 = vmatpush1.bf16.msra.mxu1 %v10676_v56  ;;  %v3617_v56 = vld [vmem:[%s15182_s18 + $0x10] sm:$0xff] }
0x124d   : > { %v3374_v17 = vsel %vm1569_vm9, %v11863_v15, %v11864_v14  ;;  %10678 = vmatprep.subr.bf16.mxu1 %v13156_v7  ;;  %v3421_v39 = vsel %vm3122_vm1, %v11888_v33, %v11889_v32  ;;  %v10696_v14 = vpack.c.bf16 %v3616_v54, %v3615_v53  ;;  %v3618_v15 = vld [vmem:[%s15182_s18 + $0x18] sm:$0xff] }
0x124e   : > { %v11867_v18 = vpop.permute.xlu1 %11866  ;;  %v10679_v19 = vpack.c.bf16 %v3374_v17, %v3373_v16  ;;  %v11892_v30 = vpop.permute.xlu0 %11891  ;;  %v10700_v16 = vpack.c.bf16 %v3618_v15, %v3617_v56  ;;  %v3622_v32 = vld [vmem:[%s15182_s18 + $0x38] sm:$0xff] }
0x124f   : > { %v11869_v20 = vunpack.i.h.bf16 %v11867_v18  ;;  %v11868_v25 = vunpack.i.l.bf16 %v11867_v18  ;;  %v11894_v40 = vunpack.i.h.bf16 %v11892_v30  ;;  %v11893_v41 = vunpack.i.l.bf16 %v11892_v30  ;;  %10697 = vmatprep.subr.bf16.mxu0 %v10696_v14 }
0x1250   : > { %10680 = vmatpush1.bf16.msra.mxu1 %v10679_v19  ;;  %10699 = vmatpush3.bf16.msra.mxu0 %v10696_v14 }
0x1251   : > { %10681 = vmatprep.subr.bf16.mxu1 %v13156_v7  ;;  %v3400_v60 = vsel %vm1601_vm10, %v11868_v25, %v11869_v20  ;;  %v3443_v45 = vsel %vm3134_vm3, %v11893_v41, %v11894_v40  ;;  %10701 = vmatprep.subr.bf16.mxu0 %v10700_v16  ;;  %v3627_v40 = vld [vmem:[%s15182_s18 + $0x60] sm:$0xff]  ;;  %v3628_v41 = vld [vmem:[%s15182_s18 + $0x68] sm:$0xff] }
0x1252   : > { %v11872_v55 = vpop.permute.xlu1 %11871  ;;  %v10685_v23 = vpack.c.bf16 %v3400_v60, %v3399_v31  ;;  %v11897_v59 = vpop.permute.xlu0 %11896  ;;  %v3621_v31 = vld [vmem:[%s15182_s18 + $0x30] sm:$0xff] }
0x1253   : > { %v11874_v28 = vunpack.i.h.bf16 %v11872_v55  ;;  %v11873_v29 = vunpack.i.l.bf16 %v11872_v55  ;;  %v11899_v46 = vunpack.i.h.bf16 %v11897_v59  ;;  %v11898_v48 = vunpack.i.l.bf16 %v11897_v59 }
0x1254   : > { %10683 = vmatpush1.bf16.msra.mxu1 %v10682_v62  ;;  %10703 = vmatpush3.bf16.msra.mxu0 %v10700_v16  ;;  %v10708_v33 = vpack.c.bf16 %v3622_v32, %v3621_v31  ;;  %v10720_v59 = vpack.c.bf16 %v3628_v41, %v3627_v40  ;;  %v3901_v16 = vld [vmem:[%s15183_s2 + $0x8] sm:$0xff] }
0x1255   : > { %10684 = vmatprep.subr.bf16.mxu1 %v13156_v7  ;;  %v3422_v35 = vsel %vm3122_vm1, %v11873_v29, %v11874_v28  ;;  %v3465_v52 = vsel %vm15120_vm2, %v11898_v48, %v11899_v46  ;;  %v3619_v28 = vld [vmem:[%s15182_s18 + $0x20] sm:$0xff]  ;;  %v3620_v29 = vld [vmem:[%s15182_s18 + $0x28] sm:$0xff] }
0x1256   : > { %v11877_v34 = vpop.permute.xlu1 %11876  ;;  %v10688_v62 = vpack.c.bf16 %v3422_v35, %v3421_v39  ;;  %v10704_v30 = vpack.c.bf16 %v3620_v29, %v3619_v28 }
0x1257   : > { %v11879_v37 = vunpack.i.h.bf16 %v11877_v34  ;;  %v11878_v38 = vunpack.i.l.bf16 %v11877_v34  ;;  %v3623_v34 = vld [vmem:[%s15182_s18 + $0x40] sm:$0xff] }
0x1258   : > { %10686 = vmatpush1.bf16.msra.mxu1 %v10685_v23  ;;  %10705 = vmatprep.subr.bf16.mxu0 %v10704_v30  ;;  %v3624_v23 = vld [vmem:[%s15182_s18 + $0x48] sm:$0xff] }
0x1259   : > { %10687 = vmatprep.subr.bf16.mxu1 %v13156_v7  ;;  %v3444_v42 = vsel %vm3134_vm3, %v11878_v38, %v11879_v37  ;;  %10707 = vmatpush3.bf16.msra.mxu0 %v10704_v30  ;;  %v10712_v35 = vpack.c.bf16 %v3624_v23, %v3623_v34  ;;  %v3625_v37 = vld [vmem:[%s15182_s18 + $0x50] sm:$0xff]  ;;  %v3626_v38 = vld [vmem:[%s15182_s18 + $0x58] sm:$0xff] }
0x125a   : > { %v11902_v27 = vpop.permute.xlu1 %11901  ;;  %v10691_v50 = vpack.c.bf16 %v3444_v42, %v3443_v45  ;;  %10709 = vmatprep.subr.bf16.mxu0 %v10708_v33  ;;  %v10716_v39 = vpack.c.bf16 %v3626_v38, %v3625_v37 }
0x125b   : > { %v11904_v43 = vunpack.i.h.bf16 %v11902_v27  ;;  %v11903_v44 = vunpack.i.l.bf16 %v11902_v27  ;;  %v3629_v27 = vld [vmem:[%s15182_s18 + $0x70] sm:$0xff] }
0x125c   : > { %10689 = vmatpush1.bf16.msra.mxu1 %v10688_v62  ;;  %v3630_v62 = vld [vmem:[%s15182_s18 + $0x78] sm:$0xff] }
0x125d   : > { %10690 = vmatprep.subr.bf16.mxu1 %v13156_v7  ;;  %v3466_v51 = vsel %vm15120_vm2, %v11903_v44, %v11904_v43  ;;  %10711 = vmatpush3.bf16.msra.mxu0 %v10708_v33  ;;  %v10724_v42 = vpack.c.bf16 %v3630_v62, %v3629_v27 }
0x125e   : > { %v10694_v57 = vpack.c.bf16 %v3466_v51, %v3465_v52  ;;  %10713 = vmatprep.subr.bf16.mxu0 %v10712_v35 }
0x1260   : > { %10692 = vmatpush1.bf16.msra.mxu1 %v10691_v50 }
0x1261   : > { %10693 = vmatprep.subr.bf16.mxu1 %v13156_v7  ;;  %10715 = vmatpush3.bf16.msra.mxu0 %v10712_v35 }
0x1262   : > { %10717 = vmatprep.subr.bf16.mxu0 %v10716_v39 }
0x1264   : > { %10695 = vmatpush1.bf16.msra.mxu1 %v10694_v57 }
0x1265   : > { %10728 = vmatprep.subr.bf16.mxu1 %v13156_v7  ;;  %10719 = vmatpush3.bf16.msra.mxu0 %v10716_v39 }
0x1266   : > { %10721 = vmatprep.subr.bf16.mxu0 %v10720_v59 }
0x1267   : > { %3564 = vmatmul.mubr.f32.vlgmr.msra.gmra.mrb[16].mxu1 %v3471_v58 }
0x1268   : > { %9421 = vmatprep.mubr.msk.f32.mxu1 %vm3074_vm4, %v3474_v0 }
0x1269   : > { %10723 = vmatpush3.bf16.msra.mxu0 %v10720_v59 }
0x126a   : > { %10725 = vmatprep.subr.bf16.mxu0 %v10724_v42 }
0x126b   : > { %3569 = vmatmul.mubr.f32.gmra.mrb[18].mxu1 %v3473_v6 }
0x126c   : > { %9423 = vmatprep.mubr.msk.f32.mxu1 %vm3074_vm4, %v3901_v16 }
0x126d   : > { %10727 = vmatpush3.bf16.msra.mxu0 %v10724_v42 }
0x133a   : > { %v3565_v36 = vpop.f32.mrb[16].mxu1 }
0x133b   : > { %v3567_v21 = vpop.f32.mrb[17].mxu1  ;;  %v3581_v10 = vmul.f32 %v13987_v49, %v3565_v36 }
0x133d   : > { %3583 = vadd.xlane.f32.xlu0 %v3581_v10 }
0x133e   : > { %v3570_v11 = vpop.f32.mrb[18].mxu1 }
0x133f   : > { %v3582_v12 = vmul.f32 %v13987_v49, %v3570_v11  ;;  %v3572_v13 = vpop.f32.mrb[19].mxu1 }
0x1341   : > { %3585 = vadd.xlane.f32.xlu1 %v3582_v12 }
0x13ca   : > { %v3584_v17 = vpop.xlane.xlu0 %3583 }
0x13cb   : > { %v3587_v61 = vmul.f32 0.015625, %v3584_v17 }
0x13cd   : > { %v3589_v18 = vsub.f32 %v3565_v36, %v3587_v61 }
0x13ce   : > { %v3586_v19 = vpop.xlane.xlu1 %3585 }
0x13cf   : > { %v3588_v20 = vmul.f32 0.015625, %v3586_v19  ;;  %v3591_v25 = vmul.f32 %v13987_v49, %v3589_v18 }
0x13d1   : > { %v3590_v63 = vsub.f32 %v3570_v11, %v3588_v20  ;;  %v3593_v26 = vmul.f32 %v3591_v25, %v3591_v25 }
0x13d3   : > { %3595 = vadd.xlane.f32.xlu0 %v3593_v26  ;;  %v3592_v55 = vmul.f32 %v13987_v49, %v3590_v63 }
0x13d5   : > { %v3594_v60 = vmul.f32 %v3592_v55, %v3592_v55 }
0x13d7   : > { %3597 = vadd.xlane.f32.xlu0 %v3594_v60 }
0x1460   : > { %v3596_v43 = vpop.xlane.xlu0 %3595 }
0x1461   : > { %v3599_v44 = vmul.f32 0.015625, %v3596_v43 }
0x1463   : > { %v3601_v45 = vadd.f32 1e-05, %v3599_v44 }
0x1464   : > { %v3598_v46 = vpop.xlane.xlu0 %3597 }
0x1465   : > { %12628 = vrsqrt.f32 %v3601_v45  ;;  %v3600_v48 = vmul.f32 0.015625, %v3598_v46 }
0x1467   : > { %v3602_v50 = vadd.f32 1e-05, %v3600_v48 }
0x1469   : > { %12630 = vrsqrt.f32 %v3602_v50 }
0x146f   : > { %v12629_v51 = vpop.eup %12628 }
0x1470   : > { %v3605_v52 = vmul.f32 %v12629_v51, %v3589_v18 }
0x1472   : > { %vm3607_vm13 = vcmp.ge.f32.partialorder %v3605_v52, 0.0  ;;  %v3609_v57 = vmul.f32 0.2, %v3605_v52 }
0x1473   : > { %v12631_v58 = vpop.eup %12630 }
0x1474   : > { %v3611_v0 = vsel %vm3607_vm13, %v3605_v52, %v3609_v57  ;;  %v3606_v6 = vmul.f32 %v12631_v58, %v3590_v63  ;;  %vm3730_vm13 = vcmask 269312  }
0x1475   : > { %v14076_v36 = vmul.f32 %v13987_v49, %v3611_v0 }
0x1476   : > { %vm3608_vm14 = vcmp.ge.f32.partialorder %v3606_v6, 0.0  ;;  %v3610_v21 = vmul.f32 0.2, %v3606_v6 }
0x1477   : > { %10097 = vmatprep.mubr.f32.mxu0 %v14076_v36 }
0x1478   : > { %v3612_v10 = vsel %vm3608_vm14, %v3606_v6, %v3610_v21  ;;  %vm3753_vm14 = vcmask 261120  }
0x1479   : > { %v14080_v11 = vmul.f32 %v13987_v49, %v3612_v10 }
0x147b   : > { %10098 = vmatmul.mubr.f32.vlgmr.msra.gmra.mrb[18].mxu0 %v14080_v11  ;;  %v10959_v12 = vpack.c.bf16 %v14080_v11, %v14076_v36 }
0x154e   : > { %v14085_v13 = vpop.f32.mrb[18].mxu0 }
0x154f   : > { %v14087_v53 = vpop.f32.mrb[19].mxu0  ;;  %v11910_v54 = vpack.i.bf16 %v14085_v13, %v13149_v1  ;;  %v11945_v15 = vpack.i.bf16 %v13149_v1, %v14085_v13 }
0x1550   : > { %v11930_v49 = vpack.i.bf16 %v14087_v53, %v13149_v1  ;;  %v10741_v56 = vpack.c.bf16 %v14085_v13, %v14087_v53  ;;  %v11960_v14 = vpack.i.bf16 %v13149_v1, %v14087_v53 }
0x1551   : > { %11911 = vrot.lane.b32.xlu1 %v11910_v54, %s15111_s26  ;;  %11906 = vrot.lane.b32.xlu0 %v11910_v54, %s15109_s22 }
0x1555   : > { %11931 = vrot.lane.b32.xlu0 %v11930_v49, %s15131_s10  ;;  %11916 = vrot.lane.b32.xlu1 %v11930_v49, %s15109_s22  ;;  %s15123_s22 = smov 96  }
0x1559   : > { %11936 = vrot.lane.b32.xlu0 %v11930_v49, %s15121_s15  ;;  %11921 = vrot.lane.b32.xlu1 %v11930_v49, %s15111_s26  ;;  %s15117_s26 = smov 95  }
0x155d   : > { %11961 = vrot.lane.b32.xlu0 %v11960_v14, %s15125_s28  ;;  %11926 = vrot.lane.b32.xlu1 %v11910_v54, %s15131_s10 }
0x1561   : > { %11966 = vrot.lane.b32.xlu0 %v11960_v14, %s15129_s23  ;;  %11941 = vrot.lane.b32.xlu1 %v11910_v54, %s15121_s15  ;;  %s15185_s15 = smov 33  }
0x1565   : > { %11971 = vrot.lane.b32.xlu0 %v11960_v14, %s15123_s22  ;;  %11946 = vrot.lane.b32.xlu1 %v11945_v15, %s15125_s28 }
0x1569   : > { %11976 = vrot.lane.b32.xlu0 %v11960_v14, %s15117_s26  ;;  %11951 = vrot.lane.b32.xlu1 %v11945_v15, %s15129_s23 }
0x156d   : > { %11956 = vrot.lane.b32.xlu1 %v11945_v15, %s15123_s22  ;;  %s15186_s22 = smov 32  }
0x1571   : > { %11981 = vrot.lane.b32.xlu1 %v11945_v15, %s15117_s26  ;;  %s15184_s26 = sld [smem:[#allocation36_spill]] }
0x15c3   : > { %v11912_v17 = vpop.permute.xlu1 %11911  ;;  %v11907_v61 = vpop.permute.xlu0 %11906 }
0x15c4   : > { %v11909_v18 = vunpack.i.h.bf16 %v11907_v61  ;;  %v11908_v19 = vunpack.i.l.bf16 %v11907_v61  ;;  %v11914_v55 = vunpack.i.h.bf16 %v11912_v17  ;;  %v11913_v60 = vunpack.i.l.bf16 %v11912_v17 }
0x15c6   : > { %v3732_v28 = vsel %vm3730_vm13, %v11908_v19, %v11909_v18  ;;  %v3755_v23 = vsel %vm3753_vm14, %v11913_v60, %v11914_v55 }
0x15c7   : > { %v11932_v20 = vpop.permute.xlu0 %11931  ;;  %v11917_v25 = vpop.permute.xlu1 %11916 }
0x15c8   : > { %v11919_v63 = vunpack.i.h.bf16 %v11917_v25  ;;  %v11918_v26 = vunpack.i.l.bf16 %v11917_v25  ;;  %v11934_v35 = vunpack.i.h.bf16 %v11932_v20  ;;  %v11933_v37 = vunpack.i.l.bf16 %v11932_v20 }
0x15ca   : > { %v3731_v29 = vsel %vm3730_vm13, %v11918_v26, %v11919_v63  ;;  %v3777_v62 = vsel %vm3776_vm12, %v11933_v37, %v11934_v35 }
0x15cb   : > { %v11937_v30 = vpop.permute.xlu0 %11936  ;;  %v11922_v31 = vpop.permute.xlu1 %11921  ;;  %v10729_v32 = vpack.c.bf16 %v3732_v28, %v3731_v29 }
0x15cc   : > { %v11924_v33 = vunpack.i.h.bf16 %v11922_v31  ;;  %v11923_v34 = vunpack.i.l.bf16 %v11922_v31  ;;  %v11939_v42 = vunpack.i.h.bf16 %v11937_v30  ;;  %v11938_v43 = vunpack.i.l.bf16 %v11937_v30 }
0x15cd   : > { %10730 = vmatpush1.bf16.msra.mxu1 %v10729_v32 }
0x15ce   : > { %v3754_v38 = vsel %vm3753_vm14, %v11923_v34, %v11924_v33  ;;  %10731 = vmatprep.subr.bf16.mxu1 %v13156_v7  ;;  %v3799_v51 = vsel %vm1569_vm9, %v11938_v43, %v11939_v42  ;;  %v3907_v42 = vld [vmem:[%s15183_s2 + $0x38] sm:$0xff]  ;;  %v3906_v43 = vld [vmem:[%s15183_s2 + $0x30] sm:$0xff] }
0x15cf   : > { %v11927_v39 = vpop.permute.xlu1 %11926  ;;  %v10732_v40 = vpack.c.bf16 %v3755_v23, %v3754_v38  ;;  %v11962_v27 = vpop.permute.xlu0 %11961 }
0x15d0   : > { %v11929_v41 = vunpack.i.h.bf16 %v11927_v39  ;;  %v11928_v59 = vunpack.i.l.bf16 %v11927_v39  ;;  %v11964_v10 = vunpack.i.h.bf16 %v11962_v27  ;;  %v11963_v54 = vunpack.i.l.bf16 %v11962_v27  ;;  %v3905_v27 = vld [vmem:[%s15183_s2 + $0x28] sm:$0xff] }
0x15d1   : > { %10733 = vmatpush1.bf16.msra.mxu1 %v10732_v40  ;;  %v3900_v40 = vld [vmem:[%s15183_s2] sm:$0xff] }
0x15d2   : > { %v3778_v44 = vsel %vm3776_vm12, %v11928_v59, %v11929_v41  ;;  %10734 = vmatprep.subr.bf16.mxu1 %v13156_v7  ;;  %v3825_v61 = vsel %vm1601_vm10, %v11963_v54, %v11964_v10  ;;  %v3903_v41 = vld [vmem:[%s15183_s2 + $0x18] sm:$0xff]  ;;  %v3902_v59 = vld [vmem:[%s15183_s2 + $0x10] sm:$0xff] }
0x15d3   : > { %v11942_v45 = vpop.permute.xlu1 %11941  ;;  %v10735_v46 = vpack.c.bf16 %v3778_v44, %v3777_v62  ;;  %v11967_v57 = vpop.permute.xlu0 %11966  ;;  %v3904_v62 = vld [vmem:[%s15183_s2 + $0x20] sm:$0xff]  ;;  %s15189_s2 = sld [smem:[#allocation47_spill]] }
0x15d4   : > { %v11944_v48 = vunpack.i.h.bf16 %v11942_v45  ;;  %v11943_v50 = vunpack.i.l.bf16 %v11942_v45  ;;  %v11969_v18 = vunpack.i.h.bf16 %v11967_v57  ;;  %v11968_v19 = vunpack.i.l.bf16 %v11967_v57  ;;  %v14155_v44 = vld [vmem:[%s15184_s26] ss:$0 sm:$0xff] }
0x15d5   : > { %10736 = vmatpush1.bf16.msra.mxu1 %v10735_v46 }
0x15d6   : > { %v3800_v52 = vsel %vm1569_vm9, %v11943_v50, %v11944_v48  ;;  %10737 = vmatprep.subr.bf16.mxu1 %v13156_v7  ;;  %v3848_v60 = vsel %vm3847_vm11, %v11968_v19, %v11969_v18 }
0x15d7   : > { %v11947_v58 = vpop.permute.xlu1 %11946  ;;  %v10738_v0 = vpack.c.bf16 %v3800_v52, %v3799_v51  ;;  %v11972_v17 = vpop.permute.xlu0 %11971 }
0x15d8   : > { %v11949_v6 = vunpack.i.h.bf16 %v11947_v58  ;;  %v11948_v21 = vunpack.i.l.bf16 %v11947_v58  ;;  %v11974_v28 = vunpack.i.h.bf16 %v11972_v17  ;;  %v11973_v29 = vunpack.i.l.bf16 %v11972_v17 }
0x15d9   : > { %10739 = vmatpush1.bf16.msra.mxu1 %v10738_v0 }
0x15da   : > { %10740 = vmatprep.subr.bf16.mxu1 %v13156_v7  ;;  %v3826_v14 = vsel %vm1601_vm10, %v11948_v21, %v11949_v6  ;;  %v3871_v33 = vsel %vm3870_vm8, %v11973_v29, %v11974_v28 }
0x15db   : > { %v11952_v49 = vpop.permute.xlu1 %11951  ;;  %v10744_v25 = vpack.c.bf16 %v3826_v14, %v3825_v61  ;;  %v11977_v13 = vpop.permute.xlu0 %11976 }
0x15dc   : > { %v11954_v15 = vunpack.i.h.bf16 %v11952_v49  ;;  %v11953_v16 = vunpack.i.l.bf16 %v11952_v49  ;;  %v11979_v34 = vunpack.i.h.bf16 %v11977_v13  ;;  %v11978_v23 = vunpack.i.l.bf16 %v11977_v13 }
0x15dd   : > { %10742 = vmatpush1.bf16.msra.mxu1 %v10741_v56 }
0x15de   : > { %10743 = vmatprep.subr.bf16.mxu1 %v13156_v7  ;;  %v3849_v63 = vsel %vm3847_vm11, %v11953_v16, %v11954_v15  ;;  %v3894_v38 = vsel %vm3893_vm7, %v11978_v23, %v11979_v34 }
0x15df   : > { %v11957_v20 = vpop.permute.xlu1 %11956  ;;  %v10747_v56 = vpack.c.bf16 %v3849_v63, %v3848_v60 }
0x15e0   : > { %v11959_v26 = vunpack.i.h.bf16 %v11957_v20  ;;  %v11958_v55 = vunpack.i.l.bf16 %v11957_v20 }
0x15e1   : > { %10745 = vmatpush1.bf16.msra.mxu1 %v10744_v25 }
0x15e2   : > { %10746 = vmatprep.subr.bf16.mxu1 %v13156_v7  ;;  %v3872_v30 = vsel %vm3870_vm8, %v11958_v55, %v11959_v26 }
0x15e3   : > { %v11982_v53 = vpop.permute.xlu1 %11981  ;;  %v10750_v35 = vpack.c.bf16 %v3872_v30, %v3871_v33 }
0x15e4   : > { %v11984_v31 = vunpack.i.h.bf16 %v11982_v53  ;;  %v11983_v32 = vunpack.i.l.bf16 %v11982_v53 }
0x15e5   : > { %10748 = vmatpush1.bf16.msra.mxu1 %v10747_v56 }
0x15e6   : > { %10749 = vmatprep.subr.bf16.mxu1 %v13156_v7  ;;  %v3895_v37 = vsel %vm3893_vm7, %v11983_v32, %v11984_v31 }
0x15e7   : > { %v10753_v39 = vpack.c.bf16 %v3895_v37, %v3894_v38 }
0x15e9   : > { %10751 = vmatpush1.bf16.msra.mxu1 %v10750_v35 }
0x15ea   : > { %10752 = vmatprep.subr.bf16.mxu1 %v13156_v7 }
0x15ed   : > { %10754 = vmatpush1.bf16.msra.mxu1 %v10753_v39 }
0x15f0   : > { %4003 = vmatmul.mubr.f32.vlgmr.msra.gmra.mrb[20].mxu1 %v3900_v40 }
0x15f1   : > { %9424 = vmatprep.mubr.msk.f32.mxu1 %vm3074_vm4, %v3903_v41 }
0x15f4   : > { %4008 = vmatmul.mubr.f32.gmra.mrb[22].mxu1 %v3902_v59 }
0x15f5   : > { %9425 = vmatprep.mubr.msk.f32.mxu1 %vm3074_vm4, %v3905_v27 }
0x15f8   : > { %4013 = vmatmul.mubr.f32.gmra.mrb[24].mxu1 %v3904_v62 }
0x15f9   : > { %9426 = vmatprep.mubr.msk.f32.mxu1 %vm3074_vm4, %v3907_v42 }
0x15fc   : > { %4018 = vmatmul.mubr.f32.gmra.mrb[26].mxu1 %v3906_v43 }
0x16c3   : > { %v4004_v45 = vpop.f32.mrb[20].mxu1 }
0x16c4   : > { %v4030_v46 = vmul.f32 %v14155_v44, %v4004_v45  ;;  %v4006_v48 = vpop.f32.mrb[21].mxu1 }
0x16c6   : > { %4034 = vadd.xlane.f32.xlu0 %v4030_v46 }
0x16c7   : > { %v4009_v50 = vpop.f32.mrb[22].mxu1 }
0x16c8   : > { %v4031_v51 = vmul.f32 %v14155_v44, %v4009_v50  ;;  %v4011_v52 = vpop.f32.mrb[23].mxu1 }
0x16ca   : > { %4036 = vadd.xlane.f32.xlu1 %v4031_v51 }
0x16cb   : > { %v4014_v57 = vpop.f32.mrb[24].mxu1 }
0x16cc   : > { %v4032_v58 = vmul.f32 %v14155_v44, %v4014_v57  ;;  %v4016_v0 = vpop.f32.mrb[25].mxu1 }
0x16ce   : > { %4038 = vadd.xlane.f32.xlu0 %v4032_v58 }
0x16cf   : > { %v4019_v6 = vpop.f32.mrb[26].mxu1 }
0x16d0   : > { %v4033_v21 = vmul.f32 %v14155_v44, %v4019_v6  ;;  %v4021_v10 = vpop.f32.mrb[27].mxu1 }
0x16d2   : > { %4040 = vadd.xlane.f32.xlu0 %v4033_v21 }
0x1753   : > { %v4035_v54 = vpop.xlane.xlu0 %4034 }
0x1754   : > { %v4042_v49 = vmul.f32 0.0625, %v4035_v54 }
0x1756   : > { %v4046_v14 = vsub.f32 %v4004_v45, %v4042_v49 }
0x1757   : > { %v4037_v15 = vpop.xlane.xlu1 %4036 }
0x1758   : > { %v4043_v16 = vmul.f32 0.0625, %v4037_v15  ;;  %v4050_v17 = vmul.f32 %v14155_v44, %v4046_v14 }
0x175a   : > { %v4047_v61 = vsub.f32 %v4009_v50, %v4043_v16  ;;  %v4054_v18 = vmul.f32 %v4050_v17, %v4050_v17 }
0x175b   : > { %v4039_v19 = vpop.xlane.xlu0 %4038 }
0x175c   : > { %v4044_v20 = vmul.f32 0.0625, %v4039_v19  ;;  %4058 = vadd.xlane.f32.xlu1 %v4054_v18  ;;  %v4051_v25 = vmul.f32 %v14155_v44, %v4047_v61 }
0x175e   : > { %v4048_v63 = vsub.f32 %v4014_v57, %v4044_v20  ;;  %v4055_v26 = vmul.f32 %v4051_v25, %v4051_v25 }
0x175f   : > { %v4041_v55 = vpop.xlane.xlu0 %4040 }
0x1760   : > { %v4045_v60 = vmul.f32 0.0625, %v4041_v55  ;;  %4060 = vadd.xlane.f32.xlu0 %v4055_v26  ;;  %v4052_v28 = vmul.f32 %v14155_v44, %v4048_v63  ;;  %v4475_v55 = vld [vmem:[%s15189_s2 + $0x8] sm:$0xff] }
0x1761   : > { %4598 = vmatprep.mubr.f32.mxu0 %v4475_v55 }
0x1762   : > { %v4049_v29 = vsub.f32 %v4019_v6, %v4045_v60  ;;  %v4056_v13 = vmul.f32 %v4052_v28, %v4052_v28  ;;  %v4476_v60 = vld [vmem:[%s15189_s2 + $0x10] sm:$0xff] }
0x1763   : > { %10108 = vmatprep.mubr.msk.f32.mxu1 %vm3753_vm14, %v4476_v60 }
0x1764   : > { %4062 = vadd.xlane.f32.xlu1 %v4056_v13  ;;  %v4053_v53 = vmul.f32 %v14155_v44, %v4049_v29 }
0x1766   : > { %v4057_v56 = vmul.f32 %v4053_v53, %v4053_v53 }
0x1768   : > { %4064 = vadd.xlane.f32.xlu0 %v4057_v56 }
0x17e9   : > { %v4059_v30 = vpop.xlane.xlu1 %4058 }
0x17ea   : > { %v4066_v31 = vmul.f32 0.0625, %v4059_v30 }
0x17ec   : > { %v4070_v32 = vadd.f32 1e-05, %v4066_v31 }
0x17ed   : > { %v4061_v33 = vpop.xlane.xlu0 %4060 }
0x17ee   : > { %12632 = vrsqrt.f32 %v4070_v32  ;;  %v4067_v34 = vmul.f32 0.0625, %v4061_v33 }
0x17f0   : > { %v4071_v23 = vadd.f32 1e-05, %v4067_v34 }
0x17f1   : > { %v4063_v35 = vpop.xlane.xlu1 %4062 }
0x17f2   : > { %12634 = vrsqrt.f32 %v4071_v23  ;;  %v4068_v37 = vmul.f32 0.0625, %v4063_v35 }
0x17f4   : > { %v4072_v38 = vadd.f32 1e-05, %v4068_v37 }
0x17f5   : > { %v4065_v39 = vpop.xlane.xlu0 %4064 }
0x17f6   : > { %12636 = vrsqrt.f32 %v4072_v38  ;;  %v4069_v40 = vmul.f32 0.0625, %v4065_v39 }
0x17f8   : > { %v12633_v41 = vpop.eup %12632  ;;  %v4073_v59 = vadd.f32 1e-05, %v4069_v40 }
0x17f9   : > { %v4078_v27 = vmul.f32 %v12633_v41, %v4046_v14 }
0x17fa   : > { %12638 = vrsqrt.f32 %v4073_v59 }
0x17fb   : > { %vm4082_vm6 = vcmp.ge.f32.partialorder %v4078_v27, 0.0  ;;  %v4086_v62 = vmul.f32 0.2, %v4078_v27 }
0x17fc   : > { %v12635_v42 = vpop.eup %12634 }
0x17fd   : > { %v4090_v43 = vsel %vm4082_vm6, %v4078_v27, %v4086_v62  ;;  %v4079_v45 = vmul.f32 %v12635_v42, %v4047_v61 }
0x17fe   : > { %v4094_v46 = vmul.f32 %v14155_v44, %v4090_v43 }
0x17ff   : > { %vm4083_vm2 = vcmp.ge.f32.partialorder %v4079_v45, 0.0  ;;  %v4087_v48 = vmul.f32 0.2, %v4079_v45 }
0x1800   : > { %v12637_v50 = vpop.eup %12636  ;;  %v11985_v51 = vpack.i.bf16 %v4094_v46, %v13149_v1  ;;  %v11990_v52 = vpack.i.bf16 %v13149_v1, %v4094_v46 }
0x1801   : > { %v4091_v57 = vsel %vm4083_vm2, %v4079_v45, %v4087_v48  ;;  %v4080_v58 = vmul.f32 %v12637_v50, %v4048_v63 }
0x1802   : > { %v4095_v0 = vmul.f32 %v14155_v44, %v4091_v57  ;;  %11986 = vrot.lane.b32.xlu1 %v11985_v51, %s15185_s15  ;;  %11991 = vrot.lane.b32.xlu0 %v11990_v52, %s15125_s28 }
0x1803   : > { %v4088_v6 = vmul.f32 0.2, %v4080_v58  ;;  %vm4084_vm6 = vcmp.ge.f32.partialorder %v4080_v58, 0.0 }
0x1804   : > { %v12639_v21 = vpop.eup %12638  ;;  %v12025_v10 = vpack.i.bf16 %v13149_v1, %v4095_v0  ;;  %v10755_v54 = vpack.c.bf16 %v4095_v0, %v4094_v46  ;;  %v12030_v16 = vpack.i.bf16 %v4095_v0, %v13149_v1 }
0x1805   : > { %v4081_v49 = vmul.f32 %v12639_v21, %v4049_v29  ;;  %v4092_v14 = vsel %vm4084_vm6, %v4080_v58, %v4088_v6 }
0x1806   : > { %11996 = vrot.lane.b32.xlu0 %v11985_v51, %s15186_s22  ;;  %12026 = vrot.lane.b32.xlu1 %v12025_v10, %s15125_s28  ;;  %v4096_v61 = vmul.f32 %v14155_v44, %v4092_v14  ;;  %s15187_s28 = smov 96  }
0x1807   : > { %vm4085_vm2 = vcmp.ge.f32.partialorder %v4081_v49, 0.0  ;;  %v4089_v15 = vmul.f32 0.2, %v4081_v49  ;;  %10756 = vmatprep.subr.bf16.mxu0 %v10755_v54 }
0x1808   : > { %v12055_v20 = vpack.i.bf16 %v4096_v61, %v13149_v1  ;;  %v12060_v25 = vpack.i.bf16 %v13149_v1, %v4096_v61 }
0x1809   : > { %v4093_v17 = vsel %vm4085_vm2, %v4081_v49, %v4089_v15 }
0x180a   : > { %v4097_v18 = vmul.f32 %v14155_v44, %v4093_v17  ;;  %12001 = vrot.lane.b32.xlu0 %v11990_v52, %s15129_s23  ;;  %12031 = vrot.lane.b32.xlu1 %v12030_v16, %s15186_s22 }
0x180c   : > { %v10759_v19 = vpack.c.bf16 %v4097_v18, %v4096_v61  ;;  %v12090_v63 = vpack.i.bf16 %v4097_v18, %v13149_v1  ;;  %v12095_v26 = vpack.i.bf16 %v13149_v1, %v4097_v18 }
0x180e   : > { %12006 = vrot.lane.b32.xlu0 %v11985_v51, %s15131_s10  ;;  %12036 = vrot.lane.b32.xlu1 %v12025_v10, %s15129_s23  ;;  %s15190_s23 = smov 127  }
0x1812   : > { %12011 = vrot.lane.b32.xlu0 %v11990_v52, %s15187_s28  ;;  %12041 = vrot.lane.b32.xlu1 %v12030_v16, %s15131_s10  ;;  %s15191_s10 = smov 97  }
0x1816   : > { %12046 = vrot.lane.b32.xlu1 %v12025_v10, %s15187_s28  ;;  %12016 = vrot.lane.b32.xlu0 %v12030_v16, %s15185_s15 }
0x181a   : > { %12051 = vrot.lane.b32.xlu1 %v12030_v16, %s15188_s0  ;;  %12021 = vrot.lane.b32.xlu0 %v11985_v51, %s15188_s0 }
0x181e   : > { %12056 = vrot.lane.b32.xlu1 %v12055_v20, %s15185_s15  ;;  %12061 = vrot.lane.b32.xlu0 %v12060_v25, %s15190_s23 }
0x1822   : > { %12066 = vrot.lane.b32.xlu0 %v12055_v20, %s15186_s22  ;;  %12091 = vrot.lane.b32.xlu1 %v12090_v63, %s15185_s15  ;;  %s15193_s15 = smov 95  }
0x1826   : > { %12071 = vrot.lane.b32.xlu0 %v12060_v25, %s15191_s10  ;;  %12096 = vrot.lane.b32.xlu1 %v12095_v26, %s15190_s23 }
0x182a   : > { %12076 = vrot.lane.b32.xlu0 %v12055_v20, %s15192_s3  ;;  %12101 = vrot.lane.b32.xlu1 %v12090_v63, %s15186_s22  ;;  %s15197_s22 = smov 113  }
0x182e   : > { %12081 = vrot.lane.b32.xlu0 %v12060_v25, %s15187_s28  ;;  %12106 = vrot.lane.b32.xlu1 %v12095_v26, %s15191_s10  ;;  %s15196_s10 = smov 16  }
0x1832   : > { %12086 = vrot.lane.b32.xlu0 %v12055_v20, %s15188_s0  ;;  %12111 = vrot.lane.b32.xlu1 %v12090_v63, %s15192_s3  ;;  %s15194_s3 = sld [smem:[#allocation43_spill]] }
0x1836   : > { %12126 = vrot.lane.b32.xlu0 %v11990_v52, %s15193_s15  ;;  %12116 = vrot.lane.b32.xlu1 %v12095_v26, %s15187_s28  ;;  %s15195_s28 = smov 17  }
0x183a   : > { %12136 = vrot.lane.b32.xlu0 %v12060_v25, %s15193_s15  ;;  %12121 = vrot.lane.b32.xlu1 %v12090_v63, %s15188_s0 }
0x183e   : > { %12131 = vrot.lane.b32.xlu1 %v12025_v10, %s15193_s15 }
0x1842   : > { %12141 = vrot.lane.b32.xlu1 %v12095_v26, %s15193_s15  ;;  %s15198_s15 = smov 15  }
0x1874   : > { %v11987_v28 = vpop.permute.xlu1 %11986  ;;  %v11992_v29 = vpop.permute.xlu0 %11991 }
0x1875   : > { %v11989_v23 = vunpack.i.h.bf16 %v11987_v28  ;;  %v11988_v35 = vunpack.i.l.bf16 %v11987_v28  ;;  %v11994_v52 = vunpack.i.h.bf16 %v11992_v29  ;;  %v11993_v57 = vunpack.i.l.bf16 %v11992_v29 }
0x1877   : > { %v4146_v41 = vsel %vm3730_vm13, %v11988_v35, %v11989_v23  ;;  %v4330_v26 = vsel %vm1601_vm10, %v11993_v57, %v11994_v52 }
0x1878   : > { %v12027_v13 = vpop.permute.xlu1 %12026  ;;  %v11997_v53 = vpop.permute.xlu0 %11996 }
0x1879   : > { %v12029_v46 = vunpack.i.h.bf16 %v12027_v13  ;;  %v12028_v48 = vunpack.i.l.bf16 %v12027_v13  ;;  %v11999_v58 = vunpack.i.h.bf16 %v11997_v53  ;;  %v11998_v0 = vunpack.i.l.bf16 %v11997_v53 }
0x187b   : > { %v4331_v15 = vsel %vm1601_vm10, %v12028_v48, %v12029_v46 }
0x187c   : > { %v12032_v56 = vpop.permute.xlu1 %12031  ;;  %v14212_v30 = vpop.permute.xlu0 %12001  ;;  %v10763_v29 = vpack.c.bf16 %v4331_v15, %v4330_v26 }
0x187d   : > { %v12034_v10 = vunpack.i.h.bf16 %v12032_v56  ;;  %v12033_v54 = vunpack.i.l.bf16 %v12032_v56 }
0x187f   : > { %v4191_v55 = vsel %vm3753_vm14, %v12033_v54, %v12034_v10 }
0x1880   : > { %v14214_v31 = vpop.permute.xlu1 %12036  ;;  %v14216_v32 = vpop.permute.xlu0 %12006 }
0x1881   : > { %v12039_v13 = vunpack.i.h.bf16 %v14214_v31  ;;  %v12038_v53 = vunpack.i.l.bf16 %v14214_v31  ;;  %v12009_v46 = vunpack.i.h.bf16 %v14216_v32 }
0x1883   : > { %v4375_v52 = vsel %vm3847_vm11, %v12038_v53, %v12039_v13 }
0x1884   : > { %v14218_v33 = vpop.permute.xlu1 %12041  ;;  %v14220_v34 = vpop.permute.xlu0 %12011 }
0x1885   : > { %v12044_v56 = vunpack.i.h.bf16 %v14218_v33  ;;  %v12043_v23 = vunpack.i.l.bf16 %v14218_v33  ;;  %v12008_v33 = vunpack.i.l.bf16 %v14216_v32 }
0x1888   : > { %v14222_v37 = vpop.permute.xlu1 %12046  ;;  %v12017_v38 = vpop.permute.xlu0 %12016 }
0x1889   : > { %v12019_v39 = vunpack.i.h.bf16 %v12017_v38  ;;  %v12018_v40 = vunpack.i.l.bf16 %v12017_v38 }
0x188b   : > { %v4147_v59 = vsel %vm3730_vm13, %v12018_v40, %v12019_v39 }
0x188c   : > { %v14226_v27 = vpop.permute.xlu1 %12051  ;;  %v14228_v62 = vpop.permute.xlu0 %12021  ;;  %v10757_v42 = vpack.c.bf16 %v4147_v59, %v4146_v41  ;;  %v12004_v41 = vunpack.i.h.bf16 %v14212_v30  ;;  %v12003_v59 = vunpack.i.l.bf16 %v14212_v30 }
0x188d   : > { %v12054_v26 = vunpack.i.h.bf16 %v14226_v27  ;;  %v12023_v53 = vunpack.i.l.bf16 %v14228_v62 }
0x188e   : > { %10758 = vmatpush3.bf16.msra.mxu0 %v10757_v42 }
0x188f   : > { %10760 = vmatprep.subr.bf16.mxu0 %v10759_v19  ;;  %v4190_v19 = vsel %vm3753_vm14, %v11998_v0, %v11999_v58 }
0x1890   : > { %v12057_v43 = vpop.permute.xlu1 %12056  ;;  %v12062_v45 = vpop.permute.xlu0 %12061 }
0x1891   : > { %v12059_v50 = vunpack.i.h.bf16 %v12057_v43  ;;  %v12058_v51 = vunpack.i.l.bf16 %v12057_v43  ;;  %v12064_v17 = vunpack.i.h.bf16 %v12062_v45  ;;  %v12063_v61 = vunpack.i.l.bf16 %v12062_v45 }
0x1892   : > { %v10765_v45 = vpack.c.bf16 %v4191_v55, %v4190_v19  ;;  %v12053_v55 = vunpack.i.l.bf16 %v14226_v27 }
0x1893   : > { %v4148_v16 = vsel %vm3730_vm13, %v12058_v51, %v12059_v50  ;;  %v4332_v39 = vsel %vm1601_vm10, %v12063_v61, %v12064_v17  ;;  %v4235_v51 = vsel %vm3776_vm12, %v12043_v23, %v12044_v56  ;;  %v12014_v61 = vunpack.i.h.bf16 %v14220_v34 }
0x1894   : > { %v12092_v6 = vpop.permute.xlu1 %12091  ;;  %v12067_v21 = vpop.permute.xlu0 %12066 }
0x1895   : > { %v12094_v49 = vunpack.i.h.bf16 %v12092_v6  ;;  %v12093_v14 = vunpack.i.l.bf16 %v12092_v6  ;;  %v12069_v35 = vunpack.i.h.bf16 %v12067_v21  ;;  %v12068_v38 = vunpack.i.l.bf16 %v12067_v21 }
0x1896   : > { %v12049_v6 = vunpack.i.h.bf16 %v14222_v37  ;;  %v12048_v21 = vunpack.i.l.bf16 %v14222_v37 }
0x1897   : > { %v4149_v18 = vsel %vm3730_vm13, %v12093_v14, %v12094_v49  ;;  %v4192_v57 = vsel %vm3753_vm14, %v12068_v38, %v12069_v35  ;;  %v4374_v49 = vsel %vm3847_vm11, %v12003_v59, %v12004_v41  ;;  %v4234_v14 = vsel %vm3776_vm12, %v12008_v33, %v12009_v46 }
0x1898   : > { %v12097_v20 = vpop.permute.xlu1 %12096  ;;  %v12072_v25 = vpop.permute.xlu0 %12071  ;;  %v10761_v63 = vpack.c.bf16 %v4149_v18, %v4148_v16  ;;  %v10771_v17 = vpack.c.bf16 %v4375_v52, %v4374_v49  ;;  %v12013_v18 = vunpack.i.l.bf16 %v14220_v34  ;;  %v10773_v19 = vpack.c.bf16 %v4235_v51, %v4234_v14 }
0x1899   : > { %v12099_v60 = vunpack.i.h.bf16 %v12097_v20  ;;  %v12098_v28 = vunpack.i.l.bf16 %v12097_v20  ;;  %v12074_v58 = vunpack.i.h.bf16 %v12072_v25  ;;  %v12073_v0 = vunpack.i.l.bf16 %v12072_v25 }
0x189a   : > { %10762 = vmatpush3.bf16.msra.mxu0 %v10761_v63  ;;  %v4419_v13 = vsel %vm3870_vm8, %v12048_v21, %v12049_v6  ;;  %v12024_v34 = vunpack.i.h.bf16 %v14228_v62  ;;  %v4418_v35 = vsel %vm3870_vm8, %v12013_v18, %v12014_v61 }
0x189b   : > { %10764 = vmatprep.subr.bf16.mxu0 %v10763_v29  ;;  %v4333_v40 = vsel %vm1601_vm10, %v12098_v28, %v12099_v60  ;;  %v4376_v37 = vsel %vm3847_vm11, %v12073_v0, %v12074_v58 }
0x189c   : > { %v12102_v42 = vpop.permute.xlu1 %12101  ;;  %v12077_v43 = vpop.permute.xlu0 %12076  ;;  %v10767_v31 = vpack.c.bf16 %v4333_v40, %v4332_v39 }
0x189d   : > { %v12104_v48 = vunpack.i.h.bf16 %v12102_v42  ;;  %v12103_v50 = vunpack.i.l.bf16 %v12102_v42  ;;  %v12079_v20 = vunpack.i.h.bf16 %v12077_v43  ;;  %v12078_v25 = vunpack.i.l.bf16 %v12077_v43 }
0x189e   : > { %10766 = vmatpush3.bf16.msra.mxu0 %v10765_v45  ;;  %v10779_v42 = vpack.c.bf16 %v4419_v13, %v4418_v35  ;;  %v4279_v43 = vsel %vm1569_vm9, %v12053_v55, %v12054_v26  ;;  %v4278_v45 = vsel %vm1569_vm9, %v12023_v53, %v12024_v34  ;;  %v4481_v13 = vld [vmem:[%s15189_s2 + $0x38] sm:$0xff]  ;;  %v4480_v53 = vld [vmem:[%s15189_s2 + $0x30] sm:$0xff]  ;;  %v4482_v35 = vld [vmem:[%s15189_s2 + $0x40] sm:$0xff] }
0x189f   : > { %v4193_v30 = vsel %vm3753_vm14, %v12103_v50, %v12104_v48  ;;  %10768 = vmatprep.subr.bf16.mxu0 %v10767_v31  ;;  %v4236_v38 = vsel %vm3776_vm12, %v12078_v25, %v12079_v20  ;;  %v4478_v25 = vld [vmem:[%s15189_s2 + $0x20] sm:$0xff] }
0x18a0   : > { %v12107_v10 = vpop.permute.xlu1 %12106  ;;  %v12082_v32 = vpop.permute.xlu0 %12081  ;;  %v10769_v54 = vpack.c.bf16 %v4193_v30, %v4192_v57  ;;  %v10781_v57 = vpack.c.bf16 %v4279_v43, %v4278_v45 }
0x18a1   : > { %v12109_v15 = vunpack.i.h.bf16 %v12107_v10  ;;  %v12108_v16 = vunpack.i.l.bf16 %v12107_v10  ;;  %v12084_v39 = vunpack.i.h.bf16 %v12082_v32  ;;  %v12083_v40 = vunpack.i.l.bf16 %v12082_v32 }
0x18a2   : > { %10770 = vmatpush3.bf16.msra.mxu0 %v10769_v54 }
0x18a3   : > { %10772 = vmatprep.subr.bf16.mxu0 %v10771_v17  ;;  %v4377_v63 = vsel %vm3847_vm11, %v12108_v16, %v12109_v15  ;;  %v4420_v50 = vsel %vm3870_vm8, %v12083_v40, %v12084_v39  ;;  %v4474_v17 = vld [vmem:[%s15189_s2] sm:$0xff]  ;;  %v4485_v39 = vld [vmem:[%s15189_s2 + $0x58] sm:$0xff] }
0x18a4   : > { %v12112_v60 = vpop.permute.xlu1 %12111  ;;  %v12087_v28 = vpop.permute.xlu0 %12086  ;;  %v10775_v29 = vpack.c.bf16 %v4377_v63, %v4376_v37 }
0x18a5   : > { %v12114_v56 = vunpack.i.h.bf16 %v12112_v60  ;;  %v12113_v23 = vunpack.i.l.bf16 %v12112_v60  ;;  %v12089_v33 = vunpack.i.h.bf16 %v12087_v28  ;;  %v12088_v48 = vunpack.i.l.bf16 %v12087_v28  ;;  %v4477_v60 = vld [vmem:[%s15189_s2 + $0x18] sm:$0xff] }
0x18a6   : > { %10774 = vmatpush3.bf16.msra.mxu0 %v10773_v19 }
0x18a7   : > { %v4237_v27 = vsel %vm3776_vm12, %v12113_v23, %v12114_v56  ;;  %10776 = vmatprep.subr.bf16.mxu0 %v10775_v29  ;;  %v4280_v6 = vsel %vm1569_vm9, %v12088_v48, %v12089_v33  ;;  %v4479_v56 = vld [vmem:[%s15189_s2 + $0x28] sm:$0xff]  ;;  %v4484_v23 = vld [vmem:[%s15189_s2 + $0x50] sm:$0xff] }
0x18a8   : > { %v12117_v41 = vpop.permute.xlu1 %12116  ;;  %v10777_v59 = vpack.c.bf16 %v4237_v27, %v4236_v38  ;;  %v12127_v46 = vpop.permute.xlu0 %12126  ;;  %v4483_v38 = vld [vmem:[%s15189_s2 + $0x48] sm:$0xff]  ;;  %s15199_s2 = smov 112  }
0x18a9   : > { %v12119_v62 = vunpack.i.h.bf16 %v12117_v41  ;;  %v12118_v31 = vunpack.i.l.bf16 %v12117_v41  ;;  %v12129_v21 = vunpack.i.h.bf16 %v12127_v46  ;;  %v12128_v10 = vunpack.i.l.bf16 %v12127_v46 }
0x18aa   : > { %10778 = vmatpush3.bf16.msra.mxu0 %v10777_v59 }
0x18ab   : > { %10780 = vmatprep.subr.bf16.mxu0 %v10779_v42  ;;  %v4421_v51 = vsel %vm3870_vm8, %v12118_v31, %v12119_v62  ;;  %v4462_v19 = vsel %vm3893_vm7, %v12128_v10, %v12129_v21 }
0x18ac   : > { %v12122_v52 = vpop.permute.xlu1 %12121  ;;  %v10783_v58 = vpack.c.bf16 %v4421_v51, %v4420_v50  ;;  %v12137_v54 = vpop.permute.xlu0 %12136 }
0x18ad   : > { %v12124_v0 = vunpack.i.h.bf16 %v12122_v52  ;;  %v12123_v30 = vunpack.i.l.bf16 %v12122_v52  ;;  %v12139_v61 = vunpack.i.h.bf16 %v12137_v54  ;;  %v12138_v18 = vunpack.i.l.bf16 %v12137_v54 }
0x18ae   : > { %10782 = vmatpush3.bf16.msra.mxu0 %v10781_v57 }
0x18af   : > { %v4281_v32 = vsel %vm1569_vm9, %v12123_v30, %v12124_v0  ;;  %10784 = vmatprep.subr.bf16.mxu0 %v10783_v58  ;;  %v4464_v28 = vsel %vm3893_vm7, %v12138_v18, %v12139_v61 }
0x18b0   : > { %v12132_v49 = vpop.permute.xlu1 %12131  ;;  %v10785_v14 = vpack.c.bf16 %v4281_v32, %v4280_v6 }
0x18b1   : > { %v12134_v15 = vunpack.i.h.bf16 %v12132_v49  ;;  %v12133_v16 = vunpack.i.l.bf16 %v12132_v49 }
0x18b2   : > { %10786 = vmatpush3.bf16.msra.mxu0 %v10785_v14 }
0x18b3   : > { %v4463_v20 = vsel %vm3893_vm7, %v12133_v16, %v12134_v15 }
0x18b4   : > { %v12142_v37 = vpop.permute.xlu1 %12141  ;;  %v10787_v63 = vpack.c.bf16 %v4463_v20, %v4462_v19 }
0x18b5   : > { %v12144_v26 = vunpack.i.h.bf16 %v12142_v37  ;;  %v12143_v55 = vunpack.i.l.bf16 %v12142_v37  ;;  %4599 = vmatmul.mubr.f32.vlgmr.msra.gmra.mrb[20].mxu0 %v4474_v17 }
0x18b6   : > { %10788 = vmatprep.subr.bf16.mxu1 %v10787_v63  ;;  %4603 = vmatprep.mubr.f32.mxu0 %v4478_v25 }
0x18b7   : > { %10790 = vmatpush3.bf16.msra.mxu1 %v10787_v63  ;;  %v4465_v29 = vsel %vm3893_vm7, %v12143_v55, %v12144_v26 }
0x18b8   : > { %v10791_v34 = vpack.c.bf16 %v4465_v29, %v4464_v28 }
0x18b9   : > { %4604 = vmatmul.mubr.f32.gmra.mrb[22].mxu0 %v4477_v60 }
0x18ba   : > { %10792 = vmatprep.subr.bf16.mxu1 %v10791_v34  ;;  %4608 = vmatprep.mubr.f32.mxu0 %v4481_v13 }
0x18bb   : > { %10794 = vmatpush3.bf16.msra.mxu1 %v10791_v34 }
0x18bd   : > { %4609 = vmatmul.mubr.f32.gmra.mrb[24].mxu0 %v4480_v53 }
0x18be   : > { %10109 = vmatmul.mubr.msk.f32.vlgmr.msra.gmra.mrb[28].mxu1 %vm3753_vm14, %v4479_v56  ;;  %4613 = vmatprep.mubr.f32.mxu0 %v4484_v23  ;;  %v4779_v56 = vld [vmem:[#allocation17] sm:$0xff]  ;;  %v4863_v23 = vld [vmem:[#allocation17 + $0x10] sm:$0xff] }
0x18bf   : > { %10111 = vmatprep.mubr.msk.f32.mxu1 %vm3753_vm14, %v4482_v35 }
0x18c1   : > { %4614 = vmatmul.mubr.f32.gmra.mrb[26].mxu0 %v4483_v38 }
0x18c2   : > { %10112 = vmatmul.mubr.msk.f32.gmra.mrb[30].mxu1 %vm3753_vm14, %v4485_v39  ;;  %10133 = vmatprep.mubr.msk.f32.mxu0 %vm3753_vm14, %v4863_v23 }
0x18c3   : > { %10122 = vmatprep.mubr.msk.f32.mxu1 %vm3753_vm14, %v4779_v56 }
0x1988   : > { %v9664_v40 = vpop.f32.mrb[20].mxu0 }
0x1989   : > { %v9665_v27 = vpop.f32.mrb[21].mxu0 }
0x198a   : > { %v9666_v41 = vadd.f32 %v9665_v27, %v9664_v40 }
0x198c   : > { %v9667_v59 = vpop.f32.mrb[22].mxu0 }
0x198d   : > { %v9668_v42 = vpop.f32.mrb[23].mxu0 }
0x198e   : > { %v9669_v43 = vadd.f32 %v9668_v42, %v9667_v59 }
0x1990   : > { %v9670_v45 = vpop.f32.mrb[24].mxu0 }
0x1991   : > { %v10110_v62 = vpop.f32.mrb[28].mxu1  ;;  %v9671_v31 = vpop.f32.mrb[25].mxu0 }
0x1992   : > { %v4691_v46 = vadd.f32 %v10110_v62, %v9669_v43  ;;  %v4685_v33 = vpop.f32.mrb[29].mxu1  ;;  %v9672_v48 = vadd.f32 %v9671_v31, %v9670_v45 }
0x1993   : > { %v4686_v50 = vadd.f32 %v9666_v41, %v4685_v33 }
0x1994   : > { %v4712_v51 = vmul.f32 %v14155_v44, %v4691_v46  ;;  %v9673_v52 = vpop.f32.mrb[26].mxu0 }
0x1995   : > { %v4711_v57 = vmul.f32 %v14155_v44, %v4686_v50  ;;  %v10113_v58 = vpop.f32.mrb[30].mxu1  ;;  %v9674_v0 = vpop.f32.mrb[27].mxu0 }
0x1996   : > { %4717 = vadd.xlane.f32.xlu1 %v4712_v51  ;;  %v4695_v30 = vpop.f32.mrb[31].mxu1  ;;  %v9675_v6 = vadd.f32 %v9674_v0, %v9673_v52 }
0x1997   : > { %v4696_v21 = vadd.f32 %v9672_v48, %v4695_v30  ;;  %4715 = vadd.xlane.f32.xlu0 %v4711_v57 }
0x1998   : > { %v4701_v10 = vadd.f32 %v10113_v58, %v9675_v6 }
0x1999   : > { %v4713_v32 = vmul.f32 %v14155_v44, %v4696_v21 }
0x199a   : > { %v4714_v54 = vmul.f32 %v14155_v44, %v4701_v10 }
0x199b   : > { %4719 = vadd.xlane.f32.xlu0 %v4713_v32 }
0x199f   : > { %4721 = vadd.xlane.f32.xlu0 %v4714_v54 }
0x1a23   : > { %v4718_v49 = vpop.xlane.xlu1 %4717 }
0x1a24   : > { %v4724_v14 = vmul.f32 0.0625, %v4718_v49  ;;  %v4716_v15 = vpop.xlane.xlu0 %4715 }
0x1a25   : > { %v4723_v16 = vmul.f32 0.0625, %v4716_v15 }
0x1a26   : > { %v4728_v17 = vsub.f32 %v4691_v46, %v4724_v14 }
0x1a27   : > { %v4727_v61 = vsub.f32 %v4686_v50, %v4723_v16 }
0x1a28   : > { %v4720_v18 = vpop.xlane.xlu0 %4719  ;;  %v4732_v19 = vmul.f32 %v14155_v44, %v4728_v17 }
0x1a29   : > { %v4725_v20 = vmul.f32 0.0625, %v4720_v18  ;;  %v4731_v25 = vmul.f32 %v14155_v44, %v4727_v61 }
0x1a2a   : > { %v4736_v37 = vmul.f32 %v4732_v19, %v4732_v19  ;;  %v4780_v19 = vld [vmem:[#allocation17 + $0x8] sm:$0xff] }
0x1a2b   : > { %v4729_v63 = vsub.f32 %v4696_v21, %v4725_v20  ;;  %v4735_v26 = vmul.f32 %v4731_v25, %v4731_v25  ;;  %v4864_v20 = vld [vmem:[#allocation17 + $0x18] sm:$0xff]  ;;  %v4947_v25 = vld [vmem:[#allocation17 + $0x20] sm:$0xff] }
0x1a2c   : > { %4741 = vadd.xlane.f32.xlu0 %v4736_v37  ;;  %v4722_v55 = vpop.xlane.xlu0 %4721  ;;  %v5031_v37 = vld [vmem:[#allocation17 + $0x30] sm:$0xff] }
0x1a2d   : > { %v4726_v60 = vmul.f32 0.0625, %v4722_v55  ;;  %4739 = vadd.xlane.f32.xlu1 %v4735_v26  ;;  %v4733_v28 = vmul.f32 %v14155_v44, %v4729_v63  ;;  %v5032_v26 = vld [vmem:[#allocation17 + $0x38] sm:$0xff] }
0x1a2f   : > { %v4730_v29 = vsub.f32 %v4701_v10, %v4726_v60  ;;  %v4737_v13 = vmul.f32 %v4733_v28, %v4733_v28 }
0x1a31   : > { %4743 = vadd.xlane.f32.xlu1 %v4737_v13  ;;  %v4734_v34 = vmul.f32 %v14155_v44, %v4730_v29 }
0x1a33   : > { %v4738_v53 = vmul.f32 %v4734_v34, %v4734_v34 }
0x1a35   : > { %4745 = vadd.xlane.f32.xlu0 %v4738_v53 }
0x1ab9   : > { %v4742_v35 = vpop.xlane.xlu0 %4741 }
0x1aba   : > { %v4748_v38 = vmul.f32 0.0625, %v4742_v35  ;;  %v4740_v39 = vpop.xlane.xlu1 %4739 }
0x1abb   : > { %v4747_v40 = vmul.f32 0.0625, %v4740_v39 }
0x1abc   : > { %v4752_v27 = vadd.f32 1e-05, %v4748_v38 }
0x1abd   : > { %v4751_v41 = vadd.f32 1e-05, %v4747_v40 }
0x1abe   : > { %12640 = vrsqrt.f32 %v4752_v27  ;;  %v4744_v59 = vpop.xlane.xlu1 %4743 }
0x1abf   : > { %12642 = vrsqrt.f32 %v4751_v41  ;;  %v4749_v42 = vmul.f32 0.0625, %v4744_v59 }
0x1ac1   : > { %v4753_v43 = vadd.f32 1e-05, %v4749_v42 }
0x1ac2   : > { %v4746_v45 = vpop.xlane.xlu0 %4745 }
0x1ac3   : > { %12644 = vrsqrt.f32 %v4753_v43  ;;  %v4750_v62 = vmul.f32 0.0625, %v4746_v45 }
0x1ac5   : > { %v4754_v31 = vadd.f32 1e-05, %v4750_v62 }
0x1ac7   : > { %12646 = vrsqrt.f32 %v4754_v31 }
0x1ac8   : > { %v12641_v46 = vpop.eup %12640 }
0x1ac9   : > { %v12643_v33 = vpop.eup %12642  ;;  %v4760_v48 = vmul.f32 %v12641_v46, %v4728_v17 }
0x1aca   : > { %v4759_v50 = vmul.f32 %v12643_v33, %v4727_v61 }
0x1acb   : > { %vm4764_vm7 = vcmp.ge.f32.partialorder %v4760_v48, 0.0  ;;  %v4768_v51 = vmul.f32 0.2, %v4760_v48 }
0x1acc   : > { %vm4763_vm8 = vcmp.ge.f32.partialorder %v4759_v50, 0.0  ;;  %v4767_v52 = vmul.f32 0.2, %v4759_v50 }
0x1acd   : > { %v12645_v57 = vpop.eup %12644  ;;  %v4772_v58 = vsel %vm4764_vm7, %v4760_v48, %v4768_v51 }
0x1ace   : > { %v4776_v0 = vmul.f32 %v14155_v44, %v4772_v58  ;;  %v4771_v30 = vsel %vm4763_vm8, %v4759_v50, %v4767_v52  ;;  %v4761_v6 = vmul.f32 %v12645_v57, %v4729_v63  ;;  %v4948_v63 = vld [vmem:[#allocation17 + $0x28] sm:$0xff] }
0x1acf   : > { %v4775_v21 = vmul.f32 %v14155_v44, %v4771_v30 }
0x1ad0   : > { %v4769_v10 = vmul.f32 0.2, %v4761_v6  ;;  %vm4765_vm11 = vcmp.ge.f32.partialorder %v4761_v6, 0.0 }
0x1ad1   : > { %v12647_v32 = vpop.eup %12646  ;;  %v10795_v54 = vpack.c.bf16 %v4776_v0, %v4775_v21 }
0x1ad2   : > { %v4762_v49 = vmul.f32 %v12647_v32, %v4730_v29  ;;  %v4773_v14 = vsel %vm4765_vm11, %v4761_v6, %v4769_v10 }
0x1ad3   : > { %10796 = vmatprep.subr.bf16.mxu1 %v10795_v54  ;;  %10804 = vmatprep.subr.bf16.mxu0 %v10795_v54  ;;  %v4777_v17 = vmul.f32 %v14155_v44, %v4773_v14 }
0x1ad4   : > { %vm4766_vm12 = vcmp.ge.f32.partialorder %v4762_v49, 0.0  ;;  %v4770_v15 = vmul.f32 0.2, %v4762_v49  ;;  %10798 = vmatpush3.bf16.msra.mxu1 %v10795_v54  ;;  %10806 = vmatpush3.bf16.msra.mxu0 %v10795_v54 }
0x1ad6   : > { %v4774_v16 = vsel %vm4766_vm12, %v4762_v49, %v4770_v15 }
0x1ad7   : > { %v4778_v61 = vmul.f32 %v14155_v44, %v4774_v16 }
0x1ad9   : > { %v10799_v18 = vpack.c.bf16 %v4778_v61, %v4777_v17 }
0x1adb   : > { %10800 = vmatprep.subr.bf16.mxu1 %v10799_v18  ;;  %10808 = vmatprep.subr.bf16.mxu0 %v10799_v18 }
0x1adc   : > { %10802 = vmatpush3.bf16.msra.mxu1 %v10799_v18  ;;  %10810 = vmatpush3.bf16.msra.mxu0 %v10799_v18 }
0x1add   : > { %10812 = vmatprep.subr.bf16.mxu1 %v10795_v54  ;;  %10820 = vmatprep.subr.bf16.mxu0 %v10795_v54 }
0x1adf   : > { %10123 = vmatmul.mubr.msk.f32.vlgmr.msra.gmra.mrb[32].mxu1 %vm3753_vm14, %v4780_v19  ;;  %10134 = vmatmul.mubr.msk.f32.vlgmr.msra.gmra.mrb[28].mxu0 %vm3753_vm14, %v4864_v20 }
0x1ae0   : > { %10814 = vmatpush3.bf16.msra.mxu1 %v10795_v54  ;;  %10822 = vmatpush3.bf16.msra.mxu0 %v10795_v54 }
0x1ae1   : > { %10816 = vmatprep.subr.bf16.mxu1 %v10799_v18  ;;  %10824 = vmatprep.subr.bf16.mxu0 %v10799_v18 }
0x1ae2   : > { %10144 = vmatprep.mubr.msk.f32.mxu1 %vm3753_vm14, %v4947_v25  ;;  %10155 = vmatprep.mubr.msk.f32.mxu0 %vm3753_vm14, %v5031_v37 }
0x1ae4   : > { %10818 = vmatpush3.bf16.msra.mxu1 %v10799_v18  ;;  %10826 = vmatpush3.bf16.msra.mxu0 %v10799_v18 }
0x1ae7   : > { %10145 = vmatmul.mubr.msk.f32.vlgmr.msra.gmra.mrb[34].mxu1 %vm3753_vm14, %v4948_v63  ;;  %10156 = vmatmul.mubr.msk.f32.vlgmr.msra.gmra.mrb[30].mxu0 %vm3753_vm14, %v5032_v26 }
0x1bb2   : > { %v10124_v55 = vpop.f32.mrb[32].mxu1  ;;  %v10135_v60 = vpop.f32.mrb[28].mxu0 }
0x1bb3   : > { %v5115_v28 = vmul.f32 %v10124_v55, %v14155_v44  ;;  %v5123_v29 = vmul.f32 %v10135_v60, %v14155_v44  ;;  %v4853_v13 = vpop.f32.mrb[33].mxu1  ;;  %v4937_v34 = vpop.f32.mrb[29].mxu0 }
0x1bb4   : > { %v5114_v53 = vmul.f32 %v14155_v44, %v4853_v13  ;;  %v5122_v56 = vmul.f32 %v14155_v44, %v4937_v34 }
0x1bb5   : > { %5126 = vadd.xlane.f32.xlu0 %v5123_v29  ;;  %5118 = vadd.xlane.f32.xlu1 %v5115_v28 }
0x1bb9   : > { %5124 = vadd.xlane.f32.xlu0 %v5122_v56  ;;  %5116 = vadd.xlane.f32.xlu1 %v5114_v53  ;;  %v9441_v56 = vld [vmem:[%s15194_s3 + $0x80] sm:$0xff] }
0x1bba   : > { %v10146_v23 = vpop.f32.mrb[34].mxu1  ;;  %v10157_v35 = vpop.f32.mrb[30].mxu0 }
0x1bbb   : > { %v5131_v38 = vmul.f32 %v10146_v23, %v14155_v44  ;;  %v5021_v39 = vpop.f32.mrb[35].mxu1  ;;  %v5105_v40 = vpop.f32.mrb[31].mxu0  ;;  %v5139_v41 = vmul.f32 %v10157_v35, %v14155_v44 }
0x1bbc   : > { %v5130_v27 = vmul.f32 %v14155_v44, %v5021_v39  ;;  %v5138_v59 = vmul.f32 %v14155_v44, %v5105_v40 }
0x1bbd   : > { %5134 = vadd.xlane.f32.xlu0 %v5131_v38  ;;  %v9443_v38 = vld [vmem:[%s15194_s3 + $0x90] sm:$0xff] }
0x1bbe   : > { %5132 = vadd.xlane.f32.xlu1 %v5130_v27  ;;  %v9445_v27 = vld [vmem:[%s15194_s3 + $0xa0] sm:$0xff] }
0x1bc1   : > { %5142 = vadd.xlane.f32.xlu0 %v5139_v41  ;;  %v9446_v41 = vld [vmem:[%s15194_s3 + $0xa8] sm:$0xff] }
0x1bc2   : > { %5140 = vadd.xlane.f32.xlu1 %v5138_v59  ;;  %v10835_v59 = vpack.c.bf16 %v9446_v41, %v9445_v27 }
0x1c42   : > { %v5127_v42 = vpop.xlane.xlu0 %5126  ;;  %v5119_v43 = vpop.xlane.xlu1 %5118 }
0x1c43   : > { %v5129_v46 = vadd.f32 %v5127_v42, %v5119_v43  ;;  %v14363_v42 = vpack.i.bf16 %v14080_v11, %v13149_v1  ;;  %v9447_v43 = vld [vmem:[%s15194_s3 + $0xb0] sm:$0xff] }
0x1c46   : > { %v5125_v45 = vpop.xlane.xlu0 %5124  ;;  %v5117_v62 = vpop.xlane.xlu1 %5116 }
0x1c47   : > { %v5128_v48 = vadd.f32 %v5125_v45, %v5117_v62  ;;  %v9448_v45 = vld [vmem:[%s15194_s3 + $0xb8] sm:$0xff]  ;;  %v14369_v62 = vpack.i.bf16 %v13149_v1, %v14076_v36 }
0x1c4a   : > { %v5135_v31 = vpop.xlane.xlu0 %5134 }
0x1c4b   : > { %v5133_v33 = vpop.xlane.xlu1 %5132  ;;  %v5137_v50 = vadd.f32 %v5135_v31, %v5129_v46  ;;  %v10839_v31 = vpack.c.bf16 %v9448_v45, %v9447_v43  ;;  %v14377_v46 = vpack.i.bf16 %v13149_v1, %v14080_v11 }
0x1c4c   : > { %v5136_v51 = vadd.f32 %v5133_v33, %v5128_v48  ;;  %v9449_v33 = vld [vmem:[%s15194_s3 + $0xc0] sm:$0xff]  ;;  %v9450_v48 = vld [vmem:[%s15194_s3 + $0xc8] sm:$0xff] }
0x1c4e   : > { %v5143_v52 = vpop.xlane.xlu0 %5142 }
0x1c4f   : > { %v5145_v57 = vadd.f32 %v5143_v52, %v5137_v50  ;;  %v5141_v58 = vpop.xlane.xlu1 %5140  ;;  %v10843_v50 = vpack.c.bf16 %v9450_v48, %v9449_v33  ;;  %v9452_v52 = vld [vmem:[%s15194_s3 + $0xd8] sm:$0xff] }
0x1c50   : > { %v5144_v0 = vadd.f32 %v5141_v58, %v5136_v51  ;;  %v9451_v51 = vld [vmem:[%s15194_s3 + $0xd0] sm:$0xff]  ;;  %v9453_v58 = vld [vmem:[%s15194_s3 + $0xe0] sm:$0xff] }
0x1c51   : > { %v5147_v30 = vmul.f32 0.015625, %v5145_v57  ;;  %v10847_v57 = vpack.c.bf16 %v9452_v52, %v9451_v51  ;;  %v5214_v52 = vld [vmem:[%s15194_s3 + $0x10] sm:$0xff] }
0x1c52   : > { %v5146_v6 = vmul.f32 0.015625, %v5144_v0  ;;  %v9454_v0 = vld [vmem:[%s15194_s3 + $0xe8] sm:$0xff] }
0x1c53   : > { %v14317_v21 = vsub.f32 %v10135_v60, %v5147_v30  ;;  %v14319_v10 = vsub.f32 %v10124_v55, %v5147_v30  ;;  %v14329_v15 = vsub.f32 %v10146_v23, %v5147_v30  ;;  %v14337_v20 = vsub.f32 %v10157_v35, %v5147_v30  ;;  %v9442_v23 = vld [vmem:[%s15194_s3 + $0x88] sm:$0xff] }
0x1c54   : > { %v14321_v32 = vsub.f32 %v4937_v34, %v5146_v6  ;;  %v14323_v54 = vsub.f32 %v4853_v13, %v5146_v6  ;;  %v14331_v16 = vsub.f32 %v5021_v39, %v5146_v6  ;;  %v14339_v25 = vsub.f32 %v5105_v40, %v5146_v6  ;;  %v9444_v39 = vld [vmem:[%s15194_s3 + $0x98] sm:$0xff]  ;;  %v9455_v6 = vld [vmem:[%s15194_s3 + $0xf0] sm:$0xff] }
0x1c55   : > { %v5163_v49 = vmul.f32 %v14155_v44, %v14317_v21  ;;  %v5151_v14 = vmul.f32 %v14155_v44, %v14319_v10  ;;  %v5175_v26 = vmul.f32 %v14155_v44, %v14329_v15  ;;  %v5187_v29 = vmul.f32 %v14155_v44, %v14337_v20 }
0x1c56   : > { %v5162_v18 = vmul.f32 %v14155_v44, %v14321_v32  ;;  %v5150_v19 = vmul.f32 %v14155_v44, %v14323_v54  ;;  %v5174_v55 = vmul.f32 %v14155_v44, %v14331_v16  ;;  %v5186_v13 = vmul.f32 %v14155_v44, %v14339_v25 }
0x1c57   : > { %v5165_v17 = vmul.f32 %v5163_v49, %v5163_v49  ;;  %v5153_v61 = vmul.f32 %v5151_v14, %v5151_v14  ;;  %v5177_v60 = vmul.f32 %v5175_v26, %v5175_v26  ;;  %v5189_v34 = vmul.f32 %v5187_v29, %v5187_v29  ;;  %v9456_v49 = vld [vmem:[%s15194_s3 + $0xf8] sm:$0xff] }
0x1c58   : > { %v5164_v37 = vmul.f32 %v5162_v18, %v5162_v18  ;;  %v5152_v63 = vmul.f32 %v5150_v19, %v5150_v19  ;;  %v5176_v28 = vmul.f32 %v5174_v55, %v5174_v55  ;;  %v5188_v53 = vmul.f32 %v5186_v13, %v5186_v13 }
0x1c59   : > { %5168 = vadd.xlane.f32.xlu0 %v5165_v17  ;;  %5156 = vadd.xlane.f32.xlu1 %v5153_v61  ;;  %v10827_v35 = vpack.c.bf16 %v9442_v23, %v9441_v56  ;;  %v10831_v40 = vpack.c.bf16 %v9444_v39, %v9443_v38  ;;  %v14355_v44 = vpack.i.bf16 %v14076_v36, %v13149_v1  ;;  %v5212_v17 = vld [vmem:[%s15194_s3] sm:$0xff]  ;;  %v5213_v61 = vld [vmem:[%s15194_s3 + $0x8] sm:$0xff] }
0x1c5a   : > { %v10851_v30 = vpack.c.bf16 %v9454_v0, %v9453_v58  ;;  %v10855_v14 = vpack.c.bf16 %v9456_v49, %v9455_v6  ;;  %v10859_v18 = vpack.c.bf16 %v5213_v61, %v5212_v17  ;;  %v5216_v49 = vld [vmem:[%s15194_s3 + $0x20] sm:$0xff]  ;;  %v5218_v61 = vld [vmem:[%s15194_s3 + $0x30] sm:$0xff] }
0x1c5b   : > { %10828 = vmatprep.subr.bf16.mxu1 %v10827_v35 }
0x1c5c   : > { %10830 = vmatpush3.bf16.msra.mxu1 %v10827_v35 }
0x1c5d   : > { %5166 = vadd.xlane.f32.xlu0 %v5164_v37  ;;  %5154 = vadd.xlane.f32.xlu1 %v5152_v63 }
0x1c5e   : > { %10832 = vmatprep.subr.bf16.mxu1 %v10831_v40 }
0x1c60   : > { %10834 = vmatpush3.bf16.msra.mxu1 %v10831_v40 }
0x1c61   : > { %5180 = vadd.xlane.f32.xlu0 %v5177_v60  ;;  %5178 = vadd.xlane.f32.xlu1 %v5176_v28 }
0x1c62   : > { %10836 = vmatprep.subr.bf16.mxu1 %v10835_v59 }
0x1c64   : > { %10838 = vmatpush3.bf16.msra.mxu1 %v10835_v59 }
0x1c65   : > { %5192 = vadd.xlane.f32.xlu0 %v5189_v34  ;;  %5190 = vadd.xlane.f32.xlu1 %v5188_v53 }
0x1c66   : > { %10840 = vmatprep.subr.bf16.mxu1 %v10839_v31 }
0x1c68   : > { %10842 = vmatpush3.bf16.msra.mxu1 %v10839_v31 }
0x1c69   : > { %10844 = vmatprep.subr.bf16.mxu1 %v10843_v50 }
0x1c6c   : > { %10846 = vmatpush3.bf16.msra.mxu1 %v10843_v50 }
0x1c6d   : > { %10848 = vmatprep.subr.bf16.mxu1 %v10847_v57 }
0x1c70   : > { %10850 = vmatpush3.bf16.msra.mxu1 %v10847_v57  ;;  %v5215_v57 = vld [vmem:[%s15194_s3 + $0x18] sm:$0xff] }
0x1c71   : > { %10852 = vmatprep.subr.bf16.mxu1 %v10851_v30 }
0x1c74   : > { %10854 = vmatpush3.bf16.msra.mxu1 %v10851_v30  ;;  %v10863_v30 = vpack.c.bf16 %v5215_v57, %v5214_v52  ;;  %v9461_v52 = vld [vmem:[%s15194_s3 + $0x120] sm:$0xff]  ;;  %v9462_v57 = vld [vmem:[%s15194_s3 + $0x128] sm:$0xff] }
0x1c75   : > { %10856 = vmatprep.subr.bf16.mxu1 %v10855_v14 }
0x1c76   : > { %12146 = vrot.lane.b32.xlu1 %v14355_v44, %s15195_s28 }
0x1c78   : > { %10858 = vmatpush3.bf16.msra.mxu1 %v10855_v14  ;;  %v5217_v14 = vld [vmem:[%s15194_s3 + $0x28] sm:$0xff] }
0x1c79   : > { %10860 = vmatprep.subr.bf16.mxu1 %v10859_v18  ;;  %v10867_v17 = vpack.c.bf16 %v5217_v14, %v5216_v49  ;;  %v9467_v14 = vld [vmem:[%s15194_s3 + $0x150] sm:$0xff] }
0x1c7a   : > { %12151 = vrot.lane.b32.xlu1 %v14363_v42, %s15195_s28 }
0x1c7b   : > { %12156 = vrot.lane.b32.xlu0 %v14369_v62, %s15190_s23 }
0x1c7e   : > { %12161 = vrot.lane.b32.xlu1 %v14377_v46, %s15190_s23 }
0x1c7f   : > { %12166 = vrot.lane.b32.xlu0 %v14355_v44, %s15196_s10 }
0x1c82   : > { %12171 = vrot.lane.b32.xlu1 %v14363_v42, %s15196_s10 }
0x1ce6   : > { %v5169_v19 = vpop.xlane.xlu0 %5168  ;;  %v5157_v37 = vpop.xlane.xlu1 %5156 }
0x1ce7   : > { %v5171_v28 = vadd.f32 %v5169_v19, %v5157_v37  ;;  %v5219_v19 = vld [vmem:[%s15194_s3 + $0x38] sm:$0xff] }
0x1ce8   : > { %v10871_v37 = vpack.c.bf16 %v5219_v19, %v5218_v61  ;;  %v9469_v19 = vld [vmem:[%s15194_s3 + $0x160] sm:$0xff] }
0x1cea   : > { %v5167_v63 = vpop.xlane.xlu0 %5166  ;;  %v5155_v26 = vpop.xlane.xlu1 %5154 }
0x1ceb   : > { %v5170_v29 = vadd.f32 %v5167_v63, %v5155_v26  ;;  %v5220_v63 = vld [vmem:[%s15194_s3 + $0x40] sm:$0xff]  ;;  %v5221_v26 = vld [vmem:[%s15194_s3 + $0x48] sm:$0xff] }
0x1cee   : > { %v5181_v55 = vpop.xlane.xlu0 %5180  ;;  %v5179_v60 = vpop.xlane.xlu1 %5178 }
0x1cef   : > { %v5183_v13 = vadd.f32 %v5181_v55, %v5171_v28  ;;  %v5182_v34 = vadd.f32 %v5179_v60, %v5170_v29  ;;  %v10875_v55 = vpack.c.bf16 %v5221_v26, %v5220_v63  ;;  %v5222_v60 = vld [vmem:[%s15194_s3 + $0x50] sm:$0xff]  ;;  %v5223_v28 = vld [vmem:[%s15194_s3 + $0x58] sm:$0xff]  ;;  %v5224_v29 = vld [vmem:[%s15194_s3 + $0x60] sm:$0xff] }
0x1cf0   : > { %v9471_v26 = vld [vmem:[%s15194_s3 + $0x170] sm:$0xff] }
0x1cf2   : > { %v5193_v53 = vpop.xlane.xlu0 %5192  ;;  %v5191_v56 = vpop.xlane.xlu1 %5190 }
0x1cf3   : > { %v5195_v23 = vadd.f32 %v5193_v53, %v5183_v13  ;;  %v5194_v35 = vadd.f32 %v5191_v56, %v5182_v34  ;;  %v5225_v13 = vld [vmem:[%s15194_s3 + $0x68] sm:$0xff]  ;;  %v5226_v53 = vld [vmem:[%s15194_s3 + $0x70] sm:$0xff]  ;;  %v5227_v56 = vld [vmem:[%s15194_s3 + $0x78] sm:$0xff] }
0x1cf4   : > { %v10883_v34 = vpack.c.bf16 %v5225_v13, %v5224_v29  ;;  %v9473_v13 = vld [vmem:[%s15194_s3 + $0x180] sm:$0xff] }
0x1cf5   : > { %v5197_v38 = vmul.f32 0.015625, %v5195_v23  ;;  %v5196_v39 = vmul.f32 0.015625, %v5194_v35 }
0x1cf7   : > { %v5199_v40 = vadd.f32 1e-05, %v5197_v38  ;;  %v5198_v27 = vadd.f32 1e-05, %v5196_v39  ;;  %v10887_v38 = vpack.c.bf16 %v5227_v56, %v5226_v53 }
0x1cf9   : > { %12648 = vrsqrt.f32 %v5199_v40  ;;  %v9457_v40 = vld [vmem:[%s15194_s3 + $0x100] sm:$0xff] }
0x1cfa   : > { %12650 = vrsqrt.f32 %v5198_v27  ;;  %v9458_v27 = vld [vmem:[%s15194_s3 + $0x108] sm:$0xff] }
0x1d03   : > { %v14395_v41 = vpop.eup %12648 }
0x1d04   : > { %v14397_v59 = vpop.eup %12650  ;;  %v5229_v43 = vmul.f32 %v14395_v41, %v14317_v21  ;;  %v14408_v21 = vld [vmem:[%s15184_s26] ss:$0 sm:$0xff]  ;;  %v5203_v23 = vmul.f32 %v14395_v41, %v14319_v10  ;;  %v9459_v10 = vld [vmem:[%s15194_s3 + $0x110] sm:$0xff] }
0x1d05   : > { %v5228_v45 = vmul.f32 %v14397_v59, %v14321_v32  ;;  %v5202_v31 = vmul.f32 %v14397_v59, %v14323_v54  ;;  %v5405_v35 = vmul.f32 %v14397_v59, %v14331_v16 }
0x1d06   : > { %vm5231_vm13 = vcmp.ge.f32.partialorder %v5229_v43, 0.0  ;;  %v5233_v33 = vmul.f32 0.2, %v5229_v43  ;;  %v5207_v39 = vmul.f32 0.2, %v5203_v23  ;;  %vm5205_vm7 = vcmp.ge.f32.partialorder %v5203_v23, 0.0 }
0x1d07   : > { %vm5230_vm6 = vcmp.ge.f32.partialorder %v5228_v45, 0.0  ;;  %v5232_v48 = vmul.f32 0.2, %v5228_v45  ;;  %vm5204_vm2 = vcmp.ge.f32.partialorder %v5202_v31, 0.0  ;;  %v5206_v50 = vmul.f32 0.2, %v5202_v31 }
0x1d08   : > { %v5235_v51 = vsel %vm5231_vm13, %v5229_v43, %v5233_v33  ;;  %v5409_v43 = vmul.f32 0.2, %v5405_v35  ;;  %vm5407_vm8 = vcmp.ge.f32.partialorder %v5405_v35, 0.0  ;;  %v9460_v33 = vld [vmem:[%s15194_s3 + $0x118] sm:$0xff] }
0x1d09   : > { %v5234_v58 = vsel %vm5230_vm6, %v5228_v45, %v5232_v48  ;;  %v5237_v32 = vmul.f32 %v14408_v21, %v5235_v51  ;;  %v5208_v0 = vsel %vm5204_vm2, %v5202_v31, %v5206_v50  ;;  %v10891_v45 = vpack.c.bf16 %v9458_v27, %v9457_v40  ;;  %v9477_v40 = vld [vmem:[%s15194_s3 + $0x1a0] sm:$0xff]  ;;  %v9478_v27 = vld [vmem:[%s15194_s3 + $0x1a8] sm:$0xff] }
0x1d0a   : > { %v5236_v54 = vmul.f32 %v14408_v21, %v5234_v58  ;;  %v5210_v6 = vmul.f32 %v14408_v21, %v5208_v0  ;;  %v5209_v31 = vsel %vm5205_vm7, %v5203_v23, %v5207_v39  ;;  %v5411_v16 = vsel %vm5407_vm8, %v5405_v35, %v5409_v43  ;;  %v9464_v0 = vld [vmem:[%s15194_s3 + $0x138] sm:$0xff] }
0x1d0b   : > { %v5211_v48 = vmul.f32 %v14408_v21, %v5209_v31  ;;  %v10895_v50 = vpack.c.bf16 %v9460_v33, %v9459_v10  ;;  %v5413_v51 = vmul.f32 %v14408_v21, %v5411_v16  ;;  %v10899_v58 = vpack.c.bf16 %v9462_v57, %v9461_v52  ;;  %v9476_v35 = vld [vmem:[%s15194_s3 + $0x198] sm:$0xff]  ;;  %v9481_v33 = vld [vmem:[%s15194_s3 + $0x1c0] sm:$0xff]  ;;  %v9482_v16 = vld [vmem:[%s15194_s3 + $0x1c8] sm:$0xff] }
0x1d0c   : > { %10190 = vmatprep.mubr.f32.mxu1 %v5236_v54  ;;  %v10931_v43 = vpack.c.bf16 %v9478_v27, %v9477_v40  ;;  %v9480_v31 = vld [vmem:[%s15194_s3 + $0x1b8] sm:$0xff]  ;;  %v9485_v57 = vld [vmem:[%s15194_s3 + $0x1e0] sm:$0xff]  ;;  %vm15201_vm6 = vcmask 908288  }
0x1d0d   : > { %10191 = vmatmul.mubr.f32.vlgmr.msra.gmra.mrb[36].mxu1 %v5237_v32  ;;  %v9463_v32 = vld [vmem:[%s15194_s3 + $0x130] sm:$0xff]  ;;  %vm15202_vm2 = vmmov %vm15201_vm6 }
0x1d0e   : > { %10862 = vmatpush3.bf16.msra.mxu1 %v10859_v18  ;;  %10225 = vmatprep.mubr.f32.mxu1 %v5210_v6  ;;  %v10879_v18 = vpack.c.bf16 %v5223_v28, %v5222_v60  ;;  %v10903_v54 = vpack.c.bf16 %v9464_v0, %v9463_v32  ;;  %v9466_v6 = vld [vmem:[%s15194_s3 + $0x148] sm:$0xff]  ;;  %v5406_v60 = vmul.f32 %v14395_v41, %v14329_v15  ;;  %v9475_v15 = vld [vmem:[%s15194_s3 + $0x190] sm:$0xff]  ;;  %vm15203_vm7 = vmmov %vm15202_vm2 }
0x1d0f   : > { %10864 = vmatprep.subr.bf16.mxu1 %v10863_v30  ;;  %v5509_v28 = vmul.f32 %v14397_v59, %v14339_v25  ;;  %v9487_v0 = vld [vmem:[%s15194_s3 + $0x1f0] sm:$0xff]  ;;  %vm15204_vm8 = vmmov %vm15202_vm2 }
0x1d10   : > { %v5410_v29 = vmul.f32 0.2, %v5406_v60  ;;  %vm5408_vm11 = vcmp.ge.f32.partialorder %v5406_v60, 0.0 }
0x1d11   : > { %v5513_v53 = vmul.f32 0.2, %v5509_v28  ;;  %vm5511_vm12 = vcmp.ge.f32.partialorder %v5509_v28, 0.0 }
0x1d12   : > { %10866 = vmatpush3.bf16.msra.mxu1 %v10863_v30  ;;  %v9465_v30 = vld [vmem:[%s15194_s3 + $0x140] sm:$0xff]  ;;  %v5412_v23 = vsel %vm5408_vm11, %v5406_v60, %v5410_v29 }
0x1d13   : > { %10868 = vmatprep.subr.bf16.mxu1 %v10867_v17  ;;  %v10907_v49 = vpack.c.bf16 %v9466_v6, %v9465_v30  ;;  %v5515_v25 = vsel %vm5511_vm12, %v5509_v28, %v5513_v53  ;;  %v5414_v59 = vmul.f32 %v14408_v21, %v5412_v23  ;;  %v5510_v30 = vmul.f32 %v14395_v41, %v14337_v20  ;;  %v14515_v28 = vpop.permute.xlu0 %12156 }
0x1d14   : > { %v5517_v39 = vmul.f32 %v14408_v21, %v5515_v25 }
0x1d15   : > { %vm5512_vm13 = vcmp.ge.f32.partialorder %v5510_v30, 0.0 }
0x1d16   : > { %10870 = vmatpush3.bf16.msra.mxu1 %v10867_v17  ;;  %v9468_v17 = vld [vmem:[%s15194_s3 + $0x158] sm:$0xff] }
0x1d17   : > { %10872 = vmatprep.subr.bf16.mxu1 %v10871_v37  ;;  %v10911_v61 = vpack.c.bf16 %v9468_v17, %v9467_v14  ;;  %v14517_v29 = vpop.permute.xlu0 %12166 }
0x1d18   : > { %v12168_v36 = vunpack.i.l.bf16 %v14517_v29 }
0x1d1a   : > { %10874 = vmatpush3.bf16.msra.mxu1 %v10871_v37  ;;  %v9470_v37 = vld [vmem:[%s15194_s3 + $0x168] sm:$0xff] }
0x1d1b   : > { %10876 = vmatprep.subr.bf16.mxu1 %v10875_v55  ;;  %v10915_v63 = vpack.c.bf16 %v9470_v37, %v9469_v19 }
0x1d1e   : > { %10878 = vmatpush3.bf16.msra.mxu1 %v10875_v55  ;;  %v9472_v55 = vld [vmem:[%s15194_s3 + $0x178] sm:$0xff] }
0x1d1f   : > { %10880 = vmatprep.subr.bf16.mxu1 %v10879_v18 }
0x1d22   : > { %10882 = vmatpush3.bf16.msra.mxu1 %v10879_v18  ;;  %v10919_v18 = vpack.c.bf16 %v9472_v55, %v9471_v26  ;;  %v5990_v26 = vld [vmem:[#allocation18 + $0x8] sm:$0xff]  ;;  %v12147_v55 = vpop.permute.xlu1 %12146 }
0x1d23   : > { %10884 = vmatprep.subr.bf16.mxu1 %v10883_v34  ;;  %6101 = vmatprep.mubr.f32.mxu0 %v5990_v26  ;;  %v12149_v40 = vunpack.i.h.bf16 %v12147_v55  ;;  %v12148_v27 = vunpack.i.l.bf16 %v12147_v55  ;;  %v12169_v26 = vunpack.i.h.bf16 %v14517_v29 }
0x1d26   : > { %10886 = vmatpush3.bf16.msra.mxu1 %v10883_v34  ;;  %v9474_v34 = vld [vmem:[%s15194_s3 + $0x188] sm:$0xff]  ;;  %v12152_v60 = vpop.permute.xlu1 %12151 }
0x1d27   : > { %10888 = vmatprep.subr.bf16.mxu1 %v10887_v38  ;;  %v10923_v56 = vpack.c.bf16 %v9474_v34, %v9473_v13  ;;  %v12154_v25 = vunpack.i.h.bf16 %v12152_v60 }
0x1d2a   : > { %10890 = vmatpush3.bf16.msra.mxu1 %v10887_v38  ;;  %v10927_v38 = vpack.c.bf16 %v9476_v35, %v9475_v15 }
0x1d2b   : > { %10892 = vmatprep.subr.bf16.mxu1 %v10891_v45 }
0x1d2d   : > { %10226 = vmatmul.mubr.f32.vlgmr.msra.gmra.mrb[36].mxu1 %v5211_v48  ;;  %v10939_v48 = vpack.c.bf16 %v9482_v16, %v9481_v33 }
0x1d2e   : > { %10894 = vmatpush3.bf16.msra.mxu1 %v10891_v45  ;;  %10260 = vmatprep.mubr.f32.mxu1 %v5413_v51  ;;  %v9479_v45 = vld [vmem:[%s15194_s3 + $0x1b0] sm:$0xff]  ;;  %v9484_v51 = vld [vmem:[%s15194_s3 + $0x1d8] sm:$0xff] }
0x1d2f   : > { %10896 = vmatprep.subr.bf16.mxu1 %v10895_v50  ;;  %v10935_v10 = vpack.c.bf16 %v9480_v31, %v9479_v45 }
0x1d32   : > { %10898 = vmatpush3.bf16.msra.mxu1 %v10895_v50  ;;  %v9483_v50 = vld [vmem:[%s15194_s3 + $0x1d0] sm:$0xff] }
0x1d33   : > { %10900 = vmatprep.subr.bf16.mxu1 %v10899_v58  ;;  %v10943_v52 = vpack.c.bf16 %v9484_v51, %v9483_v50 }
0x1d36   : > { %10902 = vmatpush3.bf16.msra.mxu1 %v10899_v58  ;;  %v9486_v58 = vld [vmem:[%s15194_s3 + $0x1e8] sm:$0xff] }
0x1d37   : > { %10904 = vmatprep.subr.bf16.mxu1 %v10903_v54  ;;  %v10947_v32 = vpack.c.bf16 %v9486_v58, %v9485_v57  ;;  %v5663_v57 = vsel %vm3062_vm15, %v12148_v27, %v12149_v40 }
0x1d3a   : > { %10906 = vmatpush3.bf16.msra.mxu1 %v10903_v54  ;;  %v9488_v54 = vld [vmem:[%s15194_s3 + $0x1f8] sm:$0xff]  ;;  %s15200_s3 = smov 111  }
0x1d3b   : > { %10908 = vmatprep.subr.bf16.mxu1 %v10907_v49  ;;  %v10951_v6 = vpack.c.bf16 %v9488_v54, %v9487_v0 }
0x1d3e   : > { %10910 = vmatpush3.bf16.msra.mxu1 %v10907_v49  ;;  %v5514_v49 = vmul.f32 0.2, %v5510_v30 }
0x1d3f   : > { %10912 = vmatprep.subr.bf16.mxu1 %v10911_v61 }
0x1d40   : > { %v5516_v14 = vsel %vm5512_vm13, %v5510_v30, %v5514_v49  ;;  %v12159_v49 = vunpack.i.h.bf16 %v14515_v28 }
0x1d41   : > { %v5518_v17 = vmul.f32 %v14408_v21, %v5516_v14  ;;  %v12158_v14 = vunpack.i.l.bf16 %v14515_v28 }
0x1d42   : > { %10914 = vmatpush3.bf16.msra.mxu1 %v10911_v61 }
0x1d43   : > { %10916 = vmatprep.subr.bf16.mxu1 %v10915_v63 }
0x1d46   : > { %10918 = vmatpush3.bf16.msra.mxu1 %v10915_v63 }
0x1d47   : > { %10920 = vmatprep.subr.bf16.mxu1 %v10919_v18 }
0x1d4a   : > { %10922 = vmatpush3.bf16.msra.mxu1 %v10919_v18  ;;  %v12162_v18 = vpop.permute.xlu1 %12161 }
0x1d4b   : > { %10924 = vmatprep.subr.bf16.mxu1 %v10923_v56  ;;  %v12164_v58 = vunpack.i.h.bf16 %v12162_v18 }
0x1d4d   : > { %10261 = vmatmul.mubr.f32.vlgmr.msra.gmra.mrb[36].mxu1 %v5414_v59  ;;  %v12153_v59 = vunpack.i.l.bf16 %v12152_v60 }
0x1d4e   : > { %10926 = vmatpush3.bf16.msra.mxu1 %v10923_v56  ;;  %10295 = vmatprep.mubr.f32.mxu1 %v5517_v39 }
0x1d4f   : > { %10928 = vmatprep.subr.bf16.mxu1 %v10927_v38  ;;  %v5664_v50 = vsel %vm3062_vm15, %v12153_v59, %v12154_v25 }
0x1d52   : > { %10930 = vmatpush3.bf16.msra.mxu1 %v10927_v38 }
0x1d53   : > { %10932 = vmatprep.subr.bf16.mxu1 %v10931_v43 }
0x1d56   : > { %10934 = vmatpush3.bf16.msra.mxu1 %v10931_v43 }
0x1d57   : > { %10936 = vmatprep.subr.bf16.mxu1 %v10935_v10 }
0x1d5a   : > { %10938 = vmatpush3.bf16.msra.mxu1 %v10935_v10 }
0x1d5b   : > { %10940 = vmatprep.subr.bf16.mxu1 %v10939_v48 }
0x1d5e   : > { %10942 = vmatpush3.bf16.msra.mxu1 %v10939_v48 }
0x1d5f   : > { %10944 = vmatprep.subr.bf16.mxu1 %v10943_v52 }
0x1d62   : > { %10946 = vmatpush3.bf16.msra.mxu1 %v10943_v52 }
0x1d63   : > { %10948 = vmatprep.subr.bf16.mxu1 %v10947_v32 }
0x1d66   : > { %10950 = vmatpush3.bf16.msra.mxu1 %v10947_v32  ;;  %v12163_v32 = vunpack.i.l.bf16 %v12162_v18 }
0x1d67   : > { %10952 = vmatprep.subr.bf16.mxu1 %v10951_v6 }
0x1d68   : > { %v5848_v11 = vsel %vm1601_vm10, %v12163_v32, %v12164_v58 }
0x1d6a   : > { %10954 = vmatpush3.bf16.msra.mxu1 %v10951_v6 }
0x1d6b   : > { %11066 = vmatprep.subr.bf16.mxu1 %v13156_v7 }
0x1d6d   : > { %10296 = vmatmul.mubr.f32.vlgmr.msra.gmra.mrb[36].mxu1 %v5518_v17 }
0x1d6e   : > { %10369 = vmatprep.mubr.msk.f32.mxu1 %vm13150_vm0, %v13149_v1 }
0x1e40   : > { %v10297_v61 = vpop.f32.mrb[36].mxu1 }
0x1e41   : > { %v5602_v19 = vpop.f32.mrb[37].mxu1  ;;  %v12180_v20 = vpack.i.bf16 %v13149_v1, %v10297_v61  ;;  %v12175_v41 = vpack.i.bf16 %v10297_v61, %v13149_v1 }
0x1e42   : > { %v10955_v37 = vpack.c.bf16 %v10297_v61, %v5602_v19  ;;  %v12195_v21 = vpack.i.bf16 %v5602_v19, %v13149_v1  ;;  %v12245_v63 = vpack.i.bf16 %v13149_v1, %v5602_v19  ;;  %v10961_v19 = vpack.c.bf16 %v5664_v50, %v5663_v57 }
0x1e43   : > { %12181 = vrot.lane.b32.xlu1 %v12180_v20, %s15190_s23  ;;  %12176 = vrot.lane.b32.xlu0 %v12175_v41, %s15195_s28 }
0x1e44   : > { %10956 = vmatprep.subr.bf16.mxu0 %v10955_v37 }
0x1e47   : > { %12186 = vrot.lane.b32.xlu1 %v12175_v41, %s15196_s10  ;;  %12206 = vrot.lane.b32.xlu0 %v14369_v62, %s15197_s22 }
0x1e4b   : > { %12191 = vrot.lane.b32.xlu1 %v12180_v20, %s15197_s22  ;;  %12216 = vrot.lane.b32.xlu0 %v14355_v44, %s15198_s15 }
0x1e4f   : > { %12236 = vrot.lane.b32.xlu0 %v14369_v62, %s15199_s2  ;;  %12196 = vrot.lane.b32.xlu1 %v12195_v21, %s15195_s28 }
0x1e53   : > { %12246 = vrot.lane.b32.xlu0 %v12245_v63, %s15190_s23  ;;  %12201 = vrot.lane.b32.xlu1 %v12175_v41, %s15198_s15 }
0x1e57   : > { %12251 = vrot.lane.b32.xlu0 %v12195_v21, %s15196_s10  ;;  %12211 = vrot.lane.b32.xlu1 %v14377_v46, %s15197_s22 }
0x1e5b   : > { %12256 = vrot.lane.b32.xlu0 %v12245_v63, %s15197_s22  ;;  %12221 = vrot.lane.b32.xlu1 %v14363_v42, %s15198_s15 }
0x1e5f   : > { %12261 = vrot.lane.b32.xlu0 %v12195_v21, %s15198_s15  ;;  %12226 = vrot.lane.b32.xlu1 %v12180_v20, %s15199_s2 }
0x1e63   : > { %12266 = vrot.lane.b32.xlu0 %v12245_v63, %s15199_s2  ;;  %12231 = vrot.lane.b32.xlu1 %v12175_v41, %s15188_s0 }
0x1e67   : > { %12271 = vrot.lane.b32.xlu0 %v12195_v21, %s15188_s0  ;;  %12241 = vrot.lane.b32.xlu1 %v14377_v46, %s15199_s2 }
0x1e6b   : > { %12276 = vrot.lane.b32.xlu0 %v14355_v44, %s15188_s0  ;;  %12281 = vrot.lane.b32.xlu1 %v14363_v42, %s15188_s0  ;;  %v12172_v44 = vpop.permute.xlu1 %12171 }
0x1e6c   : > { %v12174_v41 = vunpack.i.h.bf16 %v12172_v44  ;;  %v12173_v37 = vunpack.i.l.bf16 %v12172_v44 }
0x1e6f   : > { %12291 = vrot.lane.b32.xlu0 %v12245_v63, %s15200_s3  ;;  %12286 = vrot.lane.b32.xlu1 %v12180_v20, %s15200_s3 }
0x1e73   : > { %12296 = vrot.lane.b32.xlu0 %v14369_v62, %s15200_s3  ;;  %12301 = vrot.lane.b32.xlu1 %v14377_v46, %s15200_s3 }
0x1eb5   : > { %v12177_v13 = vpop.permute.xlu0 %12176  ;;  %v12182_v42 = vpop.permute.xlu1 %12181 }
0x1eb6   : > { %v12179_v62 = vunpack.i.h.bf16 %v12177_v13  ;;  %v12178_v15 = vunpack.i.l.bf16 %v12177_v13  ;;  %v12184_v45 = vunpack.i.h.bf16 %v12182_v42  ;;  %v12183_v31 = vunpack.i.l.bf16 %v12182_v42 }
0x1eb7   : > { %v5847_v42 = vsel %vm1601_vm10, %v12158_v14, %v12159_v49 }
0x1eb8   : > { %v5662_v43 = vsel %vm3062_vm15, %v12178_v15, %v12179_v62  ;;  %v5846_v6 = vsel %vm1601_vm10, %v12183_v31, %v12184_v45  ;;  %v10967_v15 = vpack.c.bf16 %v5848_v11, %v5847_v42 }
0x1eb9   : > { %v14519_v34 = vpop.permute.xlu0 %12206  ;;  %v12187_v53 = vpop.permute.xlu1 %12186 }
0x1eba   : > { %v12189_v0 = vunpack.i.h.bf16 %v12187_v53  ;;  %v12188_v54 = vunpack.i.l.bf16 %v12187_v53  ;;  %v5708_v53 = vsel %vm3074_vm4, %v12173_v37, %v12174_v41  ;;  %v12209_v27 = vunpack.i.h.bf16 %v14519_v34 }
0x1ebd   : > { %v14521_v56 = vpop.permute.xlu0 %12216  ;;  %v14523_v23 = vpop.permute.xlu1 %12191 }
0x1ebe   : > { %v12194_v55 = vunpack.i.h.bf16 %v14523_v23  ;;  %v12193_v60 = vunpack.i.l.bf16 %v14523_v23  ;;  %v12219_v57 = vunpack.i.h.bf16 %v14521_v56 }
0x1ec0   : > { %v5890_v40 = vsel %vm3122_vm1, %v12193_v60, %v12194_v55 }
0x1ec1   : > { %v14525_v46 = vpop.permute.xlu0 %12236  ;;  %v12197_v35 = vpop.permute.xlu1 %12196 }
0x1ec2   : > { %v12199_v38 = vunpack.i.h.bf16 %v12197_v35  ;;  %v12198_v39 = vunpack.i.l.bf16 %v12197_v35  ;;  %v5707_v35 = vsel %vm3074_vm4, %v12168_v36, %v12169_v26  ;;  %v12239_v41 = vunpack.i.h.bf16 %v14525_v46 }
0x1ec3   : > { %v12238_v37 = vunpack.i.l.bf16 %v14525_v46 }
0x1ec4   : > { %v5661_v10 = vsel %vm3062_vm15, %v12198_v39, %v12199_v38 }
0x1ec5   : > { %v12247_v33 = vpop.permute.xlu0 %12246  ;;  %v14529_v16 = vpop.permute.xlu1 %12201  ;;  %v10957_v48 = vpack.c.bf16 %v5662_v43, %v5661_v10  ;;  %v12208_v43 = vunpack.i.l.bf16 %v14519_v34  ;;  %v10969_v10 = vpack.c.bf16 %v5708_v53, %v5707_v35  ;;  %v5935_v53 = vsel %vm3134_vm3, %v12238_v37, %v12239_v41 }
0x1ec6   : > { %v12249_v51 = vunpack.i.h.bf16 %v12247_v33  ;;  %v12248_v52 = vunpack.i.l.bf16 %v12247_v33  ;;  %v12204_v23 = vunpack.i.h.bf16 %v14529_v16  ;;  %v12203_v38 = vunpack.i.l.bf16 %v14529_v16 }
0x1ec7   : > { %10958 = vmatpush3.bf16.msra.mxu0 %v10957_v48  ;;  %v12218_v16 = vunpack.i.l.bf16 %v14521_v56  ;;  %v5891_v14 = vsel %vm3122_vm1, %v12208_v43, %v12209_v27 }
0x1ec8   : > { %10960 = vmatprep.subr.bf16.mxu0 %v10959_v12  ;;  %v5845_v30 = vsel %vm1601_vm10, %v12248_v52, %v12249_v51  ;;  %v5706_v12 = vsel %vm3074_vm4, %v12188_v54, %v12189_v0  ;;  %v5750_v32 = vsel %vm3086_vm5, %v12203_v38, %v12204_v23 }
0x1ec9   : > { %v12252_v17 = vpop.permute.xlu0 %12251  ;;  %v12212_v61 = vpop.permute.xlu1 %12211  ;;  %v10963_v20 = vpack.c.bf16 %v5846_v6, %v5845_v30 }
0x1eca   : > { %v12254_v21 = vunpack.i.h.bf16 %v12252_v17  ;;  %v12253_v63 = vunpack.i.l.bf16 %v12252_v17  ;;  %v12214_v25 = vunpack.i.h.bf16 %v12212_v61  ;;  %v12213_v59 = vunpack.i.l.bf16 %v12212_v61 }
0x1ecb   : > { %10962 = vmatpush3.bf16.msra.mxu0 %v10961_v19 }
0x1ecc   : > { %v5705_v28 = vsel %vm3074_vm4, %v12253_v63, %v12254_v21  ;;  %10964 = vmatprep.subr.bf16.mxu0 %v10963_v20  ;;  %v5892_v58 = vsel %vm3122_vm1, %v12213_v59, %v12214_v25  ;;  %v5751_v20 = vsel %vm3086_vm5, %v12218_v16, %v12219_v57  ;;  %v5993_v16 = vld [vmem:[#allocation18 + $0x20] sm:$0xff] }
0x1ecd   : > { %v12257_v18 = vpop.permute.xlu0 %12256  ;;  %v12222_v44 = vpop.permute.xlu1 %12221  ;;  %v10965_v13 = vpack.c.bf16 %v5706_v12, %v5705_v28  ;;  %v10975_v56 = vpack.c.bf16 %v5892_v58, %v5891_v14 }
0x1ece   : > { %v12259_v29 = vunpack.i.h.bf16 %v12257_v18  ;;  %v12258_v62 = vunpack.i.l.bf16 %v12257_v18  ;;  %v12224_v48 = vunpack.i.h.bf16 %v12222_v44  ;;  %v12223_v50 = vunpack.i.l.bf16 %v12222_v44 }
0x1ecf   : > { %10966 = vmatpush3.bf16.msra.mxu0 %v10965_v13 }
0x1ed0   : > { %10968 = vmatprep.subr.bf16.mxu0 %v10967_v15  ;;  %v5889_v39 = vsel %vm3122_vm1, %v12258_v62, %v12259_v29  ;;  %v5752_v17 = vsel %vm3086_vm5, %v12223_v50, %v12224_v48 }
0x1ed1   : > { %v12262_v45 = vpop.permute.xlu0 %12261  ;;  %v12227_v31 = vpop.permute.xlu1 %12226  ;;  %v10971_v33 = vpack.c.bf16 %v5890_v40, %v5889_v39  ;;  %v10977_v55 = vpack.c.bf16 %v5752_v17, %v5751_v20 }
0x1ed2   : > { %v12264_v51 = vunpack.i.h.bf16 %v12262_v45  ;;  %v12263_v52 = vunpack.i.l.bf16 %v12262_v45  ;;  %v12229_v34 = vunpack.i.h.bf16 %v12227_v31  ;;  %v12228_v54 = vunpack.i.l.bf16 %v12227_v31 }
0x1ed3   : > { %10970 = vmatpush3.bf16.msra.mxu0 %v10969_v10 }
0x1ed4   : > { %v5749_v0 = vsel %vm3086_vm5, %v12263_v52, %v12264_v51  ;;  %10972 = vmatprep.subr.bf16.mxu0 %v10971_v33  ;;  %v5934_v36 = vsel %vm3134_vm3, %v12228_v54, %v12229_v34  ;;  %v5989_v51 = vld [vmem:[#allocation18] sm:$0xff] }
0x1ed5   : > { %v12267_v30 = vpop.permute.xlu0 %12266  ;;  %v12232_v6 = vpop.permute.xlu1 %12231  ;;  %v10973_v49 = vpack.c.bf16 %v5750_v32, %v5749_v0 }
0x1ed6   : > { %v12269_v61 = vunpack.i.h.bf16 %v12267_v30  ;;  %v12268_v19 = vunpack.i.l.bf16 %v12267_v30  ;;  %v12234_v21 = vunpack.i.h.bf16 %v12232_v6  ;;  %v12233_v63 = vunpack.i.l.bf16 %v12232_v6 }
0x1ed7   : > { %10974 = vmatpush3.bf16.msra.mxu0 %v10973_v49  ;;  %v5992_v49 = vld [vmem:[#allocation18 + $0x18] sm:$0xff] }
0x1ed8   : > { %10976 = vmatprep.subr.bf16.mxu0 %v10975_v56  ;;  %v5933_v26 = vsel %vm3134_vm3, %v12268_v19, %v12269_v61  ;;  %v5794_v42 = vsel %vm1569_vm9, %v12233_v63, %v12234_v21  ;;  %v5991_v61 = vld [vmem:[#allocation18 + $0x10] sm:$0xff]  ;;  %v5994_v56 = vld [vmem:[#allocation18 + $0x28] sm:$0xff] }
0x1ed9   : > { %v12272_v11 = vpop.permute.xlu0 %12271  ;;  %v12242_v12 = vpop.permute.xlu1 %12241  ;;  %v10979_v60 = vpack.c.bf16 %v5934_v36, %v5933_v26 }
0x1eda   : > { %v12274_v28 = vunpack.i.h.bf16 %v12272_v11  ;;  %v12273_v18 = vunpack.i.l.bf16 %v12272_v11  ;;  %v12244_v44 = vunpack.i.h.bf16 %v12242_v12  ;;  %v12243_v13 = vunpack.i.l.bf16 %v12242_v12  ;;  %v14582_v11 = vld [vmem:[%s15181_s8] ss:$0 sm:$0xff] }
0x1edb   : > { %10978 = vmatpush3.bf16.msra.mxu0 %v10977_v55 }
0x1edc   : > { %v5793_v46 = vsel %vm1569_vm9, %v12273_v18, %v12274_v28  ;;  %10980 = vmatprep.subr.bf16.mxu0 %v10979_v60  ;;  %v5936_v29 = vsel %vm3134_vm3, %v12243_v13, %v12244_v44 }
0x1edd   : > { %v12277_v62 = vpop.permute.xlu0 %12276  ;;  %v12282_v15 = vpop.permute.xlu1 %12281  ;;  %v10981_v35 = vpack.c.bf16 %v5794_v42, %v5793_v46  ;;  %v10983_v25 = vpack.c.bf16 %v5936_v29, %v5935_v53 }
0x1ede   : > { %v12279_v59 = vunpack.i.h.bf16 %v12277_v62  ;;  %v12278_v23 = vunpack.i.l.bf16 %v12277_v62  ;;  %v12284_v38 = vunpack.i.h.bf16 %v12282_v15  ;;  %v12283_v39 = vunpack.i.l.bf16 %v12282_v15 }
0x1edf   : > { %10982 = vmatpush3.bf16.msra.mxu0 %v10981_v35 }
0x1ee0   : > { %v5795_v40 = vsel %vm1569_vm9, %v12278_v23, %v12279_v59  ;;  %v5796_v27 = vsel %vm1569_vm9, %v12283_v39, %v12284_v38  ;;  %10984 = vmatprep.subr.bf16.mxu0 %v10983_v25 }
0x1ee1   : > { %v12292_v43 = vpop.permute.xlu0 %12291  ;;  %v12287_v45 = vpop.permute.xlu1 %12286  ;;  %v10985_v31 = vpack.c.bf16 %v5796_v27, %v5795_v40 }
0x1ee2   : > { %v12294_v10 = vunpack.i.h.bf16 %v12292_v43  ;;  %v12293_v33 = vunpack.i.l.bf16 %v12292_v43  ;;  %v12289_v48 = vunpack.i.h.bf16 %v12287_v45  ;;  %v12288_v50 = vunpack.i.l.bf16 %v12287_v45 }
0x1ee3   : > { %10986 = vmatpush3.bf16.msra.mxu0 %v10985_v31 }
0x1ee4   : > { %v5977_v52 = vsel %vm15201_vm6, %v12293_v33, %v12294_v10  ;;  %v5978_v57 = vsel %vm15202_vm2, %v12288_v50, %v12289_v48 }
0x1ee5   : > { %v12297_v58 = vpop.permute.xlu0 %12296  ;;  %v12302_v32 = vpop.permute.xlu1 %12301  ;;  %v10987_v0 = vpack.c.bf16 %v5978_v57, %v5977_v52 }
0x1ee6   : > { %v12299_v34 = vunpack.i.h.bf16 %v12297_v58  ;;  %v12298_v54 = vunpack.i.l.bf16 %v12297_v58  ;;  %v12304_v30 = vunpack.i.h.bf16 %v12302_v32  ;;  %v12303_v6 = vunpack.i.l.bf16 %v12302_v32  ;;  %6102 = vmatmul.mubr.f32.vlgmr.msra.gmra.mrb[32].mxu0 %v5989_v51 }
0x1ee7   : > { %10988 = vmatprep.subr.bf16.mxu0 %v10987_v0  ;;  %6106 = vmatprep.mubr.f32.mxu0 %v5993_v16 }
0x1ee8   : > { %10990 = vmatpush3.bf16.msra.mxu0 %v10987_v0  ;;  %v5979_v14 = vsel %vm15203_vm7, %v12298_v54, %v12299_v34  ;;  %v5980_v17 = vsel %vm15204_vm8, %v12303_v6, %v12304_v30  ;;  %v6417_v54 = vld [vmem:[#allocation20 + $0x8] sm:$0xff] }
0x1ee9   : > { %v10991_v19 = vpack.c.bf16 %v5980_v17, %v5979_v14 }
0x1eea   : > { %6107 = vmatmul.mubr.f32.gmra.mrb[34].mxu0 %v5992_v49 }
0x1eeb   : > { %10992 = vmatprep.subr.bf16.mxu0 %v10991_v19  ;;  %10306 = vmatprep.mubr.msk.f32.mxu0 %vm3753_vm14, %v5991_v61 }
0x1eec   : > { %10994 = vmatpush3.bf16.msra.mxu0 %v10991_v19 }
0x1eed   : > { %10995 = vmatprep.subr.bf16.mxu0 %v13156_v7 }
0x1eef   : > { %10307 = vmatmul.mubr.msk.f32.vlgmr.msra.gmra.mrb[36].mxu0 %vm3753_vm14, %v5994_v56 }
0x1ef0   : > { %9492 = vmatprep.mubr.msk.f32.mxu0 %vm3074_vm4, %v6417_v54 }
0x1fb9   : > { %v9812_v20 = vpop.f32.mrb[32].mxu0 }
0x1fba   : > { %v9813_v41 = vpop.f32.mrb[33].mxu0 }
0x1fbb   : > { %v9814_v37 = vadd.f32 %v9813_v41, %v9812_v20 }
0x1fbd   : > { %v9815_v21 = vpop.f32.mrb[34].mxu0 }
0x1fbe   : > { %v9816_v63 = vpop.f32.mrb[35].mxu0 }
0x1fbf   : > { %v9817_v26 = vadd.f32 %v9816_v63, %v9815_v21 }
0x1fc2   : > { %v10308_v36 = vpop.f32.mrb[36].mxu0 }
0x1fc3   : > { %v6184_v12 = vadd.f32 %v10308_v36, %v9817_v26  ;;  %v6178_v55 = vpop.f32.mrb[37].mxu0 }
0x1fc4   : > { %v6179_v60 = vadd.f32 %v9814_v37, %v6178_v55 }
0x1fc5   : > { %v6195_v28 = vmul.f32 %v14582_v11, %v6184_v12 }
0x1fc6   : > { %v6194_v18 = vmul.f32 %v14582_v11, %v6179_v60 }
0x1fc7   : > { %6198 = vadd.xlane.f32.xlu1 %v6195_v28 }
0x1fc8   : > { %6196 = vadd.xlane.f32.xlu0 %v6194_v18 }
0x2054   : > { %v6199_v44 = vpop.xlane.xlu1 %6198 }
0x2055   : > { %v6201_v13 = vmul.f32 0.015625, %v6199_v44  ;;  %v6197_v42 = vpop.xlane.xlu0 %6196 }
0x2056   : > { %v6200_v46 = vmul.f32 0.015625, %v6197_v42 }
0x2057   : > { %v6203_v53 = vsub.f32 %v6184_v12, %v6201_v13 }
0x2058   : > { %v6202_v29 = vsub.f32 %v6179_v60, %v6200_v46 }
0x2059   : > { %v6205_v35 = vmul.f32 %v14582_v11, %v6203_v53 }
0x205a   : > { %v6204_v62 = vmul.f32 %v14582_v11, %v6202_v29 }
0x205b   : > { %v6207_v25 = vmul.f32 %v6205_v35, %v6205_v35 }
0x205c   : > { %v6206_v15 = vmul.f32 %v6204_v62, %v6204_v62 }
0x205e   : > { %6208 = vadd.xlane.f32.xlu0 %v6206_v15 }
0x2062   : > { %6210 = vadd.xlane.f32.xlu0 %v6207_v25 }
0x20eb   : > { %v6209_v59 = vpop.xlane.xlu0 %6208 }
0x20ec   : > { %v6212_v23 = vmul.f32 0.015625, %v6209_v59 }
0x20ee   : > { %v6214_v38 = vadd.f32 1e-05, %v6212_v23 }
0x20ef   : > { %v6211_v39 = vpop.xlane.xlu0 %6210 }
0x20f0   : > { %12652 = vrsqrt.f32 %v6214_v38  ;;  %v6213_v40 = vmul.f32 0.015625, %v6211_v39 }
0x20f2   : > { %v6215_v27 = vadd.f32 1e-05, %v6213_v40 }
0x20f4   : > { %12654 = vrsqrt.f32 %v6215_v27 }
0x20fa   : > { %v12653_v43 = vpop.eup %12652 }
0x20fb   : > { %v6218_v45 = vmul.f32 %v12653_v43, %v6202_v29 }
0x20fd   : > { %v6222_v31 = vmul.f32 0.2, %v6218_v45  ;;  %vm6220_vm14 = vcmp.ge.f32.partialorder %v6218_v45, 0.0 }
0x20fe   : > { %v12655_v10 = vpop.eup %12654 }
0x20ff   : > { %v6219_v33 = vmul.f32 %v12655_v10, %v6203_v53  ;;  %v6224_v48 = vsel %vm6220_vm14, %v6218_v45, %v6222_v31 }
0x2100   : > { %v14589_v52 = vmul.f32 %v14582_v11, %v6224_v48 }
0x2101   : > { %vm6221_vm11 = vcmp.ge.f32.partialorder %v6219_v33, 0.0  ;;  %v6223_v50 = vmul.f32 0.2, %v6219_v33 }
0x2102   : > { %v12315_v32 = vpack.i.bf16 %v14589_v52, %v13149_v1  ;;  %v12360_v0 = vpack.i.bf16 %v13149_v1, %v14589_v52 }
0x2103   : > { %v6225_v51 = vsel %vm6221_vm11, %v6219_v33, %v6223_v50 }
0x2104   : > { %v14592_v57 = vmul.f32 %v14582_v11, %v6225_v51 }
0x2106   : > { %v12310_v16 = vpack.i.bf16 %v14592_v57, %v13149_v1  ;;  %v11008_v58 = vpack.c.bf16 %v14592_v57, %v14589_v52  ;;  %v12345_v34 = vpack.i.bf16 %v13149_v1, %v14592_v57 }
0x2108   : > { %12311 = vrot.lane.b32.xlu1 %v12310_v16, %s15196_s10  ;;  %12306 = vrot.lane.b32.xlu0 %v12310_v16, %s15195_s28 }
0x210c   : > { %12316 = vrot.lane.b32.xlu1 %v12315_v32, %s15195_s28  ;;  %12331 = vrot.lane.b32.xlu0 %v12315_v32, %s15198_s15  ;;  %s15209_s28 = smov 23  }
0x2110   : > { %12321 = vrot.lane.b32.xlu1 %v12315_v32, %s15196_s10  ;;  %12336 = vrot.lane.b32.xlu0 %v12315_v32, %s15188_s0  ;;  %s15210_s10 = smov 105  }
0x2114   : > { %12326 = vrot.lane.b32.xlu1 %v12310_v16, %s15198_s15  ;;  %12361 = vrot.lane.b32.xlu0 %v12360_v0, %s15190_s23  ;;  %s15212_s15 = smov 103  }
0x2118   : > { %12341 = vrot.lane.b32.xlu1 %v12310_v16, %s15188_s0  ;;  %12366 = vrot.lane.b32.xlu0 %v12360_v0, %s15197_s22 }
0x211c   : > { %12346 = vrot.lane.b32.xlu1 %v12345_v34, %s15190_s23  ;;  %12371 = vrot.lane.b32.xlu0 %v12360_v0, %s15199_s2 }
0x2120   : > { %12351 = vrot.lane.b32.xlu1 %v12345_v34, %s15197_s22  ;;  %12376 = vrot.lane.b32.xlu0 %v12360_v0, %s15200_s3  ;;  %s15211_s22 = smov 104  }
0x2124   : > { %12356 = vrot.lane.b32.xlu1 %v12345_v34, %s15199_s2  ;;  %s15207_s2 = smov 25  }
0x2128   : > { %12381 = vrot.lane.b32.xlu1 %v12345_v34, %s15200_s3  ;;  %s15208_s3 = smov 24  }
0x217a   : > { %v12312_v30 = vpop.permute.xlu1 %12311  ;;  %v12307_v6 = vpop.permute.xlu0 %12306 }
0x217b   : > { %v12309_v49 = vunpack.i.h.bf16 %v12307_v6  ;;  %v12308_v14 = vunpack.i.l.bf16 %v12307_v6  ;;  %v12314_v20 = vunpack.i.h.bf16 %v12312_v30  ;;  %v12313_v41 = vunpack.i.l.bf16 %v12312_v30 }
0x217d   : > { %v6253_v37 = vsel %vm3062_vm15, %v12308_v14, %v12309_v49  ;;  %v6275_v60 = vsel %vm3074_vm4, %v12313_v41, %v12314_v20 }
0x217e   : > { %v12317_v17 = vpop.permute.xlu1 %12316  ;;  %v12332_v61 = vpop.permute.xlu0 %12331 }
0x217f   : > { %v12319_v19 = vunpack.i.h.bf16 %v12317_v17  ;;  %v12318_v56 = vunpack.i.l.bf16 %v12317_v17  ;;  %v12334_v28 = vunpack.i.h.bf16 %v12332_v61  ;;  %v12333_v18 = vunpack.i.l.bf16 %v12332_v61 }
0x2181   : > { %v6252_v21 = vsel %vm3062_vm15, %v12318_v56, %v12319_v19  ;;  %v6296_v62 = vsel %vm3086_vm5, %v12333_v18, %v12334_v28 }
0x2182   : > { %v10996_v63 = vpack.c.bf16 %v6253_v37, %v6252_v21  ;;  %v12322_v26 = vpop.permute.xlu1 %12321  ;;  %v12337_v36 = vpop.permute.xlu0 %12336 }
0x2183   : > { %v12324_v12 = vunpack.i.h.bf16 %v12322_v26  ;;  %v12323_v55 = vunpack.i.l.bf16 %v12322_v26  ;;  %v12339_v15 = vunpack.i.h.bf16 %v12337_v36  ;;  %v12338_v35 = vunpack.i.l.bf16 %v12337_v36 }
0x2184   : > { %10997 = vmatpush1.bf16.msra.mxu0 %v10996_v63 }
0x2185   : > { %v6274_v44 = vsel %vm3074_vm4, %v12323_v55, %v12324_v12  ;;  %10998 = vmatprep.subr.bf16.mxu0 %v13156_v7  ;;  %v6318_v40 = vsel %vm1569_vm9, %v12338_v35, %v12339_v15 }
0x2186   : > { %v10999_v13 = vpack.c.bf16 %v6275_v60, %v6274_v44  ;;  %v12327_v42 = vpop.permute.xlu1 %12326  ;;  %v12362_v29 = vpop.permute.xlu0 %12361  ;;  %v6416_v44 = vld [vmem:[#allocation20] sm:$0xff] }
0x2187   : > { %v12329_v46 = vunpack.i.h.bf16 %v12327_v42  ;;  %v12328_v53 = vunpack.i.l.bf16 %v12327_v42  ;;  %v12364_v48 = vunpack.i.h.bf16 %v12362_v29  ;;  %v12363_v50 = vunpack.i.l.bf16 %v12362_v29  ;;  %v6418_v42 = vld [vmem:[#allocation20 + $0x10] sm:$0xff] }
0x2188   : > { %11000 = vmatpush1.bf16.msra.mxu0 %v10999_v13  ;;  %v6419_v13 = vld [vmem:[#allocation20 + $0x18] sm:$0xff] }
0x2189   : > { %v6297_v25 = vsel %vm3086_vm5, %v12328_v53, %v12329_v46  ;;  %11001 = vmatprep.subr.bf16.mxu0 %v13156_v7  ;;  %v6344_v54 = vsel %vm1601_vm10, %v12363_v50, %v12364_v48 }
0x218a   : > { %v11002_v59 = vpack.c.bf16 %v6297_v25, %v6296_v62  ;;  %v12342_v23 = vpop.permute.xlu1 %12341  ;;  %v12367_v45 = vpop.permute.xlu0 %12366 }
0x218b   : > { %v12344_v38 = vunpack.i.h.bf16 %v12342_v23  ;;  %v12343_v39 = vunpack.i.l.bf16 %v12342_v23  ;;  %v12369_v30 = vunpack.i.h.bf16 %v12367_v45  ;;  %v12368_v6 = vunpack.i.l.bf16 %v12367_v45 }
0x218c   : > { %11003 = vmatpush1.bf16.msra.mxu0 %v11002_v59 }
0x218d   : > { %v6319_v27 = vsel %vm1569_vm9, %v12343_v39, %v12344_v38  ;;  %11004 = vmatprep.subr.bf16.mxu0 %v13156_v7  ;;  %v6366_v56 = vsel %vm3122_vm1, %v12368_v6, %v12369_v30 }
0x218e   : > { %v11005_v43 = vpack.c.bf16 %v6319_v27, %v6318_v40  ;;  %v12347_v31 = vpop.permute.xlu1 %12346  ;;  %v12372_v34 = vpop.permute.xlu0 %12371 }
0x218f   : > { %v12349_v10 = vunpack.i.h.bf16 %v12347_v31  ;;  %v12348_v33 = vunpack.i.l.bf16 %v12347_v31  ;;  %v12374_v20 = vunpack.i.h.bf16 %v12372_v34  ;;  %v12373_v41 = vunpack.i.l.bf16 %v12372_v34 }
0x2190   : > { %11006 = vmatpush1.bf16.msra.mxu0 %v11005_v43 }
0x2191   : > { %11007 = vmatprep.subr.bf16.mxu0 %v13156_v7  ;;  %v6345_v16 = vsel %vm1601_vm10, %v12348_v33, %v12349_v10  ;;  %v6388_v26 = vsel %vm3134_vm3, %v12373_v41, %v12374_v20  ;;  %v6635_v20 = vld [vmem:[#allocation21 + $0x8] sm:$0xff]  ;;  %v6710_v41 = vld [vmem:[#allocation21 + $0x10] sm:$0xff] }
0x2192   : > { %v12352_v51 = vpop.permute.xlu1 %12351  ;;  %v11011_v49 = vpack.c.bf16 %v6345_v16, %v6344_v54  ;;  %v12377_v57 = vpop.permute.xlu0 %12376 }
0x2193   : > { %v12354_v32 = vunpack.i.h.bf16 %v12352_v51  ;;  %v12353_v0 = vunpack.i.l.bf16 %v12352_v51  ;;  %v12379_v36 = vunpack.i.h.bf16 %v12377_v57  ;;  %v12378_v12 = vunpack.i.l.bf16 %v12377_v57 }
0x2194   : > { %11009 = vmatpush1.bf16.msra.mxu0 %v11008_v58 }
0x2195   : > { %11010 = vmatprep.subr.bf16.mxu0 %v13156_v7  ;;  %v6367_v17 = vsel %vm3122_vm1, %v12353_v0, %v12354_v32  ;;  %vm15205_vm1 = vmmov %vm15202_vm2 }
0x2196   : > { %v12357_v14 = vpop.permute.xlu1 %12356  ;;  %v11014_v52 = vpack.c.bf16 %v6367_v17, %v6366_v56  ;;  %vm15206_vm15 = vmmov %vm15205_vm1  ;;  %v6560_v56 = vld [vmem:[#allocation21] sm:$0xff] }
0x2197   : > { %v12359_v61 = vunpack.i.h.bf16 %v12357_v14  ;;  %v12358_v19 = vunpack.i.l.bf16 %v12357_v14  ;;  %v6410_v28 = vsel %vm15206_vm15, %v12378_v12, %v12379_v36 }
0x2198   : > { %11012 = vmatpush1.bf16.msra.mxu0 %v11011_v49 }
0x2199   : > { %11013 = vmatprep.subr.bf16.mxu0 %v13156_v7  ;;  %v6389_v37 = vsel %vm3134_vm3, %v12358_v19, %v12359_v61 }
0x219a   : > { %v12382_v58 = vpop.permute.xlu1 %12381  ;;  %v11017_v55 = vpack.c.bf16 %v6389_v37, %v6388_v26 }
0x219b   : > { %v12384_v21 = vunpack.i.h.bf16 %v12382_v58  ;;  %v12383_v63 = vunpack.i.l.bf16 %v12382_v58 }
0x219c   : > { %11015 = vmatpush1.bf16.msra.mxu0 %v11014_v52  ;;  %v6785_v52 = vld [vmem:[#allocation21 + $0x18] sm:$0xff] }
0x219d   : > { %11016 = vmatprep.subr.bf16.mxu0 %v13156_v7  ;;  %v6411_v60 = vsel %vm15205_vm1, %v12383_v63, %v12384_v21  ;;  %vm15218_vm1 = vcmask 195584  }
0x219e   : > { %v11020_v18 = vpack.c.bf16 %v6411_v60, %v6410_v28  ;;  %vm15219_vm15 = vmmov %vm15218_vm1 }
0x21a0   : > { %11018 = vmatpush1.bf16.msra.mxu0 %v11017_v55 }
0x21a1   : > { %11019 = vmatprep.subr.bf16.mxu0 %v13156_v7 }
0x21a4   : > { %11021 = vmatpush1.bf16.msra.mxu0 %v11020_v18 }
0x21a5   : > { %11022 = vmatprep.subr.bf16.mxu0 %v13156_v7 }
0x21a7   : > { %6509 = vmatmul.mubr.f32.vlgmr.msra.gmra.mrb[38].mxu0 %v6416_v44  ;;  %v6963_v44 = vld [vmem:[#allocation9 + $0x188] sm:$0xff] }
0x21a8   : > { %9493 = vmatprep.mubr.msk.f32.mxu0 %vm3074_vm4, %v6419_v13  ;;  %v6966_v13 = vld [vmem:[#allocation9 + $0x1a0] sm:$0xff] }
0x21ab   : > { %6514 = vmatmul.mubr.f32.gmra.mrb[40].mxu0 %v6418_v42  ;;  %v6962_v42 = vld [vmem:[#allocation9 + $0x180] sm:$0xff] }
0x21ac   : > { %10313 = vmatprep.mubr.msk.f32.mxu0 %vm13150_vm0, %v13149_v1 }
0x227a   : > { %v6510_v46 = vpop.f32.mrb[38].mxu0 }
0x227b   : > { %v6526_v53 = vmul.f32 %v14582_v11, %v6510_v46  ;;  %v6512_v29 = vpop.f32.mrb[39].mxu0 }
0x227c   : > { %v6964_v29 = vld [vmem:[#allocation9 + $0x190] sm:$0xff] }
0x227d   : > { %6528 = vadd.xlane.f32.xlu0 %v6526_v53  ;;  %v6965_v53 = vld [vmem:[#allocation9 + $0x198] sm:$0xff] }
0x227e   : > { %v6515_v62 = vpop.f32.mrb[40].mxu0 }
0x227f   : > { %v6527_v15 = vmul.f32 %v14582_v11, %v6515_v62  ;;  %v6517_v35 = vpop.f32.mrb[41].mxu0 }
0x2281   : > { %6530 = vadd.xlane.f32.xlu1 %v6527_v15  ;;  %v11036_v15 = vpack.c.bf16 %v6965_v53, %v6962_v42 }
0x230a   : > { %v6529_v25 = vpop.xlane.xlu0 %6528 }
0x230b   : > { %v6532_v59 = vmul.f32 0.015625, %v6529_v25 }
0x230d   : > { %v6534_v23 = vsub.f32 %v6510_v46, %v6532_v59  ;;  %v11034_v46 = vpack.c.bf16 %v6966_v13, %v6963_v44  ;;  %v6983_v44 = vld [vmem:[#allocation9 + $0x228] sm:$0xff]  ;;  %v6982_v13 = vld [vmem:[#allocation9 + $0x220] sm:$0xff] }
0x230e   : > { %v6531_v38 = vpop.xlane.xlu1 %6530 }
0x230f   : > { %v6533_v39 = vmul.f32 0.015625, %v6531_v38  ;;  %v6536_v40 = vmul.f32 %v14582_v11, %v6534_v23 }
0x2311   : > { %v6535_v27 = vsub.f32 %v6515_v62, %v6533_v39  ;;  %v6538_v43 = vmul.f32 %v6536_v40, %v6536_v40  ;;  %v6967_v62 = vld [vmem:[#allocation9 + $0x1a8] sm:$0xff] }
0x2312   : > { %v11067_v35 = vpack.c.bf16 %v6967_v62, %v6964_v29  ;;  %v6987_v29 = vld [vmem:[#allocation9 + $0x248] sm:$0xff]  ;;  %v6990_v62 = vld [vmem:[#allocation9 + $0x260] sm:$0xff] }
0x2313   : > { %6540 = vadd.xlane.f32.xlu0 %v6538_v43  ;;  %v6537_v45 = vmul.f32 %v14582_v11, %v6535_v27 }
0x2314   : > { %11068 = vmatpush3.bf16.msra.mxu1 %v11067_v35  ;;  %v11050_v35 = vpack.c.bf16 %v6990_v62, %v6987_v29 }
0x2315   : > { %v6539_v31 = vmul.f32 %v6537_v45, %v6537_v45  ;;  %11069 = vmatprep.subr.bf16.mxu1 %v13156_v7 }
0x2317   : > { %6542 = vadd.xlane.f32.xlu0 %v6539_v31 }
0x23a0   : > { %v6541_v10 = vpop.xlane.xlu0 %6540 }
0x23a1   : > { %v6544_v33 = vmul.f32 0.015625, %v6541_v10 }
0x23a3   : > { %v6546_v48 = vadd.f32 1e-05, %v6544_v33 }
0x23a4   : > { %v6543_v50 = vpop.xlane.xlu0 %6542 }
0x23a5   : > { %12656 = vrsqrt.f32 %v6546_v48  ;;  %v6545_v51 = vmul.f32 0.015625, %v6543_v50 }
0x23a7   : > { %v6547_v16 = vadd.f32 1e-05, %v6545_v51 }
0x23a9   : > { %12658 = vrsqrt.f32 %v6547_v16 }
0x23af   : > { %v12657_v32 = vpop.eup %12656 }
0x23b0   : > { %v6550_v0 = vmul.f32 %v12657_v32, %v6534_v23 }
0x23b2   : > { %v6554_v34 = vmul.f32 0.2, %v6550_v0  ;;  %vm6552_vm3 = vcmp.ge.f32.partialorder %v6550_v0, 0.0 }
0x23b3   : > { %v12659_v54 = vpop.eup %12658 }
0x23b4   : > { %v6551_v30 = vmul.f32 %v12659_v54, %v6535_v27  ;;  %v6556_v49 = vsel %vm6552_vm3, %v6550_v0, %v6554_v34  ;;  %vm15220_vm3 = vmmov %vm15218_vm1 }
0x23b5   : > { %v6558_v17 = vmul.f32 %v14582_v11, %v6556_v49  ;;  %v6968_v49 = vld [vmem:[#allocation9 + $0x1b0] sm:$0xff] }
0x23b6   : > { %vm6553_vm5 = vcmp.ge.f32.partialorder %v6551_v30, 0.0  ;;  %v6555_v6 = vmul.f32 0.2, %v6551_v30 }
0x23b8   : > { %v6557_v14 = vsel %vm6553_vm5, %v6551_v30, %v6555_v6  ;;  %v6969_v30 = vld [vmem:[#allocation9 + $0x1b8] sm:$0xff]  ;;  %v6972_v6 = vld [vmem:[#allocation9 + $0x1d0] sm:$0xff] }
0x23b9   : > { %v6559_v61 = vmul.f32 %v14582_v11, %v6557_v14  ;;  %v11038_v14 = vpack.c.bf16 %v6972_v6, %v6969_v30  ;;  %v6998_v30 = vld [vmem:[#allocation9 + $0x2a0] sm:$0xff] }
0x23bb   : > { %v11023_v19 = vpack.c.bf16 %v6559_v61, %v6558_v17  ;;  %v6971_v17 = vld [vmem:[#allocation9 + $0x1c8] sm:$0xff]  ;;  %v6970_v61 = vld [vmem:[#allocation9 + $0x1c0] sm:$0xff] }
0x23bd   : > { %11024 = vmatpush3.bf16.msra.mxu0 %v11023_v19 }
0x23be   : > { %11025 = vmatprep.subr.bf16.mxu0 %v13156_v7 }
0x23c0   : > { %10314 = vmatmul.mubr.msk.f32.vlgmr.msra.gmra.mrb[42].mxu0 %vm3074_vm4, %v6560_v56  ;;  %v11040_v56 = vpack.c.bf16 %v6971_v17, %v6968_v49  ;;  %v7001_v49 = vld [vmem:[#allocation9 + $0x2b8] sm:$0xff]  ;;  %v7003_v17 = vld [vmem:[#allocation9 + $0x2c8] sm:$0xff] }
0x23c1   : > { %11027 = vmatpush3.bf16.msra.mxu0 %v11023_v19  ;;  %10320 = vmatprep.mubr.msk.f32.mxu0 %vm13150_vm0, %v13149_v1 }
0x23c2   : > { %11028 = vmatprep.subr.bf16.mxu0 %v13156_v7 }
0x23c4   : > { %10321 = vmatmul.mubr.msk.f32.vlgmr.msra.gmra.mrb[44].mxu0 %vm3074_vm4, %v6635_v20 }
0x23c5   : > { %11030 = vmatpush3.bf16.msra.mxu0 %v11023_v19  ;;  %10327 = vmatprep.mubr.msk.f32.mxu0 %vm13150_vm0, %v13149_v1 }
0x23c6   : > { %11031 = vmatprep.subr.bf16.mxu0 %v13156_v7 }
0x23c8   : > { %10328 = vmatmul.mubr.msk.f32.vlgmr.msra.gmra.mrb[46].mxu0 %vm3074_vm4, %v6710_v41  ;;  %v6975_v41 = vld [vmem:[#allocation9 + $0x1e8] sm:$0xff] }
0x23c9   : > { %11033 = vmatpush3.bf16.msra.mxu0 %v11023_v19  ;;  %10334 = vmatprep.mubr.msk.f32.mxu0 %vm13150_vm0, %v13149_v1  ;;  %v6973_v19 = vld [vmem:[#allocation9 + $0x1d8] sm:$0xff] }
0x23ca   : > { %11035 = vmatprep.subr.bf16.mxu0 %v11034_v46  ;;  %v11070_v20 = vpack.c.bf16 %v6973_v19, %v6970_v61  ;;  %v6985_v46 = vld [vmem:[#allocation9 + $0x238] sm:$0xff]  ;;  %v11060_v61 = vpack.c.bf16 %v7001_v49, %v6998_v30 }
0x23cb   : > { %v11076_v53 = vpack.c.bf16 %v6985_v46, %v6982_v13 }
0x23cc   : > { %10335 = vmatmul.mubr.msk.f32.vlgmr.msra.gmra.mrb[48].mxu0 %vm3074_vm4, %v6785_v52  ;;  %11071 = vmatpush3.bf16.msra.mxu1 %v11070_v20  ;;  %v6978_v52 = vld [vmem:[#allocation9 + $0x200] sm:$0xff]  ;;  %v7008_v20 = vld [vmem:[#allocation9 + $0x2f0] sm:$0xff] }
0x23cd   : > { %7074 = vmatprep.mubr.f32.mxu0 %v13149_v1  ;;  %11037 = vmatpush1.bf16.msra.mxu0 %v11036_v15  ;;  %v6986_v15 = vld [vmem:[#allocation9 + $0x240] sm:$0xff] }
0x23ce   : > { %11039 = vmatprep.subr.bf16.mxu0 %v11038_v14  ;;  %11072 = vmatprep.subr.bf16.mxu1 %v13156_v7  ;;  %v7000_v14 = vld [vmem:[#allocation9 + $0x2b0] sm:$0xff] }
0x23cf   : > { %v11085_v19 = vpack.c.bf16 %v7003_v17, %v7000_v14  ;;  %v6923_v14 = vld [vmem:[#allocation9 + $0x78] sm:$0xff]  ;;  %v6922_v17 = vld [vmem:[#allocation9 + $0x70] sm:$0xff] }
0x23d1   : > { %11041 = vmatpush1.bf16.msra.mxu0 %v11040_v56  ;;  %v7005_v56 = vld [vmem:[#allocation9 + $0x2d8] sm:$0xff] }
0x2493   : > { %v6630_v57 = vpop.f32.mrb[42].mxu0 }
0x2494   : > { %v6859_v58 = vmul.f32 %v14582_v11, %v6630_v57  ;;  %v10315_v37 = vpop.f32.mrb[43].mxu0 }
0x2495   : > { %v6977_v37 = vld [vmem:[#allocation9 + $0x1f8] sm:$0xff] }
0x2496   : > { %6860 = vadd.xlane.f32.xlu1 %v6859_v58  ;;  %v6974_v58 = vld [vmem:[#allocation9 + $0x1e0] sm:$0xff] }
0x2497   : > { %v6705_v21 = vpop.f32.mrb[44].mxu0 }
0x2498   : > { %v6863_v63 = vmul.f32 %v14582_v11, %v6705_v21  ;;  %v10322_v26 = vpop.f32.mrb[45].mxu0 }
0x2499   : > { %v11044_v26 = vpack.c.bf16 %v6977_v37, %v6974_v58  ;;  %v7006_v58 = vld [vmem:[#allocation9 + $0x2e0] sm:$0xff]  ;;  %v7009_v37 = vld [vmem:[#allocation9 + $0x2f8] sm:$0xff] }
0x249a   : > { %6864 = vadd.xlane.f32.xlu0 %v6863_v63  ;;  %v12395_v63 = vpack.i.bf16 %v13956_v9, %v13953_v8 }
0x249b   : > { %v6780_v36 = vpop.f32.mrb[46].mxu0 }
0x249c   : > { %v6867_v12 = vmul.f32 %v14582_v11, %v6780_v36  ;;  %v10329_v55 = vpop.f32.mrb[47].mxu0 }
0x249d   : > { %v6981_v55 = vld [vmem:[#allocation9 + $0x218] sm:$0xff] }
0x249e   : > { %6868 = vadd.xlane.f32.xlu1 %v6867_v12 }
0x249f   : > { %v6855_v60 = vpop.f32.mrb[48].mxu0 }
0x24a0   : > { %v6871_v28 = vmul.f32 %v14582_v11, %v6855_v60  ;;  %v10336_v18 = vpop.f32.mrb[49].mxu0 }
0x24a1   : > { %v6980_v18 = vld [vmem:[#allocation9 + $0x210] sm:$0xff] }
0x24a2   : > { %6872 = vadd.xlane.f32.xlu0 %v6871_v28  ;;  %v11048_v42 = vpack.c.bf16 %v6983_v44, %v6980_v18 }
0x2523   : > { %v6861_v25 = vpop.xlane.xlu1 %6860 }
0x2527   : > { %v6865_v59 = vpop.xlane.xlu0 %6864 }
0x2528   : > { %v6866_v38 = vadd.f32 %v6865_v59, %v6861_v25  ;;  %v6989_v25 = vld [vmem:[#allocation9 + $0x258] sm:$0xff]  ;;  %v6988_v59 = vld [vmem:[#allocation9 + $0x250] sm:$0xff] }
0x252b   : > { %v6869_v23 = vpop.xlane.xlu1 %6868 }
0x252c   : > { %v6870_v39 = vadd.f32 %v6869_v23, %v6866_v38  ;;  %v6991_v23 = vld [vmem:[#allocation9 + $0x268] sm:$0xff]  ;;  %v11052_v38 = vpack.c.bf16 %v6989_v25, %v6986_v15  ;;  %v6908_v15 = vld [vmem:[#allocation9] sm:$0xff]  ;;  %v6910_v25 = vld [vmem:[#allocation9 + $0x10] sm:$0xff] }
0x252f   : > { %v6873_v40 = vpop.xlane.xlu0 %6872 }
0x2530   : > { %v6874_v27 = vadd.f32 %v6873_v40, %v6870_v39  ;;  %v11079_v39 = vpack.c.bf16 %v6991_v23, %v6988_v59  ;;  %v6993_v40 = vld [vmem:[#allocation9 + $0x278] sm:$0xff]  ;;  %v6913_v59 = vld [vmem:[#allocation9 + $0x28] sm:$0xff] }
0x2532   : > { %v6875_v43 = vmul.f32 0.00390625, %v6874_v27  ;;  %v6996_v27 = vld [vmem:[#allocation9 + $0x290] sm:$0xff] }
0x2534   : > { %v14677_v45 = vsub.f32 %v6705_v21, %v6875_v43  ;;  %v14679_v31 = vsub.f32 %v6630_v57, %v6875_v43  ;;  %v14681_v10 = vsub.f32 %v6855_v60, %v6875_v43  ;;  %v14683_v33 = vsub.f32 %v6780_v36, %v6875_v43  ;;  %v6976_v21 = vld [vmem:[#allocation9 + $0x1f0] sm:$0xff]  ;;  %v6979_v36 = vld [vmem:[#allocation9 + $0x208] sm:$0xff] }
0x2535   : > { %v11042_v57 = vpack.c.bf16 %v6978_v52, %v6975_v41  ;;  %v11073_v12 = vpack.c.bf16 %v6979_v36, %v6976_v21  ;;  %v6984_v60 = vld [vmem:[#allocation9 + $0x230] sm:$0xff]  ;;  %v11062_v52 = vpack.c.bf16 %v7008_v20, %v7005_v56  ;;  %v6909_v21 = vld [vmem:[#allocation9 + $0x8] sm:$0xff]  ;;  %v11088_v36 = vpack.c.bf16 %v7009_v37, %v7006_v58  ;;  %v6928_v58 = vld [vmem:[#allocation9 + $0xa0] sm:$0xff] }
0x2536   : > { %v6883_v48 = vmul.f32 %v14582_v11, %v14677_v45  ;;  %v6877_v50 = vmul.f32 %v14582_v11, %v14679_v31  ;;  %v6895_v32 = vmul.f32 %v14582_v11, %v14681_v10  ;;  %v6889_v0 = vmul.f32 %v14582_v11, %v14683_v33  ;;  %v6992_v43 = vld [vmem:[#allocation9 + $0x270] sm:$0xff]  ;;  %v6931_v37 = vld [vmem:[#allocation9 + $0xb8] sm:$0xff] }
0x2537   : > { %11043 = vmatprep.subr.bf16.mxu0 %v11042_v57  ;;  %11074 = vmatpush3.bf16.msra.mxu1 %v11073_v12  ;;  %v11046_v28 = vpack.c.bf16 %v6984_v60, %v6981_v55  ;;  %v7004_v41 = vld [vmem:[#allocation9 + $0x2d0] sm:$0xff]  ;;  %v7007_v57 = vld [vmem:[#allocation9 + $0x2e8] sm:$0xff] }
0x2538   : > { %v6884_v51 = vmul.f32 %v6883_v48, %v6883_v48  ;;  %v6878_v16 = vmul.f32 %v6877_v50, %v6877_v50  ;;  %v6896_v34 = vmul.f32 %v6895_v32, %v6895_v32  ;;  %v6890_v54 = vmul.f32 %v6889_v0, %v6889_v0  ;;  %11045 = vmatpush1.bf16.msra.mxu0 %v11044_v26  ;;  %v6995_v50 = vld [vmem:[#allocation9 + $0x288] sm:$0xff] }
0x2539   : > { %11075 = vmatprep.subr.bf16.mxu1 %v13156_v7  ;;  %11047 = vmatprep.subr.bf16.mxu0 %v11046_v28  ;;  %v11054_v48 = vpack.c.bf16 %v6996_v27, %v6993_v40  ;;  %v11056_v32 = vpack.c.bf16 %v6995_v50, %v6992_v43  ;;  %v11064_v26 = vpack.c.bf16 %v7007_v57, %v7004_v41  ;;  %v6926_v41 = vld [vmem:[#allocation9 + $0x90] sm:$0xff]  ;;  %v6929_v57 = vld [vmem:[#allocation9 + $0xa8] sm:$0xff] }
0x253a   : > { %6885 = vadd.xlane.f32.xlu0 %v6884_v51  ;;  %6879 = vadd.xlane.f32.xlu1 %v6878_v16  ;;  %v6994_v51 = vld [vmem:[#allocation9 + $0x280] sm:$0xff]  ;;  %v6997_v16 = vld [vmem:[#allocation9 + $0x298] sm:$0xff]  ;;  %v11123_v43 = vpack.c.bf16 %v6913_v59, %v6910_v25  ;;  %v6945_v59 = vld [vmem:[#allocation9 + $0x128] sm:$0xff] }
0x253b   : > { %11077 = vmatpush3.bf16.msra.mxu1 %v11076_v53  ;;  %v11082_v0 = vpack.c.bf16 %v6997_v16, %v6994_v51  ;;  %v6917_v16 = vld [vmem:[#allocation9 + $0x48] sm:$0xff]  ;;  %v6943_v25 = vld [vmem:[#allocation9 + $0x118] sm:$0xff] }
0x253c   : > { %11049 = vmatpush1.bf16.msra.mxu0 %v11048_v42  ;;  %11078 = vmatprep.subr.bf16.mxu1 %v13156_v7 }
0x253d   : > { %11051 = vmatprep.subr.bf16.mxu0 %v11050_v35  ;;  %v6911_v35 = vld [vmem:[#allocation9 + $0x18] sm:$0xff] }
0x253e   : > { %6897 = vadd.xlane.f32.xlu0 %v6896_v34  ;;  %6891 = vadd.xlane.f32.xlu1 %v6890_v54  ;;  %v6999_v34 = vld [vmem:[#allocation9 + $0x2a8] sm:$0xff]  ;;  %v7002_v54 = vld [vmem:[#allocation9 + $0x2c0] sm:$0xff]  ;;  %v11092_v27 = vpack.c.bf16 %v6911_v35, %v6908_v15 }
0x253f   : > { %11080 = vmatpush3.bf16.msra.mxu1 %v11079_v39  ;;  %v11058_v6 = vpack.c.bf16 %v7002_v54, %v6999_v34  ;;  %v6918_v39 = vld [vmem:[#allocation9 + $0x50] sm:$0xff]  ;;  %v6921_v34 = vld [vmem:[#allocation9 + $0x68] sm:$0xff]  ;;  %v6940_v35 = vld [vmem:[#allocation9 + $0x100] sm:$0xff] }
0x2540   : > { %11053 = vmatpush1.bf16.msra.mxu0 %v11052_v38  ;;  %11081 = vmatprep.subr.bf16.mxu1 %v13156_v7  ;;  %v6915_v38 = vld [vmem:[#allocation9 + $0x38] sm:$0xff]  ;;  %v6941_v15 = vld [vmem:[#allocation9 + $0x108] sm:$0xff] }
0x2541   : > { %11055 = vmatprep.subr.bf16.mxu0 %v11054_v48  ;;  %v6914_v48 = vld [vmem:[#allocation9 + $0x30] sm:$0xff]  ;;  %v11094_v51 = vpack.c.bf16 %v6918_v39, %v6915_v38  ;;  %v11138_v39 = vpack.c.bf16 %v6943_v25, %v6940_v35  ;;  %v7315_v25 = vld [vmem:[#allocation9 + $0x388] sm:$0xff] }
0x2542   : > { %v11096_v54 = vpack.c.bf16 %v6917_v16, %v6914_v48  ;;  %v6946_v48 = vld [vmem:[#allocation9 + $0x130] sm:$0xff] }
0x2543   : > { %11083 = vmatpush3.bf16.msra.mxu1 %v11082_v0  ;;  %v6919_v0 = vld [vmem:[#allocation9 + $0x58] sm:$0xff]  ;;  %v6954_v16 = vld [vmem:[#allocation9 + $0x170] sm:$0xff] }
0x2544   : > { %11057 = vmatpush1.bf16.msra.mxu0 %v11056_v32  ;;  %11084 = vmatprep.subr.bf16.mxu1 %v13156_v7  ;;  %v6916_v32 = vld [vmem:[#allocation9 + $0x40] sm:$0xff]  ;;  %v7312_v35 = vld [vmem:[#allocation9 + $0x370] sm:$0xff] }
0x2545   : > { %11059 = vmatprep.subr.bf16.mxu0 %v11058_v6  ;;  %v11126_v30 = vpack.c.bf16 %v6919_v0, %v6916_v32  ;;  %v6920_v6 = vld [vmem:[#allocation9 + $0x60] sm:$0xff] }
0x2546   : > { %v11100_v56 = vpack.c.bf16 %v6923_v14, %v6920_v6  ;;  %v6952_v6 = vld [vmem:[#allocation9 + $0x160] sm:$0xff] }
0x2547   : > { %11086 = vmatpush3.bf16.msra.mxu1 %v11085_v19  ;;  %v6930_v19 = vld [vmem:[#allocation9 + $0xb0] sm:$0xff] }
0x2548   : > { %11061 = vmatpush1.bf16.msra.mxu0 %v11060_v61  ;;  %11087 = vmatprep.subr.bf16.mxu1 %v13156_v7  ;;  %v6927_v61 = vld [vmem:[#allocation9 + $0x98] sm:$0xff] }
0x2549   : > { %11063 = vmatprep.subr.bf16.mxu0 %v11062_v52  ;;  %v11102_v52 = vpack.c.bf16 %v6930_v19, %v6927_v61  ;;  %v7298_v19 = vld [vmem:[#allocation9 + $0x300] sm:$0xff] }
0x254b   : > { %11089 = vmatpush3.bf16.msra.mxu1 %v11088_v36  ;;  %v11132_v36 = vpack.c.bf16 %v6931_v37, %v6928_v58  ;;  %v7305_v58 = vld [vmem:[#allocation9 + $0x338] sm:$0xff]  ;;  %v7308_v37 = vld [vmem:[#allocation9 + $0x350] sm:$0xff] }
0x254c   : > { %11065 = vmatpush1.bf16.msra.mxu0 %v11064_v26  ;;  %11122 = vmatprep.subr.bf16.mxu1 %v13156_v7  ;;  %v11104_v26 = vpack.c.bf16 %v6929_v57, %v6926_v41  ;;  %v7300_v41 = vld [vmem:[#allocation9 + $0x310] sm:$0xff] }
0x254f   : > { %12391 = vrot.lane.b32.xlu1 %v13149_v1, %s15207_s2 }
0x2553   : > { %12396 = vrot.lane.b32.xlu1 %v12395_v63, %s15208_s3 }
0x2554   : > { %12386 = vrot.lane.b32.xlu0 %v12395_v63, %s15207_s2 }
0x2557   : > { %12406 = vrot.lane.b32.xlu1 %v12395_v63, %s15209_s28 }
0x2558   : > { %12401 = vrot.lane.b32.xlu0 %v13149_v1, %s15208_s3 }
0x255b   : > { %12416 = vrot.lane.b32.xlu1 %v12395_v63, %s15188_s0  ;;  %v6912_v63 = vld [vmem:[#allocation9 + $0x20] sm:$0xff] }
0x255c   : > { %12411 = vrot.lane.b32.xlu0 %v13149_v1, %s15209_s28  ;;  %v11090_v12 = vpack.c.bf16 %v6912_v63, %v6909_v21  ;;  %v6933_v21 = vld [vmem:[#allocation9 + $0xc8] sm:$0xff]  ;;  %v6936_v63 = vld [vmem:[#allocation9 + $0xe0] sm:$0xff] }
0x255e   : > { %11091 = vmatprep.subr.bf16.mxu0 %v11090_v12  ;;  %v6932_v12 = vld [vmem:[#allocation9 + $0xc0] sm:$0xff] }
0x2560   : > { %12421 = vrot.lane.b32.xlu0 %v13149_v1, %s15188_s0 }
0x25c7   : > { %v6886_v55 = vpop.xlane.xlu0 %6885  ;;  %v6880_v60 = vpop.xlane.xlu1 %6879 }
0x25c8   : > { %v6887_v28 = vadd.f32 %v6886_v55, %v6880_v60  ;;  %v11106_v55 = vpack.c.bf16 %v6936_v63, %v6933_v21  ;;  %v6935_v60 = vld [vmem:[#allocation9 + $0xd8] sm:$0xff] }
0x25cb   : > { %v6892_v18 = vpop.xlane.xlu1 %6891  ;;  %v6898_v13 = vpop.xlane.xlu0 %6897 }
0x25cc   : > { %v6893_v44 = vadd.f32 %v6892_v18, %v6887_v28  ;;  %v6934_v28 = vld [vmem:[#allocation9 + $0xd0] sm:$0xff]  ;;  %v6937_v18 = vld [vmem:[#allocation9 + $0xe8] sm:$0xff] }
0x25ce   : > { %v6899_v42 = vadd.f32 %v6898_v13, %v6893_v44  ;;  %v6939_v44 = vld [vmem:[#allocation9 + $0xf8] sm:$0xff]  ;;  %v6942_v13 = vld [vmem:[#allocation9 + $0x110] sm:$0xff] }
0x25d0   : > { %v6900_v46 = vmul.f32 0.00390625, %v6899_v42  ;;  %v11108_v42 = vpack.c.bf16 %v6935_v60, %v6932_v12  ;;  %v7307_v60 = vld [vmem:[#allocation9 + $0x348] sm:$0xff] }
0x25d2   : > { %v6901_v53 = vadd.f32 1e-05, %v6900_v46  ;;  %v11135_v46 = vpack.c.bf16 %v6937_v18, %v6934_v28  ;;  %v7306_v28 = vld [vmem:[#allocation9 + $0x340] sm:$0xff]  ;;  %v7309_v18 = vld [vmem:[#allocation9 + $0x358] sm:$0xff] }
0x25d4   : > { %12660 = vrsqrt.f32 %v6901_v53  ;;  %v6938_v53 = vld [vmem:[#allocation9 + $0xf0] sm:$0xff] }
0x25d5   : > { %v11112_v38 = vpack.c.bf16 %v6941_v15, %v6938_v53  ;;  %v7310_v53 = vld [vmem:[#allocation9 + $0x360] sm:$0xff]  ;;  %v7313_v15 = vld [vmem:[#allocation9 + $0x378] sm:$0xff] }
0x25de   : > { %v14714_v29 = vpop.eup %12660 }
0x25df   : > { %v6956_v62 = vmul.f32 %v14714_v29, %v14677_v45  ;;  %v6924_v45 = vld [vmem:[#allocation9 + $0x80] sm:$0xff]  ;;  %v6903_v32 = vmul.f32 %v14714_v29, %v14679_v31 }
0x25e0   : > { %v11098_v49 = vpack.c.bf16 %v6924_v45, %v6921_v34  ;;  %v6950_v45 = vld [vmem:[#allocation9 + $0x150] sm:$0xff] }
0x25e1   : > { %vm6957_vm12 = vcmp.ge.f32.partialorder %v6956_v62, 0.0  ;;  %v6958_v23 = vmul.f32 0.2, %v6956_v62  ;;  %v6905_v14 = vmul.f32 0.2, %v6903_v32  ;;  %vm6904_vm13 = vcmp.ge.f32.partialorder %v6903_v32, 0.0 }
0x25e3   : > { %v6959_v40 = vsel %vm6957_vm12, %v6956_v62, %v6958_v23  ;;  %v11110_v62 = vpack.c.bf16 %v6942_v13, %v6939_v44  ;;  %v6948_v23 = vld [vmem:[#allocation9 + $0x140] sm:$0xff]  ;;  %v6906_v57 = vsel %vm6904_vm13, %v6903_v32, %v6905_v14  ;;  %v7311_v44 = vld [vmem:[#allocation9 + $0x368] sm:$0xff]  ;;  %v7332_v14 = vld [vmem:[#allocation9 + $0x410] sm:$0xff] }
0x25e4   : > { %v6960_v50 = vmul.f32 %v14582_v11, %v6959_v40  ;;  %v6925_v11 = vld [vmem:[#allocation9 + $0x88] sm:$0xff]  ;;  %v6944_v40 = vld [vmem:[#allocation9 + $0x120] sm:$0xff]  ;;  %vm15222_vm12 = vmmov %vm15218_vm1 }
0x25e5   : > { %v11129_v20 = vpack.c.bf16 %v6925_v11, %v6922_v17  ;;  %v7299_v17 = vld [vmem:[#allocation9 + $0x308] sm:$0xff]  ;;  %v7302_v11 = vld [vmem:[#allocation9 + $0x320] sm:$0xff]  ;;  %vm15223_vm13 = vmmov %vm15218_vm1 }
0x25e6   : > { %7075 = vmatmul.mubr.f32.vlgmr.msra.gmra.mrb[50].mxu0 %v6960_v50  ;;  %10370 = vmatmul.mubr.f32.vlgmr.msra.gmra.mrb[38].mxu1 %v6960_v50  ;;  %v6949_v50 = vld [vmem:[#allocation9 + $0x148] sm:$0xff]  ;;  %v7314_v13 = vld [vmem:[#allocation9 + $0x380] sm:$0xff] }
0x25e7   : > { %11093 = vmatpush1.bf16.msra.mxu0 %v11092_v27  ;;  %11124 = vmatpush3.bf16.msra.mxu1 %v11123_v43  ;;  %v11114_v27 = vpack.c.bf16 %v6948_v23, %v6945_v59  ;;  %v6947_v43 = vld [vmem:[#allocation9 + $0x138] sm:$0xff]  ;;  %v11141_v34 = vpack.c.bf16 %v6949_v50, %v6946_v48  ;;  %v7320_v23 = vld [vmem:[#allocation9 + $0x3b0] sm:$0xff]  ;;  %v7318_v48 = vld [vmem:[#allocation9 + $0x3a0] sm:$0xff] }
0x25e8   : > { %11095 = vmatprep.subr.bf16.mxu0 %v11094_v51  ;;  %11125 = vmatprep.subr.bf16.mxu1 %v13156_v7  ;;  %v6951_v51 = vld [vmem:[#allocation9 + $0x158] sm:$0xff]  ;;  %v11116_v0 = vpack.c.bf16 %v6947_v43, %v6944_v40  ;;  %v7316_v40 = vld [vmem:[#allocation9 + $0x390] sm:$0xff]  ;;  %v7319_v43 = vld [vmem:[#allocation9 + $0x3a8] sm:$0xff] }
0x25e9   : > { %7215 = vmatprep.mubr.f32.mxu0 %v13149_v1  ;;  %10404 = vmatprep.mubr.msk.f32.mxu1 %vm13150_vm0, %v13149_v1  ;;  %v7317_v59 = vld [vmem:[#allocation9 + $0x398] sm:$0xff]  ;;  %v11160_v32 = vpack.c.bf16 %v7319_v43, %v7316_v40  ;;  %v7498_v40 = vld [vmem:[#allocation9 + $0x490] sm:$0xff] }
0x25ea   : > { %v7321_v50 = vld [vmem:[#allocation9 + $0x3b8] sm:$0xff] }
0x25eb   : > { %11097 = vmatpush1.bf16.msra.mxu0 %v11096_v54  ;;  %11127 = vmatpush3.bf16.msra.mxu1 %v11126_v30  ;;  %v11118_v54 = vpack.c.bf16 %v6954_v16, %v6951_v51  ;;  %v6953_v30 = vld [vmem:[#allocation9 + $0x168] sm:$0xff]  ;;  %v7326_v16 = vld [vmem:[#allocation9 + $0x3e0] sm:$0xff] }
0x25ec   : > { %11099 = vmatprep.subr.bf16.mxu0 %v11098_v49  ;;  %11128 = vmatprep.subr.bf16.mxu1 %v13156_v7  ;;  %v6955_v49 = vld [vmem:[#allocation9 + $0x178] sm:$0xff]  ;;  %v11120_v61 = vpack.c.bf16 %v6953_v30, %v6950_v45  ;;  %v7323_v51 = vld [vmem:[#allocation9 + $0x3c8] sm:$0xff]  ;;  %v7324_v30 = vld [vmem:[#allocation9 + $0x3d0] sm:$0xff] }
0x25ed   : > { %v11144_v31 = vpack.c.bf16 %v6955_v49, %v6952_v6  ;;  %v11162_v45 = vpack.c.bf16 %v7326_v16, %v7323_v51  ;;  %v7327_v6 = vld [vmem:[#allocation9 + $0x3e8] sm:$0xff]  ;;  %v7329_v49 = vld [vmem:[#allocation9 + $0x3f8] sm:$0xff] }
0x25ef   : > { %11101 = vmatpush1.bf16.msra.mxu0 %v11100_v56  ;;  %11130 = vmatpush3.bf16.msra.mxu1 %v11129_v20  ;;  %v11146_v56 = vpack.c.bf16 %v7302_v11, %v7299_v17  ;;  %v7301_v20 = vld [vmem:[#allocation9 + $0x318] sm:$0xff]  ;;  %v11191_v11 = vpack.c.bf16 %v7327_v6, %v7324_v30  ;;  %v7509_v6 = vld [vmem:[#allocation9 + $0x4e8] sm:$0xff] }
0x25f0   : > { %11103 = vmatprep.subr.bf16.mxu0 %v11102_v52  ;;  %11131 = vmatprep.subr.bf16.mxu1 %v13156_v7  ;;  %v7303_v52 = vld [vmem:[#allocation9 + $0x328] sm:$0xff]  ;;  %v11148_v21 = vpack.c.bf16 %v7301_v20, %v7298_v19  ;;  %v7333_v20 = vld [vmem:[#allocation9 + $0x418] sm:$0xff] }
0x25f1   : > { %v11179_v63 = vpack.c.bf16 %v7303_v52, %v7300_v41  ;;  %v7331_v19 = vld [vmem:[#allocation9 + $0x408] sm:$0xff]  ;;  %v7338_v52 = vld [vmem:[#allocation9 + $0x440] sm:$0xff]  ;;  %v7507_v30 = vld [vmem:[#allocation9 + $0x4d8] sm:$0xff] }
0x25f2   : > { %v7335_v41 = vld [vmem:[#allocation9 + $0x428] sm:$0xff] }
0x25f3   : > { %11105 = vmatpush1.bf16.msra.mxu0 %v11104_v26  ;;  %11133 = vmatpush3.bf16.msra.mxu1 %v11132_v36  ;;  %v7304_v26 = vld [vmem:[#allocation9 + $0x330] sm:$0xff] }
0x25f4   : > { %11107 = vmatprep.subr.bf16.mxu0 %v11106_v55  ;;  %11134 = vmatprep.subr.bf16.mxu1 %v13156_v7  ;;  %v14732_v36 = vld [vmem:[%s15181_s8] ss:$0 sm:$0xff]  ;;  %v11150_v55 = vpack.c.bf16 %v7308_v37, %v7305_v58  ;;  %v7334_v37 = vld [vmem:[#allocation9 + $0x420] sm:$0xff] }
0x25f5   : > { %v6907_v12 = vmul.f32 %v14732_v36, %v6906_v57 }
0x25f7   : > { %11109 = vmatpush1.bf16.msra.mxu0 %v11108_v42  ;;  %11136 = vmatpush3.bf16.msra.mxu1 %v11135_v46  ;;  %v11152_v42 = vpack.c.bf16 %v7307_v60, %v7304_v26  ;;  %v11182_v46 = vpack.c.bf16 %v7309_v18, %v7306_v28  ;;  %v7336_v26 = vld [vmem:[#allocation9 + $0x430] sm:$0xff]  ;;  %v7292_v28 = vmul.f32 %v14714_v29, %v14683_v33 }
0x25f8   : > { %11111 = vmatprep.subr.bf16.mxu0 %v11110_v62  ;;  %11137 = vmatprep.subr.bf16.mxu1 %v13156_v7  ;;  %v11154_v62 = vpack.c.bf16 %v7314_v13, %v7311_v44  ;;  %v7344_v60 = vld [vmem:[#allocation9 + $0x470] sm:$0xff] }
0x25f9   : > { %v7340_v13 = vld [vmem:[#allocation9 + $0x450] sm:$0xff]  ;;  %vm7293_vm6 = vcmp.ge.f32.partialorder %v7292_v28, 0.0 }
0x25fb   : > { %11113 = vmatpush1.bf16.msra.mxu0 %v11112_v38  ;;  %11139 = vmatpush3.bf16.msra.mxu1 %v11138_v39  ;;  %v11156_v38 = vpack.c.bf16 %v7313_v15, %v7310_v53  ;;  %v11185_v39 = vpack.c.bf16 %v7315_v25, %v7312_v35  ;;  %v7342_v53 = vld [vmem:[#allocation9 + $0x460] sm:$0xff]  ;;  %v7294_v15 = vmul.f32 0.2, %v7292_v28  ;;  %v7497_v35 = vld [vmem:[#allocation9 + $0x488] sm:$0xff] }
0x25fc   : > { %11115 = vmatprep.subr.bf16.mxu0 %v11114_v27  ;;  %11140 = vmatprep.subr.bf16.mxu1 %v13156_v7  ;;  %v11158_v27 = vpack.c.bf16 %v7320_v23, %v7317_v59  ;;  %v7500_v25 = vld [vmem:[#allocation9 + $0x4a0] sm:$0xff] }
0x25fd   : > { %v7496_v23 = vld [vmem:[#allocation9 + $0x480] sm:$0xff]  ;;  %v7295_v43 = vsel %vm7293_vm6, %v7292_v28, %v7294_v15  ;;  %vm15224_vm6 = vcmask 187392  }
0x25ff   : > { %11117 = vmatpush1.bf16.msra.mxu0 %v11116_v0  ;;  %11142 = vmatpush3.bf16.msra.mxu1 %v11141_v34  ;;  %v11188_v0 = vpack.c.bf16 %v7321_v50, %v7318_v48  ;;  %v7322_v34 = vld [vmem:[#allocation9 + $0x3c0] sm:$0xff]  ;;  %v7503_v48 = vld [vmem:[#allocation9 + $0x4b8] sm:$0xff]  ;;  %v7506_v50 = vld [vmem:[#allocation9 + $0x4d0] sm:$0xff] }
0x2600   : > { %11119 = vmatprep.subr.bf16.mxu0 %v11118_v54  ;;  %11143 = vmatprep.subr.bf16.mxu1 %v13156_v7  ;;  %v7325_v54 = vld [vmem:[#allocation9 + $0x3d8] sm:$0xff] }
0x2601   : > { %v11164_v17 = vpack.c.bf16 %v7325_v54, %v7322_v34  ;;  %v11206_v34 = vpack.c.bf16 %v7506_v50, %v7503_v48  ;;  %v7504_v54 = vld [vmem:[#allocation9 + $0x4c0] sm:$0xff] }
0x2602   : > { %v7532_v48 = vld [vmem:[#allocation9 + $0x5a0] sm:$0xff] }
0x2603   : > { %11121 = vmatpush1.bf16.msra.mxu0 %v11120_v61  ;;  %11145 = vmatpush3.bf16.msra.mxu1 %v11144_v31  ;;  %v7328_v61 = vld [vmem:[#allocation9 + $0x3f0] sm:$0xff]  ;;  %v11166_v31 = vpack.c.bf16 %v7332_v14, %v7329_v49  ;;  %v7512_v49 = vld [vmem:[#allocation9 + $0x500] sm:$0xff] }
0x2604   : > { %11147 = vmatprep.subr.bf16.mxu0 %v11146_v56  ;;  %11178 = vmatprep.subr.bf16.mxu1 %v13156_v7  ;;  %v7330_v56 = vld [vmem:[#allocation9 + $0x400] sm:$0xff]  ;;  %v11168_v57 = vpack.c.bf16 %v7331_v19, %v7328_v61  ;;  %v11210_v61 = vpack.c.bf16 %v7512_v49, %v7509_v6  ;;  %v7510_v19 = vld [vmem:[#allocation9 + $0x4f0] sm:$0xff] }
0x2605   : > { %v11194_v58 = vpack.c.bf16 %v7333_v20, %v7330_v56  ;;  %v7513_v56 = vld [vmem:[#allocation9 + $0x508] sm:$0xff]  ;;  %v7515_v20 = vld [vmem:[#allocation9 + $0x518] sm:$0xff]  ;;  %v7538_v6 = vld [vmem:[#allocation9 + $0x5d0] sm:$0xff] }
0x2606   : > { %7216 = vmatmul.mubr.f32.vlgmr.msra.gmra.mrb[50].mxu0 %v6907_v12  ;;  %10405 = vmatmul.mubr.f32.vlgmr.msra.gmra.mrb[38].mxu1 %v6907_v12  ;;  %v7339_v12 = vld [vmem:[#allocation9 + $0x448] sm:$0xff] }
0x2607   : > { %11149 = vmatpush1.bf16.msra.mxu0 %v11148_v21  ;;  %11180 = vmatpush3.bf16.msra.mxu1 %v11179_v63  ;;  %v11170_v21 = vpack.c.bf16 %v7338_v52, %v7335_v41  ;;  %v7337_v63 = vld [vmem:[#allocation9 + $0x438] sm:$0xff]  ;;  %v11197_v44 = vpack.c.bf16 %v7339_v12, %v7336_v26  ;;  %v7518_v41 = vld [vmem:[#allocation9 + $0x530] sm:$0xff]  ;;  %v7521_v12 = vld [vmem:[#allocation9 + $0x548] sm:$0xff] }
0x2608   : > { %11151 = vmatprep.subr.bf16.mxu0 %v11150_v55  ;;  %11181 = vmatprep.subr.bf16.mxu1 %v13156_v7  ;;  %v7341_v55 = vld [vmem:[#allocation9 + $0x458] sm:$0xff]  ;;  %v11172_v18 = vpack.c.bf16 %v7337_v63, %v7334_v37  ;;  %v11214_v37 = vpack.c.bf16 %v7518_v41, %v7515_v20  ;;  %v7516_v63 = vld [vmem:[#allocation9 + $0x520] sm:$0xff] }
0x2609   : > { %7410 = vmatprep.mubr.f32.mxu0 %v13149_v1  ;;  %10439 = vmatprep.mubr.msk.f32.mxu1 %vm13150_vm0, %v13149_v1  ;;  %v7519_v26 = vld [vmem:[#allocation9 + $0x538] sm:$0xff] }
0x260a   : > { %v11244_v28 = vpack.c.bf16 %v7519_v26, %v7516_v63  ;;  %v8117_v63 = vld [vmem:[#allocation23 + $0x8] sm:$0xff]  ;;  %v12387_v26 = vpop.permute.xlu0 %12386 }
0x260b   : > { %11153 = vmatpush1.bf16.msra.mxu0 %v11152_v42  ;;  %11183 = vmatpush3.bf16.msra.mxu1 %v11182_v46  ;;  %v11174_v42 = vpack.c.bf16 %v7344_v60, %v7341_v55  ;;  %v7343_v46 = vld [vmem:[#allocation9 + $0x468] sm:$0xff]  ;;  %v7524_v55 = vld [vmem:[#allocation9 + $0x560] sm:$0xff] }
0x260c   : > { %11155 = vmatprep.subr.bf16.mxu0 %v11154_v62  ;;  %11184 = vmatprep.subr.bf16.mxu1 %v13156_v7  ;;  %v7345_v62 = vld [vmem:[#allocation9 + $0x478] sm:$0xff]  ;;  %v11176_v59 = vpack.c.bf16 %v7343_v46, %v7340_v13  ;;  %v7525_v46 = vld [vmem:[#allocation9 + $0x568] sm:$0xff] }
0x260d   : > { %v11200_v33 = vpack.c.bf16 %v7345_v62, %v7342_v53  ;;  %v7523_v13 = vld [vmem:[#allocation9 + $0x558] sm:$0xff]  ;;  %v7530_v62 = vld [vmem:[#allocation9 + $0x590] sm:$0xff] }
0x260e   : > { %v7527_v53 = vld [vmem:[#allocation9 + $0x578] sm:$0xff] }
0x260f   : > { %11157 = vmatpush1.bf16.msra.mxu0 %v11156_v38  ;;  %11186 = vmatpush3.bf16.msra.mxu1 %v11185_v39  ;;  %v11202_v38 = vpack.c.bf16 %v7500_v25, %v7497_v35  ;;  %v7499_v39 = vld [vmem:[#allocation9 + $0x498] sm:$0xff]  ;;  %v7526_v25 = vld [vmem:[#allocation9 + $0x570] sm:$0xff] }
0x2610   : > { %11159 = vmatprep.subr.bf16.mxu0 %v11158_v27  ;;  %11187 = vmatprep.subr.bf16.mxu1 %v13156_v7  ;;  %v7501_v27 = vld [vmem:[#allocation9 + $0x4a8] sm:$0xff]  ;;  %v11204_v51 = vpack.c.bf16 %v7499_v39, %v7496_v23  ;;  %v7528_v23 = vld [vmem:[#allocation9 + $0x580] sm:$0xff] }
0x2611   : > { %v11235_v16 = vpack.c.bf16 %v7501_v27, %v7498_v40  ;;  %v7533_v39 = vld [vmem:[#allocation9 + $0x5a8] sm:$0xff]  ;;  %v7536_v40 = vld [vmem:[#allocation9 + $0x5c0] sm:$0xff] }
0x2612   : > { %v11226_v50 = vpack.c.bf16 %v7536_v40, %v7533_v39 }
0x2613   : > { %11161 = vmatpush1.bf16.msra.mxu0 %v11160_v32  ;;  %11189 = vmatpush3.bf16.msra.mxu1 %v11188_v0  ;;  %v7502_v32 = vld [vmem:[#allocation9 + $0x4b0] sm:$0xff]  ;;  %v7296_v0 = vmul.f32 %v14732_v36, %v7295_v43 }
0x2614   : > { %11163 = vmatprep.subr.bf16.mxu0 %v11162_v45  ;;  %11190 = vmatprep.subr.bf16.mxu1 %v13156_v7  ;;  %v7505_v45 = vld [vmem:[#allocation9 + $0x4c8] sm:$0xff] }
0x2615   : > { %v11208_v14 = vpack.c.bf16 %v7505_v45, %v7502_v32  ;;  %v7537_v32 = vld [vmem:[#allocation9 + $0x5c8] sm:$0xff]  ;;  %v7490_v45 = vmul.f32 %v14714_v29, %v14681_v10 }
0x2617   : > { %11165 = vmatpush1.bf16.msra.mxu0 %v11164_v17  ;;  %11192 = vmatpush3.bf16.msra.mxu1 %v11191_v11  ;;  %v11238_v17 = vpack.c.bf16 %v7507_v30, %v7504_v54  ;;  %v7508_v11 = vld [vmem:[#allocation9 + $0x4e0] sm:$0xff]  ;;  %vm7491_vm2 = vcmp.ge.f32.partialorder %v7490_v45, 0.0 }
0x2618   : > { %11167 = vmatprep.subr.bf16.mxu0 %v11166_v31  ;;  %11193 = vmatprep.subr.bf16.mxu1 %v13156_v7  ;;  %v7511_v31 = vld [vmem:[#allocation9 + $0x4f8] sm:$0xff] }
0x2619   : > { %v11212_v52 = vpack.c.bf16 %v7511_v31, %v7508_v11  ;;  %v7543_v11 = vld [vmem:[#allocation9 + $0x5f8] sm:$0xff] }
0x261b   : > { %11169 = vmatpush1.bf16.msra.mxu0 %v11168_v57  ;;  %11195 = vmatpush3.bf16.msra.mxu1 %v11194_v58  ;;  %v11241_v57 = vpack.c.bf16 %v7513_v56, %v7510_v19  ;;  %v7514_v58 = vld [vmem:[#allocation9 + $0x510] sm:$0xff] }
0x261c   : > { %11171 = vmatprep.subr.bf16.mxu0 %v11170_v21  ;;  %11196 = vmatprep.subr.bf16.mxu1 %v13156_v7  ;;  %v7517_v21 = vld [vmem:[#allocation9 + $0x528] sm:$0xff] }
0x261d   : > { %v11216_v60 = vpack.c.bf16 %v7517_v21, %v7514_v58  ;;  %v12450_v21 = vpack.i.bf16 %v13959_v24, %v13956_v9 }
0x261f   : > { %11173 = vmatpush1.bf16.msra.mxu0 %v11172_v18  ;;  %11198 = vmatpush3.bf16.msra.mxu1 %v11197_v44  ;;  %v7520_v18 = vld [vmem:[#allocation9 + $0x540] sm:$0xff]  ;;  %v11218_v44 = vpack.c.bf16 %v7524_v55, %v7521_v12  ;;  %v12392_v12 = vpop.permute.xlu1 %12391  ;;  %v14810_v55 = vpop.permute.xlu0 %12401 }
0x2620   : > { %11175 = vmatprep.subr.bf16.mxu0 %v11174_v42  ;;  %11199 = vmatprep.subr.bf16.mxu1 %v13156_v7  ;;  %v7522_v42 = vld [vmem:[#allocation9 + $0x550] sm:$0xff]  ;;  %v11220_v15 = vpack.c.bf16 %v7523_v13, %v7520_v18 }
0x2621   : > { %v11247_v35 = vpack.c.bf16 %v7525_v46, %v7522_v42 }
0x2623   : > { %11177 = vmatpush1.bf16.msra.mxu0 %v11176_v59  ;;  %11201 = vmatpush3.bf16.msra.mxu1 %v11200_v33  ;;  %v11222_v59 = vpack.c.bf16 %v7530_v62, %v7527_v53  ;;  %v7529_v33 = vld [vmem:[#allocation9 + $0x588] sm:$0xff] }
0x2624   : > { %11203 = vmatprep.subr.bf16.mxu0 %v11202_v38  ;;  %11234 = vmatprep.subr.bf16.mxu1 %v13156_v7  ;;  %v7531_v38 = vld [vmem:[#allocation9 + $0x598] sm:$0xff]  ;;  %v11224_v27 = vpack.c.bf16 %v7529_v33, %v7526_v25  ;;  %v12388_v25 = vunpack.i.l.bf16 %v12387_v26 }
0x2625   : > { %v11250_v43 = vpack.c.bf16 %v7531_v38, %v7528_v23  ;;  %v12389_v23 = vunpack.i.h.bf16 %v12387_v26  ;;  %v12393_v38 = vunpack.i.l.bf16 %v12392_v12 }
0x2626   : > { %7411 = vmatmul.mubr.f32.vlgmr.msra.gmra.mrb[50].mxu0 %v7296_v0  ;;  %10440 = vmatmul.mubr.f32.vlgmr.msra.gmra.mrb[38].mxu1 %v7296_v0  ;;  %v7539_v0 = vld [vmem:[#allocation9 + $0x5d8] sm:$0xff] }
0x2627   : > { %11205 = vmatpush1.bf16.msra.mxu0 %v11204_v51  ;;  %11236 = vmatpush3.bf16.msra.mxu1 %v11235_v16  ;;  %v7535_v51 = vld [vmem:[#allocation9 + $0x5b8] sm:$0xff]  ;;  %v7534_v16 = vld [vmem:[#allocation9 + $0x5b0] sm:$0xff] }
0x2628   : > { %11207 = vmatprep.subr.bf16.mxu0 %v11206_v34  ;;  %11237 = vmatprep.subr.bf16.mxu1 %v13156_v7  ;;  %v7542_v34 = vld [vmem:[#allocation9 + $0x5f0] sm:$0xff]  ;;  %v11228_v54 = vpack.c.bf16 %v7535_v51, %v7532_v48  ;;  %v11253_v30 = vpack.c.bf16 %v7537_v32, %v7534_v16 }
0x2629   : > { %7608 = vmatprep.mubr.f32.mxu0 %v13149_v1  ;;  %10474 = vmatprep.mubr.msk.f32.mxu1 %vm13150_vm0, %v13149_v1  ;;  %v11230_v49 = vpack.c.bf16 %v7542_v34, %v7539_v0 }
0x262b   : > { %11209 = vmatpush1.bf16.msra.mxu0 %v11208_v14  ;;  %11239 = vmatpush3.bf16.msra.mxu1 %v11238_v17  ;;  %v7541_v14 = vld [vmem:[#allocation9 + $0x5e8] sm:$0xff]  ;;  %v7540_v17 = vld [vmem:[#allocation9 + $0x5e0] sm:$0xff] }
0x262c   : > { %11211 = vmatprep.subr.bf16.mxu0 %v11210_v61  ;;  %11240 = vmatprep.subr.bf16.mxu1 %v13156_v7  ;;  %v7492_v61 = vmul.f32 0.2, %v7490_v45  ;;  %v11232_v31 = vpack.c.bf16 %v7541_v14, %v7538_v6  ;;  %v11256_v19 = vpack.c.bf16 %v7543_v11, %v7540_v17  ;;  %v12403_v14 = vunpack.i.l.bf16 %v14810_v55 }
0x262e   : > { %v7493_v10 = vsel %vm7491_vm2, %v7490_v45, %v7492_v61  ;;  %vm15225_vm2 = vmmov %vm15218_vm1 }
0x262f   : > { %11213 = vmatpush1.bf16.msra.mxu0 %v11212_v52  ;;  %11242 = vmatpush3.bf16.msra.mxu1 %v11241_v57  ;;  %v7494_v29 = vmul.f32 %v14732_v36, %v7493_v10 }
0x2630   : > { %11215 = vmatprep.subr.bf16.mxu0 %v11214_v37  ;;  %11243 = vmatprep.subr.bf16.mxu1 %v13156_v7 }
0x2633   : > { %11217 = vmatpush1.bf16.msra.mxu0 %v11216_v60  ;;  %11245 = vmatpush3.bf16.msra.mxu1 %v11244_v28  ;;  %v14812_v60 = vpop.permute.xlu1 %12396  ;;  %v14814_v28 = vpop.permute.xlu0 %12411 }
0x2634   : > { %11219 = vmatprep.subr.bf16.mxu0 %v11218_v44  ;;  %11246 = vmatprep.subr.bf16.mxu1 %v13156_v7  ;;  %v12399_v39 = vunpack.i.h.bf16 %v14812_v60  ;;  %v12398_v40 = vunpack.i.l.bf16 %v14812_v60 }
0x2637   : > { %11221 = vmatpush1.bf16.msra.mxu0 %v11220_v15  ;;  %11248 = vmatpush3.bf16.msra.mxu1 %v11247_v35  ;;  %v14816_v18 = vpop.permute.xlu1 %12406  ;;  %v14818_v44 = vpop.permute.xlu0 %12421 }
0x2638   : > { %11223 = vmatprep.subr.bf16.mxu0 %v11222_v59  ;;  %11249 = vmatprep.subr.bf16.mxu1 %v13156_v7  ;;  %v12394_v59 = vunpack.i.h.bf16 %v12392_v12 }
0x263b   : > { %11225 = vmatpush1.bf16.msra.mxu0 %v11224_v27  ;;  %11251 = vmatpush3.bf16.msra.mxu1 %v11250_v43  ;;  %v14820_v13 = vpop.permute.xlu1 %12416 }
0x263c   : > { %11227 = vmatprep.subr.bf16.mxu0 %v11226_v50  ;;  %11252 = vmatprep.subr.bf16.mxu1 %v13156_v7 }
0x263f   : > { %11229 = vmatpush1.bf16.msra.mxu0 %v11228_v54  ;;  %11254 = vmatpush3.bf16.msra.mxu1 %v11253_v30 }
0x2640   : > { %11231 = vmatprep.subr.bf16.mxu0 %v11230_v49  ;;  %11255 = vmatprep.subr.bf16.mxu1 %v13156_v7  ;;  %v12404_v49 = vunpack.i.h.bf16 %v14810_v55  ;;  %v12408_v55 = vunpack.i.l.bf16 %v14816_v18 }
0x2643   : > { %11233 = vmatpush1.bf16.msra.mxu0 %v11232_v31  ;;  %11257 = vmatpush3.bf16.msra.mxu1 %v11256_v19 }
0x2644   : > { %11294 = vmatprep.subr.bf16.mxu1 %v13156_v7 }
0x2646   : > { %7609 = vmatmul.mubr.f32.vlgmr.msra.gmra.mrb[50].mxu0 %v7494_v29  ;;  %10475 = vmatmul.mubr.f32.vlgmr.msra.gmra.mrb[38].mxu1 %v7494_v29 }
0x2647   : > { %9499 = vmatprep.mubr.msk.f32.mxu0 %vm3074_vm4, %v8117_v63  ;;  %9500 = vmatprep.mubr.msk.f32.mxu1 %vm3074_vm4, %v8117_v63  ;;  %vm15213_vm4 = vcmask 203776  }
0x2648   : > { %v7739_v0 = vsel %vm15213_vm4, %v12394_v59, %v12388_v25  ;;  %vm15214_vm7 = vmmov %vm15213_vm4 }
0x2649   : > { %vm15215_vm8 = vmmov %vm15213_vm4 }
0x264a   : > { %vm15216_vm14 = vmmov %vm15213_vm4 }
0x264b   : > { %vm15217_vm11 = vmmov %vm15213_vm4 }
0x264c   : > { %v7740_v31 = vsel %vm15217_vm11, %v12388_v25, %v12389_v23  ;;  %vm15221_vm5 = vmmov %vm15213_vm4 }
0x264d   : > { %vm15226_vm4 = vmmov %vm15224_vm6 }
0x264e   : > { %vm15230_vm11 = vmmov %vm15226_vm4 }
0x2719   : > { %v14764_v56 = vpop.f32.mrb[50].mxu0  ;;  %v14766_v20 = vpop.f32.mrb[38].mxu1 }
0x271a   : > { %v14768_v41 = vpop.f32.mrb[51].mxu0  ;;  %v10476_v52 = vpop.f32.mrb[39].mxu1  ;;  %v12425_v57 = vpack.i.bf16 %v13959_v24, %v14766_v20  ;;  %v12455_v58 = vpack.i.bf16 %v13953_v8, %v14764_v56 }
0x271b   : > { %v12485_v36 = vpack.i.bf16 %v14768_v41, %v14764_v56  ;;  %v12515_v37 = vpack.i.bf16 %v14766_v20, %v14768_v41  ;;  %v7790_v52 = vsel %vm15220_vm3, %v12398_v40, %v12399_v39 }
0x271c   : > { %12426 = vrot.lane.b32.xlu1 %v12425_v57, %s15207_s2  ;;  %12456 = vrot.lane.b32.xlu0 %v12455_v58, %s15190_s23 }
0x2720   : > { %12431 = vrot.lane.b32.xlu1 %v12425_v57, %s15208_s3  ;;  %12471 = vrot.lane.b32.xlu0 %v12455_v58, %s15210_s10 }
0x2724   : > { %12436 = vrot.lane.b32.xlu1 %v12425_v57, %s15209_s28  ;;  %12486 = vrot.lane.b32.xlu0 %v12485_v36, %s15208_s3 }
0x2728   : > { %12491 = vrot.lane.b32.xlu0 %v12485_v36, %s15209_s28  ;;  %12441 = vrot.lane.b32.xlu1 %v12485_v36, %s15207_s2 }
0x272c   : > { %12496 = vrot.lane.b32.xlu0 %v12485_v36, %s15188_s0  ;;  %12446 = vrot.lane.b32.xlu1 %v12425_v57, %s15188_s0  ;;  %v12409_v57 = vunpack.i.h.bf16 %v14816_v18 }
0x2730   : > { %12501 = vrot.lane.b32.xlu0 %v12455_v58, %s15211_s22  ;;  %12451 = vrot.lane.b32.xlu1 %v12450_v21, %s15190_s23 }
0x2734   : > { %12516 = vrot.lane.b32.xlu0 %v12515_v37, %s15190_s23  ;;  %12461 = vrot.lane.b32.xlu1 %v13149_v1, %s15190_s23 }
0x2738   : > { %12521 = vrot.lane.b32.xlu0 %v12515_v37, %s15210_s10  ;;  %12466 = vrot.lane.b32.xlu1 %v12450_v21, %s15210_s10 }
0x273c   : > { %12526 = vrot.lane.b32.xlu0 %v12515_v37, %s15211_s22  ;;  %12476 = vrot.lane.b32.xlu1 %v13149_v1, %s15210_s10 }
0x2740   : > { %12531 = vrot.lane.b32.xlu0 %v12515_v37, %s15212_s15  ;;  %12481 = vrot.lane.b32.xlu1 %v12450_v21, %s15211_s22 }
0x2744   : > { %12536 = vrot.lane.b32.xlu0 %v12455_v58, %s15212_s15  ;;  %12506 = vrot.lane.b32.xlu1 %v13149_v1, %s15211_s22 }
0x2748   : > { %12511 = vrot.lane.b32.xlu1 %v12450_v21, %s15212_s15 }
0x274c   : > { %12541 = vrot.lane.b32.xlu1 %v13149_v1, %s15212_s15 }
0x278e   : > { %v12427_v42 = vpop.permute.xlu1 %12426  ;;  %v14822_v46 = vpop.permute.xlu0 %12456 }
0x278f   : > { %v12429_v33 = vunpack.i.h.bf16 %v12427_v42  ;;  %v12428_v27 = vunpack.i.l.bf16 %v12427_v42 }
0x2791   : > { %v7741_v34 = vsel %vm15214_vm7, %v12389_v23, %v12429_v33  ;;  %vm15227_vm7 = vmmov %vm15226_vm4 }
0x2792   : > { %v12432_v53 = vpop.permute.xlu1 %12431  ;;  %v14824_v62 = vpop.permute.xlu0 %12471 }
0x2793   : > { %v12434_v45 = vunpack.i.h.bf16 %v12432_v53  ;;  %v12433_v54 = vunpack.i.l.bf16 %v12432_v53 }
0x2795   : > { %v7791_v21 = vsel %vm15222_vm12, %v12399_v39, %v12434_v45  ;;  %v12414_v39 = vunpack.i.h.bf16 %v14814_v28 }
0x2796   : > { %v14826_v15 = vpop.permute.xlu1 %12436  ;;  %v12487_v35 = vpop.permute.xlu0 %12486 }
0x2797   : > { %v12489_v50 = vunpack.i.h.bf16 %v12487_v35  ;;  %v12488_v51 = vunpack.i.l.bf16 %v12487_v35  ;;  %v12439_v63 = vunpack.i.h.bf16 %v14826_v15  ;;  %v12438_v26 = vunpack.i.l.bf16 %v14826_v15 }
0x2798   : > { %v7789_v15 = vsel %vm15225_vm2, %v12404_v49, %v12398_v40  ;;  %v12424_v49 = vunpack.i.h.bf16 %v14818_v44 }
0x2799   : > { %v7788_v19 = vsel %vm15218_vm1, %v12489_v50, %v12433_v54  ;;  %v7787_v29 = vsel %vm15219_vm15, %v12488_v51, %v12489_v50  ;;  %v7786_v42 = vsel %vm15223_vm13, %v12403_v14, %v12488_v51  ;;  %v12418_v50 = vunpack.i.l.bf16 %v14820_v13 }
0x279a   : > { %v12492_v43 = vpop.permute.xlu0 %12491  ;;  %v12442_v48 = vpop.permute.xlu1 %12441  ;;  %v11298_v60 = vpack.c.bf16 %v7791_v21, %v7788_v19  ;;  %v11262_v25 = vpack.c.bf16 %v7790_v52, %v7787_v29  ;;  %v7841_v51 = vsel %vm15227_vm7, %v12409_v57, %v12439_v63  ;;  %v11264_v40 = vpack.c.bf16 %v7789_v15, %v7786_v42 }
0x279b   : > { %v12444_v16 = vunpack.i.h.bf16 %v12442_v48  ;;  %v12443_v32 = vunpack.i.l.bf16 %v12442_v48  ;;  %v12494_v10 = vunpack.i.h.bf16 %v12492_v43  ;;  %v12493_v58 = vunpack.i.l.bf16 %v12492_v43 }
0x279c   : > { %v12413_v43 = vunpack.i.l.bf16 %v14814_v28  ;;  %v12419_v48 = vunpack.i.h.bf16 %v14820_v13  ;;  %v12423_v14 = vunpack.i.l.bf16 %v14818_v44  ;;  %v7889_v44 = vsel %vm1569_vm9, %v12424_v49, %v12418_v50 }
0x279d   : > { %v7738_v30 = vsel %vm15215_vm8, %v12444_v16, %v12428_v27  ;;  %v7736_v6 = vsel %vm15216_vm14, %v12393_v38, %v12443_v32  ;;  %v7737_v37 = vsel %vm15221_vm5, %v12443_v32, %v12444_v16  ;;  %v7838_v59 = vsel %vm15224_vm6, %v12494_v10, %v12438_v26  ;;  %vm15228_vm8 = vmmov %vm15226_vm4 }
0x279e   : > { %v11295_v17 = vpack.c.bf16 %v7741_v34, %v7738_v30  ;;  %v14836_v11 = vpop.permute.xlu0 %12496  ;;  %v12447_v61 = vpop.permute.xlu1 %12446  ;;  %v11260_v36 = vpack.c.bf16 %v7739_v0, %v7736_v6  ;;  %v11258_v12 = vpack.c.bf16 %v7740_v31, %v7737_v37  ;;  %v7837_v27 = vsel %vm15226_vm4, %v12493_v58, %v12494_v10  ;;  %vm15229_vm14 = vmmov %vm15226_vm4 }
0x279f   : > { %v12499_v33 = vunpack.i.h.bf16 %v14836_v11  ;;  %v12449_v23 = vunpack.i.h.bf16 %v12447_v61  ;;  %v12448_v38 = vunpack.i.l.bf16 %v12447_v61  ;;  %v12498_v18 = vunpack.i.l.bf16 %v14836_v11 }
0x27a0   : > { %11296 = vmatpush1.bf16.msra.mxu1 %v11295_v17  ;;  %11259 = vmatprep.subr.bf16.mxu0 %v11258_v12  ;;  %v11301_v16 = vpack.c.bf16 %v7841_v51, %v7838_v59  ;;  %v7840_v34 = vsel %vm15228_vm8, %v12408_v55, %v12409_v57  ;;  %v7836_v45 = vsel %vm15229_vm14, %v12413_v43, %v12493_v58  ;;  %v12458_v26 = vunpack.i.l.bf16 %v14822_v46 }
0x27a1   : > { %11297 = vmatprep.subr.bf16.mxu1 %v13156_v7  ;;  %11261 = vmatpush1.bf16.msra.mxu0 %v11260_v36  ;;  %v7891_v54 = vsel %vm1569_vm9, %v12419_v48, %v12449_v23  ;;  %v7888_v28 = vsel %vm1569_vm9, %v12499_v33, %v12448_v38  ;;  %v11266_v30 = vpack.c.bf16 %v7840_v34, %v7837_v27  ;;  %v12473_v27 = vunpack.i.l.bf16 %v14824_v62 }
0x27a2   : > { %v14850_v53 = vpop.permute.xlu0 %12501  ;;  %v14852_v35 = vpop.permute.xlu1 %12451  ;;  %11263 = vmatprep.subr.bf16.mxu0 %v11262_v25  ;;  %v7887_v13 = vsel %vm1569_vm9, %v12498_v18, %v12499_v33  ;;  %v7839_v6 = vsel %vm15230_vm11, %v12414_v39, %v12408_v55  ;;  %v7890_v17 = vsel %vm1569_vm9, %v12418_v50, %v12419_v48  ;;  %v11304_v61 = vpack.c.bf16 %v7891_v54, %v7888_v28 }
0x27a3   : > { %v11268_v11 = vpack.c.bf16 %v7839_v6, %v7836_v45  ;;  %v7886_v52 = vsel %vm1569_vm9, %v12423_v14, %v12498_v18  ;;  %v11270_v36 = vpack.c.bf16 %v7890_v17, %v7887_v13  ;;  %v12454_v37 = vunpack.i.h.bf16 %v14852_v35 }
0x27a4   : > { %11299 = vmatpush1.bf16.msra.mxu1 %v11298_v60  ;;  %v12453_v21 = vunpack.i.l.bf16 %v14852_v35  ;;  %v11274_v63 = vpack.c.bf16 %v13956_v9, %v14768_v41  ;;  %v11272_v12 = vpack.c.bf16 %v7889_v44, %v7886_v52  ;;  %v11307_v25 = vpack.c.bf16 %v13959_v24, %v14766_v20 }
0x27a5   : > { %11300 = vmatprep.subr.bf16.mxu1 %v13156_v7  ;;  %11265 = vmatpush1.bf16.msra.mxu0 %v11264_v40  ;;  %v12459_v39 = vunpack.i.h.bf16 %v14822_v46  ;;  %v12474_v18 = vunpack.i.h.bf16 %v14824_v62  ;;  %v11276_v24 = vpack.c.bf16 %v13953_v8, %v14764_v56  ;;  %vm15231_vm1 = vcmask 859136  }
0x27a6   : > { %v12517_v32 = vpop.permute.xlu0 %12516  ;;  %v12462_v0 = vpop.permute.xlu1 %12461  ;;  %11267 = vmatprep.subr.bf16.mxu0 %v11266_v30  ;;  %v7952_v20 = vsel %vm1601_vm10, %v12453_v21, %v12454_v37  ;;  %vm15232_vm15 = vmmov %vm15231_vm1  ;;  %vm15237_vm6 = vcmask 850944   ;;  %vm15243_vm11 = vcmask 842752  }
0x27a7   : > { %v12519_v31 = vunpack.i.h.bf16 %v12517_v32  ;;  %v12463_v19 = vunpack.i.l.bf16 %v12462_v0  ;;  %v12518_v57 = vunpack.i.l.bf16 %v12517_v32  ;;  %v12464_v58 = vunpack.i.h.bf16 %v12462_v0  ;;  %vm15233_vm3 = vmmov %vm15231_vm1 }
0x27a8   : > { %11302 = vmatpush1.bf16.msra.mxu1 %v11301_v16  ;;  %vm15234_vm5 = vmmov %vm15231_vm1  ;;  %v7951_v45 = vsel %vm1601_vm10, %v12459_v39, %v12453_v21 }
0x27a9   : > { %11303 = vmatprep.subr.bf16.mxu1 %v13156_v7  ;;  %11269 = vmatpush1.bf16.msra.mxu0 %v11268_v11  ;;  %v7950_v55 = vsel %vm1601_vm10, %v12519_v31, %v12463_v19  ;;  %v7953_v59 = vsel %vm1601_vm10, %v12454_v37, %v12464_v58  ;;  %v7949_v23 = vsel %vm1601_vm10, %v12518_v57, %v12519_v31  ;;  %vm15235_vm12 = vmmov %vm15231_vm1  ;;  %v12503_v31 = vunpack.i.l.bf16 %v14850_v53 }
0x27aa   : > { %v12522_v10 = vpop.permute.xlu0 %12521  ;;  %v12467_v29 = vpop.permute.xlu1 %12466  ;;  %11271 = vmatprep.subr.bf16.mxu0 %v11270_v36  ;;  %v7948_v43 = vsel %vm1601_vm10, %v12458_v26, %v12518_v57  ;;  %v11310_v48 = vpack.c.bf16 %v7953_v59, %v7950_v55  ;;  %v11278_v40 = vpack.c.bf16 %v7952_v20, %v7949_v23  ;;  %vm15236_vm13 = vmmov %vm15231_vm1  ;;  %v8116_v20 = vld [vmem:[#allocation23] sm:$0xff] }
0x27ab   : > { %v12524_v9 = vunpack.i.h.bf16 %v12522_v10  ;;  %v12523_v41 = vunpack.i.l.bf16 %v12522_v10  ;;  %v12469_v38 = vunpack.i.h.bf16 %v12467_v29  ;;  %v12468_v15 = vunpack.i.l.bf16 %v12467_v29  ;;  %vm15238_vm2 = vmmov %vm15237_vm6 }
0x27ac   : > { %11305 = vmatpush1.bf16.msra.mxu1 %v11304_v61  ;;  %v11280_v54 = vpack.c.bf16 %v7951_v45, %v7948_v43  ;;  %v12504_v61 = vunpack.i.h.bf16 %v14850_v53  ;;  %vm15239_vm4 = vmmov %vm15238_vm2 }
0x27ad   : > { %11306 = vmatprep.subr.bf16.mxu1 %v13156_v7  ;;  %11273 = vmatpush1.bf16.msra.mxu0 %v11272_v12  ;;  %v7999_v62 = vsel %vm15233_vm3, %v12523_v41, %v12524_v9  ;;  %v8002_v34 = vsel %vm15234_vm5, %v12468_v15, %v12469_v38  ;;  %v7998_v28 = vsel %vm15235_vm12, %v12473_v27, %v12523_v41  ;;  %vm15240_vm7 = vmmov %vm15238_vm2  ;;  %v8316_v27 = vld [vmem:[%s15180_s1] sm:$0x7] }
0x27ae   : > { %v14884_v60 = vpop.permute.xlu0 %12526  ;;  %v12477_v42 = vpop.permute.xlu1 %12476  ;;  %11275 = vmatprep.subr.bf16.mxu0 %v11274_v63  ;;  %v8001_v30 = vsel %vm15236_vm13, %v12474_v18, %v12468_v15  ;;  %v11282_v17 = vpack.c.bf16 %v8002_v34, %v7999_v62  ;;  %vm15241_vm8 = vmmov %vm15238_vm2  ;;  %v8321_v43 = vrot.slane %v8316_v27, %v13618_v3 }
0x27af   : > { %v12479_v35 = vunpack.i.h.bf16 %v12477_v42  ;;  %v12478_v33 = vunpack.i.l.bf16 %v12477_v42  ;;  %v12529_v8 = vunpack.i.h.bf16 %v14884_v60  ;;  %v12528_v56 = vunpack.i.l.bf16 %v14884_v60  ;;  %vm15242_vm14 = vmmov %vm15238_vm2 }
0x27b0   : > { %11308 = vmatpush1.bf16.msra.mxu1 %v11307_v25  ;;  %v11284_v36 = vpack.c.bf16 %v8001_v30, %v7998_v28 }
0x27b1   : > { %11309 = vmatprep.subr.bf16.mxu1 %v13156_v7  ;;  %v8000_v46 = vsel %vm15231_vm1, %v12524_v9, %v12478_v33  ;;  %v8003_v16 = vsel %vm15232_vm15, %v12469_v38, %v12479_v35  ;;  %11277 = vmatpush1.bf16.msra.mxu0 %v11276_v24  ;;  %v8049_v10 = vsel %vm15238_vm2, %v12528_v56, %v12529_v8  ;;  %vm15244_vm1 = vmmov %vm15243_vm11 }
0x27b2   : > { %v14898_v50 = vpop.permute.xlu0 %12531  ;;  %v12482_v51 = vpop.permute.xlu1 %12481  ;;  %11279 = vmatprep.subr.bf16.mxu0 %v11278_v40  ;;  %v11313_v13 = vpack.c.bf16 %v8003_v16, %v8000_v46  ;;  %v8048_v60 = vsel %vm15242_vm14, %v12503_v31, %v12528_v56  ;;  %vm15245_vm15 = vmmov %vm15244_vm1 }
0x27b3   : > { %v12484_v32 = vunpack.i.h.bf16 %v12482_v51  ;;  %v12483_v0 = vunpack.i.l.bf16 %v12482_v51  ;;  %v12534_v29 = vunpack.i.h.bf16 %v14898_v50  ;;  %v12533_v52 = vunpack.i.l.bf16 %v14898_v50  ;;  %vm15246_vm3 = vmmov %vm15244_vm1 }
0x27b4   : > { %11311 = vmatpush1.bf16.msra.mxu1 %v11310_v48  ;;  %vm15247_vm5 = vmmov %vm15244_vm1  ;;  %v8325_v48 = vrot.slane %v8316_v27, %v13621_v4  ;;  %v8329_v50 = vrot.slane %v8316_v27, %v13624_v5 }
0x27b5   : > { %11312 = vmatprep.subr.bf16.mxu1 %v13156_v7  ;;  %v8052_v11 = vsel %vm15237_vm6, %v12483_v0, %v12484_v32  ;;  %11281 = vmatpush1.bf16.msra.mxu0 %v11280_v54  ;;  %v8051_v44 = vsel %vm15241_vm8, %v12504_v61, %v12483_v0  ;;  %v8099_v25 = vsel %vm15244_vm1, %v12533_v52, %v12534_v29  ;;  %vm15248_vm12 = vmmov %vm15244_vm1 }
0x27b6   : > { %v12507_v6 = vpop.permute.xlu1 %12506  ;;  %v12537_v19 = vpop.permute.xlu0 %12536  ;;  %11283 = vmatprep.subr.bf16.mxu0 %v11282_v17  ;;  %v11286_v21 = vpack.c.bf16 %v8052_v11, %v8049_v10  ;;  %v11288_v35 = vpack.c.bf16 %v8051_v44, %v8048_v60 }
0x27b7   : > { %v12509_v49 = vunpack.i.h.bf16 %v12507_v6  ;;  %v12508_v14 = vunpack.i.l.bf16 %v12507_v6  ;;  %v12539_v63 = vunpack.i.h.bf16 %v12537_v19  ;;  %v12538_v26 = vunpack.i.l.bf16 %v12537_v19 }
0x27b8   : > { %11314 = vmatpush1.bf16.msra.mxu1 %v11313_v13 }
0x27b9   : > { %v8050_v57 = vsel %vm15239_vm4, %v12529_v8, %v12508_v14  ;;  %v8053_v58 = vsel %vm15240_vm7, %v12484_v32, %v12509_v49  ;;  %11315 = vmatprep.subr.bf16.mxu1 %v13156_v7  ;;  %11285 = vmatpush1.bf16.msra.mxu0 %v11284_v36  ;;  %v8098_v9 = vsel %vm15246_vm3, %v12538_v26, %v12533_v52  ;;  %vm15249_vm4 = vcmask 195584  }
0x27ba   : > { %v11316_v53 = vpack.c.bf16 %v8053_v58, %v8050_v57  ;;  %v12512_v37 = vpop.permute.xlu1 %12511  ;;  %11287 = vmatprep.subr.bf16.mxu0 %v11286_v21  ;;  %vm15250_vm7 = vcmask 203776   ;;  %vm15252_vm14 = vmmov %vm15249_vm4  ;;  %vm15256_vm3 = vcmask 850944  }
0x27bb   : > { %v12514_v12 = vunpack.i.h.bf16 %v12512_v37  ;;  %v12513_v55 = vunpack.i.l.bf16 %v12512_v37  ;;  %vm15251_vm8 = vmmov %vm15250_vm7 }
0x27bc   : > { %11317 = vmatpush1.bf16.msra.mxu1 %v11316_v53 }
0x27bd   : > { %v8101_v42 = vsel %vm15243_vm11, %v12539_v63, %v12513_v55  ;;  %v8102_v59 = vsel %vm15245_vm15, %v12513_v55, %v12514_v12  ;;  %11318 = vmatprep.subr.bf16.mxu1 %v13156_v7  ;;  %11289 = vmatpush1.bf16.msra.mxu0 %v11288_v35  ;;  %vm15253_vm11 = vcmask 187392   ;;  %vm15255_vm15 = vcmask 859136  }
0x27be   : > { %v12542_v33 = vpop.permute.xlu1 %12541  ;;  %v11290_v23 = vpack.c.bf16 %v8102_v59, %v8099_v25  ;;  %v11292_v15 = vpack.c.bf16 %v8101_v42, %v8098_v9  ;;  %vm15254_vm1 = vmmov %vm15253_vm11 }
0x27bf   : > { %v12544_v41 = vunpack.i.h.bf16 %v12542_v33  ;;  %v12543_v38 = vunpack.i.l.bf16 %v12542_v33 }
0x27c0   : > { %11291 = vmatprep.subr.bf16.mxu0 %v11290_v23 }
0x27c1   : > { %v8100_v39 = vsel %vm15247_vm5, %v12534_v29, %v12543_v38  ;;  %v8103_v18 = vsel %vm15248_vm12, %v12514_v12, %v12544_v41  ;;  %11293 = vmatpush1.bf16.msra.mxu0 %v11292_v15  ;;  %vm15257_vm5 = vmmov %vm15256_vm3 }
0x27c2   : > { %v11319_v24 = vpack.c.bf16 %v8103_v18, %v8100_v39  ;;  %vm15258_vm12 = vmmov %vm15255_vm15 }
0x27c4   : > { %11320 = vmatpush1.bf16.msra.mxu1 %v11319_v24  ;;  %8240 = vmatmul.mubr.f32.vlgmr.msra.gmra.mrb[52].mxu0 %v8116_v20 }
0x27c5   : > { %8681 = vmatprep.mubr.f32.mxu0 %v13149_v1 }
0x27c7   : > { %8311 = vmatmul.mubr.f32.vlgmr.msra.gmra.mrb[40].mxu1 %v8116_v20 }
0x27c8   : > { %8888 = vmatprep.mubr.f32.mxu1 %v13149_v1 }
0x2897   : > { %v8241_v51 = vpop.f32.mrb[52].mxu0 }
0x2898   : > { %v8333_v46 = vmul.f32 %v8321_v43, %v8241_v51  ;;  %v8243_v16 = vpop.f32.mrb[53].mxu0 }
0x2899   : > { %v8334_v0 = vmul.f32 %v8325_v48, %v8243_v16 }
0x289a   : > { %v8312_v40 = vpop.f32.mrb[40].mxu1 }
0x289b   : > { %v8314_v32 = vpop.f32.mrb[41].mxu1  ;;  %v8335_v8 = vmul.f32 %v8329_v50, %v8312_v40  ;;  %v8336_v56 = vadd.f32 %v8334_v0, %v8333_v46 }
0x289d   : > { %v8337_v62 = vadd.f32 %v8336_v56, %v8335_v8 }
0x289f   : > { %8338 = vadd.xlane.f32.xlu0 %v8337_v62 }
0x28b5   : > { %8388 = vrot.lane.b32.xlu0 %v13149_v1, %s15207_s2 }
0x28b9   : > { %8438 = vrot.lane.b32.xlu0 %v13149_v1, %s15209_s28 }
0x292c   : > { %v8339_v34 = vpop.xlane.xlu0 %8338 }
0x292d   : > { %v8340_v45 = vmul.f32 0.00390625, %v8339_v34 }
0x292f   : > { %v8341_v54 = vsub.f32 %v8241_v51, %v8340_v45  ;;  %v8342_v28 = vsub.f32 %v8243_v16, %v8340_v45  ;;  %v8343_v30 = vsub.f32 %v8312_v40, %v8340_v45 }
0x2930   : > { %v8389_v35 = vpop.permute.xlu0 %8388 }
0x2931   : > { %v8344_v13 = vmul.f32 %v8341_v54, %v8321_v43  ;;  %v8345_v6 = vmul.f32 %v8342_v28, %v8325_v48  ;;  %v8346_v49 = vmul.f32 %v8343_v30, %v8329_v50 }
0x2933   : > { %v8347_v14 = vmul.f32 %v8344_v13, %v8344_v13  ;;  %v8348_v17 = vmul.f32 %v8345_v6, %v8345_v6  ;;  %v8349_v11 = vmul.f32 %v8346_v49, %v8346_v49 }
0x2934   : > { %v8439_v23 = vpop.permute.xlu0 %8438 }
0x2935   : > { %v8350_v61 = vadd.f32 %v8348_v17, %v8347_v14 }
0x2937   : > { %v8351_v31 = vadd.f32 %v8350_v61, %v8349_v11 }
0x2939   : > { %8352 = vadd.xlane.f32.xlu1 %v8351_v31 }
0x294a   : > { %8413 = vrot.lane.b32.xlu1 %v13149_v1, %s15208_s3 }
0x294e   : > { %8463 = vrot.lane.b32.xlu1 %v13149_v1, %s15188_s0 }
0x29c6   : > { %v8353_v19 = vpop.xlane.xlu1 %8352 }
0x29c7   : > { %v8354_v10 = vmul.f32 0.00390625, %v8353_v19 }
0x29c9   : > { %v8355_v29 = vadd.f32 1e-05, %v8354_v10 }
0x29ca   : > { %v8414_v59 = vpop.permute.xlu1 %8413 }
0x29cb   : > { %12662 = vrsqrt.f32 %v8355_v29 }
0x29ce   : > { %v8464_v33 = vpop.permute.xlu1 %8463 }
0x29d5   : > { %v12663_v52 = vpop.eup %12662 }
0x29d6   : > { %v8357_v57 = vmul.f32 %v12663_v52, %v8341_v54  ;;  %v8358_v58 = vmul.f32 %v12663_v52, %v8342_v28  ;;  %v8359_v36 = vmul.f32 %v12663_v52, %v8343_v30 }
0x29d8   : > { %vm8360_vm13 = vcmp.ge.f32.partialorder %v8357_v57, 0.0  ;;  %vm8361_vm6 = vcmp.ge.f32.partialorder %v8358_v58, 0.0  ;;  %v8363_v44 = vmul.f32 0.2, %v8357_v57  ;;  %v8364_v53 = vmul.f32 0.2, %v8358_v58 }
0x29d9   : > { %v8365_v21 = vmul.f32 0.2, %v8359_v36  ;;  %vm8362_vm2 = vcmp.ge.f32.partialorder %v8359_v36, 0.0 }
0x29da   : > { %v8366_v37 = vsel %vm8360_vm13, %v8357_v57, %v8363_v44  ;;  %v8367_v63 = vsel %vm8361_vm6, %v8358_v58, %v8364_v53  ;;  %vm15259_vm13 = vcmask 842752   ;;  %vm15260_vm6 = vmmov %vm15249_vm4 }
0x29db   : > { %v14942_v26 = vmul.f32 %v8366_v37, %v8321_v43  ;;  %v14944_v12 = vmul.f32 %v8367_v63, %v8325_v48  ;;  %v8368_v60 = vsel %vm8362_vm2, %v8359_v36, %v8365_v21  ;;  %vm15261_vm2 = vmmov %vm15250_vm7 }
0x29dc   : > { %v14950_v42 = vmul.f32 %v8368_v60, %v8329_v50 }
0x29dd   : > { %v12550_v55 = vpack.i.bf16 %v14944_v12, %v14942_v26 }
0x29de   : > { %v12565_v25 = vpack.i.bf16 %v14950_v42, %v14944_v12 }
0x29df   : > { %12551 = vrot.lane.b32.xlu1 %v12550_v55, %s15208_s3  ;;  %12546 = vrot.lane.b32.xlu0 %v12550_v55, %s15207_s2 }
0x29e3   : > { %12561 = vrot.lane.b32.xlu1 %v12550_v55, %s15188_s0  ;;  %12556 = vrot.lane.b32.xlu0 %v12550_v55, %s15209_s28 }
0x29e7   : > { %8494 = vrot.lane.b32.xlu1 %v14942_v26, %s15190_s23  ;;  %12566 = vrot.lane.b32.xlu0 %v12565_v25, %s15190_s23 }
0x29eb   : > { %12576 = vrot.lane.b32.xlu1 %v12565_v25, %s15211_s22  ;;  %12571 = vrot.lane.b32.xlu0 %v12565_v25, %s15210_s10 }
0x29ef   : > { %8544 = vrot.lane.b32.xlu1 %v14942_v26, %s15211_s22  ;;  %8519 = vrot.lane.b32.xlu0 %v14942_v26, %s15210_s10 }
0x29f3   : > { %8573 = vrot.lane.b32.xlu1 %v14950_v42, %s15212_s15  ;;  %8571 = vrot.lane.b32.xlu0 %v14944_v12, %s15212_s15 }
0x29f7   : > { %8419 = vrot.lane.b32.xlu1 %v14950_v42, %s15208_s3  ;;  %8394 = vrot.lane.b32.xlu0 %v14950_v42, %s15207_s2 }
0x29fb   : > { %8444 = vrot.lane.b32.xlu1 %v14950_v42, %s15209_s28  ;;  %8569 = vrot.lane.b32.xlu0 %v14942_v26, %s15212_s15 }
0x29ff   : > { %8500 = vrot.lane.b32.xlu1 %v13149_v1, %s15190_s23  ;;  %8469 = vrot.lane.b32.xlu0 %v14950_v42, %s15188_s0  ;;  %s11368_s23 = smul.u32 6, %s15276_s11 }
0x2a01   : > { %s1094_s0 = scalar_lea.vmem %s13327_s21, %s11368_s23 }
0x2a03   : > { %8550 = vrot.lane.b32.xlu1 %v13149_v1, %s15211_s22  ;;  %8525 = vrot.lane.b32.xlu0 %v13149_v1, %s15210_s10 }
0x2a07   : > { %8575 = vrot.lane.b32.xlu0 %v13149_v1, %s15212_s15 }
0x2a51   : > { %v12552_v9 = vpop.permute.xlu1 %12551  ;;  %v12547_v41 = vpop.permute.xlu0 %12546 }
0x2a52   : > { %v12554_v38 = vunpack.i.h.bf16 %v12552_v9  ;;  %v12553_v15 = vunpack.i.l.bf16 %v12552_v9  ;;  %v12549_v39 = vunpack.i.h.bf16 %v12547_v41  ;;  %v12548_v18 = vunpack.i.l.bf16 %v12547_v41  ;;  %v8586_v9 = vld [vmem:[#allocation24] sm:$0xff] }
0x2a54   : > { %v8421_v24 = vsel %vm15249_vm4, %v8414_v59, %v12553_v15  ;;  %v8396_v20 = vsel %vm15250_vm7, %v8389_v35, %v12548_v18  ;;  %v8397_v27 = vsel %vm15251_vm8, %v12548_v18, %v12549_v39  ;;  %v8422_v43 = vsel %vm15252_vm14, %v12553_v15, %v12554_v38  ;;  %vm15262_vm4 = vmmov %vm15259_vm13 }
0x2a55   : > { %v11323_v48 = vpack.c.bf16 %v8421_v24, %v8396_v20  ;;  %v14991_v50 = vpop.permute.xlu1 %12561  ;;  %v14993_v51 = vpop.permute.xlu0 %12556  ;;  %v11321_v40 = vpack.c.bf16 %v8422_v43, %v8397_v27  ;;  %vm15263_vm7 = vcmask 588800   ;;  %vm15264_vm8 = vmmov %vm15254_vm1 }
0x2a56   : > { %v12564_v46 = vunpack.i.h.bf16 %v14991_v50  ;;  %v12563_v16 = vunpack.i.l.bf16 %v14991_v50  ;;  %v12559_v32 = vunpack.i.h.bf16 %v14993_v51  ;;  %v12558_v0 = vunpack.i.l.bf16 %v14993_v51  ;;  %vm15265_vm14 = vmmov %vm15256_vm3 }
0x2a57   : > { %11322 = vmatprep.subr.bf16.mxu0 %v11321_v40 }
0x2a58   : > { %v8471_v8 = vsel %vm1569_vm9, %v8464_v33, %v12563_v16  ;;  %v8446_v56 = vsel %vm15253_vm11, %v8439_v23, %v12558_v0  ;;  %11324 = vmatpush1.bf16.msra.mxu0 %v11323_v48  ;;  %v8447_v62 = vsel %vm15254_vm1, %v12558_v0, %v12559_v32  ;;  %v8472_v34 = vsel %vm1569_vm9, %v12563_v16, %v12564_v46  ;;  %vm15266_vm11 = vmmov %vm15258_vm12 }
0x2a59   : > { %v11327_v45 = vpack.c.bf16 %v8471_v8, %v8446_v56  ;;  %v8495_v54 = vpop.permute.xlu1 %8494  ;;  %v12567_v28 = vpop.permute.xlu0 %12566  ;;  %v11325_v30 = vpack.c.bf16 %v8472_v34, %v8447_v62  ;;  %vm15269_vm1 = vcmask 1041408  }
0x2a5a   : > { %v12569_v13 = vunpack.i.h.bf16 %v12567_v28  ;;  %v12568_v6 = vunpack.i.l.bf16 %v12567_v28 }
0x2a5b   : > { %11326 = vmatprep.subr.bf16.mxu0 %v11325_v30 }
0x2a5c   : > { %v8502_v49 = vsel %vm1601_vm10, %v8495_v54, %v12568_v6  ;;  %11328 = vmatpush1.bf16.msra.mxu0 %v11327_v45  ;;  %v8503_v14 = vsel %vm1601_vm10, %v12568_v6, %v12569_v13 }
0x2a5d   : > { %v11331_v17 = vpack.c.bf16 %v8502_v49, %v14942_v26  ;;  %v12577_v11 = vpop.permute.xlu1 %12576  ;;  %v12572_v61 = vpop.permute.xlu0 %12571  ;;  %v11329_v31 = vpack.c.bf16 %v8503_v14, %v14944_v12 }
0x2a5e   : > { %v12579_v19 = vunpack.i.h.bf16 %v12577_v11  ;;  %v12578_v10 = vunpack.i.l.bf16 %v12577_v11  ;;  %v12574_v29 = vunpack.i.h.bf16 %v12572_v61  ;;  %v12573_v52 = vunpack.i.l.bf16 %v12572_v61 }
0x2a5f   : > { %11330 = vmatprep.subr.bf16.mxu0 %v11329_v31 }
0x2a60   : > { %11332 = vmatpush1.bf16.msra.mxu0 %v11331_v17  ;;  %v8528_v57 = vsel %vm15255_vm15, %v12573_v52, %v12574_v29  ;;  %v8553_v58 = vsel %vm15256_vm3, %v12578_v10, %v12579_v19  ;;  %vm15270_vm15 = vcmask 15360  }
0x2a61   : > { %v8545_v36 = vpop.permute.xlu1 %8544  ;;  %v8520_v44 = vpop.permute.xlu0 %8519  ;;  %v11333_v53 = vpack.c.bf16 %v8553_v58, %v8528_v57 }
0x2a62   : > { %v8552_v37 = vsel %vm15257_vm5, %v8545_v36, %v12578_v10  ;;  %v8527_v21 = vsel %vm15258_vm12, %v8520_v44, %v12573_v52  ;;  %v8815_v36 = vld [vmem:[%s13322_s25] sm:$0x3] }
0x2a63   : > { %v11335_v63 = vpack.c.bf16 %v8552_v37, %v8527_v21  ;;  %11334 = vmatprep.subr.bf16.mxu0 %v11333_v53 }
0x2a65   : > { %v8574_v26 = vpop.permute.xlu1 %8573  ;;  %v8572_v12 = vpop.permute.xlu0 %8571  ;;  %11336 = vmatpush1.bf16.msra.mxu0 %v11335_v63 }
0x2a66   : > { %v8578_v55 = vsel %vm15259_vm13, %v8572_v12, %v8574_v26  ;;  %vm15271_vm13 = vcmask 64512  }
0x2a67   : > { %8633 = vmatprep.subr.mxu0 %v8578_v55 }
0x2a69   : > { %v8420_v60 = vpop.permute.xlu1 %8419  ;;  %v8395_v25 = vpop.permute.xlu0 %8394 }
0x2a6a   : > { %v8423_v59 = vsel %vm15260_vm6, %v12554_v38, %v8420_v60  ;;  %v8398_v35 = vsel %vm15261_vm2, %v12549_v39, %v8395_v25  ;;  %vm15272_vm6 = vmmov %vm15271_vm13 }
0x2a6b   : > { %v11338_v15 = vpack.c.bf16 %v8423_v59, %v8398_v35  ;;  %vm15273_vm2 = vmmov %vm15269_vm1 }
0x2a6d   : > { %v8445_v33 = vpop.permute.xlu1 %8444  ;;  %v8570_v23 = vpop.permute.xlu0 %8569 }
0x2a6e   : > { %v8577_v41 = vsel %vm15262_vm4, %v8570_v23, %v8572_v12  ;;  %v8448_v38 = vsel %vm15264_vm8, %v12559_v32, %v8445_v33 }
0x2a6f   : > { %8634 = vmatpush1.msra.mxu0 %v8577_v41  ;;  %v8814_v41 = vld [vmem:[%s13317_s29] sm:$0x3] }
0x2a70   : > { %11337 = vmatprep.subr.bf16.mxu0 %v13156_v7  ;;  %9501 = vmatmul.mubr.msk.f32.vlgmr.msra.gmra.mrb[54].mxu0 %vm15263_vm7, %v8586_v9 }
0x2a71   : > { %v8501_v18 = vpop.permute.xlu1 %8500  ;;  %v8470_v24 = vpop.permute.xlu0 %8469  ;;  %11339 = vmatpush3.bf16.msra.mxu0 %v11338_v15  ;;  %10495 = vmatprep.mubr.msk.f32.mxu0 %vm13150_vm0, %v13149_v1 }
0x2a72   : > { %v8473_v39 = vsel %vm1569_vm9, %v12564_v46, %v8470_v24  ;;  %11340 = vmatprep.subr.bf16.mxu0 %v13156_v7  ;;  %v8504_v27 = vsel %vm1601_vm10, %v12569_v13, %v8501_v18  ;;  %vm15267_vm9 = vmmov %vm15262_vm4 }
0x2a73   : > { %v11341_v20 = vpack.c.bf16 %v8473_v39, %v8448_v38  ;;  %v11344_v50 = vpack.c.bf16 %v8504_v27, %v14950_v42  ;;  %vm15268_vm10 = vmmov %vm15263_vm7  ;;  %v15036_v42 = vld [vmem:[#allocation6] sm:$0x3] }
0x2a74   : > { %vm15274_vm4 = vmmov %vm15270_vm15 }
0x2a75   : > { %v8551_v43 = vpop.permute.xlu1 %8550  ;;  %v8526_v48 = vpop.permute.xlu0 %8525  ;;  %11342 = vmatpush3.bf16.msra.mxu0 %v11341_v20 }
0x2a76   : > { %11343 = vmatprep.subr.bf16.mxu0 %v13156_v7  ;;  %v8554_v51 = vsel %vm15265_vm14, %v12579_v19, %v8551_v43  ;;  %v8529_v40 = vsel %vm15266_vm11, %v12574_v29, %v8526_v48  ;;  %v13173_v43 = vmov 1983009808  }
0x2a77   : > { %v11347_v46 = vpack.c.bf16 %v8554_v51, %v8529_v40  ;;  %v9130_v48 = vunpack.c.l.s4 %v13173_v43 }
0x2a79   : > { %11345 = vmatpush3.bf16.msra.mxu0 %v11344_v50  ;;  %v8576_v16 = vpop.permute.xlu0 %8575 }
0x2a7a   : > { %11346 = vmatprep.subr.bf16.mxu0 %v13156_v7  ;;  %v8579_v32 = vsel %vm15267_vm9, %v8574_v26, %v8576_v16  ;;  %v8758_v7 = vld [vmem:[%s15180_s1] sm:$0x7] }
0x2a7b   : > { %v8763_v0 = vrot.slane %v8758_v7, %v13618_v3  ;;  %v8767_v8 = vrot.slane %v8758_v7, %v13621_v4 }
0x2a7d   : > { %11348 = vmatpush3.bf16.msra.mxu0 %v11347_v46 }
0x2a7e   : > { %10493 = vmatprep.subr.mxu0 %v13149_v1 }
0x2a81   : > { %10494 = vmatpush3.msra.mxu0 %v8579_v32 }
0x2a82   : > { %10496 = vmatmul.mubr.msk.f32.vlgmr.msra.gmra.mrb[56].mxu0 %vm15268_vm10, %v8586_v9  ;;  %10503 = vmatprep.subr.mxu0 %v13149_v1 }
0x2a83   : > { %10504 = vmatpush3.msk.msra.mxu0 %vm15269_vm1, %v13663_v47  ;;  %10505 = vmatprep.mubr.msk.f32.mxu0 %vm13150_vm0, %v13149_v1  ;;  %v8771_v47 = vrot.slane %v8758_v7, %v13624_v5 }
0x2a86   : > { %10506 = vmatmul.mubr.msk.f32.vlgmr.msra.gmra.mrb[58].mxu0 %vm15270_vm15, %v15036_v42 }
0x2b43   : > { %v8683_v56 = vpop.f32.mrb[54].mxu0 }
0x2b44   : > { %v8775_v62 = vmul.f32 %v8763_v0, %v8683_v56  ;;  %v8685_v34 = vpop.f32.mrb[55].mxu0 }
0x2b45   : > { %v8776_v45 = vmul.f32 %v8767_v8, %v8685_v34 }
0x2b47   : > { %v8778_v54 = vadd.f32 %v8776_v45, %v8775_v62 }
0x2b55   : > { %v8754_v28 = vpop.f32.mrb[56].mxu0 }
0x2b56   : > { %v8777_v30 = vmul.f32 %v8771_v47, %v8754_v28  ;;  %v10497_v13 = vpop.f32.mrb[57].mxu0 }
0x2b58   : > { %v8779_v6 = vadd.f32 %v8778_v54, %v8777_v30 }
0x2b59   : > { %v9035_v49 = vpop.f32.mrb[58].mxu0 }
0x2b5a   : > { %8780 = vadd.xlane.f32.xlu1 %v8779_v6  ;;  %v10507_v14 = vpop.f32.mrb[59].mxu0 }
0x2b6b   : > { %9111 = vperm.xlu1 %11579, %v9035_v49  }
0x2be7   : > { %v8781_v17 = vpop.xlane.xlu1 %8780 }
0x2be8   : > { %v8782_v3 = vmul.f32 0.00390625, %v8781_v17 }
0x2bea   : > { %v8783_v11 = vsub.f32 %v8683_v56, %v8782_v3  ;;  %v8784_v4 = vsub.f32 %v8685_v34, %v8782_v3  ;;  %v8785_v61 = vsub.f32 %v8754_v28, %v8782_v3 }
0x2beb   : > { %v9112_v46 = vpop.permute.xlu1 %9111 }
0x2bec   : > { %v8786_v31 = vmul.f32 %v8783_v11, %v8763_v0  ;;  %v8787_v19 = vmul.f32 %v8784_v4, %v8767_v8  ;;  %v8788_v10 = vmul.f32 %v8785_v61, %v8771_v47 }
0x2bee   : > { %v8789_v29 = vmul.f32 %v8786_v31, %v8786_v31  ;;  %v8790_v52 = vmul.f32 %v8787_v19, %v8787_v19  ;;  %v8791_v5 = vmul.f32 %v8788_v10, %v8788_v10 }
0x2bf0   : > { %v8792_v57 = vadd.f32 %v8790_v52, %v8789_v29 }
0x2bf2   : > { %v8793_v58 = vadd.f32 %v8792_v57, %v8791_v5 }
0x2bf4   : > { %8794 = vadd.xlane.f32.xlu0 %v8793_v58 }
0x2c0a   : > { %8818 = vperm.xlu0 %11578, %v8815_v36  }
0x2c81   : > { %v8795_v44 = vpop.xlane.xlu0 %8794 }
0x2c82   : > { %v8796_v53 = vmul.f32 0.00390625, %v8795_v44 }
0x2c84   : > { %v8797_v37 = vadd.f32 1e-05, %v8796_v53 }
0x2c86   : > { %12664 = vrsqrt.f32 %v8797_v37 }
0x2c89   : > { %v8819_v50 = vpop.permute.xlu0 %8818 }
0x2c90   : > { %v12665_v21 = vpop.eup %12664 }
0x2c91   : > { %v8800_v63 = vmul.f32 %v12665_v21, %v8784_v4  ;;  %v8799_v26 = vmul.f32 %v12665_v21, %v8783_v11  ;;  %v8801_v12 = vmul.f32 %v12665_v21, %v8785_v61 }
0x2c93   : > { %vm8803_vm3 = vcmp.ge.f32.partialorder %v8800_v63, 0.0  ;;  %v8806_v55 = vmul.f32 0.2, %v8800_v63  ;;  %vm8802_vm5 = vcmp.ge.f32.partialorder %v8799_v26, 0.0  ;;  %v8805_v60 = vmul.f32 0.2, %v8799_v26 }
0x2c94   : > { %vm8804_vm12 = vcmp.ge.f32.partialorder %v8801_v12, 0.0  ;;  %v8807_v25 = vmul.f32 0.2, %v8801_v12 }
0x2c95   : > { %v8809_v59 = vsel %vm8803_vm3, %v8800_v63, %v8806_v55  ;;  %v8808_v35 = vsel %vm8802_vm5, %v8799_v26, %v8805_v60 }
0x2c96   : > { %v8812_v33 = vmul.f32 %v8809_v59, %v8767_v8  ;;  %v8811_v23 = vmul.f32 %v8808_v35, %v8763_v0  ;;  %v8810_v9 = vsel %vm8804_vm12, %v8801_v12, %v8807_v25 }
0x2c97   : > { %v8813_v15 = vmul.f32 %v8810_v9, %v8771_v47 }
0x2c98   : > { %8824 = vmatprep.subr.mxu1 %v8812_v33 }
0x2c99   : > { %8825 = vmatpush1.msra.mxu1 %v8811_v23 }
0x2c9a   : > { %9503 = vmatmul.mubr.msk.f32.vlgmr.msra.gmra.mrb[42].mxu1 %vm15271_vm13, %v8814_v41  ;;  %10498 = vmatprep.subr.mxu1 %v13149_v1 }
0x2c9b   : > { %10499 = vmatpush3.msra.mxu1 %v8813_v15  ;;  %10500 = vmatprep.mubr.msk.f32.mxu1 %vm13150_vm0, %v13149_v1 }
0x2c9c   : > { %10508 = vmatprep.subr.mxu1 %v13149_v1 }
0x2c9e   : > { %10501 = vmatmul.mubr.msk.f32.vlgmr.msra.gmra.mrb[44].mxu1 %vm15272_vm6, %v8814_v41 }
0x2c9f   : > { %10509 = vmatpush3.msk.msra.mxu1 %vm15273_vm2, %v13649_v22  ;;  %10510 = vmatprep.mubr.msk.f32.mxu1 %vm13150_vm0, %v13149_v1  ;;  %v9131_v1 = vunpack.c.0.s8 %v9130_v48 }
0x2ca1   : > { %v9134_v0 = vsub.s32 %v9131_v1, %v13614_v2 }
0x2ca2   : > { %10511 = vmatmul.mubr.msk.f32.vlgmr.msra.gmra.mrb[46].mxu1 %vm15274_vm4, %v15036_v42 }
0x2d6d   : > { %v8890_v18 = vpop.f32.mrb[42].mxu1 }
0x2d6e   : > { %v8892_v24 = vpop.f32.mrb[43].mxu1  ;;  %v8891_v51 = vadd.f32 %v8890_v18, %v8819_v50 }
0x2d6f   : > { %v8893_v40 = vadd.f32 %v8892_v24, %v8819_v50 }
0x2d70   : > { %v9114_v16 = vmul.f32 %v9112_v46, %v8891_v51 }
0x2d71   : > { %v8961_v38 = vpop.f32.mrb[44].mxu1  ;;  %v9115_v32 = vmul.f32 %v9112_v46, %v8893_v40 }
0x2d72   : > { %v10502_v39 = vpop.f32.mrb[45].mxu1  ;;  %v8962_v22 = vadd.f32 %v8961_v38, %v8819_v50 }
0x2d74   : > { %v9116_v42 = vmul.f32 %v9112_v46, %v8962_v22 }
0x2d75   : > { %v9105_v20 = vpop.f32.mrb[46].mxu1 }
0x2d76   : > { %9119 = vperm.xlu1 %11579, %v9105_v20   ;;  %v10512_v27 = vpop.f32.mrb[47].mxu1 }
0x2df5   : > { %v9120_v7 = vpop.permute.xlu1 %9119 }
0x2df6   : > { %v9122_v8 = vadd.f32 %v9120_v7, %v9114_v16  ;;  %v9123_v56 = vadd.f32 %v9120_v7, %v9115_v32  ;;  %v9124_v62 = vadd.f32 %v9120_v7, %v9116_v42 }
0x2df8   : > { %v9128_v34 = vcombine.low %v9122_v8, %v9123_v56  ;;  %v9142_v54 = vrot.slane %v9124_v62, %v9134_v0 }
0x2dfa   : > { %v9135_v45 = vrot.slane %v9128_v34, %v9134_v0 }
0x2dfc   : > { %v9143_v47 = vcombine.low %v9135_v45, %v9142_v54 }
0x2dfe   : > { %9145 = vst [vmem:[%s1094_s0] sm:$0x3f] %v9143_v47 }
0x2dff PF: > { %s77_s7 = sadd.s32 1, %s13098_s7  }
0x2e00   : > { %p74_p10 = scmp.ge.s32.totalorder %s77_s7, 4  }
0x2e02   :  { %76 = sbr.rel (!%p74_p10) target bundleno = 53 (0x35), region = 264 }
0x2e09   :  { %9167 = vsyncpa [#allocation5], 1 }
0x2e0a   :  { %9169 = vsyncpa [#allocation5 + $0x1], 1 }
0x2e0b   :  { %9170 = vsyncpa [#allocation7], 1 }
0x2e0c   :  { %9171 = vsyncpa [#allocation10], 1 }
0x2e0d   :  { %9172 = vsyncpa [#allocation13], 1 }
0x2e0e   :  { %9173 = vsyncpa [#allocation16], 1 }
0x2e0f   :  { %9174 = vsyncpa [#allocation19], 1 }
0x2e10   :  { %9175 = vsyncpa [#allocation22], 1 }
0x2e11   :  { %9176 = vsyncpa [#allocation25], 1 }

</bundles_post_ra>
